<compile_context>
chip_gen: v6e
topology: v6e:2x2x1
jax: 0.10.0
libtpu: 0.0.40
codegen_flags: <defaults>
</compile_context>

<pallas_src>
import functools

import jax
import jax.numpy as jnp
from jax.experimental import pallas as pl
from jax.experimental.pallas import tpu as pltpu

_VMEM_LIMIT = 32 * 1024 * 1024   # safe scoped-VMEM budget on v5e/v6e/v7x; actual use ~2 MiB


def _round_up(x, m):
    return (x + m - 1) // m * m


def _tiles_m(M, widest_cout):
    """Pick the M tile: keep the f32 epilogue tile <= ~64KB (16 vregs) and, when possible, give
    the grid >= 2 'parallel' steps so v7x's second TensorCore has work."""
    cap = min(256, max(8, (65536 // (4 * widest_cout)) // 8 * 8))
    Mp = _round_up(M, 8)
    if Mp <= cap:
        tm = Mp // 2 if (Mp >= 16 and (Mp // 2) % 8 == 0) else Mp
    else:
        tm = cap
    return tm, _round_up(Mp, tm)


def _pad_rows(a, rows):
    return a if a.shape[0] == rows else jnp.pad(a, ((0, rows - a.shape[0]), (0, 0)))


def _const_spec(shape):
    # whole-array (VMEM-resident) operand, same block for every grid step
    return pl.BlockSpec(shape, lambda i: (0, 0))


# ----------------------------------------------------------------------------
# Kernels (no K grid axis, no accumulator scratch, no pl.when — single-shot epilogues)
# ----------------------------------------------------------------------------
def _matmul_bn_relu_kernel(p_ref, w_ref, s_ref, b_ref, o_ref):
    y = jnp.dot(p_ref[...], w_ref[...], preferred_element_type=jnp.float32)
    o_ref[...] = jnp.maximum(y * s_ref[...] + b_ref[...], 0.0).astype(o_ref.dtype)


def _pool_conv1_kernel(*refs):
    """Running max over 9 pooling taps, then layer1.block0.conv1 (1x1) + BN + ReLU fused."""
    view_refs = refs[:9]
    w_ref, s_ref, b_ref, pool_ref, a1_ref = refs[9:]
    m = view_refs[0][...]
    for v in view_refs[1:]:
        m = jnp.maximum(m, v[...])
    pool_ref[...] = m
    a1 = jnp.dot(m, w_ref[...], preferred_element_type=jnp.float32)
    a1_ref[...] = jnp.maximum(a1 * s_ref[...] + b_ref[...], 0.0).astype(a1_ref.dtype)


def _bottleneck_kernel(*refs, has_down, has_next):
    """t = relu(P@W2*s2+b2); u = t@W3*s3+b3; y = relu(u + residual | u + (Xd@Wd*sd+bd));
       optionally a1_next = relu(y@W1n*s1n+b1n).  All K dims are tap-folded -> single dots."""
    idx = 0
    p_ref = refs[idx]; idx += 1
    w2_ref, s2_ref, b2_ref = refs[idx:idx + 3]; idx += 3
    w3_ref, s3_ref, b3_ref = refs[idx:idx + 3]; idx += 3
    if has_down:
        xd_ref, wd_ref, sd_ref, bd_ref = refs[idx:idx + 4]; idx += 4
    else:
        r_ref = refs[idx]; idx += 1
    if has_next:
        w1_ref, s1_ref, b1_ref = refs[idx:idx + 3]; idx += 3
    y_ref = refs[idx]; idx += 1
    a1_ref = refs[idx] if has_next else None

    # conv2 (3x3, taps folded into K) + BN + ReLU
    t = jnp.dot(p_ref[...], w2_ref[...], preferred_element_type=jnp.float32)
    t = jnp.maximum(t * s2_ref[...] + b2_ref[...], 0.0).astype(jnp.bfloat16)
    # conv3 (1x1) + BN
    u = jnp.dot(t, w3_ref[...], preferred_element_type=jnp.float32)
    u = u * s3_ref[...] + b3_ref[...]
    # residual: identity (precomputed rows) or fused 1x1 downsample conv + BN; add pre-ReLU, f32
    if has_down:
        r = jnp.dot(xd_ref[...], wd_ref[...], preferred_element_type=jnp.float32)
        u = u + (r * sd_ref[...] + bd_ref[...])
    else:
        u = u + r_ref[...].astype(jnp.float32)
    y = jnp.maximum(u, 0.0).astype(jnp.bfloat16)
    y_ref[...] = y
    # next block's conv1 (1x1) + BN + ReLU chained here so it never needs its own pallas_call
    if has_next:
        a1 = jnp.dot(y, w1_ref[...], preferred_element_type=jnp.float32)
        a1_ref[...] = jnp.maximum(a1 * s1_ref[...] + b1_ref[...], 0.0).astype(a1_ref.dtype)


# ----------------------------------------------------------------------------
# pallas_call wrappers
# ----------------------------------------------------------------------------
def matmul_bn_relu(p, w, scale, bias):
    M, K = p.shape
    Cout = w.shape[1]
    tm, Mpad = _tiles_m(M, Cout)
    p = _pad_rows(p, Mpad)
    out = pl.pallas_call(
        _matmul_bn_relu_kernel,
        out_shape=jax.ShapeDtypeStruct((Mpad, Cout), jnp.bfloat16),
        grid_spec=pltpu.PrefetchScalarGridSpec(
            num_scalar_prefetch=0,
            grid=(Mpad // tm,),
            in_specs=[pl.BlockSpec((tm, K), lambda i: (i, 0)),
                      _const_spec(w.shape), _const_spec(scale.shape), _const_spec(bias.shape)],
            out_specs=pl.BlockSpec((tm, Cout), lambda i: (i, 0))),
        compiler_params=pltpu.CompilerParams(
            dimension_semantics=("parallel",), vmem_limit_bytes=_VMEM_LIMIT),
        cost_estimate=pl.CostEstimate(
            flops=2 * Mpad * K * Cout, transcendentals=0,
            bytes_accessed=2 * (Mpad * K + K * Cout + Mpad * Cout)),
    )(p, w, scale, bias)
    return out[:M] if Mpad != M else out


def maxpool_conv1(views, w1, scale1, bias1):
    """MaxPool2d(3, s=2, p=1) fused with the following 1x1 conv + BN + ReLU (layer1.block0.conv1).
    Returns (pool, a1); the pool rows are needed once more as block0's downsample input."""
    M, C = views[0].shape
    P1 = w1.shape[1]
    tm, Mpad = _tiles_m(M, max(C, P1))
    views = [_pad_rows(v, Mpad) for v in views]
    in_specs = ([pl.BlockSpec((tm, C), lambda i: (i, 0)) for _ in views]
                + [_const_spec(w1.shape), _const_spec(scale1.shape), _const_spec(bias1.shape)])
    pool, a1 = pl.pallas_call(
        _pool_conv1_kernel,
        out_shape=(jax.ShapeDtypeStruct((Mpad, C), jnp.bfloat16),
                   jax.ShapeDtypeStruct((Mpad, P1), jnp.bfloat16)),
        grid_spec=pltpu.PrefetchScalarGridSpec(
            num_scalar_prefetch=0, grid=(Mpad // tm,),
            in_specs=in_specs,
            out_specs=(pl.BlockSpec((tm, C), lambda i: (i, 0)),
                       pl.BlockSpec((tm, P1), lambda i: (i, 0)))),
        compiler_params=pltpu.CompilerParams(
            dimension_semantics=("parallel",), vmem_limit_bytes=_VMEM_LIMIT),
        cost_estimate=pl.CostEstimate(
            flops=2 * Mpad * C * P1, transcendentals=0,
            bytes_accessed=2 * (9 * Mpad * C + C * P1 + Mpad * (C + P1))),
    )(*views, w1, scale1, bias1)
    if Mpad != M:
        pool, a1 = pool[:M], a1[:M]
    return pool, a1


def bottleneck_block(P, conv2, conv3, residual=None, down_branch=None, next_conv1=None):
    """One fused pallas_call for a whole bottleneck (given its conv1 output already im2col'd).
    Weights stay VMEM-resident across the parallel M tiles."""
    M, K2 = P.shape
    w2, s2, b2 = conv2
    w3, s3, b3 = conv3
    planes = w2.shape[1]
    cout = w3.shape[1]
    tm, Mpad = _tiles_m(M, cout)
    has_down = down_branch is not None
    has_next = next_conv1 is not None

    arrays = [_pad_rows(P, Mpad), w2, s2, b2, w3, s3, b3]
    in_specs = [pl.BlockSpec((tm, K2), lambda i: (i, 0)),
                _const_spec(w2.shape), _const_spec(s2.shape), _const_spec(b2.shape),
                _const_spec(w3.shape), _const_spec(s3.shape), _const_spec(b3.shape)]
    flops = 2 * Mpad * (K2 * planes + planes * cout)
    if has_down:
        xd, wd, sd, bd = down_branch
        arrays += [_pad_rows(xd, Mpad), wd, sd, bd]
        in_specs += [pl.BlockSpec((tm, xd.shape[1]), lambda i: (i, 0)),
                     _const_spec(wd.shape), _const_spec(sd.shape), _const_spec(bd.shape)]
        flops += 2 * Mpad * xd.shape[1] * cout
    else:
        arrays.append(_pad_rows(residual, Mpad))
        in_specs.append(pl.BlockSpec((tm, cout), lambda i: (i, 0)))
    if has_next:
        w1n, s1n, b1n = next_conv1
        pn = w1n.shape[1]
        arrays += [w1n, s1n, b1n]
        in_specs += [_const_spec(w1n.shape), _const_spec(s1n.shape), _const_spec(b1n.shape)]
        flops += 2 * Mpad * cout * pn
        out_shape = (jax.ShapeDtypeStruct((Mpad, cout), jnp.bfloat16),
                     jax.ShapeDtypeStruct((Mpad, pn), jnp.bfloat16))
        out_specs = (pl.BlockSpec((tm, cout), lambda i: (i, 0)),
                     pl.BlockSpec((tm, pn), lambda i: (i, 0)))
    else:
        out_shape = jax.ShapeDtypeStruct((Mpad, cout), jnp.bfloat16)
        out_specs = pl.BlockSpec((tm, cout), lambda i: (i, 0))

    bytes_acc = sum(int(a.size) * a.dtype.itemsize for a in arrays) + 2 * Mpad * cout
    if has_next:
        bytes_acc += 2 * Mpad * next_conv1[0].shape[1]

    kernel = functools.partial(_bottleneck_kernel, has_down=has_down, has_next=has_next)
    outs = pl.pallas_call(
        kernel,
        out_shape=out_shape,
        grid_spec=pltpu.PrefetchScalarGridSpec(
            num_scalar_prefetch=0, grid=(Mpad // tm,),
            in_specs=in_specs, out_specs=out_specs),
        compiler_params=pltpu.CompilerParams(
            dimension_semantics=("parallel",), vmem_limit_bytes=_VMEM_LIMIT),
        cost_estimate=pl.CostEstimate(flops=flops, transcendentals=0, bytes_accessed=bytes_acc),
    )(*arrays)

    if has_next:
        y, a1n = outs
        return (y[:M], a1n[:M]) if Mpad != M else (y, a1n)
    return outs[:M] if Mpad != M else outs


# ----------------------------------------------------------------------------
# XLA-side patch extraction (single K-folded operand per conv; column order = (tap, cin))
# ----------------------------------------------------------------------------
def _im2col(x, *, k, stride, pad, pad_cin_to=None):
    N, H, W, C = x.shape
    if pad_cin_to is not None and pad_cin_to > C:
        x = jnp.pad(x, ((0, 0), (0, 0), (0, 0), (0, pad_cin_to - C)))
        C = pad_cin_to
    xp = jnp.pad(x, ((0, 0), (pad, pad), (pad, pad), (0, 0)))
    OH = (H + 2 * pad - k) // stride + 1
    OW = (W + 2 * pad - k) // stride + 1
    taps = [xp[:, i:i + stride * (OH - 1) + 1:stride, j:j + stride * (OW - 1) + 1:stride, :]
            for i in range(k) for j in range(k)]
    p = jnp.concatenate(taps, axis=-1).reshape(N * OH * OW, k * k * C)
    return p, OH, OW


def _maxpool_views(a, N, H, W, C):
    """9 strided windows for MaxPool2d(3, stride=2, padding=1). -inf padding is safe because the
    input is post-ReLU (>= 0)."""
    x = a.reshape(N, H, W, C)
    xp = jnp.pad(x, ((0, 0), (1, 1), (1, 1), (0, 0)), constant_values=float("-inf"))
    OH = (H + 2 - 3) // 2 + 1
    OW = (W + 2 - 3) // 2 + 1
    views = [xp[:, i:i + 2 * (OH - 1) + 1:2, j:j + 2 * (OW - 1) + 1:2, :].reshape(N * OH * OW, C)
             for i in range(3) for j in range(3)]
    return views, OH, OW


# ----------------------------------------------------------------------------
# Parameters (deterministic synthetic init; BN folded to scale/bias; weights pre-reshaped 2D)
# ----------------------------------------------------------------------------
def make_conv_bn(key, cin, cout, k, pad_cin_to=None):
    kw_, kg, kb = jax.random.split(key, 3)
    fan_in = k * k * cin
    w = jax.random.normal(kw_, (k * k, cin, cout), jnp.float32) * (2.0 / fan_in) ** 0.5
    if pad_cin_to is not None and pad_cin_to > cin:
        w = jnp.pad(w, ((0, 0), (0, pad_cin_to - cin), (0, 0)))
        cin = pad_cin_to
    gamma = 1.0 + 0.1 * jax.random.normal(kg, (cout,), jnp.float32)
    beta = 0.1 * jax.random.normal(kb, (cout,), jnp.float32)
    running_mean = jnp.zeros((cout,), jnp.float32)
    running_var = jnp.ones((cout,), jnp.float32)
    scale = gamma / jnp.sqrt(running_var + 1e-5)
    bias = beta - running_mean * scale
    return (w.reshape(k * k * cin, cout).astype(jnp.bfloat16),
            scale.reshape(1, cout), bias.reshape(1, cout))


def build_base_net_params(key, end_layer=2, last_stride=1):
    expansion = 4
    layer_defs = [(64, 3, 1), (128, 4, 2), (256, 6, 2), (512, 3, last_stride)]  # resnet50
    key, kstem = jax.random.split(key)
    params = {"stem": make_conv_bn(kstem, 3, 64, 7, pad_cin_to=8), "blocks": []}
    inplanes = 64
    for (planes, nblocks, stride) in layer_defs[:end_layer]:
        for b in range(nblocks):
            key, k1, k2, k3, k4 = jax.random.split(key, 5)
            s = stride if b == 0 else 1
            blk = {"stride": s, "planes": planes,
                   "conv1": make_conv_bn(k1, inplanes, planes, 1),
                   "conv2": make_conv_bn(k2, planes, planes, 3),
                   "conv3": make_conv_bn(k3, planes, planes * expansion, 1)}
            if s != 1 or inplanes != planes * expansion:
                blk["down"] = make_conv_bn(k4, inplanes, planes * expansion, 1)
            params["blocks"].append(blk)
            inplanes = planes * expansion
    return params


# ----------------------------------------------------------------------------
# Forward pass (== base_net.forward with @autocast(): bf16 compute, f32 accumulation)
# ----------------------------------------------------------------------------
def base_net_forward(x_nchw, params):
    x = jnp.transpose(x_nchw, (0, 2, 3, 1)).astype(jnp.bfloat16)          # NCHW -> NHWC
    N = x.shape[0]

    # stem: 7x7/s2/p3 conv + BN + ReLU (Cin padded 3->8, taps folded into K=392)
    p, H, W = _im2col(x, k=7, stride=2, pad=3, pad_cin_to=8)
    a = matmul_bn_relu(p, *params["stem"])                                # (N*H*W, 64)

    # maxpool 3x3/s2/p1 fused with layer1.block0.conv1
    blocks = params["blocks"]
    views, H, W = _maxpool_views(a, N, H, W, 64)
    x_in, a1 = maxpool_conv1(views, *blocks[0]["conv1"])                  # pool rows, conv1 out

    for bi, blk in enumerate(blocks):
        s, planes = blk["stride"], blk["planes"]
        a1_img = a1.reshape(N, H, W, planes)
        P, OH, OW = _im2col(a1_img, k=3, stride=s, pad=1)                 # (M_out, 9*planes)
        M_out = N * OH * OW
        residual = down_branch = None
        if "down" in blk:
            xd = x_in if s == 1 else x_in.reshape(N, H, W, -1)[:, ::s, ::s, :].reshape(M_out, -1)
            down_branch = (xd,) + blk["down"]
        else:
            residual = x_in
        nxt = blocks[bi + 1]["conv1"] if bi + 1 < len(blocks) else None
        outs = bottleneck_block(P, blk["conv2"], blk["conv3"],
                                residual=residual, down_branch=down_branch, next_conv1=nxt)
        if nxt is not None:
            x_in, a1 = outs
        else:
            x_in, a1 = outs, None
        H, W = OH, OW

    out = x_in.reshape(N, H, W, -1)
    return jnp.transpose(out, (0, 3, 1, 2))                               # back to NCHW


# ----------------------------------------------------------------------------
if __name__ == "__main__":
    key = jax.random.PRNGKey(0)
    kp, kx = jax.random.split(key)

    end_layer = 2                                   # base_net default -> out_channels = 512
    params = build_base_net_params(kp, end_layer=end_layer, last_stride=1)

    # Small ImageNet-style input: N=2, C=3, H=W=32
    x = jax.random.normal(kx, (2, 3, 32, 32), jnp.float32)

    fwd = jax.jit(functools.partial(base_net_forward, params=params))
    out = jax.block_until_ready(fwd(x))

    expected_channels = {1: 256, 2: 512, 3: 1024, 4: 2048}[end_layer]
    assert out.shape == (2, expected_channels, 4, 4), out.shape
    assert out.dtype == jnp.bfloat16
    assert bool(jnp.all(jnp.isfinite(out.astype(jnp.float32))))
    print("KERNEL_OK")
</pallas_src>

<mosaic_0001>
module attributes {stable_mosaic.version = 11 : i64} {
  func.func @_matmul_bn_relu_kernel(%arg0: i32, %arg1: memref<256x392xbf16, #tpu.memory_space<vmem>>, %arg2: memref<392x64xbf16, #tpu.memory_space<vmem>>, %arg3: memref<1x64xf32, #tpu.memory_space<vmem>>, %arg4: memref<1x64xf32, #tpu.memory_space<vmem>>, %arg5: memref<256x64xbf16, #tpu.memory_space<vmem>>) attributes {dimension_semantics = [#tpu.dimension_semantics<parallel>], iteration_bounds = array<i64: 2>, scalar_prefetch = 0 : i64, scratch_operands = 0 : i64, tpu.core_type = #tpu.core_type<tc>, window_params = [{transform_indices = @transform_0, window_bounds = array<i64: 256, 392>}, {pipeline_mode = #tpu.pipeline_mode<synchronous>, transform_indices = @transform_1, window_bounds = array<i64: 392, 64>}, {pipeline_mode = #tpu.pipeline_mode<synchronous>, transform_indices = @transform_2, window_bounds = array<i64: 1, 64>}, {pipeline_mode = #tpu.pipeline_mode<synchronous>, transform_indices = @transform_3, window_bounds = array<i64: 1, 64>}, {transform_indices = @transform_4, window_bounds = array<i64: 256, 64>}]} {
    %c0 = arith.constant 0 : index
    %c0_0 = arith.constant 0 : index
    %0 = vector.load %arg1[%c0, %c0_0] : memref<256x392xbf16, #tpu.memory_space<vmem>>, vector<256x392xbf16>
    %c0_1 = arith.constant 0 : index
    %c0_2 = arith.constant 0 : index
    %1 = vector.load %arg2[%c0_1, %c0_2] : memref<392x64xbf16, #tpu.memory_space<vmem>>, vector<392x64xbf16>
    %cst = arith.constant dense<0.000000e+00> : vector<256x64xf32>
    %2 = tpu.matmul %0, %1, %cst {dimension_numbers = #tpu.dot_dimension_numbers<[1], [0], [0], [1], [0, 0, 1, 1], [], []>} : vector<256x392xbf16>, vector<392x64xbf16>, vector<256x64xf32> -> vector<256x64xf32>
    %c0_3 = arith.constant 0 : index
    %c0_4 = arith.constant 0 : index
    %3 = vector.load %arg3[%c0_3, %c0_4] : memref<1x64xf32, #tpu.memory_space<vmem>>, vector<1x64xf32>
    %4 = vector.broadcast %3 : vector<1x64xf32> to vector<256x64xf32>
    %5 = arith.mulf %2, %4 : vector<256x64xf32>
    %c0_5 = arith.constant 0 : index
    %c0_6 = arith.constant 0 : index
    %6 = vector.load %arg4[%c0_5, %c0_6] : memref<1x64xf32, #tpu.memory_space<vmem>>, vector<1x64xf32>
    %7 = vector.broadcast %6 : vector<1x64xf32> to vector<256x64xf32>
    %8 = arith.addf %5, %7 : vector<256x64xf32>
    %cst_7 = arith.constant 0.000000e+00 : f32
    %9 = vector.broadcast %cst_7 : f32 to vector<256x64xf32>
    %10 = arith.maximumf %8, %9 : vector<256x64xf32>
    %11 = arith.truncf %10 : vector<256x64xf32> to vector<256x64xbf16>
    %c0_8 = arith.constant 0 : index
    %c0_9 = arith.constant 0 : index
    %12 = vector.load %arg5[%c0_8, %c0_9] : memref<256x64xbf16, #tpu.memory_space<vmem>>, vector<256x64xbf16>
    tpu.vector_store %arg5[%c0_8, %c0_9], %11 {strides = array<i32>} : memref<256x64xbf16, #tpu.memory_space<vmem>>, vector<256x64xbf16>,
    return
  }
  func.func @transform_0(%arg0: i32) -> (i32, i32) {
    %c0_i32 = arith.constant 0 : i32
    %c0_i32_0 = arith.constant 0 : i32
    return %arg0, %c0_i32 : i32, i32
  }
  func.func @transform_1(%arg0: i32) -> (i32, i32) {
    %c0_i32 = arith.constant 0 : i32
    %c0_i32_0 = arith.constant 0 : i32
    %c0_i32_1 = arith.constant 0 : i32
    return %c0_i32, %c0_i32_0 : i32, i32
  }
  func.func @transform_2(%arg0: i32) -> (i32, i32) {
    %c0_i32 = arith.constant 0 : i32
    %c0_i32_0 = arith.constant 0 : i32
    %c0_i32_1 = arith.constant 0 : i32
    return %c0_i32, %c0_i32_0 : i32, i32
  }
  func.func @transform_3(%arg0: i32) -> (i32, i32) {
    %c0_i32 = arith.constant 0 : i32
    %c0_i32_0 = arith.constant 0 : i32
    %c0_i32_1 = arith.constant 0 : i32
    return %c0_i32, %c0_i32_0 : i32, i32
  }
  func.func @transform_4(%arg0: i32) -> (i32, i32) {
    %c0_i32 = arith.constant 0 : i32
    %c0_i32_0 = arith.constant 0 : i32
    return %arg0, %c0_i32 : i32, i32
  }
}

module attributes {stable_mosaic.version = 11 : i64} {
  func.func @_pool_conv1_kernel(%arg0: i32, %arg1: memref<64x64xbf16, #tpu.memory_space<vmem>>, %arg2: memref<64x64xbf16, #tpu.memory_space<vmem>>, %arg3: memref<64x64xbf16, #tpu.memory_space<vmem>>, %arg4: memref<64x64xbf16, #tpu.memory_space<vmem>>, %arg5: memref<64x64xbf16, #tpu.memory_space<vmem>>, %arg6: memref<64x64xbf16, #tpu.memory_space<vmem>>, %arg7: memref<64x64xbf16, #tpu.memory_space<vmem>>, %arg8: memref<64x64xbf16, #tpu.memory_space<vmem>>, %arg9: memref<64x64xbf16, #tpu.memory_space<vmem>>, %arg10: memref<64x64xbf16, #tpu.memory_space<vmem>>, %arg11: memref<1x64xf32, #tpu.memory_space<vmem>>, %arg12: memref<1x64xf32, #tpu.memory_space<vmem>>, %arg13: memref<64x64xbf16, #tpu.memory_space<vmem>>, %arg14: memref<64x64xbf16, #tpu.memory_space<vmem>>) attributes {dimension_semantics = [#tpu.dimension_semantics<parallel>], iteration_bounds = array<i64: 2>, scalar_prefetch = 0 : i64, scratch_operands = 0 : i64, tpu.core_type = #tpu.core_type<tc>, window_params = [{transform_indices = @transform_0, window_bounds = array<i64: 64, 64>}, {transform_indices = @transform_1, window_bounds = array<i64: 64, 64>}, {transform_indices = @transform_2, window_bounds = array<i64: 64, 64>}, {transform_indices = @transform_3, window_bounds = array<i64: 64, 64>}, {transform_indices = @transform_4, window_bounds = array<i64: 64, 64>}, {transform_indices = @transform_5, window_bounds = array<i64: 64, 64>}, {transform_indices = @transform_6, window_bounds = array<i64: 64, 64>}, {transform_indices = @transform_7, window_bounds = array<i64: 64, 64>}, {transform_indices = @transform_8, window_bounds = array<i64: 64, 64>}, {pipeline_mode = #tpu.pipeline_mode<synchronous>, transform_indices = @transform_9, window_bounds = array<i64: 64, 64>}, {pipeline_mode = #tpu.pipeline_mode<synchronous>, transform_indices = @transform_10, window_bounds = array<i64: 1, 64>}, {pipeline_mode = #tpu.pipeline_mode<synchronous>, transform_indices = @transform_11, window_bounds = array<i64: 1, 64>}, {transform_indices = @transform_12, window_bounds = array<i64: 64, 64>}, {transform_indices = @transform_13, window_bounds = array<i64: 64, 64>}]} {
    %c0 = arith.constant 0 : index
    %c0_0 = arith.constant 0 : index
    %0 = vector.load %arg1[%c0, %c0_0] : memref<64x64xbf16, #tpu.memory_space<vmem>>, vector<64x64xbf16>
    %c0_1 = arith.constant 0 : index
    %c0_2 = arith.constant 0 : index
    %1 = vector.load %arg2[%c0_1, %c0_2] : memref<64x64xbf16, #tpu.memory_space<vmem>>, vector<64x64xbf16>
    %2 = arith.maximumf %0, %1 : vector<64x64xbf16>
    %c0_3 = arith.constant 0 : index
    %c0_4 = arith.constant 0 : index
    %3 = vector.load %arg3[%c0_3, %c0_4] : memref<64x64xbf16, #tpu.memory_space<vmem>>, vector<64x64xbf16>
    %4 = arith.maximumf %2, %3 : vector<64x64xbf16>
    %c0_5 = arith.constant 0 : index
    %c0_6 = arith.constant 0 : index
    %5 = vector.load %arg4[%c0_5, %c0_6] : memref<64x64xbf16, #tpu.memory_space<vmem>>, vector<64x64xbf16>
    %6 = arith.maximumf %4, %5 : vector<64x64xbf16>
    %c0_7 = arith.constant 0 : index
    %c0_8 = arith.constant 0 : index
    %7 = vector.load %arg5[%c0_7, %c0_8] : memref<64x64xbf16, #tpu.memory_space<vmem>>, vector<64x64xbf16>
    %8 = arith.maximumf %6, %7 : vector<64x64xbf16>
    %c0_9 = arith.constant 0 : index
    %c0_10 = arith.constant 0 : index
    %9 = vector.load %arg6[%c0_9, %c0_10] : memref<64x64xbf16, #tpu.memory_space<vmem>>, vector<64x64xbf16>
    %10 = arith.maximumf %8, %9 : vector<64x64xbf16>
    %c0_11 = arith.constant 0 : index
    %c0_12 = arith.constant 0 : index
    %11 = vector.load %arg7[%c0_11, %c0_12] : memref<64x64xbf16, #tpu.memory_space<vmem>>, vector<64x64xbf16>
    %12 = arith.maximumf %10, %11 : vector<64x64xbf16>
    %c0_13 = arith.constant 0 : index
    %c0_14 = arith.constant 0 : index
    %13 = vector.load %arg8[%c0_13, %c0_14] : memref<64x64xbf16, #tpu.memory_space<vmem>>, vector<64x64xbf16>
    %14 = arith.maximumf %12, %13 : vector<64x64xbf16>
    %c0_15 = arith.constant 0 : index
    %c0_16 = arith.constant 0 : index
    %15 = vector.load %arg9[%c0_15, %c0_16] : memref<64x64xbf16, #tpu.memory_space<vmem>>, vector<64x64xbf16>
    %16 = arith.maximumf %14, %15 : vector<64x64xbf16>
    %c0_17 = arith.constant 0 : index
    %c0_18 = arith.constant 0 : index
    %17 = vector.load %arg13[%c0_17, %c0_18] : memref<64x64xbf16, #tpu.memory_space<vmem>>, vector<64x64xbf16>
    tpu.vector_store %arg13[%c0_17, %c0_18], %16 {strides = array<i32>} : memref<64x64xbf16, #tpu.memory_space<vmem>>, vector<64x64xbf16>,
    %c0_19 = arith.constant 0 : index
    %c0_20 = arith.constant 0 : index
    %18 = vector.load %arg10[%c0_19, %c0_20] : memref<64x64xbf16, #tpu.memory_space<vmem>>, vector<64x64xbf16>
    %cst = arith.constant dense<0.000000e+00> : vector<64x64xf32>
    %19 = tpu.matmul %16, %18, %cst {dimension_numbers = #tpu.dot_dimension_numbers<[1], [0], [0], [1], [0, 0, 1, 1], [], []>} : vector<64x64xbf16>, vector<64x64xbf16>, vector<64x64xf32> -> vector<64x64xf32>
    %c0_21 = arith.constant 0 : index
    %c0_22 = arith.constant 0 : index
    %20 = vector.load %arg11[%c0_21, %c0_22] : memref<1x64xf32, #tpu.memory_space<vmem>>, vector<1x64xf32>
    %21 = vector.broadcast %20 : vector<1x64xf32> to vector<64x64xf32>
    %22 = arith.mulf %19, %21 : vector<64x64xf32>
    %c0_23 = arith.constant 0 : index
    %c0_24 = arith.constant 0 : index
    %23 = vector.load %arg12[%c0_23, %c0_24] : memref<1x64xf32, #tpu.memory_space<vmem>>, vector<1x64xf32>
    %24 = vector.broadcast %23 : vector<1x64xf32> to vector<64x64xf32>
    %25 = arith.addf %22, %24 : vector<64x64xf32>
    %cst_25 = arith.constant 0.000000e+00 : f32
    %26 = vector.broadcast %cst_25 : f32 to vector<64x64xf32>
    %27 = arith.maximumf %25, %26 : vector<64x64xf32>
    %28 = arith.truncf %27 : vector<64x64xf32> to vector<64x64xbf16>
    %c0_26 = arith.constant 0 : index
    %c0_27 = arith.constant 0 : index
    %29 = vector.load %arg14[%c0_26, %c0_27] : memref<64x64xbf16, #tpu.memory_space<vmem>>, vector<64x64xbf16>
    tpu.vector_store %arg14[%c0_26, %c0_27], %28 {strides = array<i32>} : memref<64x64xbf16, #tpu.memory_space<vmem>>, vector<64x64xbf16>,
    return
  }
  func.func @transform_0(%arg0: i32) -> (i32, i32) {
    %c0_i32 = arith.constant 0 : i32
    %c0_i32_0 = arith.constant 0 : i32
    return %arg0, %c0_i32 : i32, i32
  }
  func.func @transform_1(%arg0: i32) -> (i32, i32) {
    %c0_i32 = arith.constant 0 : i32
    %c0_i32_0 = arith.constant 0 : i32
    return %arg0, %c0_i32 : i32, i32
  }
  func.func @transform_2(%arg0: i32) -> (i32, i32) {
    %c0_i32 = arith.constant 0 : i32
    %c0_i32_0 = arith.constant 0 : i32
    return %arg0, %c0_i32 : i32, i32
  }
  func.func @transform_3(%arg0: i32) -> (i32, i32) {
    %c0_i32 = arith.constant 0 : i32
    %c0_i32_0 = arith.constant 0 : i32
    return %arg0, %c0_i32 : i32, i32
  }
  func.func @transform_4(%arg0: i32) -> (i32, i32) {
    %c0_i32 = arith.constant 0 : i32
    %c0_i32_0 = arith.constant 0 : i32
    return %arg0, %c0_i32 : i32, i32
  }
  func.func @transform_5(%arg0: i32) -> (i32, i32) {
    %c0_i32 = arith.constant 0 : i32
    %c0_i32_0 = arith.constant 0 : i32
    return %arg0, %c0_i32 : i32, i32
  }
  func.func @transform_6(%arg0: i32) -> (i32, i32) {
    %c0_i32 = arith.constant 0 : i32
    %c0_i32_0 = arith.constant 0 : i32
    return %arg0, %c0_i32 : i32, i32
  }
  func.func @transform_7(%arg0: i32) -> (i32, i32) {
    %c0_i32 = arith.constant 0 : i32
    %c0_i32_0 = arith.constant 0 : i32
    return %arg0, %c0_i32 : i32, i32
  }
  func.func @transform_8(%arg0: i32) -> (i32, i32) {
    %c0_i32 = arith.constant 0 : i32
    %c0_i32_0 = arith.constant 0 : i32
    return %arg0, %c0_i32 : i32, i32
  }
  func.func @transform_9(%arg0: i32) -> (i32, i32) {
    %c0_i32 = arith.constant 0 : i32
    %c0_i32_0 = arith.constant 0 : i32
    %c0_i32_1 = arith.constant 0 : i32
    return %c0_i32, %c0_i32_0 : i32, i32
  }
  func.func @transform_10(%arg0: i32) -> (i32, i32) {
    %c0_i32 = arith.constant 0 : i32
    %c0_i32_0 = arith.constant 0 : i32
    %c0_i32_1 = arith.constant 0 : i32
    return %c0_i32, %c0_i32_0 : i32, i32
  }
  func.func @transform_11(%arg0: i32) -> (i32, i32) {
    %c0_i32 = arith.constant 0 : i32
    %c0_i32_0 = arith.constant 0 : i32
    %c0_i32_1 = arith.constant 0 : i32
    return %c0_i32, %c0_i32_0 : i32, i32
  }
  func.func @transform_12(%arg0: i32) -> (i32, i32) {
    %c0_i32 = arith.constant 0 : i32
    %c0_i32_0 = arith.constant 0 : i32
    return %arg0, %c0_i32 : i32, i32
  }
  func.func @transform_13(%arg0: i32) -> (i32, i32) {
    %c0_i32 = arith.constant 0 : i32
    %c0_i32_0 = arith.constant 0 : i32
    return %arg0, %c0_i32 : i32, i32
  }
}

module attributes {stable_mosaic.version = 11 : i64} {
  func.func @_bottleneck_kernel(%arg0: i32, %arg1: memref<64x576xbf16, #tpu.memory_space<vmem>>, %arg2: memref<576x64xbf16, #tpu.memory_space<vmem>>, %arg3: memref<1x64xf32, #tpu.memory_space<vmem>>, %arg4: memref<1x64xf32, #tpu.memory_space<vmem>>, %arg5: memref<64x256xbf16, #tpu.memory_space<vmem>>, %arg6: memref<1x256xf32, #tpu.memory_space<vmem>>, %arg7: memref<1x256xf32, #tpu.memory_space<vmem>>, %arg8: memref<64x64xbf16, #tpu.memory_space<vmem>>, %arg9: memref<64x256xbf16, #tpu.memory_space<vmem>>, %arg10: memref<1x256xf32, #tpu.memory_space<vmem>>, %arg11: memref<1x256xf32, #tpu.memory_space<vmem>>, %arg12: memref<256x64xbf16, #tpu.memory_space<vmem>>, %arg13: memref<1x64xf32, #tpu.memory_space<vmem>>, %arg14: memref<1x64xf32, #tpu.memory_space<vmem>>, %arg15: memref<64x256xbf16, #tpu.memory_space<vmem>>, %arg16: memref<64x64xbf16, #tpu.memory_space<vmem>>) attributes {dimension_semantics = [#tpu.dimension_semantics<parallel>], iteration_bounds = array<i64: 2>, scalar_prefetch = 0 : i64, scratch_operands = 0 : i64, tpu.core_type = #tpu.core_type<tc>, window_params = [{transform_indices = @transform_0, window_bounds = array<i64: 64, 576>}, {pipeline_mode = #tpu.pipeline_mode<synchronous>, transform_indices = @transform_1, window_bounds = array<i64: 576, 64>}, {pipeline_mode = #tpu.pipeline_mode<synchronous>, transform_indices = @transform_2, window_bounds = array<i64: 1, 64>}, {pipeline_mode = #tpu.pipeline_mode<synchronous>, transform_indices = @transform_3, window_bounds = array<i64: 1, 64>}, {pipeline_mode = #tpu.pipeline_mode<synchronous>, transform_indices = @transform_4, window_bounds = array<i64: 64, 256>}, {pipeline_mode = #tpu.pipeline_mode<synchronous>, transform_indices = @transform_5, window_bounds = array<i64: 1, 256>}, {pipeline_mode = #tpu.pipeline_mode<synchronous>, transform_indices = @transform_6, window_bounds = array<i64: 1, 256>}, {transform_indices = @transform_7, window_bounds = array<i64: 64, 64>}, {pipeline_mode = #tpu.pipeline_mode<synchronous>, transform_indices = @transform_8, window_bounds = array<i64: 64, 256>}, {pipeline_mode = #tpu.pipeline_mode<synchronous>, transform_indices = @transform_9, window_bounds = array<i64: 1, 256>}, {pipeline_mode = #tpu.pipeline_mode<synchronous>, transform_indices = @transform_10, window_bounds = array<i64: 1, 256>}, {pipeline_mode = #tpu.pipeline_mode<synchronous>, transform_indices = @transform_11, window_bounds = array<i64: 256, 64>}, {pipeline_mode = #tpu.pipeline_mode<synchronous>, transform_indices = @transform_12, window_bounds = array<i64: 1, 64>}, {pipeline_mode = #tpu.pipeline_mode<synchronous>, transform_indices = @transform_13, window_bounds = array<i64: 1, 64>}, {transform_indices = @transform_14, window_bounds = array<i64: 64, 256>}, {transform_indices = @transform_15, window_bounds = array<i64: 64, 64>}]} {
    %c0 = arith.constant 0 : index
    %c0_0 = arith.constant 0 : index
    %0 = vector.load %arg1[%c0, %c0_0] : memref<64x576xbf16, #tpu.memory_space<vmem>>, vector<64x576xbf16>
    %c0_1 = arith.constant 0 : index
    %c0_2 = arith.constant 0 : index
    %1 = vector.load %arg2[%c0_1, %c0_2] : memref<576x64xbf16, #tpu.memory_space<vmem>>, vector<576x64xbf16>
    %cst = arith.constant dense<0.000000e+00> : vector<64x64xf32>
    %2 = tpu.matmul %0, %1, %cst {dimension_numbers = #tpu.dot_dimension_numbers<[1], [0], [0], [1], [0, 0, 1, 1], [], []>} : vector<64x576xbf16>, vector<576x64xbf16>, vector<64x64xf32> -> vector<64x64xf32>
    %c0_3 = arith.constant 0 : index
    %c0_4 = arith.constant 0 : index
    %3 = vector.load %arg3[%c0_3, %c0_4] : memref<1x64xf32, #tpu.memory_space<vmem>>, vector<1x64xf32>
    %4 = vector.broadcast %3 : vector<1x64xf32> to vector<64x64xf32>
    %5 = arith.mulf %2, %4 : vector<64x64xf32>
    %c0_5 = arith.constant 0 : index
    %c0_6 = arith.constant 0 : index
    %6 = vector.load %arg4[%c0_5, %c0_6] : memref<1x64xf32, #tpu.memory_space<vmem>>, vector<1x64xf32>
    %7 = vector.broadcast %6 : vector<1x64xf32> to vector<64x64xf32>
    %8 = arith.addf %5, %7 : vector<64x64xf32>
    %cst_7 = arith.constant 0.000000e+00 : f32
    %9 = vector.broadcast %cst_7 : f32 to vector<64x64xf32>
    %10 = arith.maximumf %8, %9 : vector<64x64xf32>
    %11 = arith.truncf %10 : vector<64x64xf32> to vector<64x64xbf16>
    %c0_8 = arith.constant 0 : index
    %c0_9 = arith.constant 0 : index
    %12 = vector.load %arg5[%c0_8, %c0_9] : memref<64x256xbf16, #tpu.memory_space<vmem>>, vector<64x256xbf16>
    %cst_10 = arith.constant dense<0.000000e+00> : vector<64x256xf32>
    %13 = tpu.matmul %11, %12, %cst_10 {dimension_numbers = #tpu.dot_dimension_numbers<[1], [0], [0], [1], [0, 0, 1, 1], [], []>} : vector<64x64xbf16>, vector<64x256xbf16>, vector<64x256xf32> -> vector<64x256xf32>
    %c0_11 = arith.constant 0 : index
    %c0_12 = arith.constant 0 : index
    %14 = vector.load %arg6[%c0_11, %c0_12] : memref<1x256xf32, #tpu.memory_space<vmem>>, vector<1x256xf32>
    %15 = vector.broadcast %14 : vector<1x256xf32> to vector<64x256xf32>
    %16 = arith.mulf %13, %15 : vector<64x256xf32>
    %c0_13 = arith.constant 0 : index
    %c0_14 = arith.constant 0 : index
    %17 = vector.load %arg7[%c0_13, %c0_14] : memref<1x256xf32, #tpu.memory_space<vmem>>, vector<1x256xf32>
    %18 = vector.broadcast %17 : vector<1x256xf32> to vector<64x256xf32>
    %19 = arith.addf %16, %18 : vector<64x256xf32>
    %c0_15 = arith.constant 0 : index
    %c0_16 = arith.constant 0 : index
    %20 = vector.load %arg8[%c0_15, %c0_16] : memref<64x64xbf16, #tpu.memory_space<vmem>>, vector<64x64xbf16>
    %c0_17 = arith.constant 0 : index
    %c0_18 = arith.constant 0 : index
    %21 = vector.load %arg9[%c0_17, %c0_18] : memref<64x256xbf16, #tpu.memory_space<vmem>>, vector<64x256xbf16>
    %cst_19 = arith.constant dense<0.000000e+00> : vector<64x256xf32>
    %22 = tpu.matmul %20, %21, %cst_19 {dimension_numbers = #tpu.dot_dimension_numbers<[1], [0], [0], [1], [0, 0, 1, 1], [], []>} : vector<64x64xbf16>, vector<64x256xbf16>, vector<64x256xf32> -> vector<64x256xf32>
    %c0_20 = arith.constant 0 : index
    %c0_21 = arith.constant 0 : index
    %23 = vector.load %arg10[%c0_20, %c0_21] : memref<1x256xf32, #tpu.memory_space<vmem>>, vector<1x256xf32>
    %24 = vector.broadcast %23 : vector<1x256xf32> to vector<64x256xf32>
    %25 = arith.mulf %22, %24 : vector<64x256xf32>
    %c0_22 = arith.constant 0 : index
    %c0_23 = arith.constant 0 : index
    %26 = vector.load %arg11[%c0_22, %c0_23] : memref<1x256xf32, #tpu.memory_space<vmem>>, vector<1x256xf32>
    %27 = vector.broadcast %26 : vector<1x256xf32> to vector<64x256xf32>
    %28 = arith.addf %25, %27 : vector<64x256xf32>
    %29 = arith.addf %19, %28 : vector<64x256xf32>
    %cst_24 = arith.constant 0.000000e+00 : f32
    %30 = vector.broadcast %cst_24 : f32 to vector<64x256xf32>
    %31 = arith.maximumf %29, %30 : vector<64x256xf32>
    %32 = arith.truncf %31 : vector<64x256xf32> to vector<64x256xbf16>
    %c0_25 = arith.constant 0 : index
    %c0_26 = arith.constant 0 : index
    %33 = vector.load %arg15[%c0_25, %c0_26] : memref<64x256xbf16, #tpu.memory_space<vmem>>, vector<64x256xbf16>
    tpu.vector_store %arg15[%c0_25, %c0_26], %32 {strides = array<i32>} : memref<64x256xbf16, #tpu.memory_space<vmem>>, vector<64x256xbf16>,
    %c0_27 = arith.constant 0 : index
    %c0_28 = arith.constant 0 : index
    %34 = vector.load %arg12[%c0_27, %c0_28] : memref<256x64xbf16, #tpu.memory_space<vmem>>, vector<256x64xbf16>
    %cst_29 = arith.constant dense<0.000000e+00> : vector<64x64xf32>
    %35 = tpu.matmul %32, %34, %cst_29 {dimension_numbers = #tpu.dot_dimension_numbers<[1], [0], [0], [1], [0, 0, 1, 1], [], []>} : vector<64x256xbf16>, vector<256x64xbf16>, vector<64x64xf32> -> vector<64x64xf32>
    %c0_30 = arith.constant 0 : index
    %c0_31 = arith.constant 0 : index
    %36 = vector.load %arg13[%c0_30, %c0_31] : memref<1x64xf32, #tpu.memory_space<vmem>>, vector<1x64xf32>
    %37 = vector.broadcast %36 : vector<1x64xf32> to vector<64x64xf32>
    %38 = arith.mulf %35, %37 : vector<64x64xf32>
    %c0_32 = arith.constant 0 : index
    %c0_33 = arith.constant 0 : index
    %39 = vector.load %arg14[%c0_32, %c0_33] : memref<1x64xf32, #tpu.memory_space<vmem>>, vector<1x64xf32>
    %40 = vector.broadcast %39 : vector<1x64xf32> to vector<64x64xf32>
    %41 = arith.addf %38, %40 : vector<64x64xf32>
    %cst_34 = arith.constant 0.000000e+00 : f32
    %42 = vector.broadcast %cst_34 : f32 to vector<64x64xf32>
    %43 = arith.maximumf %41, %42 : vector<64x64xf32>
    %44 = arith.truncf %43 : vector<64x64xf32> to vector<64x64xbf16>
    %c0_35 = arith.constant 0 : index
    %c0_36 = arith.constant 0 : index
    %45 = vector.load %arg16[%c0_35, %c0_36] : memref<64x64xbf16, #tpu.memory_space<vmem>>, vector<64x64xbf16>
    tpu.vector_store %arg16[%c0_35, %c0_36], %44 {strides = array<i32>} : memref<64x64xbf16, #tpu.memory_space<vmem>>, vector<64x64xbf16>,
    return
  }
  func.func @transform_0(%arg0: i32) -> (i32, i32) {
    %c0_i32 = arith.constant 0 : i32
    %c0_i32_0 = arith.constant 0 : i32
    return %arg0, %c0_i32 : i32, i32
  }
  func.func @transform_1(%arg0: i32) -> (i32, i32) {
    %c0_i32 = arith.constant 0 : i32
    %c0_i32_0 = arith.constant 0 : i32
    %c0_i32_1 = arith.constant 0 : i32
    return %c0_i32, %c0_i32_0 : i32, i32
  }
  func.func @transform_2(%arg0: i32) -> (i32, i32) {
    %c0_i32 = arith.constant 0 : i32
    %c0_i32_0 = arith.constant 0 : i32
    %c0_i32_1 = arith.constant 0 : i32
    return %c0_i32, %c0_i32_0 : i32, i32
  }
  func.func @transform_3(%arg0: i32) -> (i32, i32) {
    %c0_i32 = arith.constant 0 : i32
    %c0_i32_0 = arith.constant 0 : i32
    %c0_i32_1 = arith.constant 0 : i32
    return %c0_i32, %c0_i32_0 : i32, i32
  }
  func.func @transform_4(%arg0: i32) -> (i32, i32) {
    %c0_i32 = arith.constant 0 : i32
    %c0_i32_0 = arith.constant 0 : i32
    %c0_i32_1 = arith.constant 0 : i32
    return %c0_i32, %c0_i32_0 : i32, i32
  }
  func.func @transform_5(%arg0: i32) -> (i32, i32) {
    %c0_i32 = arith.constant 0 : i32
    %c0_i32_0 = arith.constant 0 : i32
    %c0_i32_1 = arith.constant 0 : i32
    return %c0_i32, %c0_i32_0 : i32, i32
  }
  func.func @transform_6(%arg0: i32) -> (i32, i32) {
    %c0_i32 = arith.constant 0 : i32
    %c0_i32_0 = arith.constant 0 : i32
    %c0_i32_1 = arith.constant 0 : i32
    return %c0_i32, %c0_i32_0 : i32, i32
  }
  func.func @transform_7(%arg0: i32) -> (i32, i32) {
    %c0_i32 = arith.constant 0 : i32
    %c0_i32_0 = arith.constant 0 : i32
    return %arg0, %c0_i32 : i32, i32
  }
  func.func @transform_8(%arg0: i32) -> (i32, i32) {
    %c0_i32 = arith.constant 0 : i32
    %c0_i32_0 = arith.constant 0 : i32
    %c0_i32_1 = arith.constant 0 : i32
    return %c0_i32, %c0_i32_0 : i32, i32
  }
  func.func @transform_9(%arg0: i32) -> (i32, i32) {
    %c0_i32 = arith.constant 0 : i32
    %c0_i32_0 = arith.constant 0 : i32
    %c0_i32_1 = arith.constant 0 : i32
    return %c0_i32, %c0_i32_0 : i32, i32
  }
  func.func @transform_10(%arg0: i32) -> (i32, i32) {
    %c0_i32 = arith.constant 0 : i32
    %c0_i32_0 = arith.constant 0 : i32
    %c0_i32_1 = arith.constant 0 : i32
    return %c0_i32, %c0_i32_0 : i32, i32
  }
  func.func @transform_11(%arg0: i32) -> (i32, i32) {
    %c0_i32 = arith.constant 0 : i32
    %c0_i32_0 = arith.constant 0 : i32
    %c0_i32_1 = arith.constant 0 : i32
    return %c0_i32, %c0_i32_0 : i32, i32
  }
  func.func @transform_12(%arg0: i32) -> (i32, i32) {
    %c0_i32 = arith.constant 0 : i32
    %c0_i32_0 = arith.constant 0 : i32
    %c0_i32_1 = arith.constant 0 : i32
    return %c0_i32, %c0_i32_0 : i32, i32
  }
  func.func @transform_13(%arg0: i32) -> (i32, i32) {
    %c0_i32 = arith.constant 0 : i32
    %c0_i32_0 = arith.constant 0 : i32
    %c0_i32_1 = arith.constant 0 : i32
    return %c0_i32, %c0_i32_0 : i32, i32
  }
  func.func @transform_14(%arg0: i32) -> (i32, i32) {
    %c0_i32 = arith.constant 0 : i32
    %c0_i32_0 = arith.constant 0 : i32
    return %arg0, %c0_i32 : i32, i32
  }
  func.func @transform_15(%arg0: i32) -> (i32, i32) {
    %c0_i32 = arith.constant 0 : i32
    %c0_i32_0 = arith.constant 0 : i32
    return %arg0, %c0_i32 : i32, i32
  }
}

module attributes {stable_mosaic.version = 11 : i64} {
  func.func @_bottleneck_kernel(%arg0: i32, %arg1: memref<64x576xbf16, #tpu.memory_space<vmem>>, %arg2: memref<576x64xbf16, #tpu.memory_space<vmem>>, %arg3: memref<1x64xf32, #tpu.memory_space<vmem>>, %arg4: memref<1x64xf32, #tpu.memory_space<vmem>>, %arg5: memref<64x256xbf16, #tpu.memory_space<vmem>>, %arg6: memref<1x256xf32, #tpu.memory_space<vmem>>, %arg7: memref<1x256xf32, #tpu.memory_space<vmem>>, %arg8: memref<64x256xbf16, #tpu.memory_space<vmem>>, %arg9: memref<256x64xbf16, #tpu.memory_space<vmem>>, %arg10: memref<1x64xf32, #tpu.memory_space<vmem>>, %arg11: memref<1x64xf32, #tpu.memory_space<vmem>>, %arg12: memref<64x256xbf16, #tpu.memory_space<vmem>>, %arg13: memref<64x64xbf16, #tpu.memory_space<vmem>>) attributes {dimension_semantics = [#tpu.dimension_semantics<parallel>], iteration_bounds = array<i64: 2>, scalar_prefetch = 0 : i64, scratch_operands = 0 : i64, tpu.core_type = #tpu.core_type<tc>, window_params = [{transform_indices = @transform_0, window_bounds = array<i64: 64, 576>}, {pipeline_mode = #tpu.pipeline_mode<synchronous>, transform_indices = @transform_1, window_bounds = array<i64: 576, 64>}, {pipeline_mode = #tpu.pipeline_mode<synchronous>, transform_indices = @transform_2, window_bounds = array<i64: 1, 64>}, {pipeline_mode = #tpu.pipeline_mode<synchronous>, transform_indices = @transform_3, window_bounds = array<i64: 1, 64>}, {pipeline_mode = #tpu.pipeline_mode<synchronous>, transform_indices = @transform_4, window_bounds = array<i64: 64, 256>}, {pipeline_mode = #tpu.pipeline_mode<synchronous>, transform_indices = @transform_5, window_bounds = array<i64: 1, 256>}, {pipeline_mode = #tpu.pipeline_mode<synchronous>, transform_indices = @transform_6, window_bounds = array<i64: 1, 256>}, {transform_indices = @transform_7, window_bounds = array<i64: 64, 256>}, {pipeline_mode = #tpu.pipeline_mode<synchronous>, transform_indices = @transform_8, window_bounds = array<i64: 256, 64>}, {pipeline_mode = #tpu.pipeline_mode<synchronous>, transform_indices = @transform_9, window_bounds = array<i64: 1, 64>}, {pipeline_mode = #tpu.pipeline_mode<synchronous>, transform_indices = @transform_10, window_bounds = array<i64: 1, 64>}, {transform_indices = @transform_11, window_bounds = array<i64: 64, 256>}, {transform_indices = @transform_12, window_bounds = array<i64: 64, 64>}]} {
    %c0 = arith.constant 0 : index
    %c0_0 = arith.constant 0 : index
    %0 = vector.load %arg1[%c0, %c0_0] : memref<64x576xbf16, #tpu.memory_space<vmem>>, vector<64x576xbf16>
    %c0_1 = arith.constant 0 : index
    %c0_2 = arith.constant 0 : index
    %1 = vector.load %arg2[%c0_1, %c0_2] : memref<576x64xbf16, #tpu.memory_space<vmem>>, vector<576x64xbf16>
    %cst = arith.constant dense<0.000000e+00> : vector<64x64xf32>
    %2 = tpu.matmul %0, %1, %cst {dimension_numbers = #tpu.dot_dimension_numbers<[1], [0], [0], [1], [0, 0, 1, 1], [], []>} : vector<64x576xbf16>, vector<576x64xbf16>, vector<64x64xf32> -> vector<64x64xf32>
    %c0_3 = arith.constant 0 : index
    %c0_4 = arith.constant 0 : index
    %3 = vector.load %arg3[%c0_3, %c0_4] : memref<1x64xf32, #tpu.memory_space<vmem>>, vector<1x64xf32>
    %4 = vector.broadcast %3 : vector<1x64xf32> to vector<64x64xf32>
    %5 = arith.mulf %2, %4 : vector<64x64xf32>
    %c0_5 = arith.constant 0 : index
    %c0_6 = arith.constant 0 : index
    %6 = vector.load %arg4[%c0_5, %c0_6] : memref<1x64xf32, #tpu.memory_space<vmem>>, vector<1x64xf32>
    %7 = vector.broadcast %6 : vector<1x64xf32> to vector<64x64xf32>
    %8 = arith.addf %5, %7 : vector<64x64xf32>
    %cst_7 = arith.constant 0.000000e+00 : f32
    %9 = vector.broadcast %cst_7 : f32 to vector<64x64xf32>
    %10 = arith.maximumf %8, %9 : vector<64x64xf32>
    %11 = arith.truncf %10 : vector<64x64xf32> to vector<64x64xbf16>
    %c0_8 = arith.constant 0 : index
    %c0_9 = arith.constant 0 : index
    %12 = vector.load %arg5[%c0_8, %c0_9] : memref<64x256xbf16, #tpu.memory_space<vmem>>, vector<64x256xbf16>
    %cst_10 = arith.constant dense<0.000000e+00> : vector<64x256xf32>
    %13 = tpu.matmul %11, %12, %cst_10 {dimension_numbers = #tpu.dot_dimension_numbers<[1], [0], [0], [1], [0, 0, 1, 1], [], []>} : vector<64x64xbf16>, vector<64x256xbf16>, vector<64x256xf32> -> vector<64x256xf32>
    %c0_11 = arith.constant 0 : index
    %c0_12 = arith.constant 0 : index
    %14 = vector.load %arg6[%c0_11, %c0_12] : memref<1x256xf32, #tpu.memory_space<vmem>>, vector<1x256xf32>
    %15 = vector.broadcast %14 : vector<1x256xf32> to vector<64x256xf32>
    %16 = arith.mulf %13, %15 : vector<64x256xf32>
    %c0_13 = arith.constant 0 : index
    %c0_14 = arith.constant 0 : index
    %17 = vector.load %arg7[%c0_13, %c0_14] : memref<1x256xf32, #tpu.memory_space<vmem>>, vector<1x256xf32>
    %18 = vector.broadcast %17 : vector<1x256xf32> to vector<64x256xf32>
    %19 = arith.addf %16, %18 : vector<64x256xf32>
    %c0_15 = arith.constant 0 : index
    %c0_16 = arith.constant 0 : index
    %20 = vector.load %arg8[%c0_15, %c0_16] : memref<64x256xbf16, #tpu.memory_space<vmem>>, vector<64x256xbf16>
    %21 = arith.extf %20 : vector<64x256xbf16> to vector<64x256xf32>
    %22 = arith.addf %19, %21 : vector<64x256xf32>
    %cst_17 = arith.constant 0.000000e+00 : f32
    %23 = vector.broadcast %cst_17 : f32 to vector<64x256xf32>
    %24 = arith.maximumf %22, %23 : vector<64x256xf32>
    %25 = arith.truncf %24 : vector<64x256xf32> to vector<64x256xbf16>
    %c0_18 = arith.constant 0 : index
    %c0_19 = arith.constant 0 : index
    %26 = vector.load %arg12[%c0_18, %c0_19] : memref<64x256xbf16, #tpu.memory_space<vmem>>, vector<64x256xbf16>
    tpu.vector_store %arg12[%c0_18, %c0_19], %25 {strides = array<i32>} : memref<64x256xbf16, #tpu.memory_space<vmem>>, vector<64x256xbf16>,
    %c0_20 = arith.constant 0 : index
    %c0_21 = arith.constant 0 : index
    %27 = vector.load %arg9[%c0_20, %c0_21] : memref<256x64xbf16, #tpu.memory_space<vmem>>, vector<256x64xbf16>
    %cst_22 = arith.constant dense<0.000000e+00> : vector<64x64xf32>
    %28 = tpu.matmul %25, %27, %cst_22 {dimension_numbers = #tpu.dot_dimension_numbers<[1], [0], [0], [1], [0, 0, 1, 1], [], []>} : vector<64x256xbf16>, vector<256x64xbf16>, vector<64x64xf32> -> vector<64x64xf32>
    %c0_23 = arith.constant 0 : index
    %c0_24 = arith.constant 0 : index
    %29 = vector.load %arg10[%c0_23, %c0_24] : memref<1x64xf32, #tpu.memory_space<vmem>>, vector<1x64xf32>
    %30 = vector.broadcast %29 : vector<1x64xf32> to vector<64x64xf32>
    %31 = arith.mulf %28, %30 : vector<64x64xf32>
    %c0_25 = arith.constant 0 : index
    %c0_26 = arith.constant 0 : index
    %32 = vector.load %arg11[%c0_25, %c0_26] : memref<1x64xf32, #tpu.memory_space<vmem>>, vector<1x64xf32>
    %33 = vector.broadcast %32 : vector<1x64xf32> to vector<64x64xf32>
    %34 = arith.addf %31, %33 : vector<64x64xf32>
    %cst_27 = arith.constant 0.000000e+00 : f32
    %35 = vector.broadcast %cst_27 : f32 to vector<64x64xf32>
    %36 = arith.maximumf %34, %35 : vector<64x64xf32>
    %37 = arith.truncf %36 : vector<64x64xf32> to vector<64x64xbf16>
    %c0_28 = arith.constant 0 : index
    %c0_29 = arith.constant 0 : index
    %38 = vector.load %arg13[%c0_28, %c0_29] : memref<64x64xbf16, #tpu.memory_space<vmem>>, vector<64x64xbf16>
    tpu.vector_store %arg13[%c0_28, %c0_29], %37 {strides = array<i32>} : memref<64x64xbf16, #tpu.memory_space<vmem>>, vector<64x64xbf16>,
    return
  }
  func.func @transform_0(%arg0: i32) -> (i32, i32) {
    %c0_i32 = arith.constant 0 : i32
    %c0_i32_0 = arith.constant 0 : i32
    return %arg0, %c0_i32 : i32, i32
  }
  func.func @transform_1(%arg0: i32) -> (i32, i32) {
    %c0_i32 = arith.constant 0 : i32
    %c0_i32_0 = arith.constant 0 : i32
    %c0_i32_1 = arith.constant 0 : i32
    return %c0_i32, %c0_i32_0 : i32, i32
  }
  func.func @transform_2(%arg0: i32) -> (i32, i32) {
    %c0_i32 = arith.constant 0 : i32
    %c0_i32_0 = arith.constant 0 : i32
    %c0_i32_1 = arith.constant 0 : i32
    return %c0_i32, %c0_i32_0 : i32, i32
  }
  func.func @transform_3(%arg0: i32) -> (i32, i32) {
    %c0_i32 = arith.constant 0 : i32
    %c0_i32_0 = arith.constant 0 : i32
    %c0_i32_1 = arith.constant 0 : i32
    return %c0_i32, %c0_i32_0 : i32, i32
  }
  func.func @transform_4(%arg0: i32) -> (i32, i32) {
    %c0_i32 = arith.constant 0 : i32
    %c0_i32_0 = arith.constant 0 : i32
    %c0_i32_1 = arith.constant 0 : i32
    return %c0_i32, %c0_i32_0 : i32, i32
  }
  func.func @transform_5(%arg0: i32) -> (i32, i32) {
    %c0_i32 = arith.constant 0 : i32
    %c0_i32_0 = arith.constant 0 : i32
    %c0_i32_1 = arith.constant 0 : i32
    return %c0_i32, %c0_i32_0 : i32, i32
  }
  func.func @transform_6(%arg0: i32) -> (i32, i32) {
    %c0_i32 = arith.constant 0 : i32
    %c0_i32_0 = arith.constant 0 : i32
    %c0_i32_1 = arith.constant 0 : i32
    return %c0_i32, %c0_i32_0 : i32, i32
  }
  func.func @transform_7(%arg0: i32) -> (i32, i32) {
    %c0_i32 = arith.constant 0 : i32
    %c0_i32_0 = arith.constant 0 : i32
    return %arg0, %c0_i32 : i32, i32
  }
  func.func @transform_8(%arg0: i32) -> (i32, i32) {
    %c0_i32 = arith.constant 0 : i32
    %c0_i32_0 = arith.constant 0 : i32
    %c0_i32_1 = arith.constant 0 : i32
    return %c0_i32, %c0_i32_0 : i32, i32
  }
  func.func @transform_9(%arg0: i32) -> (i32, i32) {
    %c0_i32 = arith.constant 0 : i32
    %c0_i32_0 = arith.constant 0 : i32
    %c0_i32_1 = arith.constant 0 : i32
    return %c0_i32, %c0_i32_0 : i32, i32
  }
  func.func @transform_10(%arg0: i32) -> (i32, i32) {
    %c0_i32 = arith.constant 0 : i32
    %c0_i32_0 = arith.constant 0 : i32
    %c0_i32_1 = arith.constant 0 : i32
    return %c0_i32, %c0_i32_0 : i32, i32
  }
  func.func @transform_11(%arg0: i32) -> (i32, i32) {
    %c0_i32 = arith.constant 0 : i32
    %c0_i32_0 = arith.constant 0 : i32
    return %arg0, %c0_i32 : i32, i32
  }
  func.func @transform_12(%arg0: i32) -> (i32, i32) {
    %c0_i32 = arith.constant 0 : i32
    %c0_i32_0 = arith.constant 0 : i32
    return %arg0, %c0_i32 : i32, i32
  }
}

module attributes {stable_mosaic.version = 11 : i64} {
  func.func @_bottleneck_kernel(%arg0: i32, %arg1: memref<64x576xbf16, #tpu.memory_space<vmem>>, %arg2: memref<576x64xbf16, #tpu.memory_space<vmem>>, %arg3: memref<1x64xf32, #tpu.memory_space<vmem>>, %arg4: memref<1x64xf32, #tpu.memory_space<vmem>>, %arg5: memref<64x256xbf16, #tpu.memory_space<vmem>>, %arg6: memref<1x256xf32, #tpu.memory_space<vmem>>, %arg7: memref<1x256xf32, #tpu.memory_space<vmem>>, %arg8: memref<64x256xbf16, #tpu.memory_space<vmem>>, %arg9: memref<256x128xbf16, #tpu.memory_space<vmem>>, %arg10: memref<1x128xf32, #tpu.memory_space<vmem>>, %arg11: memref<1x128xf32, #tpu.memory_space<vmem>>, %arg12: memref<64x256xbf16, #tpu.memory_space<vmem>>, %arg13: memref<64x128xbf16, #tpu.memory_space<vmem>>) attributes {dimension_semantics = [#tpu.dimension_semantics<parallel>], iteration_bounds = array<i64: 2>, scalar_prefetch = 0 : i64, scratch_operands = 0 : i64, tpu.core_type = #tpu.core_type<tc>, window_params = [{transform_indices = @transform_0, window_bounds = array<i64: 64, 576>}, {pipeline_mode = #tpu.pipeline_mode<synchronous>, transform_indices = @transform_1, window_bounds = array<i64: 576, 64>}, {pipeline_mode = #tpu.pipeline_mode<synchronous>, transform_indices = @transform_2, window_bounds = array<i64: 1, 64>}, {pipeline_mode = #tpu.pipeline_mode<synchronous>, transform_indices = @transform_3, window_bounds = array<i64: 1, 64>}, {pipeline_mode = #tpu.pipeline_mode<synchronous>, transform_indices = @transform_4, window_bounds = array<i64: 64, 256>}, {pipeline_mode = #tpu.pipeline_mode<synchronous>, transform_indices = @transform_5, window_bounds = array<i64: 1, 256>}, {pipeline_mode = #tpu.pipeline_mode<synchronous>, transform_indices = @transform_6, window_bounds = array<i64: 1, 256>}, {transform_indices = @transform_7, window_bounds = array<i64: 64, 256>}, {pipeline_mode = #tpu.pipeline_mode<synchronous>, transform_indices = @transform_8, window_bounds = array<i64: 256, 128>}, {pipeline_mode = #tpu.pipeline_mode<synchronous>, transform_indices = @transform_9, window_bounds = array<i64: 1, 128>}, {pipeline_mode = #tpu.pipeline_mode<synchronous>, transform_indices = @transform_10, window_bounds = array<i64: 1, 128>}, {transform_indices = @transform_11, window_bounds = array<i64: 64, 256>}, {transform_indices = @transform_12, window_bounds = array<i64: 64, 128>}]} {
    %c0 = arith.constant 0 : index
    %c0_0 = arith.constant 0 : index
    %0 = vector.load %arg1[%c0, %c0_0] : memref<64x576xbf16, #tpu.memory_space<vmem>>, vector<64x576xbf16>
    %c0_1 = arith.constant 0 : index
    %c0_2 = arith.constant 0 : index
    %1 = vector.load %arg2[%c0_1, %c0_2] : memref<576x64xbf16, #tpu.memory_space<vmem>>, vector<576x64xbf16>
    %cst = arith.constant dense<0.000000e+00> : vector<64x64xf32>
    %2 = tpu.matmul %0, %1, %cst {dimension_numbers = #tpu.dot_dimension_numbers<[1], [0], [0], [1], [0, 0, 1, 1], [], []>} : vector<64x576xbf16>, vector<576x64xbf16>, vector<64x64xf32> -> vector<64x64xf32>
    %c0_3 = arith.constant 0 : index
    %c0_4 = arith.constant 0 : index
    %3 = vector.load %arg3[%c0_3, %c0_4] : memref<1x64xf32, #tpu.memory_space<vmem>>, vector<1x64xf32>
    %4 = vector.broadcast %3 : vector<1x64xf32> to vector<64x64xf32>
    %5 = arith.mulf %2, %4 : vector<64x64xf32>
    %c0_5 = arith.constant 0 : index
    %c0_6 = arith.constant 0 : index
    %6 = vector.load %arg4[%c0_5, %c0_6] : memref<1x64xf32, #tpu.memory_space<vmem>>, vector<1x64xf32>
    %7 = vector.broadcast %6 : vector<1x64xf32> to vector<64x64xf32>
    %8 = arith.addf %5, %7 : vector<64x64xf32>
    %cst_7 = arith.constant 0.000000e+00 : f32
    %9 = vector.broadcast %cst_7 : f32 to vector<64x64xf32>
    %10 = arith.maximumf %8, %9 : vector<64x64xf32>
    %11 = arith.truncf %10 : vector<64x64xf32> to vector<64x64xbf16>
    %c0_8 = arith.constant 0 : index
    %c0_9 = arith.constant 0 : index
    %12 = vector.load %arg5[%c0_8, %c0_9] : memref<64x256xbf16, #tpu.memory_space<vmem>>, vector<64x256xbf16>
    %cst_10 = arith.constant dense<0.000000e+00> : vector<64x256xf32>
    %13 = tpu.matmul %11, %12, %cst_10 {dimension_numbers = #tpu.dot_dimension_numbers<[1], [0], [0], [1], [0, 0, 1, 1], [], []>} : vector<64x64xbf16>, vector<64x256xbf16>, vector<64x256xf32> -> vector<64x256xf32>
    %c0_11 = arith.constant 0 : index
    %c0_12 = arith.constant 0 : index
    %14 = vector.load %arg6[%c0_11, %c0_12] : memref<1x256xf32, #tpu.memory_space<vmem>>, vector<1x256xf32>
    %15 = vector.broadcast %14 : vector<1x256xf32> to vector<64x256xf32>
    %16 = arith.mulf %13, %15 : vector<64x256xf32>
    %c0_13 = arith.constant 0 : index
    %c0_14 = arith.constant 0 : index
    %17 = vector.load %arg7[%c0_13, %c0_14] : memref<1x256xf32, #tpu.memory_space<vmem>>, vector<1x256xf32>
    %18 = vector.broadcast %17 : vector<1x256xf32> to vector<64x256xf32>
    %19 = arith.addf %16, %18 : vector<64x256xf32>
    %c0_15 = arith.constant 0 : index
    %c0_16 = arith.constant 0 : index
    %20 = vector.load %arg8[%c0_15, %c0_16] : memref<64x256xbf16, #tpu.memory_space<vmem>>, vector<64x256xbf16>
    %21 = arith.extf %20 : vector<64x256xbf16> to vector<64x256xf32>
    %22 = arith.addf %19, %21 : vector<64x256xf32>
    %cst_17 = arith.constant 0.000000e+00 : f32
    %23 = vector.broadcast %cst_17 : f32 to vector<64x256xf32>
    %24 = arith.maximumf %22, %23 : vector<64x256xf32>
    %25 = arith.truncf %24 : vector<64x256xf32> to vector<64x256xbf16>
    %c0_18 = arith.constant 0 : index
    %c0_19 = arith.constant 0 : index
    %26 = vector.load %arg12[%c0_18, %c0_19] : memref<64x256xbf16, #tpu.memory_space<vmem>>, vector<64x256xbf16>
    tpu.vector_store %arg12[%c0_18, %c0_19], %25 {strides = array<i32>} : memref<64x256xbf16, #tpu.memory_space<vmem>>, vector<64x256xbf16>,
    %c0_20 = arith.constant 0 : index
    %c0_21 = arith.constant 0 : index
    %27 = vector.load %arg9[%c0_20, %c0_21] : memref<256x128xbf16, #tpu.memory_space<vmem>>, vector<256x128xbf16>
    %cst_22 = arith.constant dense<0.000000e+00> : vector<64x128xf32>
    %28 = tpu.matmul %25, %27, %cst_22 {dimension_numbers = #tpu.dot_dimension_numbers<[1], [0], [0], [1], [0, 0, 1, 1], [], []>} : vector<64x256xbf16>, vector<256x128xbf16>, vector<64x128xf32> -> vector<64x128xf32>
    %c0_23 = arith.constant 0 : index
    %c0_24 = arith.constant 0 : index
    %29 = vector.load %arg10[%c0_23, %c0_24] : memref<1x128xf32, #tpu.memory_space<vmem>>, vector<1x128xf32>
    %30 = vector.broadcast %29 : vector<1x128xf32> to vector<64x128xf32>
    %31 = arith.mulf %28, %30 : vector<64x128xf32>
    %c0_25 = arith.constant 0 : index
    %c0_26 = arith.constant 0 : index
    %32 = vector.load %arg11[%c0_25, %c0_26] : memref<1x128xf32, #tpu.memory_space<vmem>>, vector<1x128xf32>
    %33 = vector.broadcast %32 : vector<1x128xf32> to vector<64x128xf32>
    %34 = arith.addf %31, %33 : vector<64x128xf32>
    %cst_27 = arith.constant 0.000000e+00 : f32
    %35 = vector.broadcast %cst_27 : f32 to vector<64x128xf32>
    %36 = arith.maximumf %34, %35 : vector<64x128xf32>
    %37 = arith.truncf %36 : vector<64x128xf32> to vector<64x128xbf16>
    %c0_28 = arith.constant 0 : index
    %c0_29 = arith.constant 0 : index
    %38 = vector.load %arg13[%c0_28, %c0_29] : memref<64x128xbf16, #tpu.memory_space<vmem>>, vector<64x128xbf16>
    tpu.vector_store %arg13[%c0_28, %c0_29], %37 {strides = array<i32>} : memref<64x128xbf16, #tpu.memory_space<vmem>>, vector<64x128xbf16>,
    return
  }
  func.func @transform_0(%arg0: i32) -> (i32, i32) {
    %c0_i32 = arith.constant 0 : i32
    %c0_i32_0 = arith.constant 0 : i32
    return %arg0, %c0_i32 : i32, i32
  }
  func.func @transform_1(%arg0: i32) -> (i32, i32) {
    %c0_i32 = arith.constant 0 : i32
    %c0_i32_0 = arith.constant 0 : i32
    %c0_i32_1 = arith.constant 0 : i32
    return %c0_i32, %c0_i32_0 : i32, i32
  }
  func.func @transform_2(%arg0: i32) -> (i32, i32) {
    %c0_i32 = arith.constant 0 : i32
    %c0_i32_0 = arith.constant 0 : i32
    %c0_i32_1 = arith.constant 0 : i32
    return %c0_i32, %c0_i32_0 : i32, i32
  }
  func.func @transform_3(%arg0: i32) -> (i32, i32) {
    %c0_i32 = arith.constant 0 : i32
    %c0_i32_0 = arith.constant 0 : i32
    %c0_i32_1 = arith.constant 0 : i32
    return %c0_i32, %c0_i32_0 : i32, i32
  }
  func.func @transform_4(%arg0: i32) -> (i32, i32) {
    %c0_i32 = arith.constant 0 : i32
    %c0_i32_0 = arith.constant 0 : i32
    %c0_i32_1 = arith.constant 0 : i32
    return %c0_i32, %c0_i32_0 : i32, i32
  }
  func.func @transform_5(%arg0: i32) -> (i32, i32) {
    %c0_i32 = arith.constant 0 : i32
    %c0_i32_0 = arith.constant 0 : i32
    %c0_i32_1 = arith.constant 0 : i32
    return %c0_i32, %c0_i32_0 : i32, i32
  }
  func.func @transform_6(%arg0: i32) -> (i32, i32) {
    %c0_i32 = arith.constant 0 : i32
    %c0_i32_0 = arith.constant 0 : i32
    %c0_i32_1 = arith.constant 0 : i32
    return %c0_i32, %c0_i32_0 : i32, i32
  }
  func.func @transform_7(%arg0: i32) -> (i32, i32) {
    %c0_i32 = arith.constant 0 : i32
    %c0_i32_0 = arith.constant 0 : i32
    return %arg0, %c0_i32 : i32, i32
  }
  func.func @transform_8(%arg0: i32) -> (i32, i32) {
    %c0_i32 = arith.constant 0 : i32
    %c0_i32_0 = arith.constant 0 : i32
    %c0_i32_1 = arith.constant 0 : i32
    return %c0_i32, %c0_i32_0 : i32, i32
  }
  func.func @transform_9(%arg0: i32) -> (i32, i32) {
    %c0_i32 = arith.constant 0 : i32
    %c0_i32_0 = arith.constant 0 : i32
    %c0_i32_1 = arith.constant 0 : i32
    return %c0_i32, %c0_i32_0 : i32, i32
  }
  func.func @transform_10(%arg0: i32) -> (i32, i32) {
    %c0_i32 = arith.constant 0 : i32
    %c0_i32_0 = arith.constant 0 : i32
    %c0_i32_1 = arith.constant 0 : i32
    return %c0_i32, %c0_i32_0 : i32, i32
  }
  func.func @transform_11(%arg0: i32) -> (i32, i32) {
    %c0_i32 = arith.constant 0 : i32
    %c0_i32_0 = arith.constant 0 : i32
    return %arg0, %c0_i32 : i32, i32
  }
  func.func @transform_12(%arg0: i32) -> (i32, i32) {
    %c0_i32 = arith.constant 0 : i32
    %c0_i32_0 = arith.constant 0 : i32
    return %arg0, %c0_i32 : i32, i32
  }
}

module attributes {stable_mosaic.version = 11 : i64} {
  func.func @_bottleneck_kernel(%arg0: i32, %arg1: memref<16x1152xbf16, #tpu.memory_space<vmem>>, %arg2: memref<1152x128xbf16, #tpu.memory_space<vmem>>, %arg3: memref<1x128xf32, #tpu.memory_space<vmem>>, %arg4: memref<1x128xf32, #tpu.memory_space<vmem>>, %arg5: memref<128x512xbf16, #tpu.memory_space<vmem>>, %arg6: memref<1x512xf32, #tpu.memory_space<vmem>>, %arg7: memref<1x512xf32, #tpu.memory_space<vmem>>, %arg8: memref<16x256xbf16, #tpu.memory_space<vmem>>, %arg9: memref<256x512xbf16, #tpu.memory_space<vmem>>, %arg10: memref<1x512xf32, #tpu.memory_space<vmem>>, %arg11: memref<1x512xf32, #tpu.memory_space<vmem>>, %arg12: memref<512x128xbf16, #tpu.memory_space<vmem>>, %arg13: memref<1x128xf32, #tpu.memory_space<vmem>>, %arg14: memref<1x128xf32, #tpu.memory_space<vmem>>, %arg15: memref<16x512xbf16, #tpu.memory_space<vmem>>, %arg16: memref<16x128xbf16, #tpu.memory_space<vmem>>) attributes {dimension_semantics = [#tpu.dimension_semantics<parallel>], iteration_bounds = array<i64: 2>, scalar_prefetch = 0 : i64, scratch_operands = 0 : i64, tpu.core_type = #tpu.core_type<tc>, window_params = [{transform_indices = @transform_0, window_bounds = array<i64: 16, 1152>}, {pipeline_mode = #tpu.pipeline_mode<synchronous>, transform_indices = @transform_1, window_bounds = array<i64: 1152, 128>}, {pipeline_mode = #tpu.pipeline_mode<synchronous>, transform_indices = @transform_2, window_bounds = array<i64: 1, 128>}, {pipeline_mode = #tpu.pipeline_mode<synchronous>, transform_indices = @transform_3, window_bounds = array<i64: 1, 128>}, {pipeline_mode = #tpu.pipeline_mode<synchronous>, transform_indices = @transform_4, window_bounds = array<i64: 128, 512>}, {pipeline_mode = #tpu.pipeline_mode<synchronous>, transform_indices = @transform_5, window_bounds = array<i64: 1, 512>}, {pipeline_mode = #tpu.pipeline_mode<synchronous>, transform_indices = @transform_6, window_bounds = array<i64: 1, 512>}, {transform_indices = @transform_7, window_bounds = array<i64: 16, 256>}, {pipeline_mode = #tpu.pipeline_mode<synchronous>, transform_indices = @transform_8, window_bounds = array<i64: 256, 512>}, {pipeline_mode = #tpu.pipeline_mode<synchronous>, transform_indices = @transform_9, window_bounds = array<i64: 1, 512>}, {pipeline_mode = #tpu.pipeline_mode<synchronous>, transform_indices = @transform_10, window_bounds = array<i64: 1, 512>}, {pipeline_mode = #tpu.pipeline_mode<synchronous>, transform_indices = @transform_11, window_bounds = array<i64: 512, 128>}, {pipeline_mode = #tpu.pipeline_mode<synchronous>, transform_indices = @transform_12, window_bounds = array<i64: 1, 128>}, {pipeline_mode = #tpu.pipeline_mode<synchronous>, transform_indices = @transform_13, window_bounds = array<i64: 1, 128>}, {transform_indices = @transform_14, window_bounds = array<i64: 16, 512>}, {transform_indices = @transform_15, window_bounds = array<i64: 16, 128>}]} {
    %c0 = arith.constant 0 : index
    %c0_0 = arith.constant 0 : index
    %0 = vector.load %arg1[%c0, %c0_0] : memref<16x1152xbf16, #tpu.memory_space<vmem>>, vector<16x1152xbf16>
    %c0_1 = arith.constant 0 : index
    %c0_2 = arith.constant 0 : index
    %1 = vector.load %arg2[%c0_1, %c0_2] : memref<1152x128xbf16, #tpu.memory_space<vmem>>, vector<1152x128xbf16>
    %cst = arith.constant dense<0.000000e+00> : vector<16x128xf32>
    %2 = tpu.matmul %0, %1, %cst {dimension_numbers = #tpu.dot_dimension_numbers<[1], [0], [0], [1], [0, 0, 1, 1], [], []>} : vector<16x1152xbf16>, vector<1152x128xbf16>, vector<16x128xf32> -> vector<16x128xf32>
    %c0_3 = arith.constant 0 : index
    %c0_4 = arith.constant 0 : index
    %3 = vector.load %arg3[%c0_3, %c0_4] : memref<1x128xf32, #tpu.memory_space<vmem>>, vector<1x128xf32>
    %4 = vector.broadcast %3 : vector<1x128xf32> to vector<16x128xf32>
    %5 = arith.mulf %2, %4 : vector<16x128xf32>
    %c0_5 = arith.constant 0 : index
    %c0_6 = arith.constant 0 : index
    %6 = vector.load %arg4[%c0_5, %c0_6] : memref<1x128xf32, #tpu.memory_space<vmem>>, vector<1x128xf32>
    %7 = vector.broadcast %6 : vector<1x128xf32> to vector<16x128xf32>
    %8 = arith.addf %5, %7 : vector<16x128xf32>
    %cst_7 = arith.constant 0.000000e+00 : f32
    %9 = vector.broadcast %cst_7 : f32 to vector<16x128xf32>
    %10 = arith.maximumf %8, %9 : vector<16x128xf32>
    %11 = arith.truncf %10 : vector<16x128xf32> to vector<16x128xbf16>
    %c0_8 = arith.constant 0 : index
    %c0_9 = arith.constant 0 : index
    %12 = vector.load %arg5[%c0_8, %c0_9] : memref<128x512xbf16, #tpu.memory_space<vmem>>, vector<128x512xbf16>
    %cst_10 = arith.constant dense<0.000000e+00> : vector<16x512xf32>
    %13 = tpu.matmul %11, %12, %cst_10 {dimension_numbers = #tpu.dot_dimension_numbers<[1], [0], [0], [1], [0, 0, 1, 1], [], []>} : vector<16x128xbf16>, vector<128x512xbf16>, vector<16x512xf32> -> vector<16x512xf32>
    %c0_11 = arith.constant 0 : index
    %c0_12 = arith.constant 0 : index
    %14 = vector.load %arg6[%c0_11, %c0_12] : memref<1x512xf32, #tpu.memory_space<vmem>>, vector<1x512xf32>
    %15 = vector.broadcast %14 : vector<1x512xf32> to vector<16x512xf32>
    %16 = arith.mulf %13, %15 : vector<16x512xf32>
    %c0_13 = arith.constant 0 : index
    %c0_14 = arith.constant 0 : index
    %17 = vector.load %arg7[%c0_13, %c0_14] : memref<1x512xf32, #tpu.memory_space<vmem>>, vector<1x512xf32>
    %18 = vector.broadcast %17 : vector<1x512xf32> to vector<16x512xf32>
    %19 = arith.addf %16, %18 : vector<16x512xf32>
    %c0_15 = arith.constant 0 : index
    %c0_16 = arith.constant 0 : index
    %20 = vector.load %arg8[%c0_15, %c0_16] : memref<16x256xbf16, #tpu.memory_space<vmem>>, vector<16x256xbf16>
    %c0_17 = arith.constant 0 : index
    %c0_18 = arith.constant 0 : index
    %21 = vector.load %arg9[%c0_17, %c0_18] : memref<256x512xbf16, #tpu.memory_space<vmem>>, vector<256x512xbf16>
    %cst_19 = arith.constant dense<0.000000e+00> : vector<16x512xf32>
    %22 = tpu.matmul %20, %21, %cst_19 {dimension_numbers = #tpu.dot_dimension_numbers<[1], [0], [0], [1], [0, 0, 1, 1], [], []>} : vector<16x256xbf16>, vector<256x512xbf16>, vector<16x512xf32> -> vector<16x512xf32>
    %c0_20 = arith.constant 0 : index
    %c0_21 = arith.constant 0 : index
    %23 = vector.load %arg10[%c0_20, %c0_21] : memref<1x512xf32, #tpu.memory_space<vmem>>, vector<1x512xf32>
    %24 = vector.broadcast %23 : vector<1x512xf32> to vector<16x512xf32>
    %25 = arith.mulf %22, %24 : vector<16x512xf32>
    %c0_22 = arith.constant 0 : index
    %c0_23 = arith.constant 0 : index
    %26 = vector.load %arg11[%c0_22, %c0_23] : memref<1x512xf32, #tpu.memory_space<vmem>>, vector<1x512xf32>
    %27 = vector.broadcast %26 : vector<1x512xf32> to vector<16x512xf32>
    %28 = arith.addf %25, %27 : vector<16x512xf32>
    %29 = arith.addf %19, %28 : vector<16x512xf32>
    %cst_24 = arith.constant 0.000000e+00 : f32
    %30 = vector.broadcast %cst_24 : f32 to vector<16x512xf32>
    %31 = arith.maximumf %29, %30 : vector<16x512xf32>
    %32 = arith.truncf %31 : vector<16x512xf32> to vector<16x512xbf16>
    %c0_25 = arith.constant 0 : index
    %c0_26 = arith.constant 0 : index
    %33 = vector.load %arg15[%c0_25, %c0_26] : memref<16x512xbf16, #tpu.memory_space<vmem>>, vector<16x512xbf16>
    tpu.vector_store %arg15[%c0_25, %c0_26], %32 {strides = array<i32>} : memref<16x512xbf16, #tpu.memory_space<vmem>>, vector<16x512xbf16>,
    %c0_27 = arith.constant 0 : index
    %c0_28 = arith.constant 0 : index
    %34 = vector.load %arg12[%c0_27, %c0_28] : memref<512x128xbf16, #tpu.memory_space<vmem>>, vector<512x128xbf16>
    %cst_29 = arith.constant dense<0.000000e+00> : vector<16x128xf32>
    %35 = tpu.matmul %32, %34, %cst_29 {dimension_numbers = #tpu.dot_dimension_numbers<[1], [0], [0], [1], [0, 0, 1, 1], [], []>} : vector<16x512xbf16>, vector<512x128xbf16>, vector<16x128xf32> -> vector<16x128xf32>
    %c0_30 = arith.constant 0 : index
    %c0_31 = arith.constant 0 : index
    %36 = vector.load %arg13[%c0_30, %c0_31] : memref<1x128xf32, #tpu.memory_space<vmem>>, vector<1x128xf32>
    %37 = vector.broadcast %36 : vector<1x128xf32> to vector<16x128xf32>
    %38 = arith.mulf %35, %37 : vector<16x128xf32>
    %c0_32 = arith.constant 0 : index
    %c0_33 = arith.constant 0 : index
    %39 = vector.load %arg14[%c0_32, %c0_33] : memref<1x128xf32, #tpu.memory_space<vmem>>, vector<1x128xf32>
    %40 = vector.broadcast %39 : vector<1x128xf32> to vector<16x128xf32>
    %41 = arith.addf %38, %40 : vector<16x128xf32>
    %cst_34 = arith.constant 0.000000e+00 : f32
    %42 = vector.broadcast %cst_34 : f32 to vector<16x128xf32>
    %43 = arith.maximumf %41, %42 : vector<16x128xf32>
    %44 = arith.truncf %43 : vector<16x128xf32> to vector<16x128xbf16>
    %c0_35 = arith.constant 0 : index
    %c0_36 = arith.constant 0 : index
    %45 = vector.load %arg16[%c0_35, %c0_36] : memref<16x128xbf16, #tpu.memory_space<vmem>>, vector<16x128xbf16>
    tpu.vector_store %arg16[%c0_35, %c0_36], %44 {strides = array<i32>} : memref<16x128xbf16, #tpu.memory_space<vmem>>, vector<16x128xbf16>,
    return
  }
  func.func @transform_0(%arg0: i32) -> (i32, i32) {
    %c0_i32 = arith.constant 0 : i32
    %c0_i32_0 = arith.constant 0 : i32
    return %arg0, %c0_i32 : i32, i32
  }
  func.func @transform_1(%arg0: i32) -> (i32, i32) {
    %c0_i32 = arith.constant 0 : i32
    %c0_i32_0 = arith.constant 0 : i32
    %c0_i32_1 = arith.constant 0 : i32
    return %c0_i32, %c0_i32_0 : i32, i32
  }
  func.func @transform_2(%arg0: i32) -> (i32, i32) {
    %c0_i32 = arith.constant 0 : i32
    %c0_i32_0 = arith.constant 0 : i32
    %c0_i32_1 = arith.constant 0 : i32
    return %c0_i32, %c0_i32_0 : i32, i32
  }
  func.func @transform_3(%arg0: i32) -> (i32, i32) {
    %c0_i32 = arith.constant 0 : i32
    %c0_i32_0 = arith.constant 0 : i32
    %c0_i32_1 = arith.constant 0 : i32
    return %c0_i32, %c0_i32_0 : i32, i32
  }
  func.func @transform_4(%arg0: i32) -> (i32, i32) {
    %c0_i32 = arith.constant 0 : i32
    %c0_i32_0 = arith.constant 0 : i32
    %c0_i32_1 = arith.constant 0 : i32
    return %c0_i32, %c0_i32_0 : i32, i32
  }
  func.func @transform_5(%arg0: i32) -> (i32, i32) {
    %c0_i32 = arith.constant 0 : i32
    %c0_i32_0 = arith.constant 0 : i32
    %c0_i32_1 = arith.constant 0 : i32
    return %c0_i32, %c0_i32_0 : i32, i32
  }
  func.func @transform_6(%arg0: i32) -> (i32, i32) {
    %c0_i32 = arith.constant 0 : i32
    %c0_i32_0 = arith.constant 0 : i32
    %c0_i32_1 = arith.constant 0 : i32
    return %c0_i32, %c0_i32_0 : i32, i32
  }
  func.func @transform_7(%arg0: i32) -> (i32, i32) {
    %c0_i32 = arith.constant 0 : i32
    %c0_i32_0 = arith.constant 0 : i32
    return %arg0, %c0_i32 : i32, i32
  }
  func.func @transform_8(%arg0: i32) -> (i32, i32) {
    %c0_i32 = arith.constant 0 : i32
    %c0_i32_0 = arith.constant 0 : i32
    %c0_i32_1 = arith.constant 0 : i32
    return %c0_i32, %c0_i32_0 : i32, i32
  }
  func.func @transform_9(%arg0: i32) -> (i32, i32) {
    %c0_i32 = arith.constant 0 : i32
    %c0_i32_0 = arith.constant 0 : i32
    %c0_i32_1 = arith.constant 0 : i32
    return %c0_i32, %c0_i32_0 : i32, i32
  }
  func.func @transform_10(%arg0: i32) -> (i32, i32) {
    %c0_i32 = arith.constant 0 : i32
    %c0_i32_0 = arith.constant 0 : i32
    %c0_i32_1 = arith.constant 0 : i32
    return %c0_i32, %c0_i32_0 : i32, i32
  }
  func.func @transform_11(%arg0: i32) -> (i32, i32) {
    %c0_i32 = arith.constant 0 : i32
    %c0_i32_0 = arith.constant 0 : i32
    %c0_i32_1 = arith.constant 0 : i32
    return %c0_i32, %c0_i32_0 : i32, i32
  }
  func.func @transform_12(%arg0: i32) -> (i32, i32) {
    %c0_i32 = arith.constant 0 : i32
    %c0_i32_0 = arith.constant 0 : i32
    %c0_i32_1 = arith.constant 0 : i32
    return %c0_i32, %c0_i32_0 : i32, i32
  }
  func.func @transform_13(%arg0: i32) -> (i32, i32) {
    %c0_i32 = arith.constant 0 : i32
    %c0_i32_0 = arith.constant 0 : i32
    %c0_i32_1 = arith.constant 0 : i32
    return %c0_i32, %c0_i32_0 : i32, i32
  }
  func.func @transform_14(%arg0: i32) -> (i32, i32) {
    %c0_i32 = arith.constant 0 : i32
    %c0_i32_0 = arith.constant 0 : i32
    return %arg0, %c0_i32 : i32, i32
  }
  func.func @transform_15(%arg0: i32) -> (i32, i32) {
    %c0_i32 = arith.constant 0 : i32
    %c0_i32_0 = arith.constant 0 : i32
    return %arg0, %c0_i32 : i32, i32
  }
}

module attributes {stable_mosaic.version = 11 : i64} {
  func.func @_bottleneck_kernel(%arg0: i32, %arg1: memref<16x1152xbf16, #tpu.memory_space<vmem>>, %arg2: memref<1152x128xbf16, #tpu.memory_space<vmem>>, %arg3: memref<1x128xf32, #tpu.memory_space<vmem>>, %arg4: memref<1x128xf32, #tpu.memory_space<vmem>>, %arg5: memref<128x512xbf16, #tpu.memory_space<vmem>>, %arg6: memref<1x512xf32, #tpu.memory_space<vmem>>, %arg7: memref<1x512xf32, #tpu.memory_space<vmem>>, %arg8: memref<16x512xbf16, #tpu.memory_space<vmem>>, %arg9: memref<512x128xbf16, #tpu.memory_space<vmem>>, %arg10: memref<1x128xf32, #tpu.memory_space<vmem>>, %arg11: memref<1x128xf32, #tpu.memory_space<vmem>>, %arg12: memref<16x512xbf16, #tpu.memory_space<vmem>>, %arg13: memref<16x128xbf16, #tpu.memory_space<vmem>>) attributes {dimension_semantics = [#tpu.dimension_semantics<parallel>], iteration_bounds = array<i64: 2>, scalar_prefetch = 0 : i64, scratch_operands = 0 : i64, tpu.core_type = #tpu.core_type<tc>, window_params = [{transform_indices = @transform_0, window_bounds = array<i64: 16, 1152>}, {pipeline_mode = #tpu.pipeline_mode<synchronous>, transform_indices = @transform_1, window_bounds = array<i64: 1152, 128>}, {pipeline_mode = #tpu.pipeline_mode<synchronous>, transform_indices = @transform_2, window_bounds = array<i64: 1, 128>}, {pipeline_mode = #tpu.pipeline_mode<synchronous>, transform_indices = @transform_3, window_bounds = array<i64: 1, 128>}, {pipeline_mode = #tpu.pipeline_mode<synchronous>, transform_indices = @transform_4, window_bounds = array<i64: 128, 512>}, {pipeline_mode = #tpu.pipeline_mode<synchronous>, transform_indices = @transform_5, window_bounds = array<i64: 1, 512>}, {pipeline_mode = #tpu.pipeline_mode<synchronous>, transform_indices = @transform_6, window_bounds = array<i64: 1, 512>}, {transform_indices = @transform_7, window_bounds = array<i64: 16, 512>}, {pipeline_mode = #tpu.pipeline_mode<synchronous>, transform_indices = @transform_8, window_bounds = array<i64: 512, 128>}, {pipeline_mode = #tpu.pipeline_mode<synchronous>, transform_indices = @transform_9, window_bounds = array<i64: 1, 128>}, {pipeline_mode = #tpu.pipeline_mode<synchronous>, transform_indices = @transform_10, window_bounds = array<i64: 1, 128>}, {transform_indices = @transform_11, window_bounds = array<i64: 16, 512>}, {transform_indices = @transform_12, window_bounds = array<i64: 16, 128>}]} {
    %c0 = arith.constant 0 : index
    %c0_0 = arith.constant 0 : index
    %0 = vector.load %arg1[%c0, %c0_0] : memref<16x1152xbf16, #tpu.memory_space<vmem>>, vector<16x1152xbf16>
    %c0_1 = arith.constant 0 : index
    %c0_2 = arith.constant 0 : index
    %1 = vector.load %arg2[%c0_1, %c0_2] : memref<1152x128xbf16, #tpu.memory_space<vmem>>, vector<1152x128xbf16>
    %cst = arith.constant dense<0.000000e+00> : vector<16x128xf32>
    %2 = tpu.matmul %0, %1, %cst {dimension_numbers = #tpu.dot_dimension_numbers<[1], [0], [0], [1], [0, 0, 1, 1], [], []>} : vector<16x1152xbf16>, vector<1152x128xbf16>, vector<16x128xf32> -> vector<16x128xf32>
    %c0_3 = arith.constant 0 : index
    %c0_4 = arith.constant 0 : index
    %3 = vector.load %arg3[%c0_3, %c0_4] : memref<1x128xf32, #tpu.memory_space<vmem>>, vector<1x128xf32>
    %4 = vector.broadcast %3 : vector<1x128xf32> to vector<16x128xf32>
    %5 = arith.mulf %2, %4 : vector<16x128xf32>
    %c0_5 = arith.constant 0 : index
    %c0_6 = arith.constant 0 : index
    %6 = vector.load %arg4[%c0_5, %c0_6] : memref<1x128xf32, #tpu.memory_space<vmem>>, vector<1x128xf32>
    %7 = vector.broadcast %6 : vector<1x128xf32> to vector<16x128xf32>
    %8 = arith.addf %5, %7 : vector<16x128xf32>
    %cst_7 = arith.constant 0.000000e+00 : f32
    %9 = vector.broadcast %cst_7 : f32 to vector<16x128xf32>
    %10 = arith.maximumf %8, %9 : vector<16x128xf32>
    %11 = arith.truncf %10 : vector<16x128xf32> to vector<16x128xbf16>
    %c0_8 = arith.constant 0 : index
    %c0_9 = arith.constant 0 : index
    %12 = vector.load %arg5[%c0_8, %c0_9] : memref<128x512xbf16, #tpu.memory_space<vmem>>, vector<128x512xbf16>
    %cst_10 = arith.constant dense<0.000000e+00> : vector<16x512xf32>
    %13 = tpu.matmul %11, %12, %cst_10 {dimension_numbers = #tpu.dot_dimension_numbers<[1], [0], [0], [1], [0, 0, 1, 1], [], []>} : vector<16x128xbf16>, vector<128x512xbf16>, vector<16x512xf32> -> vector<16x512xf32>
    %c0_11 = arith.constant 0 : index
    %c0_12 = arith.constant 0 : index
    %14 = vector.load %arg6[%c0_11, %c0_12] : memref<1x512xf32, #tpu.memory_space<vmem>>, vector<1x512xf32>
    %15 = vector.broadcast %14 : vector<1x512xf32> to vector<16x512xf32>
    %16 = arith.mulf %13, %15 : vector<16x512xf32>
    %c0_13 = arith.constant 0 : index
    %c0_14 = arith.constant 0 : index
    %17 = vector.load %arg7[%c0_13, %c0_14] : memref<1x512xf32, #tpu.memory_space<vmem>>, vector<1x512xf32>
    %18 = vector.broadcast %17 : vector<1x512xf32> to vector<16x512xf32>
    %19 = arith.addf %16, %18 : vector<16x512xf32>
    %c0_15 = arith.constant 0 : index
    %c0_16 = arith.constant 0 : index
    %20 = vector.load %arg8[%c0_15, %c0_16] : memref<16x512xbf16, #tpu.memory_space<vmem>>, vector<16x512xbf16>
    %21 = arith.extf %20 : vector<16x512xbf16> to vector<16x512xf32>
    %22 = arith.addf %19, %21 : vector<16x512xf32>
    %cst_17 = arith.constant 0.000000e+00 : f32
    %23 = vector.broadcast %cst_17 : f32 to vector<16x512xf32>
    %24 = arith.maximumf %22, %23 : vector<16x512xf32>
    %25 = arith.truncf %24 : vector<16x512xf32> to vector<16x512xbf16>
    %c0_18 = arith.constant 0 : index
    %c0_19 = arith.constant 0 : index
    %26 = vector.load %arg12[%c0_18, %c0_19] : memref<16x512xbf16, #tpu.memory_space<vmem>>, vector<16x512xbf16>
    tpu.vector_store %arg12[%c0_18, %c0_19], %25 {strides = array<i32>} : memref<16x512xbf16, #tpu.memory_space<vmem>>, vector<16x512xbf16>,
    %c0_20 = arith.constant 0 : index
    %c0_21 = arith.constant 0 : index
    %27 = vector.load %arg9[%c0_20, %c0_21] : memref<512x128xbf16, #tpu.memory_space<vmem>>, vector<512x128xbf16>
    %cst_22 = arith.constant dense<0.000000e+00> : vector<16x128xf32>
    %28 = tpu.matmul %25, %27, %cst_22 {dimension_numbers = #tpu.dot_dimension_numbers<[1], [0], [0], [1], [0, 0, 1, 1], [], []>} : vector<16x512xbf16>, vector<512x128xbf16>, vector<16x128xf32> -> vector<16x128xf32>
    %c0_23 = arith.constant 0 : index
    %c0_24 = arith.constant 0 : index
    %29 = vector.load %arg10[%c0_23, %c0_24] : memref<1x128xf32, #tpu.memory_space<vmem>>, vector<1x128xf32>
    %30 = vector.broadcast %29 : vector<1x128xf32> to vector<16x128xf32>
    %31 = arith.mulf %28, %30 : vector<16x128xf32>
    %c0_25 = arith.constant 0 : index
    %c0_26 = arith.constant 0 : index
    %32 = vector.load %arg11[%c0_25, %c0_26] : memref<1x128xf32, #tpu.memory_space<vmem>>, vector<1x128xf32>
    %33 = vector.broadcast %32 : vector<1x128xf32> to vector<16x128xf32>
    %34 = arith.addf %31, %33 : vector<16x128xf32>
    %cst_27 = arith.constant 0.000000e+00 : f32
    %35 = vector.broadcast %cst_27 : f32 to vector<16x128xf32>
    %36 = arith.maximumf %34, %35 : vector<16x128xf32>
    %37 = arith.truncf %36 : vector<16x128xf32> to vector<16x128xbf16>
    %c0_28 = arith.constant 0 : index
    %c0_29 = arith.constant 0 : index
    %38 = vector.load %arg13[%c0_28, %c0_29] : memref<16x128xbf16, #tpu.memory_space<vmem>>, vector<16x128xbf16>
    tpu.vector_store %arg13[%c0_28, %c0_29], %37 {strides = array<i32>} : memref<16x128xbf16, #tpu.memory_space<vmem>>, vector<16x128xbf16>,
    return
  }
  func.func @transform_0(%arg0: i32) -> (i32, i32) {
    %c0_i32 = arith.constant 0 : i32
    %c0_i32_0 = arith.constant 0 : i32
    return %arg0, %c0_i32 : i32, i32
  }
  func.func @transform_1(%arg0: i32) -> (i32, i32) {
    %c0_i32 = arith.constant 0 : i32
    %c0_i32_0 = arith.constant 0 : i32
    %c0_i32_1 = arith.constant 0 : i32
    return %c0_i32, %c0_i32_0 : i32, i32
  }
  func.func @transform_2(%arg0: i32) -> (i32, i32) {
    %c0_i32 = arith.constant 0 : i32
    %c0_i32_0 = arith.constant 0 : i32
    %c0_i32_1 = arith.constant 0 : i32
    return %c0_i32, %c0_i32_0 : i32, i32
  }
  func.func @transform_3(%arg0: i32) -> (i32, i32) {
    %c0_i32 = arith.constant 0 : i32
    %c0_i32_0 = arith.constant 0 : i32
    %c0_i32_1 = arith.constant 0 : i32
    return %c0_i32, %c0_i32_0 : i32, i32
  }
  func.func @transform_4(%arg0: i32) -> (i32, i32) {
    %c0_i32 = arith.constant 0 : i32
    %c0_i32_0 = arith.constant 0 : i32
    %c0_i32_1 = arith.constant 0 : i32
    return %c0_i32, %c0_i32_0 : i32, i32
  }
  func.func @transform_5(%arg0: i32) -> (i32, i32) {
    %c0_i32 = arith.constant 0 : i32
    %c0_i32_0 = arith.constant 0 : i32
    %c0_i32_1 = arith.constant 0 : i32
    return %c0_i32, %c0_i32_0 : i32, i32
  }
  func.func @transform_6(%arg0: i32) -> (i32, i32) {
    %c0_i32 = arith.constant 0 : i32
    %c0_i32_0 = arith.constant 0 : i32
    %c0_i32_1 = arith.constant 0 : i32
    return %c0_i32, %c0_i32_0 : i32, i32
  }
  func.func @transform_7(%arg0: i32) -> (i32, i32) {
    %c0_i32 = arith.constant 0 : i32
    %c0_i32_0 = arith.constant 0 : i32
    return %arg0, %c0_i32 : i32, i32
  }
  func.func @transform_8(%arg0: i32) -> (i32, i32) {
    %c0_i32 = arith.constant 0 : i32
    %c0_i32_0 = arith.constant 0 : i32
    %c0_i32_1 = arith.constant 0 : i32
    return %c0_i32, %c0_i32_0 : i32, i32
  }
  func.func @transform_9(%arg0: i32) -> (i32, i32) {
    %c0_i32 = arith.constant 0 : i32
    %c0_i32_0 = arith.constant 0 : i32
    %c0_i32_1 = arith.constant 0 : i32
    return %c0_i32, %c0_i32_0 : i32, i32
  }
  func.func @transform_10(%arg0: i32) -> (i32, i32) {
    %c0_i32 = arith.constant 0 : i32
    %c0_i32_0 = arith.constant 0 : i32
    %c0_i32_1 = arith.constant 0 : i32
    return %c0_i32, %c0_i32_0 : i32, i32
  }
  func.func @transform_11(%arg0: i32) -> (i32, i32) {
    %c0_i32 = arith.constant 0 : i32
    %c0_i32_0 = arith.constant 0 : i32
    return %arg0, %c0_i32 : i32, i32
  }
  func.func @transform_12(%arg0: i32) -> (i32, i32) {
    %c0_i32 = arith.constant 0 : i32
    %c0_i32_0 = arith.constant 0 : i32
    return %arg0, %c0_i32 : i32, i32
  }
}

module attributes {stable_mosaic.version = 11 : i64} {
  func.func @_bottleneck_kernel(%arg0: i32, %arg1: memref<16x1152xbf16, #tpu.memory_space<vmem>>, %arg2: memref<1152x128xbf16, #tpu.memory_space<vmem>>, %arg3: memref<1x128xf32, #tpu.memory_space<vmem>>, %arg4: memref<1x128xf32, #tpu.memory_space<vmem>>, %arg5: memref<128x512xbf16, #tpu.memory_space<vmem>>, %arg6: memref<1x512xf32, #tpu.memory_space<vmem>>, %arg7: memref<1x512xf32, #tpu.memory_space<vmem>>, %arg8: memref<16x512xbf16, #tpu.memory_space<vmem>>, %arg9: memref<16x512xbf16, #tpu.memory_space<vmem>>) attributes {dimension_semantics = [#tpu.dimension_semantics<parallel>], iteration_bounds = array<i64: 2>, scalar_prefetch = 0 : i64, scratch_operands = 0 : i64, tpu.core_type = #tpu.core_type<tc>, window_params = [{transform_indices = @transform_0, window_bounds = array<i64: 16, 1152>}, {pipeline_mode = #tpu.pipeline_mode<synchronous>, transform_indices = @transform_1, window_bounds = array<i64: 1152, 128>}, {pipeline_mode = #tpu.pipeline_mode<synchronous>, transform_indices = @transform_2, window_bounds = array<i64: 1, 128>}, {pipeline_mode = #tpu.pipeline_mode<synchronous>, transform_indices = @transform_3, window_bounds = array<i64: 1, 128>}, {pipeline_mode = #tpu.pipeline_mode<synchronous>, transform_indices = @transform_4, window_bounds = array<i64: 128, 512>}, {pipeline_mode = #tpu.pipeline_mode<synchronous>, transform_indices = @transform_5, window_bounds = array<i64: 1, 512>}, {pipeline_mode = #tpu.pipeline_mode<synchronous>, transform_indices = @transform_6, window_bounds = array<i64: 1, 512>}, {transform_indices = @transform_7, window_bounds = array<i64: 16, 512>}, {transform_indices = @transform_8, window_bounds = array<i64: 16, 512>}]} {
    %c0 = arith.constant 0 : index
    %c0_0 = arith.constant 0 : index
    %0 = vector.load %arg1[%c0, %c0_0] : memref<16x1152xbf16, #tpu.memory_space<vmem>>, vector<16x1152xbf16>
    %c0_1 = arith.constant 0 : index
    %c0_2 = arith.constant 0 : index
    %1 = vector.load %arg2[%c0_1, %c0_2] : memref<1152x128xbf16, #tpu.memory_space<vmem>>, vector<1152x128xbf16>
    %cst = arith.constant dense<0.000000e+00> : vector<16x128xf32>
    %2 = tpu.matmul %0, %1, %cst {dimension_numbers = #tpu.dot_dimension_numbers<[1], [0], [0], [1], [0, 0, 1, 1], [], []>} : vector<16x1152xbf16>, vector<1152x128xbf16>, vector<16x128xf32> -> vector<16x128xf32>
    %c0_3 = arith.constant 0 : index
    %c0_4 = arith.constant 0 : index
    %3 = vector.load %arg3[%c0_3, %c0_4] : memref<1x128xf32, #tpu.memory_space<vmem>>, vector<1x128xf32>
    %4 = vector.broadcast %3 : vector<1x128xf32> to vector<16x128xf32>
    %5 = arith.mulf %2, %4 : vector<16x128xf32>
    %c0_5 = arith.constant 0 : index
    %c0_6 = arith.constant 0 : index
    %6 = vector.load %arg4[%c0_5, %c0_6] : memref<1x128xf32, #tpu.memory_space<vmem>>, vector<1x128xf32>
    %7 = vector.broadcast %6 : vector<1x128xf32> to vector<16x128xf32>
    %8 = arith.addf %5, %7 : vector<16x128xf32>
    %cst_7 = arith.constant 0.000000e+00 : f32
    %9 = vector.broadcast %cst_7 : f32 to vector<16x128xf32>
    %10 = arith.maximumf %8, %9 : vector<16x128xf32>
    %11 = arith.truncf %10 : vector<16x128xf32> to vector<16x128xbf16>
    %c0_8 = arith.constant 0 : index
    %c0_9 = arith.constant 0 : index
    %12 = vector.load %arg5[%c0_8, %c0_9] : memref<128x512xbf16, #tpu.memory_space<vmem>>, vector<128x512xbf16>
    %cst_10 = arith.constant dense<0.000000e+00> : vector<16x512xf32>
    %13 = tpu.matmul %11, %12, %cst_10 {dimension_numbers = #tpu.dot_dimension_numbers<[1], [0], [0], [1], [0, 0, 1, 1], [], []>} : vector<16x128xbf16>, vector<128x512xbf16>, vector<16x512xf32> -> vector<16x512xf32>
    %c0_11 = arith.constant 0 : index
    %c0_12 = arith.constant 0 : index
    %14 = vector.load %arg6[%c0_11, %c0_12] : memref<1x512xf32, #tpu.memory_space<vmem>>, vector<1x512xf32>
    %15 = vector.broadcast %14 : vector<1x512xf32> to vector<16x512xf32>
    %16 = arith.mulf %13, %15 : vector<16x512xf32>
    %c0_13 = arith.constant 0 : index
    %c0_14 = arith.constant 0 : index
    %17 = vector.load %arg7[%c0_13, %c0_14] : memref<1x512xf32, #tpu.memory_space<vmem>>, vector<1x512xf32>
    %18 = vector.broadcast %17 : vector<1x512xf32> to vector<16x512xf32>
    %19 = arith.addf %16, %18 : vector<16x512xf32>
    %c0_15 = arith.constant 0 : index
    %c0_16 = arith.constant 0 : index
    %20 = vector.load %arg8[%c0_15, %c0_16] : memref<16x512xbf16, #tpu.memory_space<vmem>>, vector<16x512xbf16>
    %21 = arith.extf %20 : vector<16x512xbf16> to vector<16x512xf32>
    %22 = arith.addf %19, %21 : vector<16x512xf32>
    %cst_17 = arith.constant 0.000000e+00 : f32
    %23 = vector.broadcast %cst_17 : f32 to vector<16x512xf32>
    %24 = arith.maximumf %22, %23 : vector<16x512xf32>
    %25 = arith.truncf %24 : vector<16x512xf32> to vector<16x512xbf16>
    %c0_18 = arith.constant 0 : index
    %c0_19 = arith.constant 0 : index
    %26 = vector.load %arg9[%c0_18, %c0_19] : memref<16x512xbf16, #tpu.memory_space<vmem>>, vector<16x512xbf16>
    tpu.vector_store %arg9[%c0_18, %c0_19], %25 {strides = array<i32>} : memref<16x512xbf16, #tpu.memory_space<vmem>>, vector<16x512xbf16>,
    return
  }
  func.func @transform_0(%arg0: i32) -> (i32, i32) {
    %c0_i32 = arith.constant 0 : i32
    %c0_i32_0 = arith.constant 0 : i32
    return %arg0, %c0_i32 : i32, i32
  }
  func.func @transform_1(%arg0: i32) -> (i32, i32) {
    %c0_i32 = arith.constant 0 : i32
    %c0_i32_0 = arith.constant 0 : i32
    %c0_i32_1 = arith.constant 0 : i32
    return %c0_i32, %c0_i32_0 : i32, i32
  }
  func.func @transform_2(%arg0: i32) -> (i32, i32) {
    %c0_i32 = arith.constant 0 : i32
    %c0_i32_0 = arith.constant 0 : i32
    %c0_i32_1 = arith.constant 0 : i32
    return %c0_i32, %c0_i32_0 : i32, i32
  }
  func.func @transform_3(%arg0: i32) -> (i32, i32) {
    %c0_i32 = arith.constant 0 : i32
    %c0_i32_0 = arith.constant 0 : i32
    %c0_i32_1 = arith.constant 0 : i32
    return %c0_i32, %c0_i32_0 : i32, i32
  }
  func.func @transform_4(%arg0: i32) -> (i32, i32) {
    %c0_i32 = arith.constant 0 : i32
    %c0_i32_0 = arith.constant 0 : i32
    %c0_i32_1 = arith.constant 0 : i32
    return %c0_i32, %c0_i32_0 : i32, i32
  }
  func.func @transform_5(%arg0: i32) -> (i32, i32) {
    %c0_i32 = arith.constant 0 : i32
    %c0_i32_0 = arith.constant 0 : i32
    %c0_i32_1 = arith.constant 0 : i32
    return %c0_i32, %c0_i32_0 : i32, i32
  }
  func.func @transform_6(%arg0: i32) -> (i32, i32) {
    %c0_i32 = arith.constant 0 : i32
    %c0_i32_0 = arith.constant 0 : i32
    %c0_i32_1 = arith.constant 0 : i32
    return %c0_i32, %c0_i32_0 : i32, i32
  }
  func.func @transform_7(%arg0: i32) -> (i32, i32) {
    %c0_i32 = arith.constant 0 : i32
    %c0_i32_0 = arith.constant 0 : i32
    return %arg0, %c0_i32 : i32, i32
  }
  func.func @transform_8(%arg0: i32) -> (i32, i32) {
    %c0_i32 = arith.constant 0 : i32
    %c0_i32_0 = arith.constant 0 : i32
    return %arg0, %c0_i32 : i32, i32
  }
}

</mosaic_0001>

<bundles_post_ra>
// kernel: base_net_forward.10
= control target key start
LH: loop header
LB: loop body
LE: loop exit
PB: predicated region body
PF: predicated region fallthrough
CT: control target
= control target key end

     0   :  { %s1355_s25 = smov 0   ;;  %s1560_s0 = inlined_call_operand.vmem [shape: bf16[128,64], index: 0, kind: input, shape index: {}]   ;;  %s1561_s1 = inlined_call_operand.vmem [shape: bf16[128,64], index: 1, kind: input, shape index: {}]   ;;  %s1562_s2 = inlined_call_operand.vmem [shape: bf16[128,64], index: 2, kind: input, shape index: {}]   ;;  %s1563_s3 = inlined_call_operand.vmem [shape: bf16[128,64], index: 3, kind: input, shape index: {}]   ;;  %s1564_s4 = inlined_call_operand.vmem [shape: bf16[128,64], index: 4, kind: input, shape index: {}]   ;;  %s1565_s5 = inlined_call_operand.vmem [shape: bf16[128,64], index: 5, kind: input, shape index: {}]   ;;  %s1566_s6 = inlined_call_operand.vmem [shape: bf16[128,64], index: 6, kind: input, shape index: {}]   ;;  %s1567_s7 = inlined_call_operand.vmem [shape: bf16[128,64], index: 7, kind: input, shape index: {}]   ;;  %s1568_s8 = inlined_call_operand.vmem [shape: bf16[128,64], index: 8, kind: input, shape index: {}]   ;;  %s1569_s9 = inlined_call_operand.vmem [shape: bf16[64,64], index: 9, kind: input, shape index: {}]   ;;  %s1570_s10 = inlined_call_operand.vmem [shape: f32[1,64], index: 10, kind: input, shape index: {}]   ;;  %s1571_s11 = inlined_call_operand.vmem [shape: f32[1,64], index: 11, kind: input, shape index: {}]   ;;  %s1572_s12 = inlined_call_operand.vmem [shape: bf16[128,64], index: 12, kind: output, shape index: {0}]   ;;  %s1573_s13 = inlined_call_operand.vmem [shape: bf16[128,64], index: 13, kind: output, shape index: {1}]  }
   0x1 LB: > { %s1174_s26 = sadd.s32 4294967295, %s1283_s25   ;;  %p1178_p0 = scmp.ge.s32.totalorder %s1283_s25, 1  ;;  %s1283_s25 = sphi %s1355_s25, %s24_s25  }
   0x2   : > { %p479_p1 = scmp.lt.s32.totalorder %s1283_s25, 3 }
   0x4   : > { %p480_p2 = pnand %p1178_p0, %p479_p1 }
   0x5   : > { %s1179_s29 = sshll.u32 (!%p480_p2), %s1174_s26, 3 }
   0x6   : > { %483 = sbr.rel (%p480_p2) target bundleno = 258 (0x102), region = 68  ;;  %p569_p3 = scmp.lt.s32.totalorder (!%p480_p2), %s1179_s29, 15 }
   0xb   : > { %v1273_v0 = vld [vmem:[%s1569_s9 + $0x18] sm:$0xff]   ;;  %v1274_v1 = vld [vmem:[%s1569_s9 + $0x10] sm:$0xff]   ;;  %s1575_s29 = smov (!%p569_p3, %s1179_s29), 15  ;;  %v1275_v2 = vld [vmem:[%s1569_s9 + $0x8] sm:$0xff]   ;;  %vm771_vm0 = vcmask 519168   ;;  %vm832_vm1 = vcmask 523264  }
   0xc   : > { %1241 = vmatprep.subr.bf16.mxu0 %v1273_v0  ;;  %1257 = vmatprep.subr.bf16.mxu1 %v1273_v0  ;;  %s1372_s17 = sshll.u32 %s1575_s29, 2  ;;  %v1276_v3 = vld [vmem:[%s1569_s9] sm:$0xff]  }
   0xd   : > { %1242 = vmatpush3.bf16.msra.mxu0 %v1273_v0  ;;  %1261 = vmatpush3.bf16.msra.mxu1 %v1273_v0  ;;  %s1381_s22 = scalar_lea.vmem %s1560_s0, %s1372_s17  ;;  %s1387_s26 = scalar_lea.vmem %s1561_s1, %s1372_s17 }
   0xe   : > { %1243 = vmatprep.subr.bf16.mxu0 %v1274_v1  ;;  %1258 = vmatprep.subr.bf16.mxu1 %v1274_v1  ;;  %s1393_s29 = scalar_lea.vmem %s1562_s2, %s1372_s17  ;;  %s1399_s15 = scalar_lea.vmem %s1563_s3, %s1372_s17  ;;  %v635_v4 = vld [vmem:[%s1381_s22] sm:$0xf]  ;;  %v636_v5 = vld [vmem:[%s1381_s22 + $0x4] sm:$0xf]  ;;  %v639_v22 = vld [vmem:[%s1381_s22 + $0x10] sm:$0xf] }
   0xf   : > { %v643_v6 = vld [vmem:[%s1387_s26] sm:$0xf]  ;;  %s1408_s19 = scalar_lea.vmem %s1564_s4, %s1372_s17  ;;  %v644_v7 = vld [vmem:[%s1387_s26 + $0x4] sm:$0xf]  ;;  %s1417_s23 = scalar_lea.vmem %s1565_s5, %s1372_s17  ;;  %v640_v23 = vld [vmem:[%s1381_s22 + $0x14] sm:$0xf] }
  0x10   : > { %v651_v8 = vmax.bf16 %v643_v6, %v635_v4  ;;  %v659_v9 = vld [vmem:[%s1393_s29] sm:$0xf]  ;;  %v660_v10 = vld [vmem:[%s1393_s29 + $0x4] sm:$0xf]  ;;  %v652_v11 = vmax.bf16 %v644_v7, %v636_v5  ;;  %s1426_s28 = scalar_lea.vmem %s1566_s6, %s1372_s17  ;;  %s1435_s16 = scalar_lea.vmem %s1567_s7, %s1372_s17  ;;  %v647_v24 = vld [vmem:[%s1387_s26 + $0x10] sm:$0xf] }
  0x11   : > { %1244 = vmatpush3.bf16.msra.mxu0 %v1274_v1  ;;  %1262 = vmatpush3.bf16.msra.mxu1 %v1274_v1  ;;  %v675_v12 = vld [vmem:[%s1399_s15] sm:$0xf]  ;;  %v676_v14 = vld [vmem:[%s1399_s15 + $0x4] sm:$0xf]  ;;  %s1444_s21 = scalar_lea.vmem %s1568_s8, %s1372_s17  ;;  %v648_v26 = vld [vmem:[%s1387_s26 + $0x14] sm:$0xf]  ;;  %v655_v27 = vmax.bf16 %v647_v24, %v639_v22  ;;  %s1471_s30 = scalar_lea.vmem %s1572_s12, %s1372_s17 }
  0x12   : > { %1245 = vmatprep.subr.bf16.mxu0 %v1275_v2  ;;  %1259 = vmatprep.subr.bf16.mxu1 %v1275_v2  ;;  %v667_v13 = vmax.bf16 %v659_v9, %v651_v8  ;;  %v668_v15 = vmax.bf16 %v660_v10, %v652_v11  ;;  %v691_v16 = vld [vmem:[%s1408_s19] sm:$0xf]  ;;  %v692_v18 = vld [vmem:[%s1408_s19 + $0x4] sm:$0xf]  ;;  %v663_v28 = vld [vmem:[%s1393_s29 + $0x10] sm:$0xf]  ;;  %v656_v32 = vmax.bf16 %v648_v26, %v640_v23 }
  0x13   : > { %v707_v19 = vld [vmem:[%s1417_s23] sm:$0xf]  ;;  %v708_v20 = vld [vmem:[%s1417_s23 + $0x4] sm:$0xf]  ;;  %v664_v29 = vld [vmem:[%s1393_s29 + $0x14] sm:$0xf]  ;;  %v671_v37 = vmax.bf16 %v663_v28, %v655_v27 }
  0x14   : > { %v683_v17 = vmax.bf16 %v675_v12, %v667_v13  ;;  %v684_v21 = vmax.bf16 %v676_v14, %v668_v15  ;;  %v723_v31 = vld [vmem:[%s1426_s28] sm:$0xf]  ;;  %v679_v33 = vld [vmem:[%s1399_s15 + $0x10] sm:$0xf]  ;;  %v724_v35 = vld [vmem:[%s1426_s28 + $0x4] sm:$0xf]  ;;  %v672_v42 = vmax.bf16 %v664_v29, %v656_v32 }
  0x15   : > { %1246 = vmatpush3.bf16.msra.mxu0 %v1275_v2  ;;  %1263 = vmatpush3.bf16.msra.mxu1 %v1275_v2  ;;  %v739_v36 = vld [vmem:[%s1435_s16] sm:$0xf]  ;;  %v680_v38 = vld [vmem:[%s1399_s15 + $0x14] sm:$0xf]  ;;  %v740_v40 = vld [vmem:[%s1435_s16 + $0x4] sm:$0xf]  ;;  %v687_v46 = vmax.bf16 %v679_v33, %v671_v37 }
  0x16   : > { %1247 = vmatprep.subr.bf16.mxu0 %v1276_v3  ;;  %1260 = vmatprep.subr.bf16.mxu1 %v1276_v3  ;;  %v699_v25 = vmax.bf16 %v691_v16, %v683_v17  ;;  %v700_v30 = vmax.bf16 %v692_v18, %v684_v21  ;;  %v755_v41 = vld [vmem:[%s1444_s21] sm:$0xf]  ;;  %v695_v43 = vld [vmem:[%s1408_s19 + $0x10] sm:$0xf]  ;;  %v756_v45 = vld [vmem:[%s1444_s21 + $0x4] sm:$0xf]  ;;  %v688_v51 = vmax.bf16 %v680_v38, %v672_v42 }
  0x17   : > { %v696_v47 = vld [vmem:[%s1408_s19 + $0x14] sm:$0xf]  ;;  %v711_v48 = vld [vmem:[%s1417_s23 + $0x10] sm:$0xf]  ;;  %v637_v52 = vld [vmem:[%s1381_s22 + $0x8] sm:$0xf]  ;;  %v703_v56 = vmax.bf16 %v695_v43, %v687_v46 }
  0x18   : > { %v715_v34 = vmax.bf16 %v707_v19, %v699_v25  ;;  %v716_v39 = vmax.bf16 %v708_v20, %v700_v30  ;;  %v712_v49 = vld [vmem:[%s1417_s23 + $0x14] sm:$0xf]  ;;  %v638_v53 = vld [vmem:[%s1381_s22 + $0xc] sm:$0xf]  ;;  %v645_v54 = vld [vmem:[%s1387_s26 + $0x8] sm:$0xf]  ;;  %v704_v62 = vmax.bf16 %v696_v47, %v688_v51 }
  0x19   : > { %1248 = vmatpush3.bf16.msra.mxu0 %v1276_v3  ;;  %1264 = vmatpush3.bf16.msra.mxu1 %v1276_v3  ;;  %v646_v57 = vld [vmem:[%s1387_s26 + $0xc] sm:$0xf]  ;;  %v653_v58 = vmax.bf16 %v645_v54, %v637_v52  ;;  %v661_v59 = vld [vmem:[%s1393_s29 + $0x8] sm:$0xf]  ;;  %v727_v63 = vld [vmem:[%s1426_s28 + $0x10] sm:$0xf]  ;;  %v719_v3 = vmax.bf16 %v711_v48, %v703_v56 }
  0x1a   : > { %v731_v44 = vmax.bf16 %v723_v31, %v715_v34  ;;  %v732_v50 = vmax.bf16 %v724_v35, %v716_v39  ;;  %v662_v60 = vld [vmem:[%s1393_s29 + $0xc] sm:$0xf]  ;;  %v654_v0 = vmax.bf16 %v646_v57, %v638_v53  ;;  %v677_v1 = vld [vmem:[%s1399_s15 + $0x8] sm:$0xf]  ;;  %v728_v4 = vld [vmem:[%s1426_s28 + $0x14] sm:$0xf]  ;;  %v720_v9 = vmax.bf16 %v712_v49, %v704_v62 }
  0x1b   : > { %v743_v5 = vld [vmem:[%s1435_s16 + $0x10] sm:$0xf]  ;;  %v669_v6 = vmax.bf16 %v661_v59, %v653_v58  ;;  %v678_v7 = vld [vmem:[%s1399_s15 + $0xc] sm:$0xf]  ;;  %v744_v10 = vld [vmem:[%s1435_s16 + $0x14] sm:$0xf]  ;;  %v735_v14 = vmax.bf16 %v727_v63, %v719_v3 }
  0x1c   : > { %v747_v55 = vmax.bf16 %v739_v36, %v731_v44  ;;  %v748_v61 = vmax.bf16 %v740_v40, %v732_v50  ;;  %v759_v11 = vld [vmem:[%s1444_s21 + $0x10] sm:$0xf]  ;;  %v670_v12 = vmax.bf16 %v662_v60, %v654_v0  ;;  %v693_v13 = vld [vmem:[%s1408_s19 + $0x8] sm:$0xf]  ;;  %v760_v15 = vld [vmem:[%s1444_s21 + $0x14] sm:$0xf]  ;;  %v736_v21 = vmax.bf16 %v728_v4, %v720_v9 }
  0x1d   : > { %v685_v16 = vmax.bf16 %v677_v1, %v669_v6  ;;  %v694_v17 = vld [vmem:[%s1408_s19 + $0xc] sm:$0xf]  ;;  %v709_v18 = vld [vmem:[%s1417_s23 + $0x8] sm:$0xf]  ;;  %v641_v23 = vld [vmem:[%s1381_s22 + $0x18] sm:$0xf]  ;;  %v751_v26 = vmax.bf16 %v743_v5, %v735_v14 }
  0x1e   : > { %v763_v2 = vmax.bf16 %v755_v41, %v747_v55  ;;  %v764_v8 = vmax.bf16 %v756_v45, %v748_v61  ;;  %v710_v19 = vld [vmem:[%s1417_s23 + $0xc] sm:$0xf]  ;;  %v686_v22 = vmax.bf16 %v678_v7, %v670_v12  ;;  %v642_v24 = vld [vmem:[%s1381_s22 + $0x1c] sm:$0xf]  ;;  %v649_v25 = vld [vmem:[%s1387_s26 + $0x18] sm:$0xf]  ;;  %v752_v32 = vmax.bf16 %v744_v10, %v736_v21 }
  0x1f   : > { %v701_v27 = vmax.bf16 %v693_v13, %v685_v16  ;;  %v650_v28 = vld [vmem:[%s1387_s26 + $0x1c] sm:$0xf]  ;;  %v657_v29 = vmax.bf16 %v649_v25, %v641_v23  ;;  %v665_v30 = vld [vmem:[%s1393_s29 + $0x18] sm:$0xf]  ;;  %v725_v34 = vld [vmem:[%s1426_s28 + $0x8] sm:$0xf]  ;;  %v767_v37 = vmax.bf16 %v759_v11, %v751_v26 }
  0x20   : > { %772 = vst.msk [vmem:[%s1471_s30] sm:$0xf] %vm771_vm0, %v763_v2  ;;  %773 = vst.msk [vmem:[%s1471_s30 + $0x4] sm:$0xf] %vm771_vm0, %v764_v8  ;;  %v1201_v20 = vcombine.low %v763_v2, %v764_v8  ;;  %v666_v31 = vld [vmem:[%s1393_s29 + $0x1c] sm:$0xf]  ;;  %v702_v33 = vmax.bf16 %v694_v17, %v686_v22  ;;  %v658_v35 = vmax.bf16 %v650_v28, %v642_v24 }
  0x21   : > { %v681_v36 = vld [vmem:[%s1399_s15 + $0x18] sm:$0xf]  ;;  %v717_v38 = vmax.bf16 %v709_v18, %v701_v27  ;;  %v726_v39 = vld [vmem:[%s1426_s28 + $0xc] sm:$0xf]  ;;  %v673_v40 = vmax.bf16 %v665_v30, %v657_v29  ;;  %v682_v41 = vld [vmem:[%s1399_s15 + $0x1c] sm:$0xf]  ;;  %v768_v42 = vmax.bf16 %v760_v15, %v752_v32 }
  0x22   : > { %1249 = vmatprep.mubr.msk.bf16.mxu0 %vm832_vm1, %v1201_v20  ;;  %v718_v43 = vmax.bf16 %v710_v19, %v702_v33  ;;  %v741_v44 = vld [vmem:[%s1435_s16 + $0x8] sm:$0xf]  ;;  %v674_v45 = vmax.bf16 %v666_v31, %v658_v35  ;;  %v697_v46 = vld [vmem:[%s1408_s19 + $0x18] sm:$0xf]  ;;  %776 = vst.msk [vmem:[%s1471_s30 + $0x10] sm:$0xf] %vm771_vm0, %v767_v37 }
  0x23   : > { %v733_v47 = vmax.bf16 %v725_v34, %v717_v38  ;;  %v742_v48 = vld [vmem:[%s1435_s16 + $0xc] sm:$0xf]  ;;  %v689_v49 = vmax.bf16 %v681_v36, %v673_v40  ;;  %v698_v50 = vld [vmem:[%s1408_s19 + $0x1c] sm:$0xf]  ;;  %777 = vst.msk [vmem:[%s1471_s30 + $0x14] sm:$0xf] %vm771_vm0, %v768_v42  ;;  %v1203_v51 = vcombine.low %v767_v37, %v768_v42 }
  0x24   : > { %v734_v52 = vmax.bf16 %v726_v39, %v718_v43  ;;  %v757_v53 = vld [vmem:[%s1444_s21 + $0x8] sm:$0xf]  ;;  %v690_v54 = vmax.bf16 %v682_v41, %v674_v45  ;;  %v713_v55 = vld [vmem:[%s1417_s23 + $0x18] sm:$0xf]  ;;  %v758_v57 = vld [vmem:[%s1444_s21 + $0xc] sm:$0xf] }
  0x25   : > { %v749_v56 = vmax.bf16 %v741_v44, %v733_v47  ;;  %v705_v58 = vmax.bf16 %v697_v46, %v689_v49  ;;  %v714_v59 = vld [vmem:[%s1417_s23 + $0x1c] sm:$0xf]  ;;  %1253 = vmatprep.mubr.msk.bf16.mxu1 %vm832_vm1, %v1203_v51  ;;  %v729_v62 = vld [vmem:[%s1426_s28 + $0x18] sm:$0xf]  ;;  %v1213_v16 = vld [vmem:[%s1570_s10] ss:$0 sm:$0xff] }
  0x26   : > { %v750_v60 = vmax.bf16 %v742_v48, %v734_v52  ;;  %v706_v61 = vmax.bf16 %v698_v50, %v690_v54  ;;  %v730_v1 = vld [vmem:[%s1426_s28 + $0x1c] sm:$0xf]  ;;  %v745_v4 = vld [vmem:[%s1435_s16 + $0x18] sm:$0xf]  ;;  %v1214_v18 = vld [vmem:[%s1571_s11] ss:$0 sm:$0xff]  ;;  %s1539_s28 = scalar_lea.vmem %s1573_s13, %s1372_s17 }
  0x27   : > { %v765_v63 = vmax.bf16 %v757_v53, %v749_v56  ;;  %v721_v0 = vmax.bf16 %v713_v55, %v705_v58  ;;  %v746_v6 = vld [vmem:[%s1435_s16 + $0x1c] sm:$0xf]  ;;  %v761_v9 = vld [vmem:[%s1444_s21 + $0x18] sm:$0xf] }
  0x28   : > { %v766_v2 = vmax.bf16 %v758_v57, %v750_v60  ;;  %v722_v3 = vmax.bf16 %v714_v59, %v706_v61  ;;  %v762_v11 = vld [vmem:[%s1444_s21 + $0x1c] sm:$0xf] }
  0x29   : > { %774 = vst.msk [vmem:[%s1471_s30 + $0x8] sm:$0xf] %vm771_vm0, %v765_v63  ;;  %v737_v5 = vmax.bf16 %v729_v62, %v721_v0 }
  0x2a   : > { %775 = vst.msk [vmem:[%s1471_s30 + $0xc] sm:$0xf] %vm771_vm0, %v766_v2  ;;  %v1202_v7 = vcombine.low %v765_v63, %v766_v2  ;;  %v738_v8 = vmax.bf16 %v730_v1, %v722_v3 }
  0x2b   : > { %v753_v10 = vmax.bf16 %v745_v4, %v737_v5 }
  0x2c   : > { %1250 = vmatmul.mubr.msk.bf16.vlgmr.msra.gmra.mxu0 %vm832_vm1, %v1202_v7  ;;  %v754_v12 = vmax.bf16 %v746_v6, %v738_v8 }
  0x2d   : > { %v769_v13 = vmax.bf16 %v761_v9, %v753_v10 }
  0x2e   : > { %v770_v14 = vmax.bf16 %v762_v11, %v754_v12 }
  0x2f   : > { %778 = vst.msk [vmem:[%s1471_s30 + $0x18] sm:$0xf] %vm771_vm0, %v769_v13 }
  0x30   : > { %779 = vst.msk [vmem:[%s1471_s30 + $0x1c] sm:$0xf] %vm771_vm0, %v770_v14  ;;  %v1204_v15 = vcombine.low %v769_v13, %v770_v14 }
  0x32   : > { %1254 = vmatmul.mubr.msk.bf16.vlgmr.msra.gmra.mxu1 %vm832_vm1, %v1204_v15 }
  0xec   : > { %v1251_v17 = vpop.f32.mrf.mxu0 }
  0xed   : > { %v919_v19 = vmul.f32 %v1251_v17, %v1213_v16 }
  0xee   : > { %v879_v20 = vpop.f32.mrf.mxu0 }
  0xef   : > { %v934_v21 = vadd.f32 %v1214_v18, %v919_v19  ;;  %v917_v22 = vmul.f32 %v1213_v16, %v879_v20 }
  0xf0   : > { %v1252_v23 = vpop.f32.mrf.mxu0 }
  0xf1   : > { %v942_v24 = vmax.f32 %v934_v21, 0.0  ;;  %v932_v25 = vadd.f32 %v1214_v18, %v917_v22  ;;  %v920_v26 = vmul.f32 %v1252_v23, %v1213_v16 }
  0xf2   : > { %v1255_v27 = vpop.f32.mrf.mxu1  ;;  %v882_v28 = vpop.f32.mrf.mxu0 }
  0xf3   : > { %v1227_v29 = vpack.c.bf16 %v942_v24, %v942_v24  ;;  %v923_v30 = vmul.f32 %v1255_v27, %v1213_v16  ;;  %v940_v31 = vmax.f32 %v932_v25, 0.0  ;;  %v935_v32 = vadd.f32 %v1214_v18, %v920_v26 }
  0xf4   : > { %v895_v33 = vpop.f32.mrf.mxu1  ;;  %v918_v34 = vmul.f32 %v1213_v16, %v882_v28 }
  0xf5   : > { %982 = vst.msk [vmem:[%s1539_s28 + $0x8] sm:$0xf] %vm771_vm0, %v1227_v29  ;;  %v938_v35 = vadd.f32 %v1214_v18, %v923_v30  ;;  %v1225_v36 = vpack.c.bf16 %v940_v31, %v940_v31  ;;  %v921_v37 = vmul.f32 %v1213_v16, %v895_v33  ;;  %v943_v38 = vmax.f32 %v935_v32, 0.0 }
  0xf6   : > { %v1256_v39 = vpop.f32.mrf.mxu1  ;;  %v933_v40 = vadd.f32 %v1214_v18, %v918_v34 }
  0xf7   : > { %v946_v41 = vmax.f32 %v938_v35, 0.0  ;;  %980 = vst.msk [vmem:[%s1539_s28] sm:$0xf] %vm771_vm0, %v1225_v36  ;;  %v936_v42 = vadd.f32 %v1214_v18, %v921_v37  ;;  %v1228_v43 = vpack.c.bf16 %v943_v38, %v943_v38  ;;  %v924_v44 = vmul.f32 %v1256_v39, %v1213_v16 }
  0xf8   : > { %v941_v45 = vmax.f32 %v933_v40, 0.0  ;;  %v898_v46 = vpop.f32.mrf.mxu1 }
  0xf9   : > { %v1231_v47 = vpack.c.bf16 %v946_v41, %v946_v41  ;;  %v944_v48 = vmax.f32 %v936_v42, 0.0  ;;  %983 = vst.msk [vmem:[%s1539_s28 + $0xc] sm:$0xf] %vm771_vm0, %v1228_v43  ;;  %v939_v49 = vadd.f32 %v1214_v18, %v924_v44  ;;  %v922_v50 = vmul.f32 %v1213_v16, %v898_v46 }
  0xfa   : > { %v1226_v51 = vpack.c.bf16 %v941_v45, %v941_v45 }
  0xfb   : > { %986 = vst.msk [vmem:[%s1539_s28 + $0x18] sm:$0xf] %vm771_vm0, %v1231_v47  ;;  %v1229_v52 = vpack.c.bf16 %v944_v48, %v944_v48  ;;  %v947_v53 = vmax.f32 %v939_v49, 0.0  ;;  %v937_v54 = vadd.f32 %v1214_v18, %v922_v50 }
  0xfc   : > { %981 = vst.msk [vmem:[%s1539_s28 + $0x4] sm:$0xf] %vm771_vm0, %v1226_v51 }
  0xfd   : > { %984 = vst.msk [vmem:[%s1539_s28 + $0x10] sm:$0xf] %vm771_vm0, %v1229_v52  ;;  %v1232_v55 = vpack.c.bf16 %v947_v53, %v947_v53  ;;  %v945_v56 = vmax.f32 %v937_v54, 0.0 }
  0xff   : > { %987 = vst.msk [vmem:[%s1539_s28 + $0x1c] sm:$0xf] %vm771_vm0, %v1232_v55  ;;  %v1230_v57 = vpack.c.bf16 %v945_v56, %v945_v56 }
 0x101   : > { %985 = vst.msk [vmem:[%s1539_s28 + $0x14] sm:$0xf] %vm771_vm0, %v1230_v57 }
 0x102 PF: > { %s24_s25 = sadd.s32 1, %s1283_s25  }
 0x103   : > { %p21_p4 = scmp.ge.s32.totalorder %s24_s25, 4  }
 0x105   :  { %23 = sbr.rel (!%p21_p4) target bundleno = 1 (0x1), region = 134 }

// kernel: base_net_forward.9
= control target key start
LH: loop header
LB: loop body
LE: loop exit
PB: predicated region body
PF: predicated region fallthrough
CT: control target
= control target key end

     0   :  { %s1931_s15 = smov 0   ;;  %s2258_s0 = inlined_call_operand.vmem [shape: bf16[512,392], index: 0, kind: input, shape index: {}]   ;;  %s2259_s1 = inlined_call_operand.vmem [shape: bf16[392,64], index: 1, kind: input, shape index: {}]   ;;  %s2260_s2 = inlined_call_operand.vmem [shape: f32[1,64], index: 2, kind: input, shape index: {}]   ;;  %s2261_s3 = inlined_call_operand.vmem [shape: f32[1,64], index: 3, kind: input, shape index: {}]   ;;  %s2262_s4 = inlined_call_operand.vmem [shape: bf16[512,64], index: 4, kind: output, shape index: {}]  }
   0x1 LB: > { %s1471_s16 = sadd.s32 4294967295, %s1903_s15   ;;  %p1475_p0 = scmp.ge.s32.totalorder %s1903_s15, 1  ;;  %s1903_s15 = sphi %s1931_s15, %s14_s15  }
   0x2   : > { %p164_p1 = scmp.lt.s32.totalorder %s1903_s15, 3 }
   0x4   : > { %p165_p2 = pnand %p1475_p0, %p164_p1 }
   0x5   : > { %s1476_s9 = sshll.u32 (!%p165_p2), %s1471_s16, 5 }
   0x6   : > { %168 = sbr.rel (%p165_p2) target bundleno = 377 (0x179), region = 36  ;;  %p192_p3 = scmp.lt.s32.totalorder (!%p165_p2), %s1476_s9, 63 }
   0xb   : > { %v1776_v0 = vld [vmem:[%s2259_s1 + $0x78] sm:$0xff]   ;;  %v1905_v1 = vmov 0   ;;  %v1779_v4 = vld [vmem:[%s2259_s1 + $0x70] sm:$0xff]   ;;  %v1782_v7 = vld [vmem:[%s2259_s1 + $0x68] sm:$0xff]   ;;  %s2264_s9 = smov (!%p192_p3, %s1476_s9), 63  ;;  %vm769_vm0 = vcmask 64512  }
   0xc   : > { %983 = vmatprep.subr.bf16.mxu1 %v1905_v1  ;;  %v1777_v2 = vld [vmem:[%s2259_s1 + $0xb8] sm:$0xff]   ;;  %1655 = vmatprep.subr.bf16.mxu0 %v1776_v0  ;;  %v1780_v5 = vld [vmem:[%s2259_s1 + $0xb0] sm:$0xff]   ;;  %v1783_v8 = vld [vmem:[%s2259_s1 + $0xa8] sm:$0xff]   ;;  %s1622_s27 = sshll.u32 %s2264_s9, 4  ;;  %vm818_vm1 = vcmask 1043456   ;;  %vm1382_vm2 = vcmask 519168  }
   0xd   : > { %v1778_v3 = vld [vmem:[%s2259_s1 + $0x38] sm:$0xff]   ;;  %984 = vmatpush1.bf16.msra.mxu1 %v1777_v2  ;;  %v1781_v6 = vld [vmem:[%s2259_s1 + $0x30] sm:$0xff]   ;;  %v1784_v9 = vld [vmem:[%s2259_s1 + $0x28] sm:$0xff]   ;;  %s2008_s8 = scalar_lea.vmem %s2258_s0, %s1622_s27  ;;  %s1480_s27 = sshll.u32 %s2264_s9, 2 }
   0xe   : > { %1656 = vmatpush3.bf16.msra.mxu0 %v1778_v3  ;;  %985 = vmatprep.subr.bf16.mxu1 %v1905_v1  ;;  %v1785_v10 = vld [vmem:[%s2259_s1 + $0x60] sm:$0xff]   ;;  %v1788_v13 = vld [vmem:[%s2259_s1 + $0x58] sm:$0xff]   ;;  %v1791_v16 = vld [vmem:[%s2259_s1 + $0x50] sm:$0xff]   ;;  %s2128_s30 = scalar_lea.vmem %s2262_s4, %s1480_s27 }
   0xf   : > { %1657 = vmatprep.subr.bf16.mxu0 %v1779_v4  ;;  %v1786_v11 = vld [vmem:[%s2259_s1 + $0xa0] sm:$0xff]   ;;  %v1789_v14 = vld [vmem:[%s2259_s1 + $0x98] sm:$0xff]   ;;  %v1792_v17 = vld [vmem:[%s2259_s1 + $0x90] sm:$0xff]  }
  0x10   : > { %v1787_v12 = vld [vmem:[%s2259_s1 + $0x20] sm:$0xff]   ;;  %v1790_v15 = vld [vmem:[%s2259_s1 + $0x18] sm:$0xff]   ;;  %v1793_v18 = vld [vmem:[%s2259_s1 + $0x10] sm:$0xff]  }
  0x11   : > { %986 = vmatpush1.bf16.msra.mxu1 %v1780_v5  ;;  %v1794_v19 = vld [vmem:[%s2259_s1 + $0x48] sm:$0xff]   ;;  %v1797_v22 = vld [vmem:[%s2259_s1 + $0x40] sm:$0xff]  }
  0x12   : > { %1658 = vmatpush3.bf16.msra.mxu0 %v1781_v6  ;;  %987 = vmatprep.subr.bf16.mxu1 %v1905_v1  ;;  %v1795_v20 = vld [vmem:[%s2259_s1 + $0x88] sm:$0xff]   ;;  %v1802_v23 = vld [vmem:[%s2008_s8 + $0x4] ss:$16 sps:$4 sm:$0xff]   ;;  %v1803_v27 = vld [vmem:[%s2259_s1 + $0xc0] ss:$0 sps:$4 sm:$0xff]  }
  0x13   : > { %1659 = vmatprep.subr.bf16.mxu0 %v1782_v7  ;;  %v1796_v21 = vld [vmem:[%s2259_s1 + $0x8] sm:$0xff]   ;;  %v1798_v24 = vld [vmem:[%s2259_s1 + $0x80] sm:$0xff]   ;;  %854 = vmatprep.mubr.bf16.mxu0 %v1802_v23  ;;  %v820_v29 = vsel %vm818_vm1, %v1803_v27, 0 }
  0x14   : > { %v1806_v25 = vld [vmem:[%s2008_s8 + $0xc] ss:$16 sps:$4 sm:$0xff]   ;;  %v1799_v26 = vld [vmem:[%s2259_s1] sm:$0xff]   ;;  %v1804_v31 = vld [vmem:[%s2008_s8 + $0x8] ss:$16 sps:$4 sm:$0xff]  }
  0x15   : > { %988 = vmatpush1.bf16.msra.mxu1 %v1783_v8  ;;  %1570 = vmatprep.mubr.msk.bf16.mxu1 %vm769_vm0, %v1806_v25  ;;  %v1800_v28 = vld [vmem:[%s2008_s8] ss:$16 sps:$4 sm:$0xff]   ;;  %v1807_v30 = vld [vmem:[%s2008_s8 + $0x24] ss:$16 sps:$4 sm:$0xff]   ;;  %v1810_v32 = vld [vmem:[%s2008_s8 + $0x2c] ss:$16 sps:$4 sm:$0xff]  }
  0x16   : > { %1660 = vmatpush3.bf16.msra.mxu0 %v1784_v9  ;;  %989 = vmatprep.subr.bf16.mxu1 %v1905_v1  ;;  %v1809_v33 = vld [vmem:[%s2008_s8 + $0x20] ss:$16 sps:$4 sm:$0xff]   ;;  %v1813_v34 = vld [vmem:[%s2008_s8 + $0x44] ss:$16 sps:$4 sm:$0xff]   ;;  %v1812_v35 = vld [vmem:[%s2008_s8 + $0x28] ss:$16 sps:$4 sm:$0xff]  }
  0x17   : > { %1661 = vmatprep.subr.bf16.mxu0 %v1785_v10  ;;  %v1816_v36 = vld [vmem:[%s2008_s8 + $0x4c] ss:$16 sps:$4 sm:$0xff]   ;;  %v1815_v37 = vld [vmem:[%s2008_s8 + $0x40] ss:$16 sps:$4 sm:$0xff]   ;;  %v1819_v38 = vld [vmem:[%s2008_s8 + $0x64] ss:$16 sps:$4 sm:$0xff]  }
  0x18   : > { %v1818_v39 = vld [vmem:[%s2008_s8 + $0x48] ss:$16 sps:$4 sm:$0xff]   ;;  %v1822_v40 = vld [vmem:[%s2008_s8 + $0x6c] ss:$16 sps:$4 sm:$0xff]   ;;  %v1821_v41 = vld [vmem:[%s2008_s8 + $0x60] ss:$16 sps:$4 sm:$0xff]  }
  0x19   : > { %990 = vmatpush1.bf16.msra.mxu1 %v1786_v11  ;;  %v1825_v42 = vld [vmem:[%s2008_s8 + $0x84] ss:$16 sps:$4 sm:$0xff]   ;;  %v1824_v43 = vld [vmem:[%s2008_s8 + $0x68] ss:$16 sps:$4 sm:$0xff]   ;;  %v1828_v44 = vld [vmem:[%s2008_s8 + $0x8c] ss:$16 sps:$4 sm:$0xff]  }
  0x1a   : > { %1662 = vmatpush3.bf16.msra.mxu0 %v1787_v12  ;;  %991 = vmatprep.subr.bf16.mxu1 %v1905_v1  ;;  %v1827_v45 = vld [vmem:[%s2008_s8 + $0x80] ss:$16 sps:$4 sm:$0xff]   ;;  %v1831_v46 = vld [vmem:[%s2008_s8 + $0xa4] ss:$16 sps:$4 sm:$0xff]   ;;  %v1830_v47 = vld [vmem:[%s2008_s8 + $0x88] ss:$16 sps:$4 sm:$0xff]  }
  0x1b   : > { %1663 = vmatprep.subr.bf16.mxu0 %v1788_v13  ;;  %v1834_v48 = vld [vmem:[%s2008_s8 + $0xac] ss:$16 sps:$4 sm:$0xff]   ;;  %v1833_v49 = vld [vmem:[%s2008_s8 + $0xa0] ss:$16 sps:$4 sm:$0xff]   ;;  %v1837_v50 = vld [vmem:[%s2008_s8 + $0xc4] ss:$16 sps:$4 sm:$0xff]  }
  0x1c   : > { %v1836_v51 = vld [vmem:[%s2008_s8 + $0xa8] ss:$16 sps:$4 sm:$0xff]   ;;  %v1840_v52 = vld [vmem:[%s2008_s8 + $0xcc] ss:$16 sps:$4 sm:$0xff]   ;;  %v1839_v53 = vld [vmem:[%s2008_s8 + $0xc0] ss:$16 sps:$4 sm:$0xff]  }
  0x1d   : > { %992 = vmatpush1.bf16.msra.mxu1 %v1789_v14  ;;  %v1843_v54 = vld [vmem:[%s2008_s8 + $0xe4] ss:$16 sps:$4 sm:$0xff]   ;;  %v1842_v55 = vld [vmem:[%s2008_s8 + $0xc8] ss:$16 sps:$4 sm:$0xff]   ;;  %v1846_v56 = vld [vmem:[%s2008_s8 + $0xec] ss:$16 sps:$4 sm:$0xff]  }
  0x1e   : > { %1664 = vmatpush3.bf16.msra.mxu0 %v1790_v15  ;;  %993 = vmatprep.subr.bf16.mxu1 %v1905_v1  ;;  %v1845_v57 = vld [vmem:[%s2008_s8 + $0xe0] ss:$16 sps:$4 sm:$0xff]   ;;  %v1849_v58 = vld [vmem:[%s2008_s8 + $0x104] ss:$16 sps:$4 sm:$0xff]   ;;  %v1848_v59 = vld [vmem:[%s2008_s8 + $0xe8] ss:$16 sps:$4 sm:$0xff]  }
  0x1f   : > { %1665 = vmatprep.subr.bf16.mxu0 %v1791_v16  ;;  %v1852_v60 = vld [vmem:[%s2008_s8 + $0x10c] ss:$16 sps:$4 sm:$0xff]   ;;  %v1851_v61 = vld [vmem:[%s2008_s8 + $0x100] ss:$16 sps:$4 sm:$0xff]   ;;  %v1855_v62 = vld [vmem:[%s2008_s8 + $0x124] ss:$16 sps:$4 sm:$0xff]  }
  0x20   : > { %v1854_v63 = vld [vmem:[%s2008_s8 + $0x108] ss:$16 sps:$4 sm:$0xff]   ;;  %v1858_v0 = vld [vmem:[%s2008_s8 + $0x12c] ss:$16 sps:$4 sm:$0xff]   ;;  %v1861_v2 = vld [vmem:[%s2008_s8 + $0x144] ss:$16 sps:$4 sm:$0xff]  }
  0x21   : > { %994 = vmatpush1.bf16.msra.mxu1 %v1792_v17  ;;  %v1860_v3 = vld [vmem:[%s2008_s8 + $0x128] ss:$16 sps:$4 sm:$0xff]   ;;  %v1864_v4 = vld [vmem:[%s2008_s8 + $0x14c] ss:$16 sps:$4 sm:$0xff]   ;;  %v1863_v5 = vld [vmem:[%s2008_s8 + $0x140] ss:$16 sps:$4 sm:$0xff]  }
  0x22   : > { %1666 = vmatpush3.bf16.msra.mxu0 %v1793_v18  ;;  %995 = vmatprep.subr.bf16.mxu1 %v1905_v1  ;;  %v1867_v6 = vld [vmem:[%s2008_s8 + $0x164] ss:$16 sps:$4 sm:$0xff]   ;;  %v1866_v7 = vld [vmem:[%s2008_s8 + $0x148] ss:$16 sps:$4 sm:$0xff]   ;;  %v1870_v8 = vld [vmem:[%s2008_s8 + $0x16c] ss:$16 sps:$4 sm:$0xff]  }
  0x23   : > { %1667 = vmatprep.subr.bf16.mxu0 %v1794_v19  ;;  %v1869_v9 = vld [vmem:[%s2008_s8 + $0x160] ss:$16 sps:$4 sm:$0xff]   ;;  %v1873_v10 = vld [vmem:[%s2008_s8 + $0x184] ss:$16 sps:$4 sm:$0xff]   ;;  %v1872_v11 = vld [vmem:[%s2008_s8 + $0x168] ss:$16 sps:$4 sm:$0xff]  }
  0x24   : > { %v1876_v12 = vld [vmem:[%s2008_s8 + $0x18c] ss:$16 sps:$4 sm:$0xff]   ;;  %v1875_v13 = vld [vmem:[%s2008_s8 + $0x180] ss:$16 sps:$4 sm:$0xff]   ;;  %v1879_v14 = vld [vmem:[%s2008_s8 + $0x1a4] ss:$16 sps:$4 sm:$0xff]  }
  0x25   : > { %996 = vmatpush1.bf16.msra.mxu1 %v1795_v20  ;;  %v1878_v15 = vld [vmem:[%s2008_s8 + $0x188] ss:$16 sps:$4 sm:$0xff]   ;;  %v1882_v16 = vld [vmem:[%s2008_s8 + $0x1ac] ss:$16 sps:$4 sm:$0xff]   ;;  %v1881_v17 = vld [vmem:[%s2008_s8 + $0x1a0] ss:$16 sps:$4 sm:$0xff]  }
  0x26   : > { %1668 = vmatpush3.bf16.msra.mxu0 %v1796_v21  ;;  %997 = vmatprep.subr.bf16.mxu1 %v1905_v1  ;;  %v1885_v18 = vld [vmem:[%s2008_s8 + $0x1c4] ss:$16 sps:$4 sm:$0xff]   ;;  %v1884_v19 = vld [vmem:[%s2008_s8 + $0x1a8] ss:$16 sps:$4 sm:$0xff]   ;;  %v1888_v20 = vld [vmem:[%s2008_s8 + $0x1cc] ss:$16 sps:$4 sm:$0xff]  }
  0x27   : > { %1669 = vmatprep.subr.bf16.mxu0 %v1797_v22  ;;  %v1887_v21 = vld [vmem:[%s2008_s8 + $0x1c0] ss:$16 sps:$4 sm:$0xff]   ;;  %v1891_v22 = vld [vmem:[%s2008_s8 + $0x1e4] ss:$16 sps:$4 sm:$0xff]   ;;  %v1890_v23 = vld [vmem:[%s2008_s8 + $0x1c8] ss:$16 sps:$4 sm:$0xff]  }
  0x28   : > { %v1893_v25 = vld [vmem:[%s2008_s8 + $0x1e0] ss:$16 sps:$4 sm:$0xff]  }
  0x29   : > { %998 = vmatpush1.bf16.msra.mxu1 %v1798_v24  ;;  %v1894_v24 = vld [vmem:[%s2008_s8 + $0x1ec] ss:$16 sps:$4 sm:$0xff]  }
  0x2a   : > { %1670 = vmatpush3.bf16.msra.mxu0 %v1799_v26  ;;  %1013 = vmatprep.subr.bf16.mxu1 %v1905_v1  ;;  %v1857_v1 = vld [vmem:[%s2008_s8 + $0x120] ss:$16 sps:$4 sm:$0xff]   ;;  %v1896_v26 = vld [vmem:[%s2008_s8 + $0x1e8] ss:$16 sps:$4 sm:$0xff]  }
  0x2d   : > { %855 = vmatmul.mubr.bf16.vlgmr.msra.gmra.mxu0 %v1800_v28  ;;  %1014 = vmatpush2.bf16.msra.mxu1 %v820_v29 }
  0x2e   : > { %862 = vmatprep.mubr.bf16.mxu0 %v1807_v30 }
  0x30   : > { %1016 = vmatmul.mubr.bf16.vlgmr.msra.gmra.mxu1 %v1804_v31  ;;  %v2114_v31 = vld [vmem:[%s2260_s2] ss:$0 sm:$0xff] }
  0x31   : > { %1571 = vmatprep.mubr.msk.bf16.mxu1 %vm769_vm0, %v1810_v32 }
  0x35   : > { %863 = vmatmul.mubr.bf16.gmra.mxu0 %v1809_v33 }
  0x36   : > { %870 = vmatprep.mubr.bf16.mxu0 %v1813_v34 }
  0x38   : > { %1024 = vmatmul.mubr.bf16.gmra.mxu1 %v1812_v35  ;;  %v2119_v35 = vld [vmem:[%s2261_s3] ss:$0 sm:$0xff] }
  0x39   : > { %1572 = vmatprep.mubr.msk.bf16.mxu1 %vm769_vm0, %v1816_v36 }
  0x3d   : > { %871 = vmatmul.mubr.bf16.gmra.mxu0 %v1815_v37 }
  0x3e   : > { %878 = vmatprep.mubr.bf16.mxu0 %v1819_v38 }
  0x40   : > { %1032 = vmatmul.mubr.bf16.gmra.mxu1 %v1818_v39 }
  0x41   : > { %1573 = vmatprep.mubr.msk.bf16.mxu1 %vm769_vm0, %v1822_v40 }
  0x45   : > { %879 = vmatmul.mubr.bf16.gmra.mxu0 %v1821_v41 }
  0x46   : > { %886 = vmatprep.mubr.bf16.mxu0 %v1825_v42 }
  0x48   : > { %1040 = vmatmul.mubr.bf16.gmra.mxu1 %v1824_v43 }
  0x49   : > { %1574 = vmatprep.mubr.msk.bf16.mxu1 %vm769_vm0, %v1828_v44 }
  0x4d   : > { %887 = vmatmul.mubr.bf16.gmra.mxu0 %v1827_v45 }
  0x4e   : > { %894 = vmatprep.mubr.bf16.mxu0 %v1831_v46 }
  0x50   : > { %1048 = vmatmul.mubr.bf16.gmra.mxu1 %v1830_v47 }
  0x51   : > { %1575 = vmatprep.mubr.msk.bf16.mxu1 %vm769_vm0, %v1834_v48 }
  0x55   : > { %895 = vmatmul.mubr.bf16.gmra.mxu0 %v1833_v49 }
  0x56   : > { %902 = vmatprep.mubr.bf16.mxu0 %v1837_v50 }
  0x58   : > { %1056 = vmatmul.mubr.bf16.gmra.mxu1 %v1836_v51 }
  0x59   : > { %1576 = vmatprep.mubr.msk.bf16.mxu1 %vm769_vm0, %v1840_v52 }
  0x5d   : > { %903 = vmatmul.mubr.bf16.gmra.mxu0 %v1839_v53 }
  0x5e   : > { %910 = vmatprep.mubr.bf16.mxu0 %v1843_v54 }
  0x60   : > { %1064 = vmatmul.mubr.bf16.gmra.mxu1 %v1842_v55 }
  0x61   : > { %1577 = vmatprep.mubr.msk.bf16.mxu1 %vm769_vm0, %v1846_v56 }
  0x65   : > { %911 = vmatmul.mubr.bf16.gmra.mxu0 %v1845_v57 }
  0x66   : > { %918 = vmatprep.mubr.bf16.mxu0 %v1849_v58 }
  0x68   : > { %1072 = vmatmul.mubr.bf16.gmra.mxu1 %v1848_v59 }
  0x69   : > { %1578 = vmatprep.mubr.msk.bf16.mxu1 %vm769_vm0, %v1852_v60 }
  0x6d   : > { %919 = vmatmul.mubr.bf16.gmra.mxu0 %v1851_v61 }
  0x6e   : > { %926 = vmatprep.mubr.bf16.mxu0 %v1855_v62 }
  0x70   : > { %1080 = vmatmul.mubr.bf16.gmra.mxu1 %v1854_v63 }
  0x71   : > { %1579 = vmatprep.mubr.msk.bf16.mxu1 %vm769_vm0, %v1858_v0 }
  0x75   : > { %927 = vmatmul.mubr.bf16.gmra.mxu0 %v1857_v1 }
  0x76   : > { %934 = vmatprep.mubr.bf16.mxu0 %v1861_v2 }
  0x78   : > { %1088 = vmatmul.mubr.bf16.gmra.mxu1 %v1860_v3 }
  0x79   : > { %1580 = vmatprep.mubr.msk.bf16.mxu1 %vm769_vm0, %v1864_v4 }
  0x7d   : > { %935 = vmatmul.mubr.bf16.gmra.mxu0 %v1863_v5 }
  0x7e   : > { %942 = vmatprep.mubr.bf16.mxu0 %v1867_v6 }
  0x80   : > { %1096 = vmatmul.mubr.bf16.gmra.mxu1 %v1866_v7 }
  0x81   : > { %1581 = vmatprep.mubr.msk.bf16.mxu1 %vm769_vm0, %v1870_v8 }
  0x85   : > { %943 = vmatmul.mubr.bf16.gmra.mxu0 %v1869_v9 }
  0x86   : > { %950 = vmatprep.mubr.bf16.mxu0 %v1873_v10 }
  0x88   : > { %1104 = vmatmul.mubr.bf16.gmra.mxu1 %v1872_v11 }
  0x89   : > { %1582 = vmatprep.mubr.msk.bf16.mxu1 %vm769_vm0, %v1876_v12 }
  0x8d   : > { %951 = vmatmul.mubr.bf16.gmra.mxu0 %v1875_v13 }
  0x8e   : > { %958 = vmatprep.mubr.bf16.mxu0 %v1879_v14 }
  0x90   : > { %1112 = vmatmul.mubr.bf16.gmra.mxu1 %v1878_v15 }
  0x91   : > { %1583 = vmatprep.mubr.msk.bf16.mxu1 %vm769_vm0, %v1882_v16 }
  0x95   : > { %959 = vmatmul.mubr.bf16.gmra.mxu0 %v1881_v17 }
  0x96   : > { %966 = vmatprep.mubr.bf16.mxu0 %v1885_v18 }
  0x98   : > { %1120 = vmatmul.mubr.bf16.gmra.mxu1 %v1884_v19 }
  0x99   : > { %1584 = vmatprep.mubr.msk.bf16.mxu1 %vm769_vm0, %v1888_v20 }
  0x9d   : > { %967 = vmatmul.mubr.bf16.gmra.mxu0 %v1887_v21 }
  0x9e   : > { %974 = vmatprep.mubr.bf16.mxu0 %v1891_v22 }
  0xa0   : > { %1128 = vmatmul.mubr.bf16.gmra.mxu1 %v1890_v23 }
  0xa1   : > { %1585 = vmatprep.mubr.msk.bf16.mxu1 %vm769_vm0, %v1894_v24 }
  0xa5   : > { %975 = vmatmul.mubr.bf16.gmra.mxu0 %v1893_v25 }
  0xa8   : > { %1136 = vmatmul.mubr.bf16.gmra.mxu1 %v1896_v26 }
  0xed   : > { %v1671_v27 = vpop.f32.mrf.mxu0 }
  0xef   : > { %v1672_v28 = vpop.f32.mrf.mxu0 }
  0xf0   : > { %v1673_v29 = vadd.f32 %v1672_v28, %v1671_v27  ;;  %v1017_v30 = vpop.f32.mrf.mxu1 }
  0xf1   : > { %v1674_v32 = vpop.f32.mrf.mxu0 }
  0xf2   : > { %v1018_v33 = vadd.f32 %v1673_v29, %v1017_v30  ;;  %v1019_v34 = vpop.f32.mrf.mxu1 }
  0xf3   : > { %v1675_v36 = vpop.f32.mrf.mxu0 }
  0xf4   : > { %v1151_v37 = vmul.f32 %v2114_v31, %v1018_v33  ;;  %v1676_v38 = vadd.f32 %v1675_v36, %v1674_v32  ;;  %v1020_v39 = vpop.f32.mrf.mxu1 }
  0xf5   : > { %v1677_v40 = vpop.f32.mrf.mxu0 }
  0xf6   : > { %v1190_v41 = vadd.f32 %v2119_v35, %v1151_v37  ;;  %v1021_v42 = vadd.f32 %v1676_v38, %v1020_v39  ;;  %v1022_v43 = vpop.f32.mrf.mxu1 }
  0xf7   : > { %v1678_v44 = vpop.f32.mrf.mxu0 }
  0xf8   : > { %v1222_v45 = vmax.f32 %v1190_v41, 0.0  ;;  %v1152_v46 = vmul.f32 %v2114_v31, %v1021_v42  ;;  %v1679_v47 = vadd.f32 %v1678_v44, %v1677_v40  ;;  %v1025_v48 = vpop.f32.mrf.mxu1 }
  0xf9   : > { %v1680_v49 = vpop.f32.mrf.mxu0 }
  0xfa   : > { %v1623_v50 = vpack.c.bf16 %v1222_v45, %v1222_v45  ;;  %v1191_v51 = vadd.f32 %v2119_v35, %v1152_v46  ;;  %v1026_v52 = vadd.f32 %v1679_v47, %v1025_v48  ;;  %v1027_v53 = vpop.f32.mrf.mxu1 }
  0xfb   : > { %v1681_v54 = vpop.f32.mrf.mxu0 }
  0xfc   : > { %1383 = vst.msk [vmem:[%s2128_s30] sm:$0xf] %vm1382_vm2, %v1623_v50  ;;  %v1223_v55 = vmax.f32 %v1191_v51, 0.0  ;;  %v1153_v56 = vmul.f32 %v2114_v31, %v1026_v52  ;;  %v1682_v57 = vadd.f32 %v1681_v54, %v1680_v49  ;;  %v1028_v58 = vpop.f32.mrf.mxu1 }
  0xfd   : > { %v1683_v59 = vpop.f32.mrf.mxu0 }
  0xfe   : > { %v1624_v60 = vpack.c.bf16 %v1223_v55, %v1223_v55  ;;  %v1192_v61 = vadd.f32 %v2119_v35, %v1153_v56  ;;  %v1029_v62 = vadd.f32 %v1682_v57, %v1028_v58  ;;  %v1030_v63 = vpop.f32.mrf.mxu1 }
  0xff   : > { %v1684_v0 = vpop.f32.mrf.mxu0 }
 0x100   : > { %1384 = vst.msk [vmem:[%s2128_s30 + $0x4] sm:$0xf] %vm1382_vm2, %v1624_v60  ;;  %v1224_v1 = vmax.f32 %v1192_v61, 0.0  ;;  %v1154_v2 = vmul.f32 %v2114_v31, %v1029_v62  ;;  %v1685_v3 = vadd.f32 %v1684_v0, %v1683_v59  ;;  %v1033_v4 = vpop.f32.mrf.mxu1 }
 0x101   : > { %v1686_v5 = vpop.f32.mrf.mxu0 }
 0x102   : > { %v1625_v6 = vpack.c.bf16 %v1224_v1, %v1224_v1  ;;  %v1193_v7 = vadd.f32 %v2119_v35, %v1154_v2  ;;  %v1034_v8 = vadd.f32 %v1685_v3, %v1033_v4  ;;  %v1035_v9 = vpop.f32.mrf.mxu1 }
 0x103   : > { %v1687_v10 = vpop.f32.mrf.mxu0 }
 0x104   : > { %1385 = vst.msk [vmem:[%s2128_s30 + $0x8] sm:$0xf] %vm1382_vm2, %v1625_v6  ;;  %v1225_v11 = vmax.f32 %v1193_v7, 0.0  ;;  %v1155_v12 = vmul.f32 %v2114_v31, %v1034_v8  ;;  %v1688_v13 = vadd.f32 %v1687_v10, %v1686_v5  ;;  %v1036_v14 = vpop.f32.mrf.mxu1 }
 0x105   : > { %v1689_v15 = vpop.f32.mrf.mxu0 }
 0x106   : > { %v1626_v16 = vpack.c.bf16 %v1225_v11, %v1225_v11  ;;  %v1194_v17 = vadd.f32 %v2119_v35, %v1155_v12  ;;  %v1037_v18 = vadd.f32 %v1688_v13, %v1036_v14  ;;  %v1038_v19 = vpop.f32.mrf.mxu1 }
 0x107   : > { %v1690_v20 = vpop.f32.mrf.mxu0 }
 0x108   : > { %1386 = vst.msk [vmem:[%s2128_s30 + $0xc] sm:$0xf] %vm1382_vm2, %v1626_v16  ;;  %v1226_v21 = vmax.f32 %v1194_v17, 0.0  ;;  %v1156_v22 = vmul.f32 %v2114_v31, %v1037_v18  ;;  %v1691_v23 = vadd.f32 %v1690_v20, %v1689_v15  ;;  %v1041_v24 = vpop.f32.mrf.mxu1 }
 0x109   : > { %v1692_v25 = vpop.f32.mrf.mxu0 }
 0x10a   : > { %v1627_v26 = vpack.c.bf16 %v1226_v21, %v1226_v21  ;;  %v1195_v27 = vadd.f32 %v2119_v35, %v1156_v22  ;;  %v1042_v28 = vadd.f32 %v1691_v23, %v1041_v24  ;;  %v1043_v29 = vpop.f32.mrf.mxu1 }
 0x10b   : > { %v1693_v30 = vpop.f32.mrf.mxu0 }
 0x10c   : > { %1387 = vst.msk [vmem:[%s2128_s30 + $0x10] sm:$0xf] %vm1382_vm2, %v1627_v26  ;;  %v1227_v32 = vmax.f32 %v1195_v27, 0.0  ;;  %v1157_v33 = vmul.f32 %v2114_v31, %v1042_v28  ;;  %v1694_v34 = vadd.f32 %v1693_v30, %v1692_v25  ;;  %v1044_v36 = vpop.f32.mrf.mxu1 }
 0x10d   : > { %v1695_v37 = vpop.f32.mrf.mxu0 }
 0x10e   : > { %v1628_v38 = vpack.c.bf16 %v1227_v32, %v1227_v32  ;;  %v1196_v39 = vadd.f32 %v2119_v35, %v1157_v33  ;;  %v1045_v40 = vadd.f32 %v1694_v34, %v1044_v36  ;;  %v1046_v41 = vpop.f32.mrf.mxu1 }
 0x10f   : > { %v1696_v42 = vpop.f32.mrf.mxu0 }
 0x110   : > { %1388 = vst.msk [vmem:[%s2128_s30 + $0x14] sm:$0xf] %vm1382_vm2, %v1628_v38  ;;  %v1228_v43 = vmax.f32 %v1196_v39, 0.0  ;;  %v1158_v44 = vmul.f32 %v2114_v31, %v1045_v40  ;;  %v1697_v45 = vadd.f32 %v1696_v42, %v1695_v37  ;;  %v1049_v46 = vpop.f32.mrf.mxu1 }
 0x111   : > { %v1698_v47 = vpop.f32.mrf.mxu0 }
 0x112   : > { %v1629_v48 = vpack.c.bf16 %v1228_v43, %v1228_v43  ;;  %v1197_v49 = vadd.f32 %v2119_v35, %v1158_v44  ;;  %v1050_v50 = vadd.f32 %v1697_v45, %v1049_v46  ;;  %v1051_v51 = vpop.f32.mrf.mxu1 }
 0x113   : > { %v1699_v52 = vpop.f32.mrf.mxu0 }
 0x114   : > { %1389 = vst.msk [vmem:[%s2128_s30 + $0x18] sm:$0xf] %vm1382_vm2, %v1629_v48  ;;  %v1229_v53 = vmax.f32 %v1197_v49, 0.0  ;;  %v1159_v54 = vmul.f32 %v2114_v31, %v1050_v50  ;;  %v1700_v55 = vadd.f32 %v1699_v52, %v1698_v47  ;;  %v1052_v56 = vpop.f32.mrf.mxu1 }
 0x115   : > { %v1701_v57 = vpop.f32.mrf.mxu0 }
 0x116   : > { %v1630_v58 = vpack.c.bf16 %v1229_v53, %v1229_v53  ;;  %v1198_v59 = vadd.f32 %v2119_v35, %v1159_v54  ;;  %v1053_v60 = vadd.f32 %v1700_v55, %v1052_v56  ;;  %v1054_v61 = vpop.f32.mrf.mxu1 }
 0x117   : > { %v1702_v62 = vpop.f32.mrf.mxu0 }
 0x118   : > { %1390 = vst.msk [vmem:[%s2128_s30 + $0x1c] sm:$0xf] %vm1382_vm2, %v1630_v58  ;;  %v1230_v63 = vmax.f32 %v1198_v59, 0.0  ;;  %v1160_v0 = vmul.f32 %v2114_v31, %v1053_v60  ;;  %v1703_v1 = vadd.f32 %v1702_v62, %v1701_v57  ;;  %v1057_v2 = vpop.f32.mrf.mxu1 }
 0x119   : > { %v1704_v3 = vpop.f32.mrf.mxu0 }
 0x11a   : > { %v1631_v4 = vpack.c.bf16 %v1230_v63, %v1230_v63  ;;  %v1199_v5 = vadd.f32 %v2119_v35, %v1160_v0  ;;  %v1058_v6 = vadd.f32 %v1703_v1, %v1057_v2  ;;  %v1059_v7 = vpop.f32.mrf.mxu1 }
 0x11b   : > { %v1705_v8 = vpop.f32.mrf.mxu0 }
 0x11c   : > { %1391 = vst.msk [vmem:[%s2128_s30 + $0x20] sm:$0xf] %vm1382_vm2, %v1631_v4  ;;  %v1231_v9 = vmax.f32 %v1199_v5, 0.0  ;;  %v1161_v10 = vmul.f32 %v2114_v31, %v1058_v6  ;;  %v1706_v11 = vadd.f32 %v1705_v8, %v1704_v3  ;;  %v1060_v12 = vpop.f32.mrf.mxu1 }
 0x11d   : > { %v1707_v13 = vpop.f32.mrf.mxu0 }
 0x11e   : > { %v1632_v14 = vpack.c.bf16 %v1231_v9, %v1231_v9  ;;  %v1200_v15 = vadd.f32 %v2119_v35, %v1161_v10  ;;  %v1061_v16 = vadd.f32 %v1706_v11, %v1060_v12  ;;  %v1062_v17 = vpop.f32.mrf.mxu1 }
 0x11f   : > { %v1708_v18 = vpop.f32.mrf.mxu0 }
 0x120   : > { %1392 = vst.msk [vmem:[%s2128_s30 + $0x24] sm:$0xf] %vm1382_vm2, %v1632_v14  ;;  %v1232_v19 = vmax.f32 %v1200_v15, 0.0  ;;  %v1162_v20 = vmul.f32 %v2114_v31, %v1061_v16  ;;  %v1709_v21 = vadd.f32 %v1708_v18, %v1707_v13  ;;  %v1065_v22 = vpop.f32.mrf.mxu1 }
 0x121   : > { %v1710_v23 = vpop.f32.mrf.mxu0 }
 0x122   : > { %v1633_v24 = vpack.c.bf16 %v1232_v19, %v1232_v19  ;;  %v1201_v25 = vadd.f32 %v2119_v35, %v1162_v20  ;;  %v1066_v26 = vadd.f32 %v1709_v21, %v1065_v22  ;;  %v1067_v27 = vpop.f32.mrf.mxu1 }
 0x123   : > { %v1711_v28 = vpop.f32.mrf.mxu0 }
 0x124   : > { %1393 = vst.msk [vmem:[%s2128_s30 + $0x28] sm:$0xf] %vm1382_vm2, %v1633_v24  ;;  %v1233_v29 = vmax.f32 %v1201_v25, 0.0  ;;  %v1163_v30 = vmul.f32 %v2114_v31, %v1066_v26  ;;  %v1712_v32 = vadd.f32 %v1711_v28, %v1710_v23  ;;  %v1068_v33 = vpop.f32.mrf.mxu1 }
 0x125   : > { %v1713_v34 = vpop.f32.mrf.mxu0 }
 0x126   : > { %v1634_v36 = vpack.c.bf16 %v1233_v29, %v1233_v29  ;;  %v1202_v37 = vadd.f32 %v2119_v35, %v1163_v30  ;;  %v1069_v38 = vadd.f32 %v1712_v32, %v1068_v33  ;;  %v1070_v39 = vpop.f32.mrf.mxu1 }
 0x127   : > { %v1714_v40 = vpop.f32.mrf.mxu0 }
 0x128   : > { %1394 = vst.msk [vmem:[%s2128_s30 + $0x2c] sm:$0xf] %vm1382_vm2, %v1634_v36  ;;  %v1234_v41 = vmax.f32 %v1202_v37, 0.0  ;;  %v1164_v42 = vmul.f32 %v2114_v31, %v1069_v38  ;;  %v1715_v43 = vadd.f32 %v1714_v40, %v1713_v34  ;;  %v1073_v44 = vpop.f32.mrf.mxu1 }
 0x129   : > { %v1716_v45 = vpop.f32.mrf.mxu0 }
 0x12a   : > { %v1635_v46 = vpack.c.bf16 %v1234_v41, %v1234_v41  ;;  %v1203_v47 = vadd.f32 %v2119_v35, %v1164_v42  ;;  %v1074_v48 = vadd.f32 %v1715_v43, %v1073_v44  ;;  %v1075_v49 = vpop.f32.mrf.mxu1 }
 0x12b   : > { %v1717_v50 = vpop.f32.mrf.mxu0 }
 0x12c   : > { %1395 = vst.msk [vmem:[%s2128_s30 + $0x30] sm:$0xf] %vm1382_vm2, %v1635_v46  ;;  %v1235_v51 = vmax.f32 %v1203_v47, 0.0  ;;  %v1165_v52 = vmul.f32 %v2114_v31, %v1074_v48  ;;  %v1718_v53 = vadd.f32 %v1717_v50, %v1716_v45  ;;  %v1076_v54 = vpop.f32.mrf.mxu1 }
 0x12d   : > { %v1719_v55 = vpop.f32.mrf.mxu0 }
 0x12e   : > { %v1636_v56 = vpack.c.bf16 %v1235_v51, %v1235_v51  ;;  %v1204_v57 = vadd.f32 %v2119_v35, %v1165_v52  ;;  %v1077_v58 = vadd.f32 %v1718_v53, %v1076_v54  ;;  %v1078_v59 = vpop.f32.mrf.mxu1 }
 0x12f   : > { %v1720_v60 = vpop.f32.mrf.mxu0 }
 0x130   : > { %1396 = vst.msk [vmem:[%s2128_s30 + $0x34] sm:$0xf] %vm1382_vm2, %v1636_v56  ;;  %v1236_v61 = vmax.f32 %v1204_v57, 0.0  ;;  %v1166_v62 = vmul.f32 %v2114_v31, %v1077_v58  ;;  %v1721_v63 = vadd.f32 %v1720_v60, %v1719_v55  ;;  %v1081_v0 = vpop.f32.mrf.mxu1 }
 0x131   : > { %v1722_v1 = vpop.f32.mrf.mxu0 }
 0x132   : > { %v1637_v2 = vpack.c.bf16 %v1236_v61, %v1236_v61  ;;  %v1205_v3 = vadd.f32 %v2119_v35, %v1166_v62  ;;  %v1082_v4 = vadd.f32 %v1721_v63, %v1081_v0  ;;  %v1083_v5 = vpop.f32.mrf.mxu1 }
 0x133   : > { %v1723_v6 = vpop.f32.mrf.mxu0 }
 0x134   : > { %1397 = vst.msk [vmem:[%s2128_s30 + $0x38] sm:$0xf] %vm1382_vm2, %v1637_v2  ;;  %v1237_v7 = vmax.f32 %v1205_v3, 0.0  ;;  %v1167_v8 = vmul.f32 %v2114_v31, %v1082_v4  ;;  %v1724_v9 = vadd.f32 %v1723_v6, %v1722_v1  ;;  %v1084_v10 = vpop.f32.mrf.mxu1 }
 0x135   : > { %v1725_v11 = vpop.f32.mrf.mxu0 }
 0x136   : > { %v1638_v12 = vpack.c.bf16 %v1237_v7, %v1237_v7  ;;  %v1206_v13 = vadd.f32 %v2119_v35, %v1167_v8  ;;  %v1085_v14 = vadd.f32 %v1724_v9, %v1084_v10  ;;  %v1086_v15 = vpop.f32.mrf.mxu1 }
 0x137   : > { %v1726_v16 = vpop.f32.mrf.mxu0 }
 0x138   : > { %1398 = vst.msk [vmem:[%s2128_s30 + $0x3c] sm:$0xf] %vm1382_vm2, %v1638_v12  ;;  %v1238_v17 = vmax.f32 %v1206_v13, 0.0  ;;  %v1168_v18 = vmul.f32 %v2114_v31, %v1085_v14  ;;  %v1727_v19 = vadd.f32 %v1726_v16, %v1725_v11  ;;  %v1089_v20 = vpop.f32.mrf.mxu1 }
 0x139   : > { %v1728_v21 = vpop.f32.mrf.mxu0 }
 0x13a   : > { %v1639_v22 = vpack.c.bf16 %v1238_v17, %v1238_v17  ;;  %v1207_v23 = vadd.f32 %v2119_v35, %v1168_v18  ;;  %v1090_v24 = vadd.f32 %v1727_v19, %v1089_v20  ;;  %v1091_v25 = vpop.f32.mrf.mxu1 }
 0x13b   : > { %v1729_v26 = vpop.f32.mrf.mxu0 }
 0x13c   : > { %1399 = vst.msk [vmem:[%s2128_s30 + $0x40] sm:$0xf] %vm1382_vm2, %v1639_v22  ;;  %v1239_v27 = vmax.f32 %v1207_v23, 0.0  ;;  %v1169_v28 = vmul.f32 %v2114_v31, %v1090_v24  ;;  %v1730_v29 = vadd.f32 %v1729_v26, %v1728_v21  ;;  %v1092_v30 = vpop.f32.mrf.mxu1 }
 0x13d   : > { %v1731_v32 = vpop.f32.mrf.mxu0 }
 0x13e   : > { %v1640_v33 = vpack.c.bf16 %v1239_v27, %v1239_v27  ;;  %v1208_v34 = vadd.f32 %v2119_v35, %v1169_v28  ;;  %v1093_v36 = vadd.f32 %v1730_v29, %v1092_v30  ;;  %v1094_v37 = vpop.f32.mrf.mxu1 }
 0x13f   : > { %v1732_v38 = vpop.f32.mrf.mxu0 }
 0x140   : > { %1400 = vst.msk [vmem:[%s2128_s30 + $0x44] sm:$0xf] %vm1382_vm2, %v1640_v33  ;;  %v1240_v39 = vmax.f32 %v1208_v34, 0.0  ;;  %v1170_v40 = vmul.f32 %v2114_v31, %v1093_v36  ;;  %v1733_v41 = vadd.f32 %v1732_v38, %v1731_v32  ;;  %v1097_v42 = vpop.f32.mrf.mxu1 }
 0x141   : > { %v1734_v43 = vpop.f32.mrf.mxu0 }
 0x142   : > { %v1641_v44 = vpack.c.bf16 %v1240_v39, %v1240_v39  ;;  %v1209_v45 = vadd.f32 %v2119_v35, %v1170_v40  ;;  %v1098_v46 = vadd.f32 %v1733_v41, %v1097_v42  ;;  %v1099_v47 = vpop.f32.mrf.mxu1 }
 0x143   : > { %v1735_v48 = vpop.f32.mrf.mxu0 }
 0x144   : > { %1401 = vst.msk [vmem:[%s2128_s30 + $0x48] sm:$0xf] %vm1382_vm2, %v1641_v44  ;;  %v1241_v49 = vmax.f32 %v1209_v45, 0.0  ;;  %v1171_v50 = vmul.f32 %v2114_v31, %v1098_v46  ;;  %v1736_v51 = vadd.f32 %v1735_v48, %v1734_v43  ;;  %v1100_v52 = vpop.f32.mrf.mxu1 }
 0x145   : > { %v1737_v53 = vpop.f32.mrf.mxu0 }
 0x146   : > { %v1642_v54 = vpack.c.bf16 %v1241_v49, %v1241_v49  ;;  %v1210_v55 = vadd.f32 %v2119_v35, %v1171_v50  ;;  %v1101_v56 = vadd.f32 %v1736_v51, %v1100_v52  ;;  %v1102_v57 = vpop.f32.mrf.mxu1 }
 0x147   : > { %v1738_v58 = vpop.f32.mrf.mxu0 }
 0x148   : > { %1402 = vst.msk [vmem:[%s2128_s30 + $0x4c] sm:$0xf] %vm1382_vm2, %v1642_v54  ;;  %v1242_v59 = vmax.f32 %v1210_v55, 0.0  ;;  %v1172_v60 = vmul.f32 %v2114_v31, %v1101_v56  ;;  %v1739_v61 = vadd.f32 %v1738_v58, %v1737_v53  ;;  %v1105_v62 = vpop.f32.mrf.mxu1 }
 0x149   : > { %v1740_v63 = vpop.f32.mrf.mxu0 }
 0x14a   : > { %v1643_v0 = vpack.c.bf16 %v1242_v59, %v1242_v59  ;;  %v1211_v1 = vadd.f32 %v2119_v35, %v1172_v60  ;;  %v1106_v2 = vadd.f32 %v1739_v61, %v1105_v62  ;;  %v1107_v3 = vpop.f32.mrf.mxu1 }
 0x14b   : > { %v1741_v4 = vpop.f32.mrf.mxu0 }
 0x14c   : > { %1403 = vst.msk [vmem:[%s2128_s30 + $0x50] sm:$0xf] %vm1382_vm2, %v1643_v0  ;;  %v1243_v5 = vmax.f32 %v1211_v1, 0.0  ;;  %v1173_v6 = vmul.f32 %v2114_v31, %v1106_v2  ;;  %v1742_v7 = vadd.f32 %v1741_v4, %v1740_v63  ;;  %v1108_v8 = vpop.f32.mrf.mxu1 }
 0x14d   : > { %v1743_v9 = vpop.f32.mrf.mxu0 }
 0x14e   : > { %v1644_v10 = vpack.c.bf16 %v1243_v5, %v1243_v5  ;;  %v1212_v11 = vadd.f32 %v2119_v35, %v1173_v6  ;;  %v1109_v12 = vadd.f32 %v1742_v7, %v1108_v8  ;;  %v1110_v13 = vpop.f32.mrf.mxu1 }
 0x14f   : > { %v1744_v14 = vpop.f32.mrf.mxu0 }
 0x150   : > { %1404 = vst.msk [vmem:[%s2128_s30 + $0x54] sm:$0xf] %vm1382_vm2, %v1644_v10  ;;  %v1244_v15 = vmax.f32 %v1212_v11, 0.0  ;;  %v1174_v16 = vmul.f32 %v2114_v31, %v1109_v12  ;;  %v1745_v17 = vadd.f32 %v1744_v14, %v1743_v9  ;;  %v1113_v18 = vpop.f32.mrf.mxu1 }
 0x151   : > { %v1746_v19 = vpop.f32.mrf.mxu0 }
 0x152   : > { %v1645_v20 = vpack.c.bf16 %v1244_v15, %v1244_v15  ;;  %v1213_v21 = vadd.f32 %v2119_v35, %v1174_v16  ;;  %v1114_v22 = vadd.f32 %v1745_v17, %v1113_v18  ;;  %v1115_v23 = vpop.f32.mrf.mxu1 }
 0x153   : > { %v1747_v24 = vpop.f32.mrf.mxu0 }
 0x154   : > { %1405 = vst.msk [vmem:[%s2128_s30 + $0x58] sm:$0xf] %vm1382_vm2, %v1645_v20  ;;  %v1245_v25 = vmax.f32 %v1213_v21, 0.0  ;;  %v1175_v26 = vmul.f32 %v2114_v31, %v1114_v22  ;;  %v1748_v27 = vadd.f32 %v1747_v24, %v1746_v19  ;;  %v1116_v28 = vpop.f32.mrf.mxu1 }
 0x155   : > { %v1749_v29 = vpop.f32.mrf.mxu0 }
 0x156   : > { %v1646_v30 = vpack.c.bf16 %v1245_v25, %v1245_v25  ;;  %v1214_v32 = vadd.f32 %v2119_v35, %v1175_v26  ;;  %v1117_v33 = vadd.f32 %v1748_v27, %v1116_v28  ;;  %v1118_v34 = vpop.f32.mrf.mxu1 }
 0x157   : > { %v1750_v36 = vpop.f32.mrf.mxu0 }
 0x158   : > { %1406 = vst.msk [vmem:[%s2128_s30 + $0x5c] sm:$0xf] %vm1382_vm2, %v1646_v30  ;;  %v1246_v37 = vmax.f32 %v1214_v32, 0.0  ;;  %v1176_v38 = vmul.f32 %v2114_v31, %v1117_v33  ;;  %v1751_v39 = vadd.f32 %v1750_v36, %v1749_v29  ;;  %v1121_v40 = vpop.f32.mrf.mxu1 }
 0x159   : > { %v1752_v41 = vpop.f32.mrf.mxu0 }
 0x15a   : > { %v1647_v42 = vpack.c.bf16 %v1246_v37, %v1246_v37  ;;  %v1215_v43 = vadd.f32 %v2119_v35, %v1176_v38  ;;  %v1122_v44 = vadd.f32 %v1751_v39, %v1121_v40  ;;  %v1123_v45 = vpop.f32.mrf.mxu1 }
 0x15b   : > { %v1753_v46 = vpop.f32.mrf.mxu0 }
 0x15c   : > { %1407 = vst.msk [vmem:[%s2128_s30 + $0x60] sm:$0xf] %vm1382_vm2, %v1647_v42  ;;  %v1247_v47 = vmax.f32 %v1215_v43, 0.0  ;;  %v1177_v48 = vmul.f32 %v2114_v31, %v1122_v44  ;;  %v1754_v49 = vadd.f32 %v1753_v46, %v1752_v41  ;;  %v1124_v50 = vpop.f32.mrf.mxu1 }
 0x15d   : > { %v1755_v51 = vpop.f32.mrf.mxu0 }
 0x15e   : > { %v1648_v52 = vpack.c.bf16 %v1247_v47, %v1247_v47  ;;  %v1216_v53 = vadd.f32 %v2119_v35, %v1177_v48  ;;  %v1125_v54 = vadd.f32 %v1754_v49, %v1124_v50  ;;  %v1126_v55 = vpop.f32.mrf.mxu1 }
 0x15f   : > { %v1756_v56 = vpop.f32.mrf.mxu0 }
 0x160   : > { %1408 = vst.msk [vmem:[%s2128_s30 + $0x64] sm:$0xf] %vm1382_vm2, %v1648_v52  ;;  %v1248_v57 = vmax.f32 %v1216_v53, 0.0  ;;  %v1178_v58 = vmul.f32 %v2114_v31, %v1125_v54  ;;  %v1757_v59 = vadd.f32 %v1756_v56, %v1755_v51  ;;  %v1129_v60 = vpop.f32.mrf.mxu1 }
 0x161   : > { %v1758_v61 = vpop.f32.mrf.mxu0 }
 0x162   : > { %v1649_v62 = vpack.c.bf16 %v1248_v57, %v1248_v57  ;;  %v1217_v63 = vadd.f32 %v2119_v35, %v1178_v58  ;;  %v1130_v0 = vadd.f32 %v1757_v59, %v1129_v60  ;;  %v1131_v1 = vpop.f32.mrf.mxu1 }
 0x163   : > { %v1759_v2 = vpop.f32.mrf.mxu0 }
 0x164   : > { %1409 = vst.msk [vmem:[%s2128_s30 + $0x68] sm:$0xf] %vm1382_vm2, %v1649_v62  ;;  %v1249_v3 = vmax.f32 %v1217_v63, 0.0  ;;  %v1179_v4 = vmul.f32 %v2114_v31, %v1130_v0  ;;  %v1760_v5 = vadd.f32 %v1759_v2, %v1758_v61  ;;  %v1132_v6 = vpop.f32.mrf.mxu1 }
 0x165   : > { %v1761_v7 = vpop.f32.mrf.mxu0 }
 0x166   : > { %v1650_v8 = vpack.c.bf16 %v1249_v3, %v1249_v3  ;;  %v1218_v9 = vadd.f32 %v2119_v35, %v1179_v4  ;;  %v1133_v10 = vadd.f32 %v1760_v5, %v1132_v6  ;;  %v1134_v11 = vpop.f32.mrf.mxu1 }
 0x167   : > { %v1762_v12 = vpop.f32.mrf.mxu0 }
 0x168   : > { %1410 = vst.msk [vmem:[%s2128_s30 + $0x6c] sm:$0xf] %vm1382_vm2, %v1650_v8  ;;  %v1250_v13 = vmax.f32 %v1218_v9, 0.0  ;;  %v1180_v14 = vmul.f32 %v2114_v31, %v1133_v10  ;;  %v1763_v15 = vadd.f32 %v1762_v12, %v1761_v7  ;;  %v1137_v16 = vpop.f32.mrf.mxu1 }
 0x169   : > { %v1764_v17 = vpop.f32.mrf.mxu0 }
 0x16a   : > { %v1651_v18 = vpack.c.bf16 %v1250_v13, %v1250_v13  ;;  %v1219_v19 = vadd.f32 %v2119_v35, %v1180_v14  ;;  %v1138_v20 = vadd.f32 %v1763_v15, %v1137_v16  ;;  %v1139_v21 = vpop.f32.mrf.mxu1 }
 0x16b   : > { %v1765_v22 = vpop.f32.mrf.mxu0 }
 0x16c   : > { %1411 = vst.msk [vmem:[%s2128_s30 + $0x70] sm:$0xf] %vm1382_vm2, %v1651_v18  ;;  %v1251_v23 = vmax.f32 %v1219_v19, 0.0  ;;  %v1181_v24 = vmul.f32 %v2114_v31, %v1138_v20  ;;  %v1766_v25 = vadd.f32 %v1765_v22, %v1764_v17  ;;  %v1140_v26 = vpop.f32.mrf.mxu1 }
 0x16e   : > { %v1652_v27 = vpack.c.bf16 %v1251_v23, %v1251_v23  ;;  %v1220_v28 = vadd.f32 %v2119_v35, %v1181_v24  ;;  %v1141_v29 = vadd.f32 %v1766_v25, %v1140_v26  ;;  %v1142_v30 = vpop.f32.mrf.mxu1 }
 0x170   : > { %1412 = vst.msk [vmem:[%s2128_s30 + $0x74] sm:$0xf] %vm1382_vm2, %v1652_v27  ;;  %v1252_v32 = vmax.f32 %v1220_v28, 0.0  ;;  %v1182_v33 = vmul.f32 %v2114_v31, %v1141_v29 }
 0x172   : > { %v1653_v34 = vpack.c.bf16 %v1252_v32, %v1252_v32  ;;  %v1221_v36 = vadd.f32 %v2119_v35, %v1182_v33 }
 0x174   : > { %1413 = vst.msk [vmem:[%s2128_s30 + $0x78] sm:$0xf] %vm1382_vm2, %v1653_v34  ;;  %v1253_v37 = vmax.f32 %v1221_v36, 0.0 }
 0x176   : > { %v1654_v38 = vpack.c.bf16 %v1253_v37, %v1253_v37 }
 0x178   : > { %1414 = vst.msk [vmem:[%s2128_s30 + $0x7c] sm:$0xf] %vm1382_vm2, %v1654_v38 }
 0x179 PF: > { %s14_s15 = sadd.s32 1, %s1903_s15  }
 0x17a   : > { %p11_p4 = scmp.ge.s32.totalorder %s14_s15, 4  }
 0x17c   :  { %13 = sbr.rel (!%p11_p4) target bundleno = 1 (0x1), region = 66 }

// kernel: base_net_forward.11
= control target key start
LH: loop header
LB: loop body
LE: loop exit
PB: predicated region body
PF: predicated region fallthrough
CT: control target
= control target key end

     0   :  { %s2596_s18 = smov 0   ;;  %s3046_s0 = inlined_call_operand.vmem [shape: bf16[128,576], index: 0, kind: input, shape index: {}]   ;;  %s3047_s1 = inlined_call_operand.vmem [shape: bf16[576,64], index: 1, kind: input, shape index: {}]   ;;  %s3048_s2 = inlined_call_operand.vmem [shape: f32[1,64], index: 2, kind: input, shape index: {}]   ;;  %s3049_s3 = inlined_call_operand.vmem [shape: f32[1,64], index: 3, kind: input, shape index: {}]   ;;  %s3050_s4 = inlined_call_operand.vmem [shape: bf16[64,256], index: 4, kind: input, shape index: {}]   ;;  %s3051_s5 = inlined_call_operand.vmem [shape: f32[1,256], index: 5, kind: input, shape index: {}]   ;;  %s3052_s6 = inlined_call_operand.vmem [shape: f32[1,256], index: 6, kind: input, shape index: {}]   ;;  %s3053_s7 = inlined_call_operand.vmem [shape: bf16[128,64], index: 7, kind: input, shape index: {}]   ;;  %s3054_s8 = inlined_call_operand.vmem [shape: bf16[64,256], index: 8, kind: input, shape index: {}]   ;;  %s3055_s9 = inlined_call_operand.vmem [shape: f32[1,256], index: 9, kind: input, shape index: {}]   ;;  %s3056_s10 = inlined_call_operand.vmem [shape: f32[1,256], index: 10, kind: input, shape index: {}]   ;;  %s3057_s11 = inlined_call_operand.vmem [shape: bf16[256,64], index: 11, kind: input, shape index: {}]   ;;  %s3058_s12 = inlined_call_operand.vmem [shape: f32[1,64], index: 12, kind: input, shape index: {}]   ;;  %s3059_s13 = inlined_call_operand.vmem [shape: f32[1,64], index: 13, kind: input, shape index: {}]   ;;  %s3060_s14 = inlined_call_operand.vmem [shape: bf16[128,256], index: 14, kind: output, shape index: {0}]   ;;  %s3061_s15 = inlined_call_operand.vmem [shape: bf16[128,64], index: 15, kind: output, shape index: {1}]  }
   0x1 LB: > { %s2072_s19 = sadd.s32 4294967295, %s2513_s18   ;;  %p2076_p0 = scmp.ge.s32.totalorder %s2513_s18, 1  ;;  %s2513_s18 = sphi %s2596_s18, %s26_s18  }
   0x2   : > { %p453_p1 = scmp.lt.s32.totalorder %s2513_s18, 3 }
   0x4   : > { %p454_p2 = pnand %p2076_p0, %p453_p1 }
   0x5   : > { %s2077_s24 = sshll.u32 (!%p454_p2), %s2072_s19, 3 }
   0x6   : > { %457 = sbr.rel (%p454_p2) target bundleno = 731 (0x2db), region = 76  ;;  %p514_p3 = scmp.lt.s32.totalorder (!%p454_p2), %s2077_s24, 15 }
   0xb   : > { %v2399_v0 = vld [vmem:[%s3047_s1 + $0x78] sm:$0xff]   ;;  %v2403_v4 = vld [vmem:[%s3047_s1 + $0x70] sm:$0xff]   ;;  %v2407_v8 = vld [vmem:[%s3047_s1 + $0x68] sm:$0xff]   ;;  %s3063_s24 = smov (!%p514_p3, %s2077_s24), 15  ;;  %vm952_vm0 = vcmask 523264   ;;  %vm1959_vm1 = vcmask 519168  }
   0xc   : > { %v2400_v1 = vld [vmem:[%s3047_s1 + $0xf8] sm:$0xff]   ;;  %2229 = vmatprep.subr.bf16.mxu0 %v2399_v0  ;;  %v2404_v5 = vld [vmem:[%s3047_s1 + $0xf0] sm:$0xff]   ;;  %v2408_v9 = vld [vmem:[%s3047_s1 + $0xe8] sm:$0xff]   ;;  %s2389_s20 = smul.u32 20, %s3063_s24  ;;  %s2080_s22 = sshll.u32 %s3063_s24, 2 }
   0xd   : > { %v2401_v2 = vld [vmem:[%s3047_s1 + $0x38] sm:$0xff]   ;;  %2269 = vmatprep.subr.bf16.mxu1 %v2400_v1  ;;  %v2405_v6 = vld [vmem:[%s3047_s1 + $0x30] sm:$0xff]   ;;  %v2409_v10 = vld [vmem:[%s3047_s1 + $0x28] sm:$0xff]   ;;  %s524_s25 = scalar_lea.vmem %s3053_s7, %s2080_s22  ;;  %s2212_s26 = sshll.u32 %s3063_s24, 3 }
   0xe   : > { %v2402_v3 = vld [vmem:[%s3047_s1 + $0xb8] sm:$0xff]   ;;  %2230 = vmatpush3.bf16.msra.mxu0 %v2401_v2  ;;  %v2406_v7 = vld [vmem:[%s3047_s1 + $0xb0] sm:$0xff]   ;;  %v2410_v11 = vld [vmem:[%s3047_s1 + $0xa8] sm:$0xff]   ;;  %s2702_s17 = scalar_lea.vmem %s3046_s0, %s2389_s20  ;;  %s2958_s28 = scalar_lea.vmem %s3060_s14, %s2212_s26 }
   0xf   : > { %2270 = vmatpush3.bf16.msra.mxu1 %v2402_v3  ;;  %2231 = vmatprep.subr.bf16.mxu0 %v2403_v4  ;;  %v2411_v12 = vld [vmem:[%s3047_s1 + $0x60] sm:$0xff]   ;;  %v2415_v16 = vld [vmem:[%s3047_s1 + $0x58] sm:$0xff]   ;;  %v2419_v20 = vld [vmem:[%s3047_s1 + $0x50] sm:$0xff]   ;;  %s3025_s20 = scalar_lea.vmem %s3061_s15, %s2080_s22 }
  0x10   : > { %2271 = vmatprep.subr.bf16.mxu1 %v2404_v5  ;;  %v2412_v13 = vld [vmem:[%s3047_s1 + $0xe0] sm:$0xff]   ;;  %v2416_v17 = vld [vmem:[%s3047_s1 + $0xd8] sm:$0xff]   ;;  %v2420_v21 = vld [vmem:[%s3047_s1 + $0xd0] sm:$0xff]  }
  0x11   : > { %v2413_v14 = vld [vmem:[%s3047_s1 + $0x20] sm:$0xff]   ;;  %v2417_v18 = vld [vmem:[%s3047_s1 + $0x18] sm:$0xff]   ;;  %v2421_v22 = vld [vmem:[%s3047_s1 + $0x10] sm:$0xff]  }
  0x12   : > { %2232 = vmatpush3.bf16.msra.mxu0 %v2405_v6  ;;  %v2414_v15 = vld [vmem:[%s3047_s1 + $0xa0] sm:$0xff]   ;;  %v2418_v19 = vld [vmem:[%s3047_s1 + $0x98] sm:$0xff]   ;;  %v2422_v23 = vld [vmem:[%s3047_s1 + $0x90] sm:$0xff]  }
  0x13   : > { %2272 = vmatpush3.bf16.msra.mxu1 %v2406_v7  ;;  %2233 = vmatprep.subr.bf16.mxu0 %v2407_v8  ;;  %v2423_v24 = vld [vmem:[%s3047_s1 + $0x48] sm:$0xff]   ;;  %v2427_v28 = vld [vmem:[%s3047_s1 + $0x40] sm:$0xff]   ;;  %v2437_v36 = vld [vmem:[%s3047_s1 + $0x118] sm:$0xff]   ;;  %v2515_v7 = vmov 0  }
  0x14   : > { %2273 = vmatprep.subr.bf16.mxu1 %v2408_v9  ;;  %v2424_v25 = vld [vmem:[%s3047_s1 + $0xc8] sm:$0xff]   ;;  %v2428_v29 = vld [vmem:[%s3047_s1 + $0xc0] sm:$0xff]   ;;  %v2444_v39 = vld [vmem:[%s3047_s1 + $0x110] sm:$0xff]  }
  0x15   : > { %v2425_v26 = vld [vmem:[%s3047_s1 + $0x8] sm:$0xff]   ;;  %v2429_v30 = vld [vmem:[%s3047_s1] sm:$0xff]   ;;  %v2447_v43 = vld [vmem:[%s2702_s17 + $0x5c] ss:$20 sps:$4 sm:$0xff]  }
  0x16   : > { %2234 = vmatpush3.bf16.msra.mxu0 %v2409_v10  ;;  %v2426_v27 = vld [vmem:[%s3047_s1 + $0x88] sm:$0xff]   ;;  %v2430_v31 = vld [vmem:[%s3047_s1 + $0x80] sm:$0xff]   ;;  %v2452_v48 = vld [vmem:[%s2702_s17 + $0x7c] ss:$20 sps:$4 sm:$0xff]  }
  0x17   : > { %2274 = vmatpush3.bf16.msra.mxu1 %v2410_v11  ;;  %2235 = vmatprep.subr.bf16.mxu0 %v2411_v12  ;;  %v2431_v32 = vld [vmem:[%s2702_s17] ss:$20 sps:$4 sm:$0xff]   ;;  %v2433_v33 = vld [vmem:[%s2702_s17 + $0x4] ss:$20 sps:$4 sm:$0xff]   ;;  %v2434_v34 = vld [vmem:[%s2702_s17 + $0x8] ss:$20 sps:$4 sm:$0xff]  }
  0x18   : > { %2275 = vmatprep.subr.bf16.mxu1 %v2412_v13  ;;  %v2436_v35 = vld [vmem:[%s2702_s17 + $0xc] ss:$20 sps:$4 sm:$0xff]   ;;  %997 = vmatprep.mubr.bf16.mxu0 %v2433_v33  ;;  %v2440_v38 = vld [vmem:[%s2702_s17 + $0x34] ss:$20 sps:$4 sm:$0xff]   ;;  %v2443_v41 = vld [vmem:[%s2702_s17 + $0x30] ss:$20 sps:$4 sm:$0xff]  }
  0x19   : > { %1062 = vmatprep.mubr.bf16.mxu1 %v2436_v35  ;;  %v2438_v37 = vld [vmem:[%s2702_s17 + $0x2c] ss:$20 sps:$4 sm:$0xff]   ;;  %v2442_v40 = vld [vmem:[%s2702_s17 + $0x28] ss:$20 sps:$4 sm:$0xff]   ;;  %v2449_v46 = vld [vmem:[%s2702_s17 + $0x50] ss:$20 sps:$4 sm:$0xff]  }
  0x1a   : > { %2236 = vmatpush3.bf16.msra.mxu0 %v2413_v14  ;;  %v2445_v42 = vld [vmem:[%s2702_s17 + $0x54] ss:$20 sps:$4 sm:$0xff]   ;;  %v2458_v45 = vld [vmem:[%s3047_s1 + $0x100] sm:$0xff]   ;;  %v2450_v47 = vld [vmem:[%s2702_s17 + $0x58] ss:$20 sps:$4 sm:$0xff]  }
  0x1b   : > { %2276 = vmatpush3.bf16.msra.mxu1 %v2414_v15  ;;  %2237 = vmatprep.subr.bf16.mxu0 %v2415_v16  ;;  %v2451_v44 = vld [vmem:[%s3047_s1 + $0x108] sm:$0xff]   ;;  %v2454_v49 = vld [vmem:[%s2702_s17 + $0x84] ss:$20 sps:$4 sm:$0xff]   ;;  %v2457_v51 = vld [vmem:[%s2702_s17 + $0x80] ss:$20 sps:$4 sm:$0xff]  }
  0x1c   : > { %2277 = vmatprep.subr.bf16.mxu1 %v2416_v17  ;;  %v2456_v50 = vld [vmem:[%s2702_s17 + $0x78] ss:$20 sps:$4 sm:$0xff]   ;;  %v2459_v52 = vld [vmem:[%s2702_s17 + $0x10] ss:$20 sps:$4 sm:$0xff]   ;;  %v2461_v54 = vld [vmem:[%s2702_s17 + $0x60] ss:$20 sps:$4 sm:$0xff]  }
  0x1d   : > { %v2460_v53 = vld [vmem:[%s2702_s17 + $0x38] ss:$20 sps:$4 sm:$0xff]   ;;  %v2462_v55 = vld [vmem:[%s2702_s17 + $0x88] ss:$20 sps:$4 sm:$0xff]   ;;  %v2487_v6 = vld [vmem:[%s524_s25] sm:$0xff]  }
  0x1e   : > { %2238 = vmatpush3.bf16.msra.mxu0 %v2417_v18  ;;  %v2463_v56 = vld [vmem:[%s3050_s4 + $0x30] ss:$8 sps:$4 sm:$0xff]   ;;  %v2465_v57 = vld [vmem:[%s3050_s4 + $0x34] ss:$8 sps:$4 sm:$0xff]   ;;  %v2466_v58 = vld [vmem:[%s3050_s4 + $0x20] ss:$8 sps:$4 sm:$0xff]  }
  0x1f   : > { %2278 = vmatpush3.bf16.msra.mxu1 %v2418_v19  ;;  %2239 = vmatprep.subr.bf16.mxu0 %v2419_v20  ;;  %v2468_v59 = vld [vmem:[%s3050_s4 + $0x24] ss:$8 sps:$4 sm:$0xff]   ;;  %v2471_v60 = vld [vmem:[%s3054_s8 + $0x34] ss:$8 sps:$4 sm:$0xff]   ;;  %v2469_v61 = vld [vmem:[%s3054_s8 + $0x30] ss:$8 sps:$4 sm:$0xff]  }
  0x20   : > { %2279 = vmatprep.subr.bf16.mxu1 %v2420_v21  ;;  %v2474_v62 = vld [vmem:[%s3054_s8 + $0x24] ss:$8 sps:$4 sm:$0xff]   ;;  %v2472_v63 = vld [vmem:[%s3054_s8 + $0x20] ss:$8 sps:$4 sm:$0xff]   ;;  %v2480_v0 = vld [vmem:[%s3054_s8 + $0x14] ss:$8 sps:$4 sm:$0xff]  }
  0x21   : > { %v2478_v1 = vld [vmem:[%s3054_s8 + $0x10] ss:$8 sps:$4 sm:$0xff]   ;;  %v2483_v2 = vld [vmem:[%s3054_s8 + $0x4] ss:$8 sps:$4 sm:$0xff]   ;;  %v2477_v4 = vld [vmem:[%s3050_s4 + $0x14] ss:$8 sps:$4 sm:$0xff]  }
  0x22   : > { %2240 = vmatpush3.bf16.msra.mxu0 %v2421_v22  ;;  %v2475_v3 = vld [vmem:[%s3050_s4 + $0x10] ss:$8 sps:$4 sm:$0xff]   ;;  %v2481_v5 = vld [vmem:[%s3054_s8] ss:$8 sps:$4 sm:$0xff]   ;;  %v2486_v8 = vld [vmem:[%s3050_s4 + $0x4] ss:$8 sps:$4 sm:$0xff]  }
  0x23   : > { %2280 = vmatpush3.bf16.msra.mxu1 %v2422_v23  ;;  %2241 = vmatprep.subr.bf16.mxu0 %v2423_v24  ;;  %v2484_v9 = vld [vmem:[%s3050_s4] ss:$8 sps:$4 sm:$0xff]   ;;  %v2489_v11 = vld [vmem:[%s524_s25 + $0x10] sm:$0xff]   ;;  %v2490_v12 = vld [vmem:[%s524_s25 + $0x18] sm:$0xff]  }
  0x24   : > { %2281 = vmatprep.subr.bf16.mxu1 %v2424_v25  ;;  %v2488_v10 = vld [vmem:[%s524_s25 + $0x8] sm:$0xff]   ;;  %v2491_v13 = vld [vmem:[%s3057_s11 + $0x78] sm:$0xff]   ;;  %v2820_v15 = vld [vmem:[%s3057_s11 + $0x70] sm:$0xff]  }
  0x25   : > { %v2815_v14 = vld [vmem:[%s3057_s11 + $0x38] sm:$0xff]   ;;  %v2826_v16 = vld [vmem:[%s3057_s11 + $0x30] sm:$0xff]   ;;  %v2832_v17 = vld [vmem:[%s3057_s11 + $0x68] sm:$0xff]  }
  0x26   : > { %2242 = vmatpush3.bf16.msra.mxu0 %v2425_v26  ;;  %v2839_v18 = vld [vmem:[%s3057_s11 + $0x28] sm:$0xff]   ;;  %v2845_v19 = vld [vmem:[%s3057_s11 + $0x60] sm:$0xff]  }
  0x27   : > { %2282 = vmatpush3.bf16.msra.mxu1 %v2426_v27  ;;  %2243 = vmatprep.subr.bf16.mxu0 %v2427_v28  ;;  %v2851_v20 = vld [vmem:[%s3057_s11 + $0x20] sm:$0xff]  }
  0x28   : > { %2283 = vmatprep.subr.bf16.mxu1 %v2428_v29 }
  0x2a   : > { %2244 = vmatpush3.bf16.msra.mxu0 %v2429_v30 }
  0x2b   : > { %2284 = vmatpush3.bf16.msra.mxu1 %v2430_v31  ;;  %2357 = vmatprep.subr.bf16.mxu0 %v2437_v36 }
  0x2c   : > { %1270 = vmatprep.subr.bf16.mxu1 %v2465_v57 }
  0x2d   : > { %998 = vmatmul.mubr.bf16.vlgmr.msra.gmra.mxu0 %v2431_v32 }
  0x2e   : > { %1063 = vmatmul.mubr.bf16.vlgmr.msra.gmra.mxu1 %v2434_v34  ;;  %2358 = vmatpush3.bf16.msra.mxu0 %v2437_v36 }
  0x2f   : > { %1005 = vmatprep.mubr.bf16.mxu0 %v2438_v37  ;;  %1070 = vmatprep.mubr.bf16.mxu1 %v2440_v38 }
  0x30   : > { %2359 = vmatprep.subr.bf16.mxu0 %v2444_v39  ;;  %1271 = vmatpush1.bf16.msra.mxu1 %v2463_v56 }
  0x31   : > { %1272 = vmatprep.subr.bf16.mxu1 %v2468_v59 }
  0x32   : > { %2360 = vmatpush3.bf16.msra.mxu0 %v2444_v39 }
  0x33   : > { %2361 = vmatprep.subr.bf16.mxu0 %v2451_v44 }
  0x34   : > { %1273 = vmatpush1.bf16.msra.mxu1 %v2466_v58 }
  0x35   : > { %1006 = vmatmul.mubr.bf16.gmra.mxu0 %v2442_v40  ;;  %1274 = vmatprep.subr.bf16.mxu1 %v2477_v4 }
  0x36   : > { %1071 = vmatmul.mubr.bf16.gmra.mxu1 %v2443_v41  ;;  %1013 = vmatprep.mubr.bf16.mxu0 %v2445_v42 }
  0x37   : > { %1078 = vmatprep.mubr.bf16.mxu1 %v2447_v43  ;;  %2362 = vmatpush3.bf16.msra.mxu0 %v2451_v44 }
  0x38   : > { %2363 = vmatprep.subr.bf16.mxu0 %v2458_v45  ;;  %1275 = vmatpush1.bf16.msra.mxu1 %v2475_v3 }
  0x39   : > { %1276 = vmatprep.subr.bf16.mxu1 %v2486_v8 }
  0x3b   : > { %2364 = vmatpush3.bf16.msra.mxu0 %v2458_v45 }
  0x3c   : > { %1487 = vmatprep.subr.bf16.mxu0 %v2471_v60  ;;  %1277 = vmatpush1.bf16.msra.mxu1 %v2484_v9 }
  0x3d   : > { %1014 = vmatmul.mubr.bf16.gmra.mxu0 %v2449_v46  ;;  %2373 = vmatprep.subr.bf16.mxu1 %v2491_v13 }
  0x3e   : > { %1079 = vmatmul.mubr.bf16.gmra.mxu1 %v2450_v47  ;;  %1021 = vmatprep.mubr.bf16.mxu0 %v2452_v48 }
  0x3f   : > { %1086 = vmatprep.mubr.bf16.mxu1 %v2454_v49 }
  0x45   : > { %1022 = vmatmul.mubr.bf16.gmra.mxu0 %v2456_v50 }
  0x46   : > { %1087 = vmatmul.mubr.bf16.gmra.mxu1 %v2457_v51  ;;  %2365 = vmatprep.mubr.msk.bf16.mxu0 %vm952_vm0, %v2459_v52 }
  0x47   : > { %1294 = vmatprep.mubr.bf16.mxu1 %v2515_v7 }
  0x4d   : > { %2366 = vmatmul.mubr.msk.bf16.vlgmr.msra.gmra.mxu0 %vm952_vm0, %v2460_v53 }
  0x4e   : > { %2369 = vmatprep.mubr.msk.bf16.mxu0 %vm952_vm0, %v2461_v54  ;;  %1488 = vmatpush1.bf16.msra.mxu0 %v2469_v61 }
  0x4f   : > { %1489 = vmatprep.subr.bf16.mxu0 %v2474_v62  ;;  %v2857_v62 = vld [vmem:[%s3048_s2] ss:$0 sm:$0xff] }
  0x52   : > { %1490 = vmatpush1.bf16.msra.mxu0 %v2472_v63 }
  0x53   : > { %1491 = vmatprep.subr.bf16.mxu0 %v2480_v0 }
  0x55   : > { %2370 = vmatmul.mubr.msk.bf16.gmra.mxu0 %vm952_vm0, %v2462_v55 }
  0x56   : > { %1492 = vmatpush1.bf16.msra.mxu0 %v2478_v1  ;;  %1511 = vmatprep.mubr.bf16.mxu0 %v2515_v7 }
  0x57   : > { %1493 = vmatprep.subr.bf16.mxu0 %v2483_v2 }
  0x5a   : > { %1494 = vmatpush1.bf16.msra.mxu0 %v2481_v5 }
  0x5b   : > { %2317 = vmatprep.subr.bf16.mxu0 %v2491_v13 }
  0x5d   : > { %2172 = vmatmul.mubr.msk.bf16.vlgmr.msra.gmra.mxu0 %vm952_vm0, %v2487_v6 }
  0x5e   : > { %1521 = vmatprep.mubr.bf16.mxu0 %v2515_v7  ;;  %2318 = vmatpush3.bf16.msra.mxu0 %v2815_v14 }
  0x5f   : > { %2319 = vmatprep.subr.bf16.mxu0 %v2820_v15 }
  0x62   : > { %2320 = vmatpush3.bf16.msra.mxu0 %v2826_v16 }
  0x63   : > { %2321 = vmatprep.subr.bf16.mxu0 %v2832_v17 }
  0x65   : > { %2173 = vmatmul.mubr.msk.bf16.gmra.mxu0 %vm952_vm0, %v2488_v10  ;;  %v2147_v10 = vld [vmem:[%s3049_s3] ss:$0 sm:$0xff] }
  0x66   : > { %1531 = vmatprep.mubr.bf16.mxu0 %v2515_v7  ;;  %2322 = vmatpush3.bf16.msra.mxu0 %v2839_v18 }
  0x67   : > { %2323 = vmatprep.subr.bf16.mxu0 %v2845_v19 }
  0x6a   : > { %2324 = vmatpush3.bf16.msra.mxu0 %v2851_v20 }
  0x6d   : > { %2174 = vmatmul.mubr.msk.bf16.gmra.mxu0 %vm952_vm0, %v2489_v11 }
  0x6e   : > { %1541 = vmatprep.mubr.bf16.mxu0 %v2515_v7 }
  0x75   : > { %2175 = vmatmul.mubr.msk.bf16.gmra.mxu0 %vm952_vm0, %v2490_v12 }
  0xed   : > { %v2245_v21 = vpop.f32.mrf.mxu0 }
  0xee   : > { %v2285_v22 = vpop.f32.mrf.mxu1 }
  0xef   : > { %v2246_v23 = vpop.f32.mrf.mxu0 }
  0xf0   : > { %v2286_v24 = vpop.f32.mrf.mxu1  ;;  %v2247_v46 = vadd.f32 %v2246_v23, %v2245_v21 }
  0xf1   : > { %v2248_v25 = vpop.f32.mrf.mxu0  ;;  %v2287_v47 = vadd.f32 %v2286_v24, %v2285_v22 }
  0xf2   : > { %v2288_v26 = vpop.f32.mrf.mxu1 }
  0xf3   : > { %v2249_v27 = vpop.f32.mrf.mxu0  ;;  %v1065_v52 = vadd.f32 %v2287_v47, %v2247_v46 }
  0xf4   : > { %v2289_v28 = vpop.f32.mrf.mxu1  ;;  %v2250_v53 = vadd.f32 %v2249_v27, %v2248_v25 }
  0xf5   : > { %v2251_v29 = vpop.f32.mrf.mxu0  ;;  %v2290_v54 = vadd.f32 %v2289_v28, %v2288_v26 }
  0xf6   : > { %v2291_v30 = vpop.f32.mrf.mxu1 }
  0xf7   : > { %v2252_v31 = vpop.f32.mrf.mxu0  ;;  %v1068_v2 = vadd.f32 %v2290_v54, %v2250_v53 }
  0xf8   : > { %v2292_v32 = vpop.f32.mrf.mxu1  ;;  %v2253_v59 = vadd.f32 %v2252_v31, %v2251_v29 }
  0xf9   : > { %v2254_v33 = vpop.f32.mrf.mxu0  ;;  %v2293_v60 = vadd.f32 %v2292_v32, %v2291_v30 }
  0xfa   : > { %v2294_v34 = vpop.f32.mrf.mxu1 }
  0xfb   : > { %v2255_v35 = vpop.f32.mrf.mxu0  ;;  %v1073_v5 = vadd.f32 %v2293_v60, %v2253_v59 }
  0xfc   : > { %v2295_v36 = vpop.f32.mrf.mxu1  ;;  %v2256_v55 = vadd.f32 %v2255_v35, %v2254_v33 }
  0xfd   : > { %v2257_v37 = vpop.f32.mrf.mxu0  ;;  %v2296_v56 = vadd.f32 %v2295_v36, %v2294_v34 }
  0xfe   : > { %v2297_v38 = vpop.f32.mrf.mxu1 }
  0xff   : > { %v2258_v39 = vpop.f32.mrf.mxu0  ;;  %v1076_v1 = vadd.f32 %v2296_v56, %v2256_v55 }
 0x100   : > { %v2298_v41 = vpop.f32.mrf.mxu1  ;;  %v2259_v25 = vadd.f32 %v2258_v39, %v2257_v37 }
 0x101   : > { %v2260_v40 = vpop.f32.mrf.mxu0  ;;  %v2299_v26 = vadd.f32 %v2298_v41, %v2297_v38 }
 0x102   : > { %v2300_v44 = vpop.f32.mrf.mxu1 }
 0x103   : > { %v2261_v42 = vpop.f32.mrf.mxu0 }
 0x104   : > { %v2301_v49 = vpop.f32.mrf.mxu1  ;;  %v2262_v9 = vadd.f32 %v2261_v42, %v2260_v40  ;;  %v1081_v42 = vadd.f32 %v2299_v26, %v2259_v25  ;;  %v1335_v25 = vld [vmem:[%s3051_s5] sm:$0x3] }
 0x105   : > { %v2263_v43 = vpop.f32.mrf.mxu0  ;;  %v2302_v12 = vadd.f32 %v2301_v49, %v2300_v44 }
 0x106   : > { %v2303_v57 = vpop.f32.mrf.mxu1 }
 0x107   : > { %v2264_v45 = vpop.f32.mrf.mxu0  ;;  %v1084_v33 = vadd.f32 %v2302_v12, %v2262_v9 }
 0x108   : > { %v2304_v3 = vpop.f32.mrf.mxu1  ;;  %v2265_v38 = vadd.f32 %v2264_v45, %v2263_v43 }
 0x109   : > { %v2266_v48 = vpop.f32.mrf.mxu0  ;;  %v2305_v39 = vadd.f32 %v2304_v3, %v2303_v57 }
 0x10a   : > { %v2306_v23 = vpop.f32.mrf.mxu1 }
 0x10b   : > { %v2267_v50 = vpop.f32.mrf.mxu0  ;;  %v1089_v54 = vadd.f32 %v2305_v39, %v2265_v38 }
 0x10c   : > { %v2307_v34 = vpop.f32.mrf.mxu1  ;;  %v2268_v46 = vadd.f32 %v2267_v50, %v2266_v48 }
 0x10d   : > { %v2367_v51 = vpop.f32.mrf.mxu0  ;;  %v2308_v47 = vadd.f32 %v2307_v34, %v2306_v23 }
 0x10e   : > { %v1138_v13 = vadd.f32 %v2367_v51, %v1073_v5 }
 0x10f   : > { %v1129_v58 = vpop.f32.mrf.mxu0  ;;  %v1092_v48 = vadd.f32 %v2308_v47, %v2268_v46 }
 0x110   : > { %v1130_v61 = vadd.f32 %v1129_v58, %v1065_v52  ;;  %v1169_v30 = vmul.f32 %v2857_v62, %v1138_v13  ;;  %v1552_v13 = vld [vmem:[%s3055_s9] sm:$0x3] }
 0x111   : > { %v2368_v63 = vpop.f32.mrf.mxu0 }
 0x112   : > { %v1167_v0 = vmul.f32 %v2857_v62, %v1130_v61  ;;  %v1141_v6 = vadd.f32 %v2368_v63, %v1076_v1  ;;  %v1184_v49 = vadd.f32 %v2147_v10, %v1169_v30  ;;  %v2503_v63 = vld [vmem:[%s3057_s11 + $0x48] sm:$0xff]   ;;  %v2505_v1 = vld [vmem:[%s3057_s11 + $0x40] sm:$0xff]  }
 0x113   : > { %v1132_v4 = vpop.f32.mrf.mxu0 }
 0x114   : > { %v1133_v8 = vadd.f32 %v1132_v4, %v1068_v2  ;;  %v1182_v21 = vadd.f32 %v2147_v10, %v1167_v0  ;;  %v1170_v27 = vmul.f32 %v2857_v62, %v1141_v6  ;;  %v1192_v52 = vmax.f32 %v1184_v49, 0.0  ;;  %v2504_v0 = vld [vmem:[%s3057_s11 + $0x8] sm:$0xff]   ;;  %v2506_v2 = vld [vmem:[%s3057_s11] sm:$0xff]  }
 0x115   : > { %v2371_v11 = vpop.f32.mrf.mxu0 }
 0x116   : > { %v1168_v22 = vmul.f32 %v2857_v62, %v1133_v8  ;;  %v1190_v31 = vmax.f32 %v1182_v21, 0.0  ;;  %v1185_v36 = vadd.f32 %v2147_v10, %v1170_v27  ;;  %v1337_v8 = vlaneseq  ;;  %v1363_v27 = vld [vmem:[%s3052_s6] sm:$0x3] }
 0x117   : > { %v1145_v24 = vpop.f32.mrf.mxu0 }
 0x118   : > { %v1183_v28 = vadd.f32 %v2147_v10, %v1168_v22  ;;  %v1146_v37 = vadd.f32 %v1145_v24, %v1081_v42  ;;  %v1193_v41 = vmax.f32 %v1185_v36, 0.0  ;;  %v1580_v24 = vld [vmem:[%s3056_s10] sm:$0x3] }
 0x119   : > { %v2372_v29 = vpop.f32.mrf.mxu0 }
 0x11a   : > { %v1191_v32 = vmax.f32 %v1183_v28, 0.0  ;;  %v1171_v53 = vmul.f32 %v2857_v62, %v1146_v37  ;;  %v1199_v50 = vpack.c.bf16 %v1193_v41, %v1192_v52  ;;  %v1157_v55 = vadd.f32 %v2372_v29, %v1092_v48 }
 0x11b   : > { %v1148_v35 = vpop.f32.mrf.mxu0 }
 0x11c   : > { %v1198_v40 = vpack.c.bf16 %v1191_v32, %v1190_v31  ;;  %v1149_v44 = vadd.f32 %v1148_v35, %v1084_v33  ;;  %v1186_v43 = vadd.f32 %v2147_v10, %v1171_v53 }
 0x11d   : > { %v1513_v3 = vpop.f32.mrf.mxu0 }
 0x11e   : > { %2156 = vmatmul.mubr.msk.bf16.vlgmr.msra.gmra.mxu1 %vm952_vm0, %v1198_v40  ;;  %v1172_v51 = vmul.f32 %v2857_v62, %v1149_v44  ;;  %v1194_v57 = vmax.f32 %v1186_v43, 0.0 }
 0x11f   : > { %1304 = vmatprep.mubr.bf16.mxu1 %v2515_v7  ;;  %2381 = vmatpush3.bf16.msra.mxu1 %v2815_v14  ;;  %v1154_v14 = vadd.f32 %v2371_v11, %v1089_v54  ;;  %v1515_v4 = vpop.f32.mrf.mxu0 }
 0x120   : > { %2374 = vmatprep.subr.bf16.mxu1 %v2820_v15  ;;  %v1187_v56 = vadd.f32 %v2147_v10, %v1172_v51  ;;  %v1174_v15 = vmul.f32 %v2857_v62, %v1157_v55 }
 0x121   : > { %v1517_v5 = vpop.f32.mrf.mxu0 }
 0x122   : > { %v1195_v45 = vmax.f32 %v1187_v56, 0.0  ;;  %v1189_v58 = vadd.f32 %v2147_v10, %v1174_v15 }
 0x123   : > { %2382 = vmatpush3.bf16.msra.mxu1 %v2826_v16  ;;  %v1173_v16 = vmul.f32 %v2857_v62, %v1154_v14  ;;  %v2502_v62 = vld [vmem:[%s3057_s11 + $0x10] sm:$0xff]   ;;  %v1519_v6 = vpop.f32.mrf.mxu0 }
 0x124   : > { %2375 = vmatprep.subr.bf16.mxu1 %v2832_v17  ;;  %v1200_v17 = vpack.c.bf16 %v1195_v45, %v1194_v57  ;;  %v1197_v60 = vmax.f32 %v1189_v58, 0.0 }
 0x125   : > { %v1188_v59 = vadd.f32 %v2147_v10, %v1173_v16  ;;  %v1523_v9 = vpop.f32.mrf.mxu0  ;;  %v1338_v10 = vshrl.u32 %v1337_v8, 7 }
 0x126   : > { %2157 = vmatmul.mubr.msk.bf16.gmra.mxu1 %vm952_vm0, %v1199_v50 }
 0x127   : > { %1314 = vmatprep.mubr.bf16.mxu1 %v2515_v7  ;;  %2383 = vmatpush3.bf16.msra.mxu1 %v2839_v18  ;;  %v1196_v61 = vmax.f32 %v1188_v59, 0.0  ;;  %v1525_v11 = vpop.f32.mrf.mxu0  ;;  %v1339_v12 = vsub.s32 0, %v1338_v10  ;;  %v1343_v23 = vsub.s32 1, %v1338_v10 }
 0x128   : > { %2376 = vmatprep.subr.bf16.mxu1 %v2845_v19  ;;  %v2499_v19 = vld [vmem:[%s3057_s11 + $0x58] sm:$0xff]  }
 0x129   : > { %v1201_v18 = vpack.c.bf16 %v1197_v60, %v1196_v61  ;;  %2325 = vmatprep.subr.bf16.mxu0 %v2499_v19  ;;  %v1527_v21 = vpop.f32.mrf.mxu0  ;;  %v2911_v22 = vrot.slane %v1552_v13, %v1339_v12  ;;  %v2923_v29 = vrot.slane %v1580_v24, %v1339_v12  ;;  %v2925_v30 = vrot.slane %v1552_v13, %v1343_v23 }
 0x12a   : > { %v2927_v31 = vrot.slane %v1335_v25, %v1339_v12  ;;  %v2929_v32 = vrot.slane %v1363_v27, %v1339_v12  ;;  %v2931_v33 = vrot.slane %v1335_v25, %v1343_v23  ;;  %v2933_v35 = vrot.slane %v1580_v24, %v1343_v23 }
 0x12b   : > { %2384 = vmatpush3.bf16.msra.mxu1 %v2851_v20  ;;  %v2500_v20 = vld [vmem:[%s3057_s11 + $0x18] sm:$0xff]   ;;  %v1529_v26 = vpop.f32.mrf.mxu0  ;;  %v1564_v28 = vmul.f32 %v2911_v22, %v1513_v3  ;;  %v1565_v42 = vmul.f32 %v2925_v30, %v1515_v4  ;;  %v2938_v46 = vrot.slane %v1363_v27, %v1343_v23  ;;  %v1566_v49 = vmul.f32 %v2911_v22, %v1517_v5 }
 0x12c   : > { %2377 = vmatprep.subr.bf16.mxu1 %v2499_v19  ;;  %2326 = vmatpush3.bf16.msra.mxu0 %v2500_v20  ;;  %v1567_v41 = vmul.f32 %v2925_v30, %v1519_v6  ;;  %v1568_v54 = vmul.f32 %v2911_v22, %v1523_v9  ;;  %v1569_v19 = vmul.f32 %v2925_v30, %v1525_v11 }
 0x12d   : > { %v1533_v34 = vpop.f32.mrf.mxu0  ;;  %v1592_v40 = vadd.f32 %v2923_v29, %v1564_v28  ;;  %v1593_v52 = vadd.f32 %v2933_v35, %v1565_v42  ;;  %v1594_v56 = vadd.f32 %v2923_v29, %v1566_v49 }
 0x12e   : > { %2158 = vmatmul.mubr.msk.bf16.gmra.mxu1 %vm952_vm0, %v1200_v17  ;;  %v1595_v57 = vadd.f32 %v2933_v35, %v1567_v41  ;;  %v1572_v4 = vmul.f32 %v2911_v22, %v1533_v34  ;;  %v1597_v10 = vadd.f32 %v2933_v35, %v1569_v19 }
 0x12f   : > { %1324 = vmatprep.mubr.bf16.mxu1 %v2515_v7  ;;  %2385 = vmatpush3.bf16.msra.mxu1 %v2500_v20  ;;  %v2501_v7 = vld [vmem:[%s3057_s11 + $0x50] sm:$0xff]   ;;  %v1535_v39 = vpop.f32.mrf.mxu0  ;;  %v1570_v20 = vmul.f32 %v2911_v22, %v1527_v21 }
 0x130   : > { %2327 = vmatprep.subr.bf16.mxu0 %v2501_v7  ;;  %2378 = vmatprep.subr.bf16.mxu1 %v2501_v7  ;;  %v1600_v34 = vadd.f32 %v2923_v29, %v1572_v4 }
 0x131   : > { %2328 = vmatpush3.bf16.msra.mxu0 %v2502_v62  ;;  %v1537_v45 = vpop.f32.mrf.mxu0  ;;  %v1598_v11 = vadd.f32 %v2923_v29, %v1570_v20 }
 0x132   : > { %2329 = vmatprep.subr.bf16.mxu0 %v2503_v63 }
 0x133   : > { %2386 = vmatpush3.bf16.msra.mxu1 %v2502_v62 }
 0x134   : > { %2379 = vmatprep.subr.bf16.mxu1 %v2503_v63 }
 0x135   : > { %2330 = vmatpush3.bf16.msra.mxu0 %v2504_v0 }
 0x136   : > { %2159 = vmatmul.mubr.msk.bf16.gmra.mxu1 %vm952_vm0, %v1201_v18  ;;  %2331 = vmatprep.subr.bf16.mxu0 %v2505_v1  ;;  %v1596_v18 = vadd.f32 %v2923_v29, %v1568_v54 }
 0x137   : > { %2387 = vmatpush3.bf16.msra.mxu1 %v2504_v0 }
 0x138   : > { %2380 = vmatprep.subr.bf16.mxu1 %v2505_v1  ;;  %v1571_v1 = vmul.f32 %v2925_v30, %v1529_v26 }
 0x139   : > { %2332 = vmatpush3.bf16.msra.mxu0 %v2506_v2 }
 0x13a   : > { %v1599_v24 = vadd.f32 %v2933_v35, %v1571_v1 }
 0x13b   : > { %2388 = vmatpush3.bf16.msra.mxu1 %v2506_v2  ;;  %v1539_v2 = vpop.f32.mrf.mxu0 }
 0x13d   : > { %v1543_v27 = vpop.f32.mrf.mxu0 }
 0x13f   : > { %v1545_v54 = vpop.f32.mrf.mxu0 }
 0x140   : > { %v1577_v19 = vmul.f32 %v2925_v30, %v1545_v54 }
 0x1de   : > { %v1296_v36 = vpop.f32.mrf.mxu1 }
 0x1df   : > { %v1347_v44 = vmul.f32 %v2927_v31, %v1296_v36  ;;  %v1573_v36 = vmul.f32 %v2925_v30, %v1535_v39 }
 0x1e0   : > { %v1298_v47 = vpop.f32.mrf.mxu1 }
 0x1e1   : > { %v1375_v37 = vadd.f32 %v2929_v32, %v1347_v44  ;;  %v1348_v38 = vmul.f32 %v2931_v33, %v1298_v47 }
 0x1e2   : > { %v1300_v51 = vpop.f32.mrf.mxu1 }
 0x1e3   : > { %v1608_v53 = vadd.f32 %v1592_v40, %v1375_v37  ;;  %v1376_v48 = vadd.f32 %v2938_v46, %v1348_v38  ;;  %v1349_v50 = vmul.f32 %v2927_v31, %v1300_v51  ;;  %v1574_v51 = vmul.f32 %v2911_v22, %v1537_v45 }
 0x1e4   : > { %v1302_v55 = vpop.f32.mrf.mxu1 }
 0x1e5   : > { %v1609_v14 = vadd.f32 %v1593_v52, %v1376_v48  ;;  %v1377_v43 = vadd.f32 %v2929_v32, %v1349_v50  ;;  %v1350_v15 = vmul.f32 %v2931_v33, %v1302_v55  ;;  %v1624_v16 = vmax.f32 %v1608_v53, 0.0 }
 0x1e6   : > { %v1306_v58 = vpop.f32.mrf.mxu1  ;;  %v1575_v52 = vmul.f32 %v2925_v30, %v1539_v2 }
 0x1e7   : > { %v1625_v17 = vmax.f32 %v1609_v14, 0.0  ;;  %v1610_v59 = vadd.f32 %v1594_v56, %v1377_v43  ;;  %v1378_v60 = vadd.f32 %v2938_v46, %v1350_v15  ;;  %v1351_v61 = vmul.f32 %v2927_v31, %v1306_v58 }
 0x1e8   : > { %v1308_v7 = vpop.f32.mrf.mxu1  ;;  %v1576_v14 = vmul.f32 %v2911_v22, %v1543_v27  ;;  %v1601_v15 = vadd.f32 %v2933_v35, %v1573_v36  ;;  %v1602_v58 = vadd.f32 %v2923_v29, %v1574_v51 }
 0x1e9   : > { %v2213_v62 = vpack.c.bf16 %v1625_v17, %v1624_v16  ;;  %v1611_v63 = vadd.f32 %v1595_v57, %v1378_v60  ;;  %v1379_v0 = vadd.f32 %v2929_v32, %v1351_v61  ;;  %v1352_v3 = vmul.f32 %v2931_v33, %v1308_v7  ;;  %v1547_v7 = vpop.f32.mrf.mxu0 }
 0x1ea   : > { %v1310_v5 = vpop.f32.mrf.mxu1  ;;  %v1626_v6 = vmax.f32 %v1610_v59, 0.0 }
 0x1eb   : > { %1688 = vst [vmem:[%s2958_s28] sm:$0xff] %v2213_v62  ;;  %v1627_v8 = vmax.f32 %v1611_v63, 0.0  ;;  %v1353_v9 = vmul.f32 %v2927_v31, %v1310_v5  ;;  %v1612_v12 = vadd.f32 %v1596_v18, %v1379_v0  ;;  %v1380_v13 = vadd.f32 %v2938_v46, %v1352_v3 }
 0x1ec   : > { %v1312_v21 = vpop.f32.mrf.mxu1  ;;  %v1640_v44 = vpack.c.bf16 %v1626_v6, %v1624_v16  ;;  %v1604_v63 = vadd.f32 %v2923_v29, %v1576_v14  ;;  %v2201_v14 = vld [vmem:[%s3059_s13] ss:$0 sm:$0xff] }
 0x1ed   : > { %v2214_v23 = vpack.c.bf16 %v1627_v8, %v1626_v6  ;;  %v1381_v25 = vadd.f32 %v2929_v32, %v1353_v9  ;;  %v1354_v26 = vmul.f32 %v2931_v33, %v1312_v21  ;;  %v1613_v28 = vadd.f32 %v1597_v10, %v1380_v13  ;;  %v1549_v21 = vpop.f32.mrf.mxu0 }
 0x1ee   : > { %v1316_v40 = vpop.f32.mrf.mxu1  ;;  %v1641_v42 = vpack.c.bf16 %v1627_v8, %v1625_v17  ;;  %v1628_v38 = vmax.f32 %v1612_v12, 0.0  ;;  %v1603_v17 = vadd.f32 %v2933_v35, %v1575_v52  ;;  %v1578_v9 = vmul.f32 %v2911_v22, %v1547_v7 }
 0x1ef   : > { %1689 = vst [vmem:[%s2958_s28 + $0x8] sm:$0xff] %v2214_v23  ;;  %v1614_v47 = vadd.f32 %v1598_v11, %v1381_v25  ;;  %v1382_v49 = vadd.f32 %v2938_v46, %v1354_v26  ;;  %v1355_v37 = vmul.f32 %v2927_v31, %v1316_v40  ;;  %v1629_v41 = vmax.f32 %v1613_v28, 0.0 }
 0x1f0   : > { %1856 = vmatprep.mubr.bf16.mxu0 %v1641_v42  ;;  %v1318_v53 = vpop.f32.mrf.mxu1  ;;  %v1605_v25 = vadd.f32 %v2933_v35, %v1577_v19  ;;  %v1579_v36 = vmul.f32 %v2925_v30, %v1549_v21 }
 0x1f1   : > { %v1615_v48 = vadd.f32 %v1599_v24, %v1382_v49  ;;  %v1383_v39 = vadd.f32 %v2929_v32, %v1355_v37  ;;  %v1356_v50 = vmul.f32 %v2931_v33, %v1318_v53  ;;  %1857 = vmatmul.mubr.bf16.vlgmr.msra.gmra.mxu0 %v1640_v44  ;;  %v2215_v55 = vpack.c.bf16 %v1629_v41, %v1628_v38 }
 0x1f2   : > { %v1630_v56 = vmax.f32 %v1614_v47, 0.0  ;;  %v1320_v43 = vpop.f32.mrf.mxu1  ;;  %v1606_v44 = vadd.f32 %v2923_v29, %v1578_v9 }
 0x1f3   : > { %v1631_v45 = vmax.f32 %v1615_v48, 0.0  ;;  %v1616_v16 = vadd.f32 %v1600_v34, %v1383_v39  ;;  %v1384_v57 = vadd.f32 %v2938_v46, %v1356_v50  ;;  %1690 = vst [vmem:[%s2958_s28 + $0x10] sm:$0xff] %v2215_v55  ;;  %v1357_v59 = vmul.f32 %v2927_v31, %v1320_v43 }
 0x1f4   : > { %v1322_v60 = vpop.f32.mrf.mxu1  ;;  %v1642_v62 = vpack.c.bf16 %v1630_v56, %v1628_v38 }
 0x1f5   : > { %v2216_v61 = vpack.c.bf16 %v1631_v45, %v1630_v56  ;;  %v1617_v18 = vadd.f32 %v1601_v15, %v1384_v57  ;;  %v1358_v20 = vmul.f32 %v2931_v33, %v1322_v60  ;;  %v1385_v0 = vadd.f32 %v2929_v32, %v1357_v59 }
 0x1f6   : > { %v1326_v1 = vpop.f32.mrf.mxu1  ;;  %v1643_v2 = vpack.c.bf16 %v1631_v45, %v1629_v41  ;;  %v1632_v3 = vmax.f32 %v1616_v16, 0.0 }
 0x1f7   : > { %1691 = vst [vmem:[%s2958_s28 + $0x18] sm:$0xff] %v2216_v61  ;;  %v1633_v4 = vmax.f32 %v1617_v18, 0.0  ;;  %v1386_v5 = vadd.f32 %v2938_v46, %v1358_v20  ;;  %v1359_v6 = vmul.f32 %v2927_v31, %v1326_v1  ;;  %v1618_v8 = vadd.f32 %v1602_v58, %v1385_v0 }
 0x1f8   : > { %1864 = vmatprep.mubr.bf16.mxu1 %v1643_v2  ;;  %v1328_v10 = vpop.f32.mrf.mxu1 }
 0x1f9   : > { %v2217_v11 = vpack.c.bf16 %v1633_v4, %v1632_v3  ;;  %v1619_v12 = vadd.f32 %v1603_v17, %v1386_v5  ;;  %v1387_v13 = vadd.f32 %v2929_v32, %v1359_v6  ;;  %v1360_v23 = vmul.f32 %v2931_v33, %v1328_v10  ;;  %1865 = vmatmul.mubr.bf16.vlgmr.msra.gmra.mxu1 %v1642_v62 }
 0x1fa   : > { %v1634_v24 = vmax.f32 %v1618_v8, 0.0  ;;  %v1330_v26 = vpop.f32.mrf.mxu1 }
 0x1fb   : > { %1692 = vst [vmem:[%s2958_s28 + $0x20] sm:$0xff] %v2217_v11  ;;  %v1635_v27 = vmax.f32 %v1619_v12, 0.0  ;;  %v1620_v28 = vadd.f32 %v1604_v63, %v1387_v13  ;;  %v1388_v22 = vadd.f32 %v2938_v46, %v1360_v23  ;;  %v1361_v34 = vmul.f32 %v2927_v31, %v1330_v26 }
 0x1fc   : > { %v1332_v40 = vpop.f32.mrf.mxu1  ;;  %v1644_v53 = vpack.c.bf16 %v1634_v24, %v1632_v3  ;;  %v1607_v31 = vadd.f32 %v2933_v35, %v1579_v36  ;;  %v2200_v35 = vld [vmem:[%s3058_s12] ss:$0 sm:$0xff] }
 0x1fd   : > { %v2218_v42 = vpack.c.bf16 %v1635_v27, %v1634_v24  ;;  %v1621_v47 = vadd.f32 %v1605_v25, %v1388_v22  ;;  %v1389_v49 = vadd.f32 %v2929_v32, %v1361_v34  ;;  %v1362_v37 = vmul.f32 %v2931_v33, %v1332_v40 }
 0x1fe   : > { %v1645_v38 = vpack.c.bf16 %v1635_v27, %v1633_v4  ;;  %v1636_v41 = vmax.f32 %v1620_v28, 0.0 }
 0x1ff   : > { %1693 = vst [vmem:[%s2958_s28 + $0x28] sm:$0xff] %v2218_v42  ;;  %v1637_v51 = vmax.f32 %v1621_v47, 0.0  ;;  %v1622_v52 = vadd.f32 %v1606_v44, %v1389_v49  ;;  %v1390_v30 = vadd.f32 %v2938_v46, %v1362_v37 }
 0x200   : > { %1872 = vmatprep.mubr.bf16.mxu1 %v1645_v38 }
 0x201   : > { %v2219_v48 = vpack.c.bf16 %v1637_v51, %v1636_v41  ;;  %1873 = vmatmul.mubr.bf16.gmra.mxu1 %v1644_v53  ;;  %v1623_v29 = vadd.f32 %v1607_v31, %v1390_v30  ;;  %v1638_v39 = vmax.f32 %v1622_v52, 0.0 }
 0x203   : > { %1694 = vst [vmem:[%s2958_s28 + $0x30] sm:$0xff] %v2219_v48  ;;  %v1639_v32 = vmax.f32 %v1623_v29, 0.0  ;;  %v1646_v54 = vpack.c.bf16 %v1638_v39, %v1636_v41 }
 0x205   : > { %v2220_v50 = vpack.c.bf16 %v1639_v32, %v1638_v39  ;;  %v1647_v33 = vpack.c.bf16 %v1639_v32, %v1637_v51 }
 0x207   : > { %1695 = vst [vmem:[%s2958_s28 + $0x38] sm:$0xff] %v2220_v50  ;;  %1880 = vmatprep.mubr.bf16.mxu1 %v1647_v33 }
 0x209   : > { %1881 = vmatmul.mubr.bf16.gmra.mxu1 %v1646_v54 }
 0x2b1   : > { %v2333_v55 = vpop.f32.mrf.mxu0 }
 0x2b3   : > { %v2334_v56 = vpop.f32.mrf.mxu0 }
 0x2b4   : > { %v2335_v46 = vadd.f32 %v2334_v56, %v2333_v55 }
 0x2b5   : > { %v2336_v43 = vpop.f32.mrf.mxu0 }
 0x2b6   : > { %v1896_v15 = vmul.f32 %v2335_v46, %v2200_v35 }
 0x2b7   : > { %v2337_v45 = vpop.f32.mrf.mxu0 }
 0x2b8   : > { %v1911_v16 = vadd.f32 %v2201_v14, %v1896_v15  ;;  %v2338_v57 = vadd.f32 %v2337_v45, %v2336_v43 }
 0x2b9   : > { %v2339_v58 = vpop.f32.mrf.mxu1 }
 0x2ba   : > { %v1919_v17 = vmax.f32 %v1911_v16, 0.0  ;;  %v1897_v59 = vmul.f32 %v2338_v57, %v2200_v35 }
 0x2bb   : > { %v2340_v60 = vpop.f32.mrf.mxu1 }
 0x2bc   : > { %v2221_v61 = vpack.c.bf16 %v1919_v17, %v1919_v17  ;;  %v1912_v18 = vadd.f32 %v2201_v14, %v1897_v59  ;;  %v2341_v19 = vadd.f32 %v2340_v60, %v2339_v58 }
 0x2bd   : > { %v2342_v20 = vpop.f32.mrf.mxu1 }
 0x2be   : > { %1960 = vst.msk [vmem:[%s3025_s20] sm:$0xf] %vm1959_vm1, %v2221_v61  ;;  %v1920_v7 = vmax.f32 %v1912_v18, 0.0  ;;  %v1898_v62 = vmul.f32 %v2341_v19, %v2200_v35 }
 0x2bf   : > { %v2343_v63 = vpop.f32.mrf.mxu1 }
 0x2c0   : > { %v2222_v0 = vpack.c.bf16 %v1920_v7, %v1920_v7  ;;  %v1913_v1 = vadd.f32 %v2201_v14, %v1898_v62  ;;  %v2344_v2 = vadd.f32 %v2343_v63, %v2342_v20 }
 0x2c1   : > { %v2345_v3 = vpop.f32.mrf.mxu1 }
 0x2c2   : > { %1961 = vst.msk [vmem:[%s3025_s20 + $0x4] sm:$0xf] %vm1959_vm1, %v2222_v0  ;;  %v1921_v4 = vmax.f32 %v1913_v1, 0.0  ;;  %v1899_v5 = vmul.f32 %v2344_v2, %v2200_v35 }
 0x2c3   : > { %v2346_v6 = vpop.f32.mrf.mxu1 }
 0x2c4   : > { %v2223_v8 = vpack.c.bf16 %v1921_v4, %v1921_v4  ;;  %v1914_v9 = vadd.f32 %v2201_v14, %v1899_v5  ;;  %v2347_v10 = vadd.f32 %v2346_v6, %v2345_v3 }
 0x2c5   : > { %v2348_v11 = vpop.f32.mrf.mxu1 }
 0x2c6   : > { %1962 = vst.msk [vmem:[%s3025_s20 + $0x8] sm:$0xf] %vm1959_vm1, %v2223_v8  ;;  %v1922_v12 = vmax.f32 %v1914_v9, 0.0  ;;  %v1900_v13 = vmul.f32 %v2347_v10, %v2200_v35 }
 0x2c7   : > { %v2349_v21 = vpop.f32.mrf.mxu1 }
 0x2c8   : > { %v2224_v23 = vpack.c.bf16 %v1922_v12, %v1922_v12  ;;  %v1915_v24 = vadd.f32 %v2201_v14, %v1900_v13  ;;  %v2350_v25 = vadd.f32 %v2349_v21, %v2348_v11 }
 0x2c9   : > { %v2351_v26 = vpop.f32.mrf.mxu1 }
 0x2ca   : > { %1963 = vst.msk [vmem:[%s3025_s20 + $0xc] sm:$0xf] %vm1959_vm1, %v2224_v23  ;;  %v1923_v27 = vmax.f32 %v1915_v24, 0.0  ;;  %v1901_v28 = vmul.f32 %v2350_v25, %v2200_v35 }
 0x2cb   : > { %v2352_v22 = vpop.f32.mrf.mxu1 }
 0x2cc   : > { %v2225_v34 = vpack.c.bf16 %v1923_v27, %v1923_v27  ;;  %v1916_v36 = vadd.f32 %v2201_v14, %v1901_v28  ;;  %v2353_v40 = vadd.f32 %v2352_v22, %v2351_v26 }
 0x2cd   : > { %v2354_v42 = vpop.f32.mrf.mxu1 }
 0x2ce   : > { %1964 = vst.msk [vmem:[%s3025_s20 + $0x10] sm:$0xf] %vm1959_vm1, %v2225_v34  ;;  %v1924_v44 = vmax.f32 %v1916_v36, 0.0  ;;  %v1902_v47 = vmul.f32 %v2353_v40, %v2200_v35 }
 0x2cf   : > { %v2355_v49 = vpop.f32.mrf.mxu1 }
 0x2d0   : > { %v2226_v37 = vpack.c.bf16 %v1924_v44, %v1924_v44  ;;  %v1917_v38 = vadd.f32 %v2201_v14, %v1902_v47  ;;  %v2356_v41 = vadd.f32 %v2355_v49, %v2354_v42 }
 0x2d2   : > { %1965 = vst.msk [vmem:[%s3025_s20 + $0x14] sm:$0xf] %vm1959_vm1, %v2226_v37  ;;  %v1925_v51 = vmax.f32 %v1917_v38, 0.0  ;;  %v1903_v52 = vmul.f32 %v2356_v41, %v2200_v35 }
 0x2d4   : > { %v2227_v53 = vpack.c.bf16 %v1925_v51, %v1925_v51  ;;  %v1918_v31 = vadd.f32 %v2201_v14, %v1903_v52 }
 0x2d6   : > { %1966 = vst.msk [vmem:[%s3025_s20 + $0x18] sm:$0xf] %vm1959_vm1, %v2227_v53  ;;  %v1926_v30 = vmax.f32 %v1918_v31, 0.0 }
 0x2d8   : > { %v2228_v48 = vpack.c.bf16 %v1926_v30, %v1926_v30 }
 0x2da   : > { %1967 = vst.msk [vmem:[%s3025_s20 + $0x1c] sm:$0xf] %vm1959_vm1, %v2228_v48 }
 0x2db PF: > { %s26_s18 = sadd.s32 1, %s2513_s18  }
 0x2dc   : > { %p23_p4 = scmp.ge.s32.totalorder %s26_s18, 4  }
 0x2de   :  { %25 = sbr.rel (!%p23_p4) target bundleno = 1 (0x1), region = 121 }

// kernel: base_net_forward.12
= control target key start
LH: loop header
LB: loop body
LE: loop exit
PB: predicated region body
PF: predicated region fallthrough
CT: control target
= control target key end

     0   :  { %s2264_s21 = smov 0   ;;  %s2608_s0 = inlined_call_operand.vmem [shape: bf16[128,576], index: 0, kind: input, shape index: {}]   ;;  %s2609_s1 = inlined_call_operand.vmem [shape: bf16[576,64], index: 1, kind: input, shape index: {}]   ;;  %s2610_s2 = inlined_call_operand.vmem [shape: f32[1,64], index: 2, kind: input, shape index: {}]   ;;  %s2611_s3 = inlined_call_operand.vmem [shape: f32[1,64], index: 3, kind: input, shape index: {}]   ;;  %s2612_s4 = inlined_call_operand.vmem [shape: bf16[64,256], index: 4, kind: input, shape index: {}]   ;;  %s2613_s5 = inlined_call_operand.vmem [shape: f32[1,256], index: 5, kind: input, shape index: {}]   ;;  %s2614_s6 = inlined_call_operand.vmem [shape: f32[1,256], index: 6, kind: input, shape index: {}]   ;;  %s2615_s7 = inlined_call_operand.vmem [shape: bf16[128,256], index: 7, kind: input, shape index: {}]   ;;  %s2616_s8 = inlined_call_operand.vmem [shape: bf16[256,64], index: 8, kind: input, shape index: {}]   ;;  %s2617_s9 = inlined_call_operand.vmem [shape: f32[1,64], index: 9, kind: input, shape index: {}]   ;;  %s2618_s10 = inlined_call_operand.vmem [shape: f32[1,64], index: 10, kind: input, shape index: {}]   ;;  %s2619_s11 = inlined_call_operand.vmem [shape: bf16[128,256], index: 11, kind: output, shape index: {0}]   ;;  %s2620_s12 = inlined_call_operand.vmem [shape: bf16[128,64], index: 12, kind: output, shape index: {1}]  }
   0x1 LB: > { %s1801_s22 = sadd.s32 4294967295, %s2196_s21   ;;  %p1805_p0 = scmp.ge.s32.totalorder %s2196_s21, 1  ;;  %s2196_s21 = sphi %s2264_s21, %s23_s21  }
   0x2   : > { %p379_p1 = scmp.lt.s32.totalorder %s2196_s21, 3 }
   0x4   : > { %p380_p2 = pnand %p1805_p0, %p379_p1 }
   0x5   : > { %s1806_s19 = sshll.u32 (!%p380_p2), %s1801_s22, 3 }
   0x6   : > { %383 = sbr.rel (%p380_p2) target bundleno = 732 (0x2dc), region = 64  ;;  %p435_p3 = scmp.lt.s32.totalorder (!%p380_p2), %s1806_s19, 15 }
   0xb   : > { %v2098_v0 = vld [vmem:[%s2609_s1 + $0x78] sm:$0xff]   ;;  %v2102_v4 = vld [vmem:[%s2609_s1 + $0x70] sm:$0xff]   ;;  %v2106_v8 = vld [vmem:[%s2609_s1 + $0x68] sm:$0xff]   ;;  %s2622_s19 = smov (!%p435_p3, %s1806_s19), 15  ;;  %vm874_vm0 = vcmask 523264   ;;  %vm1688_vm1 = vcmask 519168  }
   0xc   : > { %v2099_v1 = vld [vmem:[%s2609_s1 + $0xf8] sm:$0xff]   ;;  %1944 = vmatprep.subr.bf16.mxu0 %v2098_v0  ;;  %v2103_v5 = vld [vmem:[%s2609_s1 + $0xf0] sm:$0xff]   ;;  %v2107_v9 = vld [vmem:[%s2609_s1 + $0xe8] sm:$0xff]   ;;  %s2088_s28 = smul.u32 20, %s2622_s19  ;;  %v2198_v0 = vmov 0   ;;  %s1926_s25 = sshll.u32 %s2622_s19, 3 }
   0xd   : > { %v2100_v2 = vld [vmem:[%s2609_s1 + $0x38] sm:$0xff]   ;;  %1984 = vmatprep.subr.bf16.mxu1 %v2099_v1  ;;  %v2104_v6 = vld [vmem:[%s2609_s1 + $0x30] sm:$0xff]   ;;  %v2108_v10 = vld [vmem:[%s2609_s1 + $0x28] sm:$0xff]   ;;  %s2509_s29 = scalar_lea.vmem %s2615_s7, %s1926_s25  ;;  %s2539_s15 = scalar_lea.vmem %s2619_s11, %s1926_s25 }
   0xe   : > { %v2101_v3 = vld [vmem:[%s2609_s1 + $0xb8] sm:$0xff]   ;;  %1945 = vmatpush3.bf16.msra.mxu0 %v2100_v2  ;;  %v2105_v7 = vld [vmem:[%s2609_s1 + $0xb0] sm:$0xff]   ;;  %v2109_v11 = vld [vmem:[%s2609_s1 + $0xa8] sm:$0xff]   ;;  %s2370_s23 = scalar_lea.vmem %s2608_s0, %s2088_s28  ;;  %s1815_s24 = sshll.u32 %s2622_s19, 2 }
   0xf   : > { %1985 = vmatpush3.bf16.msra.mxu1 %v2101_v3  ;;  %1946 = vmatprep.subr.bf16.mxu0 %v2102_v4  ;;  %v2110_v12 = vld [vmem:[%s2609_s1 + $0x60] sm:$0xff]   ;;  %v2114_v16 = vld [vmem:[%s2609_s1 + $0x58] sm:$0xff]   ;;  %v2118_v20 = vld [vmem:[%s2609_s1 + $0x50] sm:$0xff]   ;;  %s2587_s27 = scalar_lea.vmem %s2620_s12, %s1815_s24 }
  0x10   : > { %1986 = vmatprep.subr.bf16.mxu1 %v2103_v5  ;;  %v2111_v13 = vld [vmem:[%s2609_s1 + $0xe0] sm:$0xff]   ;;  %v2115_v17 = vld [vmem:[%s2609_s1 + $0xd8] sm:$0xff]   ;;  %v2119_v21 = vld [vmem:[%s2609_s1 + $0xd0] sm:$0xff]  }
  0x11   : > { %v2112_v14 = vld [vmem:[%s2609_s1 + $0x20] sm:$0xff]   ;;  %v2116_v18 = vld [vmem:[%s2609_s1 + $0x18] sm:$0xff]   ;;  %v2120_v22 = vld [vmem:[%s2609_s1 + $0x10] sm:$0xff]  }
  0x12   : > { %1947 = vmatpush3.bf16.msra.mxu0 %v2104_v6  ;;  %v2113_v15 = vld [vmem:[%s2609_s1 + $0xa0] sm:$0xff]   ;;  %v2117_v19 = vld [vmem:[%s2609_s1 + $0x98] sm:$0xff]   ;;  %v2121_v23 = vld [vmem:[%s2609_s1 + $0x90] sm:$0xff]  }
  0x13   : > { %1987 = vmatpush3.bf16.msra.mxu1 %v2105_v7  ;;  %1948 = vmatprep.subr.bf16.mxu0 %v2106_v8  ;;  %v2122_v24 = vld [vmem:[%s2609_s1 + $0x48] sm:$0xff]   ;;  %v2126_v28 = vld [vmem:[%s2609_s1 + $0x40] sm:$0xff]   ;;  %v2136_v36 = vld [vmem:[%s2609_s1 + $0x118] sm:$0xff]  }
  0x14   : > { %1988 = vmatprep.subr.bf16.mxu1 %v2107_v9  ;;  %v2123_v25 = vld [vmem:[%s2609_s1 + $0xc8] sm:$0xff]   ;;  %v2127_v29 = vld [vmem:[%s2609_s1 + $0xc0] sm:$0xff]   ;;  %v2143_v39 = vld [vmem:[%s2609_s1 + $0x110] sm:$0xff]  }
  0x15   : > { %v2124_v26 = vld [vmem:[%s2609_s1 + $0x8] sm:$0xff]   ;;  %v2128_v30 = vld [vmem:[%s2609_s1] sm:$0xff]   ;;  %v2146_v43 = vld [vmem:[%s2370_s23 + $0x5c] ss:$20 sps:$4 sm:$0xff]  }
  0x16   : > { %1949 = vmatpush3.bf16.msra.mxu0 %v2108_v10  ;;  %v2125_v27 = vld [vmem:[%s2609_s1 + $0x88] sm:$0xff]   ;;  %v2129_v31 = vld [vmem:[%s2609_s1 + $0x80] sm:$0xff]   ;;  %v2151_v48 = vld [vmem:[%s2370_s23 + $0x7c] ss:$20 sps:$4 sm:$0xff]  }
  0x17   : > { %1989 = vmatpush3.bf16.msra.mxu1 %v2109_v11  ;;  %1950 = vmatprep.subr.bf16.mxu0 %v2110_v12  ;;  %v2130_v32 = vld [vmem:[%s2370_s23] ss:$20 sps:$4 sm:$0xff]   ;;  %v2132_v33 = vld [vmem:[%s2370_s23 + $0x4] ss:$20 sps:$4 sm:$0xff]   ;;  %v2133_v34 = vld [vmem:[%s2370_s23 + $0x8] ss:$20 sps:$4 sm:$0xff]  }
  0x18   : > { %1990 = vmatprep.subr.bf16.mxu1 %v2111_v13  ;;  %v2135_v35 = vld [vmem:[%s2370_s23 + $0xc] ss:$20 sps:$4 sm:$0xff]   ;;  %919 = vmatprep.mubr.bf16.mxu0 %v2132_v33  ;;  %v2139_v38 = vld [vmem:[%s2370_s23 + $0x34] ss:$20 sps:$4 sm:$0xff]   ;;  %v2142_v41 = vld [vmem:[%s2370_s23 + $0x30] ss:$20 sps:$4 sm:$0xff]  }
  0x19   : > { %984 = vmatprep.mubr.bf16.mxu1 %v2135_v35  ;;  %v2137_v37 = vld [vmem:[%s2370_s23 + $0x2c] ss:$20 sps:$4 sm:$0xff]   ;;  %v2141_v40 = vld [vmem:[%s2370_s23 + $0x28] ss:$20 sps:$4 sm:$0xff]   ;;  %v2148_v46 = vld [vmem:[%s2370_s23 + $0x50] ss:$20 sps:$4 sm:$0xff]  }
  0x1a   : > { %1951 = vmatpush3.bf16.msra.mxu0 %v2112_v14  ;;  %v2144_v42 = vld [vmem:[%s2370_s23 + $0x54] ss:$20 sps:$4 sm:$0xff]   ;;  %v2157_v45 = vld [vmem:[%s2609_s1 + $0x100] sm:$0xff]   ;;  %v2149_v47 = vld [vmem:[%s2370_s23 + $0x58] ss:$20 sps:$4 sm:$0xff]  }
  0x1b   : > { %1991 = vmatpush3.bf16.msra.mxu1 %v2113_v15  ;;  %1952 = vmatprep.subr.bf16.mxu0 %v2114_v16  ;;  %v2150_v44 = vld [vmem:[%s2609_s1 + $0x108] sm:$0xff]   ;;  %v2153_v49 = vld [vmem:[%s2370_s23 + $0x84] ss:$20 sps:$4 sm:$0xff]   ;;  %v2156_v51 = vld [vmem:[%s2370_s23 + $0x80] ss:$20 sps:$4 sm:$0xff]  }
  0x1c   : > { %1992 = vmatprep.subr.bf16.mxu1 %v2115_v17  ;;  %v2155_v50 = vld [vmem:[%s2370_s23 + $0x78] ss:$20 sps:$4 sm:$0xff]   ;;  %v2158_v52 = vld [vmem:[%s2370_s23 + $0x10] ss:$20 sps:$4 sm:$0xff]   ;;  %v2160_v54 = vld [vmem:[%s2370_s23 + $0x60] ss:$20 sps:$4 sm:$0xff]  }
  0x1d   : > { %v2159_v53 = vld [vmem:[%s2370_s23 + $0x38] ss:$20 sps:$4 sm:$0xff]   ;;  %v2161_v55 = vld [vmem:[%s2370_s23 + $0x88] ss:$20 sps:$4 sm:$0xff]   ;;  %v2176_v3 = vld [vmem:[%s2616_s8 + $0x70] sm:$0xff]  }
  0x1e   : > { %1953 = vmatpush3.bf16.msra.mxu0 %v2116_v18  ;;  %v2164_v56 = vld [vmem:[%s2612_s4 + $0x34] ss:$8 sps:$4 sm:$0xff]   ;;  %v2162_v57 = vld [vmem:[%s2612_s4 + $0x30] ss:$8 sps:$4 sm:$0xff]   ;;  %v2167_v58 = vld [vmem:[%s2612_s4 + $0x24] ss:$8 sps:$4 sm:$0xff]  }
  0x1f   : > { %1993 = vmatpush3.bf16.msra.mxu1 %v2117_v19  ;;  %1954 = vmatprep.subr.bf16.mxu0 %v2118_v20  ;;  %v2165_v59 = vld [vmem:[%s2612_s4 + $0x20] ss:$8 sps:$4 sm:$0xff]   ;;  %v2170_v60 = vld [vmem:[%s2612_s4 + $0x14] ss:$8 sps:$4 sm:$0xff]   ;;  %v2168_v61 = vld [vmem:[%s2612_s4 + $0x10] ss:$8 sps:$4 sm:$0xff]  }
  0x20   : > { %1994 = vmatprep.subr.bf16.mxu1 %v2119_v21  ;;  %v2173_v62 = vld [vmem:[%s2612_s4 + $0x4] ss:$8 sps:$4 sm:$0xff]   ;;  %v2171_v63 = vld [vmem:[%s2612_s4] ss:$8 sps:$4 sm:$0xff]   ;;  %v2174_v1 = vld [vmem:[%s2616_s8 + $0x78] sm:$0xff]  }
  0x21   : > { %v2175_v2 = vld [vmem:[%s2616_s8 + $0x38] sm:$0xff]   ;;  %v2177_v4 = vld [vmem:[%s2616_s8 + $0x30] sm:$0xff]   ;;  %v2178_v5 = vld [vmem:[%s2616_s8 + $0x68] sm:$0xff]  }
  0x22   : > { %1955 = vmatpush3.bf16.msra.mxu0 %v2120_v22  ;;  %v2179_v6 = vld [vmem:[%s2616_s8 + $0x28] sm:$0xff]   ;;  %v2180_v7 = vld [vmem:[%s2616_s8 + $0x60] sm:$0xff]  }
  0x23   : > { %1995 = vmatpush3.bf16.msra.mxu1 %v2121_v23  ;;  %1956 = vmatprep.subr.bf16.mxu0 %v2122_v24  ;;  %v2181_v8 = vld [vmem:[%s2616_s8 + $0x20] sm:$0xff]  }
  0x24   : > { %1996 = vmatprep.subr.bf16.mxu1 %v2123_v25 }
  0x26   : > { %1957 = vmatpush3.bf16.msra.mxu0 %v2124_v26 }
  0x27   : > { %1997 = vmatpush3.bf16.msra.mxu1 %v2125_v27  ;;  %1958 = vmatprep.subr.bf16.mxu0 %v2126_v28 }
  0x28   : > { %1998 = vmatprep.subr.bf16.mxu1 %v2127_v29 }
  0x2a   : > { %1959 = vmatpush3.bf16.msra.mxu0 %v2128_v30 }
  0x2b   : > { %1999 = vmatpush3.bf16.msra.mxu1 %v2129_v31  ;;  %2032 = vmatprep.subr.bf16.mxu0 %v2174_v1 }
  0x2c   : > { %2072 = vmatprep.subr.bf16.mxu1 %v2136_v36 }
  0x2d   : > { %920 = vmatmul.mubr.bf16.vlgmr.msra.gmra.mxu0 %v2130_v32 }
  0x2e   : > { %985 = vmatmul.mubr.bf16.vlgmr.msra.gmra.mxu1 %v2133_v34  ;;  %927 = vmatprep.mubr.bf16.mxu0 %v2137_v37 }
  0x2f   : > { %2073 = vmatpush3.bf16.msra.mxu1 %v2136_v36  ;;  %992 = vmatprep.mubr.bf16.mxu1 %v2139_v38 }
  0x30   : > { %2074 = vmatprep.subr.bf16.mxu1 %v2143_v39  ;;  %2033 = vmatpush3.bf16.msra.mxu0 %v2175_v2 }
  0x31   : > { %2034 = vmatprep.subr.bf16.mxu0 %v2176_v3 }
  0x33   : > { %2075 = vmatpush3.bf16.msra.mxu1 %v2143_v39 }
  0x34   : > { %2076 = vmatprep.subr.bf16.mxu1 %v2150_v44  ;;  %2035 = vmatpush3.bf16.msra.mxu0 %v2177_v4 }
  0x35   : > { %928 = vmatmul.mubr.bf16.gmra.mxu0 %v2141_v40  ;;  %2036 = vmatprep.subr.bf16.mxu0 %v2178_v5 }
  0x36   : > { %993 = vmatmul.mubr.bf16.gmra.mxu1 %v2142_v41  ;;  %935 = vmatprep.mubr.bf16.mxu0 %v2144_v42 }
  0x37   : > { %1000 = vmatprep.mubr.bf16.mxu1 %v2146_v43  ;;  %2077 = vmatpush3.bf16.msra.mxu1 %v2150_v44 }
  0x38   : > { %2078 = vmatprep.subr.bf16.mxu1 %v2157_v45  ;;  %2037 = vmatpush3.bf16.msra.mxu0 %v2179_v6 }
  0x39   : > { %2038 = vmatprep.subr.bf16.mxu0 %v2180_v7 }
  0x3b   : > { %2079 = vmatpush3.bf16.msra.mxu1 %v2157_v45 }
  0x3c   : > { %1192 = vmatprep.subr.bf16.mxu1 %v2164_v56  ;;  %2039 = vmatpush3.bf16.msra.mxu0 %v2181_v8 }
  0x3d   : > { %936 = vmatmul.mubr.bf16.gmra.mxu0 %v2148_v46 }
  0x3e   : > { %1001 = vmatmul.mubr.bf16.gmra.mxu1 %v2149_v47  ;;  %943 = vmatprep.mubr.bf16.mxu0 %v2151_v48 }
  0x3f   : > { %1008 = vmatprep.mubr.bf16.mxu1 %v2153_v49 }
  0x45   : > { %944 = vmatmul.mubr.bf16.gmra.mxu0 %v2155_v50  ;;  %v1876_v50 = vld [vmem:[%s2610_s2] ss:$0 sm:$0xff] }
  0x46   : > { %1009 = vmatmul.mubr.bf16.gmra.mxu1 %v2156_v51 }
  0x47   : > { %2080 = vmatprep.mubr.msk.bf16.mxu1 %vm874_vm0, %v2158_v52 }
  0x4e   : > { %2081 = vmatmul.mubr.msk.bf16.vlgmr.msra.gmra.mxu1 %vm874_vm0, %v2159_v53 }
  0x4f   : > { %2084 = vmatprep.mubr.msk.bf16.mxu1 %vm874_vm0, %v2160_v54  ;;  %1193 = vmatpush1.bf16.msra.mxu1 %v2162_v57 }
  0x50   : > { %1194 = vmatprep.subr.bf16.mxu1 %v2167_v58 }
  0x53   : > { %1195 = vmatpush1.bf16.msra.mxu1 %v2165_v59 }
  0x54   : > { %1196 = vmatprep.subr.bf16.mxu1 %v2170_v60 }
  0x56   : > { %2085 = vmatmul.mubr.msk.bf16.gmra.mxu1 %vm874_vm0, %v2161_v55 }
  0x57   : > { %1197 = vmatpush1.bf16.msra.mxu1 %v2168_v61  ;;  %1216 = vmatprep.mubr.bf16.mxu1 %v2198_v0  ;;  %v1877_v61 = vld [vmem:[%s2611_s3] ss:$0 sm:$0xff] }
  0x58   : > { %1198 = vmatprep.subr.bf16.mxu1 %v2173_v62 }
  0x5b   : > { %1199 = vmatpush1.bf16.msra.mxu1 %v2171_v63 }
  0xed   : > { %v1960_v9 = vpop.f32.mrf.mxu0 }
  0xee   : > { %v2000_v10 = vpop.f32.mrf.mxu1 }
  0xef   : > { %v1961_v11 = vpop.f32.mrf.mxu0 }
  0xf0   : > { %v2001_v12 = vpop.f32.mrf.mxu1  ;;  %v1962_v34 = vadd.f32 %v1961_v11, %v1960_v9 }
  0xf1   : > { %v1963_v13 = vpop.f32.mrf.mxu0  ;;  %v2002_v35 = vadd.f32 %v2001_v12, %v2000_v10 }
  0xf2   : > { %v2003_v14 = vpop.f32.mrf.mxu1 }
  0xf3   : > { %v1964_v15 = vpop.f32.mrf.mxu0  ;;  %v987_v40 = vadd.f32 %v2002_v35, %v1962_v34 }
  0xf4   : > { %v2004_v16 = vpop.f32.mrf.mxu1  ;;  %v1965_v41 = vadd.f32 %v1964_v15, %v1963_v13 }
  0xf5   : > { %v1966_v17 = vpop.f32.mrf.mxu0  ;;  %v2005_v42 = vadd.f32 %v2004_v16, %v2003_v14 }
  0xf6   : > { %v2006_v18 = vpop.f32.mrf.mxu1 }
  0xf7   : > { %v1967_v19 = vpop.f32.mrf.mxu0  ;;  %v990_v54 = vadd.f32 %v2005_v42, %v1965_v41 }
  0xf8   : > { %v2007_v20 = vpop.f32.mrf.mxu1  ;;  %v1968_v47 = vadd.f32 %v1967_v19, %v1966_v17 }
  0xf9   : > { %v1969_v21 = vpop.f32.mrf.mxu0  ;;  %v2008_v48 = vadd.f32 %v2007_v20, %v2006_v18 }
  0xfa   : > { %v2009_v22 = vpop.f32.mrf.mxu1 }
  0xfb   : > { %v1970_v23 = vpop.f32.mrf.mxu0  ;;  %v995_v57 = vadd.f32 %v2008_v48, %v1968_v47  ;;  %v2182_v48 = vld [vmem:[%s2616_s8 + $0x58] sm:$0xff]  }
  0xfc   : > { %v2010_v24 = vpop.f32.mrf.mxu1  ;;  %v1971_v43 = vadd.f32 %v1970_v23, %v1969_v21  ;;  %2040 = vmatprep.subr.bf16.mxu0 %v2182_v48 }
  0xfd   : > { %v1972_v26 = vpop.f32.mrf.mxu0  ;;  %v2011_v44 = vadd.f32 %v2010_v24, %v2009_v22 }
  0xfe   : > { %v2012_v25 = vpop.f32.mrf.mxu1 }
  0xff   : > { %v1973_v29 = vpop.f32.mrf.mxu0  ;;  %v998_v53 = vadd.f32 %v2011_v44, %v1971_v43 }
 0x100   : > { %v2013_v27 = vpop.f32.mrf.mxu1  ;;  %v1974_v6 = vadd.f32 %v1973_v29, %v1972_v26 }
 0x101   : > { %v1975_v32 = vpop.f32.mrf.mxu0  ;;  %v2014_v7 = vadd.f32 %v2013_v27, %v2012_v25 }
 0x102   : > { %v2015_v28 = vpop.f32.mrf.mxu1 }
 0x103   : > { %v1976_v37 = vpop.f32.mrf.mxu0  ;;  %v1003_v19 = vadd.f32 %v2014_v7, %v1974_v6  ;;  %v1314_v7 = vld [vmem:[%s2509_s29 + $0x8] sm:$0xff] }
 0x104   : > { %v2016_v30 = vpop.f32.mrf.mxu1  ;;  %v1977_v60 = vadd.f32 %v1976_v37, %v1975_v32 }
 0x105   : > { %v1978_v45 = vpop.f32.mrf.mxu0  ;;  %v2017_v63 = vadd.f32 %v2016_v30, %v2015_v28 }
 0x106   : > { %v2018_v31 = vpop.f32.mrf.mxu1 }
 0x107   : > { %v1979_v55 = vpop.f32.mrf.mxu0  ;;  %v1006_v14 = vadd.f32 %v2017_v63, %v1977_v60  ;;  %v1285_v60 = vld [vmem:[%s2614_s6] sm:$0x3] }
 0x108   : > { %v2019_v33 = vpop.f32.mrf.mxu1  ;;  %v1980_v25 = vadd.f32 %v1979_v55, %v1978_v45  ;;  %v1259_v55 = vlaneseq }
 0x109   : > { %v1981_v4 = vpop.f32.mrf.mxu0  ;;  %v2020_v26 = vadd.f32 %v2019_v33, %v2018_v31 }
 0x10a   : > { %v2021_v36 = vpop.f32.mrf.mxu1 }
 0x10b   : > { %v1982_v15 = vpop.f32.mrf.mxu0  ;;  %v1011_v35 = vadd.f32 %v2020_v26, %v1980_v25 }
 0x10c   : > { %v2022_v38 = vpop.f32.mrf.mxu1  ;;  %v1983_v21 = vadd.f32 %v1982_v15, %v1981_v4  ;;  %v1323_v15 = vunpack.c.l.bf16 %v1314_v7 }
 0x10d   : > { %v2023_v22 = vadd.f32 %v2022_v38, %v2021_v36 }
 0x10e   : > { %v2082_v39 = vpop.f32.mrf.mxu1 }
 0x10f   : > { %v1060_v1 = vadd.f32 %v2082_v39, %v995_v57  ;;  %v1014_v32 = vadd.f32 %v2023_v22, %v1983_v21  ;;  %v1315_v21 = vld [vmem:[%s2509_s29 + $0x10] sm:$0xff] }
 0x110   : > { %v1051_v46 = vpop.f32.mrf.mxu1 }
 0x111   : > { %v1052_v49 = vadd.f32 %v1051_v46, %v987_v40  ;;  %v1091_v11 = vmul.f32 %v1876_v50, %v1060_v1 }
 0x112   : > { %v2083_v51 = vpop.f32.mrf.mxu1 }
 0x113   : > { %v1089_v52 = vmul.f32 %v1876_v50, %v1052_v49  ;;  %v1063_v58 = vadd.f32 %v2083_v51, %v998_v53  ;;  %v1106_v23 = vadd.f32 %v1877_v61, %v1091_v11  ;;  %v2183_v49 = vld [vmem:[%s2616_s8 + $0x18] sm:$0xff]   ;;  %v2186_v51 = vld [vmem:[%s2616_s8 + $0x48] sm:$0xff]   ;;  %v2188_v53 = vld [vmem:[%s2616_s8 + $0x40] sm:$0xff]  }
 0x114   : > { %v1054_v56 = vpop.f32.mrf.mxu1  ;;  %2041 = vmatpush3.bf16.msra.mxu0 %v2183_v49 }
 0x115   : > { %v1055_v59 = vadd.f32 %v1054_v56, %v990_v54  ;;  %v1104_v2 = vadd.f32 %v1877_v61, %v1089_v52  ;;  %v1092_v8 = vmul.f32 %v1876_v50, %v1063_v58  ;;  %v1114_v29 = vmax.f32 %v1106_v23, 0.0  ;;  %v2187_v52 = vld [vmem:[%s2616_s8 + $0x8] sm:$0xff]   ;;  %v2189_v54 = vld [vmem:[%s2616_s8] sm:$0xff]  }
 0x116   : > { %v2086_v62 = vpop.f32.mrf.mxu1  ;;  %v1260_v56 = vshrl.u32 %v1259_v55, 7  ;;  %v1257_v58 = vld [vmem:[%s2613_s5] sm:$0x3] }
 0x117   : > { %v1090_v3 = vmul.f32 %v1876_v50, %v1055_v59  ;;  %v1112_v12 = vmax.f32 %v1104_v2, 0.0  ;;  %v1107_v17 = vadd.f32 %v1877_v61, %v1092_v8  ;;  %v1076_v40 = vadd.f32 %v2086_v62, %v1011_v35  ;;  %v1313_v62 = vld [vmem:[%s2509_s29] sm:$0xff] }
 0x118   : > { %v1067_v5 = vpop.f32.mrf.mxu1  ;;  %v1261_v57 = vsub.s32 0, %v1260_v56  ;;  %v1265_v59 = vsub.s32 1, %v1260_v56  ;;  %v1321_v4 = vunpack.c.l.bf16 %v1313_v62  ;;  %v1318_v56 = vld [vmem:[%s2509_s29 + $0x28] sm:$0xff] }
 0x119   : > { %v1105_v9 = vadd.f32 %v1877_v61, %v1090_v3  ;;  %v1068_v24 = vadd.f32 %v1067_v5, %v1003_v19  ;;  %v1115_v27 = vmax.f32 %v1107_v17, 0.0  ;;  %v1095_v42 = vmul.f32 %v1876_v50, %v1076_v40 }
 0x11a   : > { %v2087_v10 = vpop.f32.mrf.mxu1  ;;  %v2517_v63 = vrot.slane %v1285_v60, %v1261_v57  ;;  %v2519_v1 = vrot.slane %v1257_v58, %v1265_v59  ;;  %v2522_v5 = vrot.slane %v1285_v60, %v1265_v59 }
 0x11b   : > { %v1113_v13 = vmax.f32 %v1105_v9, 0.0  ;;  %v1093_v30 = vmul.f32 %v1876_v50, %v1068_v24  ;;  %v1121_v34 = vpack.c.bf16 %v1115_v27, %v1114_v29  ;;  %v1079_v37 = vadd.f32 %v2087_v10, %v1014_v32 }
 0x11c   : > { %v1070_v16 = vpop.f32.mrf.mxu1  ;;  %v1110_v44 = vadd.f32 %v1877_v61, %v1095_v42  ;;  %v1322_v10 = vunpack.c.h.bf16 %v1313_v62 }
 0x11d   : > { %v1120_v18 = vpack.c.bf16 %v1113_v13, %v1112_v12  ;;  %v1071_v20 = vadd.f32 %v1070_v16, %v1006_v14  ;;  %v1108_v41 = vadd.f32 %v1877_v61, %v1093_v30  ;;  %v1096_v36 = vmul.f32 %v1876_v50, %v1079_v37  ;;  %v1316_v30 = vld [vmem:[%s2509_s29 + $0x18] sm:$0xff] }
 0x11e   : > { %v1118_v46 = vmax.f32 %v1110_v44, 0.0  ;;  %v1327_v42 = vunpack.c.l.bf16 %v1316_v30  ;;  %v1328_v48 = vunpack.c.h.bf16 %v1316_v30  ;;  %v1320_v30 = vld [vmem:[%s2509_s29 + $0x38] sm:$0xff] }
 0x11f   : > { %1886 = vmatmul.mubr.msk.bf16.vlgmr.msra.gmra.mxu1 %vm874_vm0, %v1120_v18  ;;  %v1094_v28 = vmul.f32 %v1876_v50, %v1071_v20  ;;  %v1116_v43 = vmax.f32 %v1108_v41, 0.0  ;;  %v1111_v31 = vadd.f32 %v1877_v61, %v1096_v36  ;;  %v2185_v50 = vld [vmem:[%s2616_s8 + $0x10] sm:$0xff]   ;;  %v1324_v20 = vunpack.c.h.bf16 %v1314_v7 }
 0x120   : > { %1226 = vmatprep.mubr.bf16.mxu1 %v2198_v0 }
 0x121   : > { %v1109_v39 = vadd.f32 %v1877_v61, %v1094_v28  ;;  %v1119_v45 = vmax.f32 %v1111_v31, 0.0  ;;  %v2514_v61 = vrot.slane %v1257_v58, %v1261_v57  ;;  %v1325_v28 = vunpack.c.l.bf16 %v1315_v21 }
 0x123   : > { %v1117_v38 = vmax.f32 %v1109_v39, 0.0  ;;  %v1123_v47 = vpack.c.bf16 %v1119_v45, %v1118_v46  ;;  %v1326_v39 = vunpack.c.h.bf16 %v1315_v21 }
 0x125   : > { %v1122_v33 = vpack.c.bf16 %v1117_v38, %v1116_v43  ;;  %v1317_v43 = vld [vmem:[%s2509_s29 + $0x20] sm:$0xff] }
 0x127   : > { %1887 = vmatmul.mubr.msk.bf16.gmra.mxu1 %vm874_vm0, %v1121_v34 }
 0x128   : > { %1236 = vmatprep.mubr.bf16.mxu1 %v2198_v0 }
 0x12f   : > { %1888 = vmatmul.mubr.msk.bf16.gmra.mxu1 %vm874_vm0, %v1122_v33 }
 0x130   : > { %1246 = vmatprep.mubr.bf16.mxu1 %v2198_v0  ;;  %v2184_v0 = vld [vmem:[%s2616_s8 + $0x50] sm:$0xff]  }
 0x131   : > { %2042 = vmatprep.subr.bf16.mxu0 %v2184_v0 }
 0x132   : > { %2043 = vmatpush3.bf16.msra.mxu0 %v2185_v50  ;;  %v1329_v50 = vunpack.c.l.bf16 %v1317_v43 }
 0x133   : > { %2044 = vmatprep.subr.bf16.mxu0 %v2186_v51 }
 0x136   : > { %2045 = vmatpush3.bf16.msra.mxu0 %v2187_v52 }
 0x137   : > { %1889 = vmatmul.mubr.msk.bf16.gmra.mxu1 %vm874_vm0, %v1123_v47  ;;  %2046 = vmatprep.subr.bf16.mxu0 %v2188_v53 }
 0x13a   : > { %2047 = vmatpush3.bf16.msra.mxu0 %v2189_v54 }
 0x1df   : > { %v1218_v2 = vpop.f32.mrf.mxu1 }
 0x1e0   : > { %v1269_v3 = vmul.f32 %v2514_v61, %v1218_v2 }
 0x1e1   : > { %v1220_v6 = vpop.f32.mrf.mxu1 }
 0x1e2   : > { %v1297_v8 = vadd.f32 %v2517_v63, %v1269_v3  ;;  %v1270_v9 = vmul.f32 %v2519_v1, %v1220_v6  ;;  %v1330_v3 = vunpack.c.h.bf16 %v1317_v43  ;;  %v1335_v43 = vunpack.c.l.bf16 %v1320_v30 }
 0x1e3   : > { %v1222_v11 = vpop.f32.mrf.mxu1 }
 0x1e4   : > { %v1337_v12 = vadd.f32 %v1321_v4, %v1297_v8  ;;  %v1298_v13 = vadd.f32 %v2522_v5, %v1270_v9  ;;  %v1271_v14 = vmul.f32 %v2514_v61, %v1222_v11  ;;  %v1331_v8 = vunpack.c.l.bf16 %v1318_v56 }
 0x1e5   : > { %v1224_v16 = vpop.f32.mrf.mxu1 }
 0x1e6   : > { %v1338_v17 = vadd.f32 %v1322_v10, %v1298_v13  ;;  %v1299_v18 = vadd.f32 %v2517_v63, %v1271_v14  ;;  %v1272_v19 = vmul.f32 %v2519_v1, %v1224_v16  ;;  %v1353_v22 = vmax.f32 %v1337_v12, 0.0  ;;  %v1319_v13 = vld [vmem:[%s2509_s29 + $0x30] sm:$0xff] }
 0x1e7   : > { %v1228_v23 = vpop.f32.mrf.mxu1  ;;  %v1333_v21 = vunpack.c.l.bf16 %v1319_v13 }
 0x1e8   : > { %v1354_v24 = vmax.f32 %v1338_v17, 0.0  ;;  %v1339_v25 = vadd.f32 %v1323_v15, %v1299_v18  ;;  %v1300_v26 = vadd.f32 %v2522_v5, %v1272_v19  ;;  %v1273_v27 = vmul.f32 %v2514_v61, %v1228_v23 }
 0x1e9   : > { %v1230_v29 = vpop.f32.mrf.mxu1  ;;  %v1332_v18 = vunpack.c.h.bf16 %v1318_v56 }
 0x1ea   : > { %v1928_v32 = vpack.c.bf16 %v1354_v24, %v1353_v22  ;;  %v1340_v34 = vadd.f32 %v1324_v20, %v1300_v26  ;;  %v1301_v35 = vadd.f32 %v2517_v63, %v1273_v27  ;;  %v1274_v37 = vmul.f32 %v2519_v1, %v1230_v29 }
 0x1eb   : > { %v1232_v40 = vpop.f32.mrf.mxu1  ;;  %v1355_v41 = vmax.f32 %v1339_v25, 0.0 }
 0x1ec   : > { %1417 = vst [vmem:[%s2539_s15] sm:$0xff] %v1928_v32  ;;  %v1356_v36 = vmax.f32 %v1340_v34, 0.0  ;;  %v1275_v38 = vmul.f32 %v2514_v61, %v1232_v40  ;;  %v1341_v31 = vadd.f32 %v1325_v28, %v1301_v35  ;;  %v1302_v33 = vadd.f32 %v2522_v5, %v1274_v37 }
 0x1ed   : > { %v1234_v44 = vpop.f32.mrf.mxu1  ;;  %v1369_v52 = vpack.c.bf16 %v1355_v41, %v1353_v22  ;;  %v1334_v37 = vunpack.c.h.bf16 %v1319_v13 }
 0x1ee   : > { %v1929_v45 = vpack.c.bf16 %v1356_v36, %v1355_v41  ;;  %v1303_v46 = vadd.f32 %v2517_v63, %v1275_v38  ;;  %v1276_v47 = vmul.f32 %v2519_v1, %v1234_v44  ;;  %v1342_v49 = vadd.f32 %v1326_v39, %v1302_v33 }
 0x1ef   : > { %v1238_v0 = vpop.f32.mrf.mxu1  ;;  %v1370_v51 = vpack.c.bf16 %v1356_v36, %v1354_v24  ;;  %v1357_v57 = vmax.f32 %v1341_v31, 0.0 }
 0x1f0   : > { %1418 = vst [vmem:[%s2539_s15 + $0x8] sm:$0xff] %v1929_v45  ;;  %v1343_v53 = vadd.f32 %v1327_v42, %v1303_v46  ;;  %v1304_v54 = vadd.f32 %v2522_v5, %v1276_v47  ;;  %v1277_v55 = vmul.f32 %v2514_v61, %v1238_v0  ;;  %v1358_v58 = vmax.f32 %v1342_v49, 0.0 }
 0x1f1   : > { %1585 = vmatprep.mubr.bf16.mxu0 %v1370_v51  ;;  %v1240_v59 = vpop.f32.mrf.mxu1  ;;  %v1336_v47 = vunpack.c.h.bf16 %v1320_v30 }
 0x1f2   : > { %v1344_v60 = vadd.f32 %v1328_v48, %v1304_v54  ;;  %v1305_v62 = vadd.f32 %v2517_v63, %v1277_v55  ;;  %v1278_v2 = vmul.f32 %v2519_v1, %v1240_v59  ;;  %1586 = vmatmul.mubr.bf16.vlgmr.msra.gmra.mxu0 %v1369_v52  ;;  %v1930_v4 = vpack.c.bf16 %v1358_v58, %v1357_v57 }
 0x1f3   : > { %v1359_v6 = vmax.f32 %v1343_v53, 0.0  ;;  %v1242_v7 = vpop.f32.mrf.mxu1 }
 0x1f4   : > { %v1360_v9 = vmax.f32 %v1344_v60, 0.0  ;;  %v1345_v10 = vadd.f32 %v1329_v50, %v1305_v62  ;;  %v1306_v11 = vadd.f32 %v2522_v5, %v1278_v2  ;;  %v1279_v12 = vmul.f32 %v2514_v61, %v1242_v7  ;;  %1419 = vst [vmem:[%s2539_s15 + $0x10] sm:$0xff] %v1930_v4  ;;  %v1915_v62 = vld [vmem:[%s2618_s10] ss:$0 sm:$0xff] }
 0x1f5   : > { %v1244_v14 = vpop.f32.mrf.mxu1  ;;  %v1371_v23 = vpack.c.bf16 %v1359_v6, %v1357_v57 }
 0x1f6   : > { %v1931_v15 = vpack.c.bf16 %v1360_v9, %v1359_v6  ;;  %v1346_v16 = vadd.f32 %v1330_v3, %v1306_v11  ;;  %v1307_v17 = vadd.f32 %v2517_v63, %v1279_v12  ;;  %v1280_v19 = vmul.f32 %v2519_v1, %v1244_v14 }
 0x1f7   : > { %v1248_v20 = vpop.f32.mrf.mxu1  ;;  %v1372_v22 = vpack.c.bf16 %v1360_v9, %v1358_v58  ;;  %v1361_v24 = vmax.f32 %v1345_v10, 0.0 }
 0x1f8   : > { %1420 = vst [vmem:[%s2539_s15 + $0x18] sm:$0xff] %v1931_v15  ;;  %v1362_v25 = vmax.f32 %v1346_v16, 0.0  ;;  %v1347_v26 = vadd.f32 %v1331_v8, %v1307_v17  ;;  %v1281_v27 = vmul.f32 %v2514_v61, %v1248_v20  ;;  %v1308_v28 = vadd.f32 %v2522_v5, %v1280_v19 }
 0x1f9   : > { %1593 = vmatprep.mubr.bf16.mxu0 %v1372_v22  ;;  %v1250_v29 = vpop.f32.mrf.mxu1 }
 0x1fa   : > { %v1932_v32 = vpack.c.bf16 %v1362_v25, %v1361_v24  ;;  %v1309_v34 = vadd.f32 %v2517_v63, %v1281_v27  ;;  %v1282_v35 = vmul.f32 %v2519_v1, %v1250_v29  ;;  %1594 = vmatmul.mubr.bf16.gmra.mxu0 %v1371_v23  ;;  %v1363_v39 = vmax.f32 %v1347_v26, 0.0 }
 0x1fb   : > { %v1348_v40 = vadd.f32 %v1332_v18, %v1308_v28  ;;  %v1252_v41 = vpop.f32.mrf.mxu1 }
 0x1fc   : > { %1421 = vst [vmem:[%s2539_s15 + $0x20] sm:$0xff] %v1932_v32  ;;  %v1349_v36 = vadd.f32 %v1333_v21, %v1309_v34  ;;  %v1310_v38 = vadd.f32 %v2522_v5, %v1282_v35  ;;  %v1283_v42 = vmul.f32 %v2514_v61, %v1252_v41  ;;  %v1373_v0 = vpack.c.bf16 %v1363_v39, %v1361_v24 }
 0x1fd   : > { %v1364_v31 = vmax.f32 %v1348_v40, 0.0  ;;  %v1254_v33 = vpop.f32.mrf.mxu1 }
 0x1fe   : > { %v1350_v44 = vadd.f32 %v1334_v37, %v1310_v38  ;;  %v1311_v45 = vadd.f32 %v2517_v63, %v1283_v42  ;;  %v1284_v46 = vmul.f32 %v2519_v1, %v1254_v33  ;;  %v1365_v50 = vmax.f32 %v1349_v36, 0.0 }
 0x1ff   : > { %v1933_v48 = vpack.c.bf16 %v1364_v31, %v1363_v39  ;;  %v1374_v49 = vpack.c.bf16 %v1364_v31, %v1362_v25 }
 0x200   : > { %v1366_v51 = vmax.f32 %v1350_v44, 0.0  ;;  %v1351_v52 = vadd.f32 %v1335_v43, %v1311_v45  ;;  %v1312_v53 = vadd.f32 %v2522_v5, %v1284_v46  ;;  %v1914_v5 = vld [vmem:[%s2617_s9] ss:$0 sm:$0xff] }
 0x201   : > { %1422 = vst [vmem:[%s2539_s15 + $0x28] sm:$0xff] %v1933_v48  ;;  %1601 = vmatprep.mubr.bf16.mxu0 %v1374_v49 }
 0x202   : > { %v1934_v61 = vpack.c.bf16 %v1366_v51, %v1365_v50  ;;  %v1352_v54 = vadd.f32 %v1336_v47, %v1312_v53  ;;  %1602 = vmatmul.mubr.bf16.gmra.mxu0 %v1373_v0  ;;  %v1367_v55 = vmax.f32 %v1351_v52, 0.0 }
 0x204   : > { %1423 = vst [vmem:[%s2539_s15 + $0x30] sm:$0xff] %v1934_v61  ;;  %v1368_v63 = vmax.f32 %v1352_v54, 0.0  ;;  %v1375_v57 = vpack.c.bf16 %v1367_v55, %v1365_v50 }
 0x206   : > { %v1935_v1 = vpack.c.bf16 %v1368_v63, %v1367_v55  ;;  %v1376_v56 = vpack.c.bf16 %v1368_v63, %v1366_v51 }
 0x208   : > { %1424 = vst [vmem:[%s2539_s15 + $0x38] sm:$0xff] %v1935_v1  ;;  %1609 = vmatprep.mubr.bf16.mxu0 %v1376_v56 }
 0x20a   : > { %1610 = vmatmul.mubr.bf16.gmra.mxu0 %v1375_v57 }
 0x2b2   : > { %v2048_v58 = vpop.f32.mrf.mxu0 }
 0x2b4   : > { %v2049_v59 = vpop.f32.mrf.mxu0 }
 0x2b5   : > { %v2050_v60 = vadd.f32 %v2049_v59, %v2048_v58 }
 0x2b6   : > { %v2051_v2 = vpop.f32.mrf.mxu0 }
 0x2b7   : > { %v1625_v3 = vmul.f32 %v2050_v60, %v1914_v5 }
 0x2b8   : > { %v2052_v4 = vpop.f32.mrf.mxu0 }
 0x2b9   : > { %v1640_v6 = vadd.f32 %v1915_v62, %v1625_v3  ;;  %v2053_v7 = vadd.f32 %v2052_v4, %v2051_v2 }
 0x2ba   : > { %v2054_v8 = vpop.f32.mrf.mxu0 }
 0x2bb   : > { %v1648_v9 = vmax.f32 %v1640_v6, 0.0  ;;  %v1626_v10 = vmul.f32 %v2053_v7, %v1914_v5 }
 0x2bc   : > { %v2055_v11 = vpop.f32.mrf.mxu0 }
 0x2bd   : > { %v1936_v12 = vpack.c.bf16 %v1648_v9, %v1648_v9  ;;  %v1641_v13 = vadd.f32 %v1915_v62, %v1626_v10  ;;  %v2056_v14 = vadd.f32 %v2055_v11, %v2054_v8 }
 0x2be   : > { %v2057_v15 = vpop.f32.mrf.mxu0 }
 0x2bf   : > { %1689 = vst.msk [vmem:[%s2587_s27] sm:$0xf] %vm1688_vm1, %v1936_v12  ;;  %v1649_v16 = vmax.f32 %v1641_v13, 0.0  ;;  %v1627_v17 = vmul.f32 %v2056_v14, %v1914_v5 }
 0x2c0   : > { %v2058_v18 = vpop.f32.mrf.mxu0 }
 0x2c1   : > { %v1937_v19 = vpack.c.bf16 %v1649_v16, %v1649_v16  ;;  %v1642_v20 = vadd.f32 %v1915_v62, %v1627_v17  ;;  %v2059_v21 = vadd.f32 %v2058_v18, %v2057_v15 }
 0x2c2   : > { %v2060_v22 = vpop.f32.mrf.mxu0 }
 0x2c3   : > { %1690 = vst.msk [vmem:[%s2587_s27 + $0x4] sm:$0xf] %vm1688_vm1, %v1937_v19  ;;  %v1650_v23 = vmax.f32 %v1642_v20, 0.0  ;;  %v1628_v24 = vmul.f32 %v2059_v21, %v1914_v5 }
 0x2c4   : > { %v2061_v25 = vpop.f32.mrf.mxu0 }
 0x2c5   : > { %v1938_v26 = vpack.c.bf16 %v1650_v23, %v1650_v23  ;;  %v1643_v27 = vadd.f32 %v1915_v62, %v1628_v24  ;;  %v2062_v28 = vadd.f32 %v2061_v25, %v2060_v22 }
 0x2c6   : > { %v2063_v29 = vpop.f32.mrf.mxu0 }
 0x2c7   : > { %1691 = vst.msk [vmem:[%s2587_s27 + $0x8] sm:$0xf] %vm1688_vm1, %v1938_v26  ;;  %v1651_v30 = vmax.f32 %v1643_v27, 0.0  ;;  %v1629_v32 = vmul.f32 %v2062_v28, %v1914_v5 }
 0x2c8   : > { %v2064_v34 = vpop.f32.mrf.mxu0 }
 0x2c9   : > { %v1939_v35 = vpack.c.bf16 %v1651_v30, %v1651_v30  ;;  %v1644_v37 = vadd.f32 %v1915_v62, %v1629_v32  ;;  %v2065_v39 = vadd.f32 %v2064_v34, %v2063_v29 }
 0x2ca   : > { %v2066_v40 = vpop.f32.mrf.mxu0 }
 0x2cb   : > { %1692 = vst.msk [vmem:[%s2587_s27 + $0xc] sm:$0xf] %vm1688_vm1, %v1939_v35  ;;  %v1652_v41 = vmax.f32 %v1644_v37, 0.0  ;;  %v1630_v36 = vmul.f32 %v2065_v39, %v1914_v5 }
 0x2cc   : > { %v2067_v38 = vpop.f32.mrf.mxu0 }
 0x2cd   : > { %v1940_v42 = vpack.c.bf16 %v1652_v41, %v1652_v41  ;;  %v1645_v43 = vadd.f32 %v1915_v62, %v1630_v36  ;;  %v2068_v31 = vadd.f32 %v2067_v38, %v2066_v40 }
 0x2ce   : > { %v2069_v33 = vpop.f32.mrf.mxu0 }
 0x2cf   : > { %1693 = vst.msk [vmem:[%s2587_s27 + $0x10] sm:$0xf] %vm1688_vm1, %v1940_v42  ;;  %v1653_v44 = vmax.f32 %v1645_v43, 0.0  ;;  %v1631_v45 = vmul.f32 %v2068_v31, %v1914_v5 }
 0x2d0   : > { %v2070_v46 = vpop.f32.mrf.mxu0 }
 0x2d1   : > { %v1941_v47 = vpack.c.bf16 %v1653_v44, %v1653_v44  ;;  %v1646_v48 = vadd.f32 %v1915_v62, %v1631_v45  ;;  %v2071_v49 = vadd.f32 %v2070_v46, %v2069_v33 }
 0x2d3   : > { %1694 = vst.msk [vmem:[%s2587_s27 + $0x14] sm:$0xf] %vm1688_vm1, %v1941_v47  ;;  %v1654_v0 = vmax.f32 %v1646_v48, 0.0  ;;  %v1632_v50 = vmul.f32 %v2071_v49, %v1914_v5 }
 0x2d5   : > { %v1942_v51 = vpack.c.bf16 %v1654_v0, %v1654_v0  ;;  %v1647_v52 = vadd.f32 %v1915_v62, %v1632_v50 }
 0x2d7   : > { %1695 = vst.msk [vmem:[%s2587_s27 + $0x18] sm:$0xf] %vm1688_vm1, %v1942_v51  ;;  %v1655_v53 = vmax.f32 %v1647_v52, 0.0 }
 0x2d9   : > { %v1943_v61 = vpack.c.bf16 %v1655_v53, %v1655_v53 }
 0x2db   : > { %1696 = vst.msk [vmem:[%s2587_s27 + $0x1c] sm:$0xf] %vm1688_vm1, %v1943_v61 }
 0x2dc PF: > { %s23_s21 = sadd.s32 1, %s2196_s21  }
 0x2dd   : > { %p20_p4 = scmp.ge.s32.totalorder %s23_s21, 4  }
 0x2df   :  { %22 = sbr.rel (!%p20_p4) target bundleno = 1 (0x1), region = 109 }

// kernel: base_net_forward.13
= control target key start
LH: loop header
LB: loop body
LE: loop exit
PB: predicated region body
PF: predicated region fallthrough
CT: control target
= control target key end

     0   :  { %s2286_s21 = smov 0   ;;  %s2618_s0 = inlined_call_operand.vmem [shape: bf16[128,576], index: 0, kind: input, shape index: {}]   ;;  %s2619_s1 = inlined_call_operand.vmem [shape: bf16[576,64], index: 1, kind: input, shape index: {}]   ;;  %s2620_s2 = inlined_call_operand.vmem [shape: f32[1,64], index: 2, kind: input, shape index: {}]   ;;  %s2621_s3 = inlined_call_operand.vmem [shape: f32[1,64], index: 3, kind: input, shape index: {}]   ;;  %s2622_s4 = inlined_call_operand.vmem [shape: bf16[64,256], index: 4, kind: input, shape index: {}]   ;;  %s2623_s5 = inlined_call_operand.vmem [shape: f32[1,256], index: 5, kind: input, shape index: {}]   ;;  %s2624_s6 = inlined_call_operand.vmem [shape: f32[1,256], index: 6, kind: input, shape index: {}]   ;;  %s2625_s7 = inlined_call_operand.vmem [shape: bf16[128,256], index: 7, kind: input, shape index: {}]   ;;  %s2626_s8 = inlined_call_operand.vmem [shape: bf16[256,128], index: 8, kind: input, shape index: {}]   ;;  %s2627_s9 = inlined_call_operand.vmem [shape: f32[1,128], index: 9, kind: input, shape index: {}]   ;;  %s2628_s10 = inlined_call_operand.vmem [shape: f32[1,128], index: 10, kind: input, shape index: {}]   ;;  %s2629_s11 = inlined_call_operand.vmem [shape: bf16[128,256], index: 11, kind: output, shape index: {0}]   ;;  %s2630_s12 = inlined_call_operand.vmem [shape: bf16[128,128], index: 12, kind: output, shape index: {1}]  }
   0x1 LB: > { %s1800_s22 = sadd.s32 4294967295, %s2218_s21   ;;  %p1804_p0 = scmp.ge.s32.totalorder %s2218_s21, 1  ;;  %s2218_s21 = sphi %s2286_s21, %s23_s21  }
   0x2   : > { %p379_p1 = scmp.lt.s32.totalorder %s2218_s21, 3 }
   0x4   : > { %p380_p2 = pnand %p1804_p0, %p379_p1 }
   0x5   : > { %s1805_s19 = sshll.u32 (!%p380_p2), %s1800_s22, 3 }
   0x6   : > { %383 = sbr.rel (%p380_p2) target bundleno = 732 (0x2dc), region = 64  ;;  %p435_p3 = scmp.lt.s32.totalorder (!%p380_p2), %s1805_s19, 15 }
   0xb   : > { %v2120_v0 = vld [vmem:[%s2619_s1 + $0x78] sm:$0xff]   ;;  %v2124_v4 = vld [vmem:[%s2619_s1 + $0x70] sm:$0xff]   ;;  %v2128_v8 = vld [vmem:[%s2619_s1 + $0x68] sm:$0xff]   ;;  %s2632_s19 = smov (!%p435_p3, %s1805_s19), 15  ;;  %vm874_vm0 = vcmask 523264  }
   0xc   : > { %v2121_v1 = vld [vmem:[%s2619_s1 + $0xf8] sm:$0xff]   ;;  %1966 = vmatprep.subr.bf16.mxu0 %v2120_v0  ;;  %v2125_v5 = vld [vmem:[%s2619_s1 + $0xf0] sm:$0xff]   ;;  %v2129_v9 = vld [vmem:[%s2619_s1 + $0xe8] sm:$0xff]   ;;  %s2110_s28 = smul.u32 20, %s2632_s19  ;;  %v2220_v0 = vmov 0   ;;  %s1925_s25 = sshll.u32 %s2632_s19, 3 }
   0xd   : > { %v2122_v2 = vld [vmem:[%s2619_s1 + $0x38] sm:$0xff]   ;;  %2006 = vmatprep.subr.bf16.mxu1 %v2121_v1  ;;  %v2126_v6 = vld [vmem:[%s2619_s1 + $0x30] sm:$0xff]   ;;  %v2130_v10 = vld [vmem:[%s2619_s1 + $0x28] sm:$0xff]   ;;  %s2531_s29 = scalar_lea.vmem %s2625_s7, %s1925_s25  ;;  %s2561_s15 = scalar_lea.vmem %s2629_s11, %s1925_s25 }
   0xe   : > { %v2123_v3 = vld [vmem:[%s2619_s1 + $0xb8] sm:$0xff]   ;;  %1967 = vmatpush3.bf16.msra.mxu0 %v2122_v2  ;;  %v2127_v7 = vld [vmem:[%s2619_s1 + $0xb0] sm:$0xff]   ;;  %v2131_v11 = vld [vmem:[%s2619_s1 + $0xa8] sm:$0xff]   ;;  %s2392_s23 = scalar_lea.vmem %s2618_s0, %s2110_s28  ;;  %s1814_s24 = sshll.u32 %s2632_s19, 2 }
   0xf   : > { %2007 = vmatpush3.bf16.msra.mxu1 %v2123_v3  ;;  %1968 = vmatprep.subr.bf16.mxu0 %v2124_v4  ;;  %v2132_v12 = vld [vmem:[%s2619_s1 + $0x60] sm:$0xff]   ;;  %v2136_v16 = vld [vmem:[%s2619_s1 + $0x58] sm:$0xff]   ;;  %v2140_v20 = vld [vmem:[%s2619_s1 + $0x50] sm:$0xff]   ;;  %s2609_s27 = scalar_lea.vmem %s2630_s12, %s1814_s24 }
  0x10   : > { %2008 = vmatprep.subr.bf16.mxu1 %v2125_v5  ;;  %v2133_v13 = vld [vmem:[%s2619_s1 + $0xe0] sm:$0xff]   ;;  %v2137_v17 = vld [vmem:[%s2619_s1 + $0xd8] sm:$0xff]   ;;  %v2141_v21 = vld [vmem:[%s2619_s1 + $0xd0] sm:$0xff]  }
  0x11   : > { %v2134_v14 = vld [vmem:[%s2619_s1 + $0x20] sm:$0xff]   ;;  %v2138_v18 = vld [vmem:[%s2619_s1 + $0x18] sm:$0xff]   ;;  %v2142_v22 = vld [vmem:[%s2619_s1 + $0x10] sm:$0xff]  }
  0x12   : > { %1969 = vmatpush3.bf16.msra.mxu0 %v2126_v6  ;;  %v2135_v15 = vld [vmem:[%s2619_s1 + $0xa0] sm:$0xff]   ;;  %v2139_v19 = vld [vmem:[%s2619_s1 + $0x98] sm:$0xff]   ;;  %v2143_v23 = vld [vmem:[%s2619_s1 + $0x90] sm:$0xff]  }
  0x13   : > { %2009 = vmatpush3.bf16.msra.mxu1 %v2127_v7  ;;  %1970 = vmatprep.subr.bf16.mxu0 %v2128_v8  ;;  %v2144_v24 = vld [vmem:[%s2619_s1 + $0x48] sm:$0xff]   ;;  %v2148_v28 = vld [vmem:[%s2619_s1 + $0x40] sm:$0xff]   ;;  %v2158_v36 = vld [vmem:[%s2619_s1 + $0x118] sm:$0xff]  }
  0x14   : > { %2010 = vmatprep.subr.bf16.mxu1 %v2129_v9  ;;  %v2145_v25 = vld [vmem:[%s2619_s1 + $0xc8] sm:$0xff]   ;;  %v2149_v29 = vld [vmem:[%s2619_s1 + $0xc0] sm:$0xff]   ;;  %v2165_v39 = vld [vmem:[%s2619_s1 + $0x110] sm:$0xff]  }
  0x15   : > { %v2146_v26 = vld [vmem:[%s2619_s1 + $0x8] sm:$0xff]   ;;  %v2150_v30 = vld [vmem:[%s2619_s1] sm:$0xff]   ;;  %v2168_v43 = vld [vmem:[%s2392_s23 + $0x5c] ss:$20 sps:$4 sm:$0xff]  }
  0x16   : > { %1971 = vmatpush3.bf16.msra.mxu0 %v2130_v10  ;;  %v2147_v27 = vld [vmem:[%s2619_s1 + $0x88] sm:$0xff]   ;;  %v2151_v31 = vld [vmem:[%s2619_s1 + $0x80] sm:$0xff]   ;;  %v2173_v48 = vld [vmem:[%s2392_s23 + $0x7c] ss:$20 sps:$4 sm:$0xff]  }
  0x17   : > { %2011 = vmatpush3.bf16.msra.mxu1 %v2131_v11  ;;  %1972 = vmatprep.subr.bf16.mxu0 %v2132_v12  ;;  %v2152_v32 = vld [vmem:[%s2392_s23] ss:$20 sps:$4 sm:$0xff]   ;;  %v2154_v33 = vld [vmem:[%s2392_s23 + $0x4] ss:$20 sps:$4 sm:$0xff]   ;;  %v2155_v34 = vld [vmem:[%s2392_s23 + $0x8] ss:$20 sps:$4 sm:$0xff]  }
  0x18   : > { %2012 = vmatprep.subr.bf16.mxu1 %v2133_v13  ;;  %v2157_v35 = vld [vmem:[%s2392_s23 + $0xc] ss:$20 sps:$4 sm:$0xff]   ;;  %919 = vmatprep.mubr.bf16.mxu0 %v2154_v33  ;;  %v2161_v38 = vld [vmem:[%s2392_s23 + $0x34] ss:$20 sps:$4 sm:$0xff]   ;;  %v2164_v41 = vld [vmem:[%s2392_s23 + $0x30] ss:$20 sps:$4 sm:$0xff]  }
  0x19   : > { %984 = vmatprep.mubr.bf16.mxu1 %v2157_v35  ;;  %v2159_v37 = vld [vmem:[%s2392_s23 + $0x2c] ss:$20 sps:$4 sm:$0xff]   ;;  %v2163_v40 = vld [vmem:[%s2392_s23 + $0x28] ss:$20 sps:$4 sm:$0xff]   ;;  %v2170_v46 = vld [vmem:[%s2392_s23 + $0x50] ss:$20 sps:$4 sm:$0xff]  }
  0x1a   : > { %1973 = vmatpush3.bf16.msra.mxu0 %v2134_v14  ;;  %v2166_v42 = vld [vmem:[%s2392_s23 + $0x54] ss:$20 sps:$4 sm:$0xff]   ;;  %v2179_v45 = vld [vmem:[%s2619_s1 + $0x100] sm:$0xff]   ;;  %v2171_v47 = vld [vmem:[%s2392_s23 + $0x58] ss:$20 sps:$4 sm:$0xff]  }
  0x1b   : > { %2013 = vmatpush3.bf16.msra.mxu1 %v2135_v15  ;;  %1974 = vmatprep.subr.bf16.mxu0 %v2136_v16  ;;  %v2172_v44 = vld [vmem:[%s2619_s1 + $0x108] sm:$0xff]   ;;  %v2175_v49 = vld [vmem:[%s2392_s23 + $0x84] ss:$20 sps:$4 sm:$0xff]   ;;  %v2178_v51 = vld [vmem:[%s2392_s23 + $0x80] ss:$20 sps:$4 sm:$0xff]  }
  0x1c   : > { %2014 = vmatprep.subr.bf16.mxu1 %v2137_v17  ;;  %v2177_v50 = vld [vmem:[%s2392_s23 + $0x78] ss:$20 sps:$4 sm:$0xff]   ;;  %v2180_v52 = vld [vmem:[%s2392_s23 + $0x10] ss:$20 sps:$4 sm:$0xff]   ;;  %v2182_v54 = vld [vmem:[%s2392_s23 + $0x60] ss:$20 sps:$4 sm:$0xff]  }
  0x1d   : > { %v2181_v53 = vld [vmem:[%s2392_s23 + $0x38] ss:$20 sps:$4 sm:$0xff]   ;;  %v2183_v55 = vld [vmem:[%s2392_s23 + $0x88] ss:$20 sps:$4 sm:$0xff]   ;;  %v2198_v3 = vld [vmem:[%s2626_s8 + $0x70] sm:$0xff]  }
  0x1e   : > { %1975 = vmatpush3.bf16.msra.mxu0 %v2138_v18  ;;  %v2186_v56 = vld [vmem:[%s2622_s4 + $0x34] ss:$8 sps:$4 sm:$0xff]   ;;  %v2184_v57 = vld [vmem:[%s2622_s4 + $0x30] ss:$8 sps:$4 sm:$0xff]   ;;  %v2189_v58 = vld [vmem:[%s2622_s4 + $0x24] ss:$8 sps:$4 sm:$0xff]  }
  0x1f   : > { %2015 = vmatpush3.bf16.msra.mxu1 %v2139_v19  ;;  %1976 = vmatprep.subr.bf16.mxu0 %v2140_v20  ;;  %v2187_v59 = vld [vmem:[%s2622_s4 + $0x20] ss:$8 sps:$4 sm:$0xff]   ;;  %v2192_v60 = vld [vmem:[%s2622_s4 + $0x14] ss:$8 sps:$4 sm:$0xff]   ;;  %v2190_v61 = vld [vmem:[%s2622_s4 + $0x10] ss:$8 sps:$4 sm:$0xff]  }
  0x20   : > { %2016 = vmatprep.subr.bf16.mxu1 %v2141_v21  ;;  %v2195_v62 = vld [vmem:[%s2622_s4 + $0x4] ss:$8 sps:$4 sm:$0xff]   ;;  %v2193_v63 = vld [vmem:[%s2622_s4] ss:$8 sps:$4 sm:$0xff]   ;;  %v2196_v1 = vld [vmem:[%s2626_s8 + $0x78] sm:$0xff]  }
  0x21   : > { %v2197_v2 = vld [vmem:[%s2626_s8 + $0x38] sm:$0xff]   ;;  %v2199_v4 = vld [vmem:[%s2626_s8 + $0x30] sm:$0xff]   ;;  %v2200_v5 = vld [vmem:[%s2626_s8 + $0x68] sm:$0xff]  }
  0x22   : > { %1977 = vmatpush3.bf16.msra.mxu0 %v2142_v22  ;;  %v2201_v6 = vld [vmem:[%s2626_s8 + $0x28] sm:$0xff]   ;;  %v2202_v7 = vld [vmem:[%s2626_s8 + $0x60] sm:$0xff]  }
  0x23   : > { %2017 = vmatpush3.bf16.msra.mxu1 %v2143_v23  ;;  %1978 = vmatprep.subr.bf16.mxu0 %v2144_v24  ;;  %v2203_v8 = vld [vmem:[%s2626_s8 + $0x20] sm:$0xff]  }
  0x24   : > { %2018 = vmatprep.subr.bf16.mxu1 %v2145_v25 }
  0x26   : > { %1979 = vmatpush3.bf16.msra.mxu0 %v2146_v26 }
  0x27   : > { %2019 = vmatpush3.bf16.msra.mxu1 %v2147_v27  ;;  %1980 = vmatprep.subr.bf16.mxu0 %v2148_v28 }
  0x28   : > { %2020 = vmatprep.subr.bf16.mxu1 %v2149_v29 }
  0x2a   : > { %1981 = vmatpush3.bf16.msra.mxu0 %v2150_v30 }
  0x2b   : > { %2021 = vmatpush3.bf16.msra.mxu1 %v2151_v31  ;;  %2054 = vmatprep.subr.bf16.mxu0 %v2196_v1 }
  0x2c   : > { %2094 = vmatprep.subr.bf16.mxu1 %v2158_v36 }
  0x2d   : > { %920 = vmatmul.mubr.bf16.vlgmr.msra.gmra.mxu0 %v2152_v32 }
  0x2e   : > { %985 = vmatmul.mubr.bf16.vlgmr.msra.gmra.mxu1 %v2155_v34  ;;  %927 = vmatprep.mubr.bf16.mxu0 %v2159_v37 }
  0x2f   : > { %2095 = vmatpush3.bf16.msra.mxu1 %v2158_v36  ;;  %992 = vmatprep.mubr.bf16.mxu1 %v2161_v38 }
  0x30   : > { %2096 = vmatprep.subr.bf16.mxu1 %v2165_v39  ;;  %2055 = vmatpush3.bf16.msra.mxu0 %v2197_v2 }
  0x31   : > { %2056 = vmatprep.subr.bf16.mxu0 %v2198_v3 }
  0x33   : > { %2097 = vmatpush3.bf16.msra.mxu1 %v2165_v39 }
  0x34   : > { %2098 = vmatprep.subr.bf16.mxu1 %v2172_v44  ;;  %2057 = vmatpush3.bf16.msra.mxu0 %v2199_v4 }
  0x35   : > { %928 = vmatmul.mubr.bf16.gmra.mxu0 %v2163_v40  ;;  %2058 = vmatprep.subr.bf16.mxu0 %v2200_v5 }
  0x36   : > { %993 = vmatmul.mubr.bf16.gmra.mxu1 %v2164_v41  ;;  %935 = vmatprep.mubr.bf16.mxu0 %v2166_v42 }
  0x37   : > { %1000 = vmatprep.mubr.bf16.mxu1 %v2168_v43  ;;  %2099 = vmatpush3.bf16.msra.mxu1 %v2172_v44 }
  0x38   : > { %2100 = vmatprep.subr.bf16.mxu1 %v2179_v45  ;;  %2059 = vmatpush3.bf16.msra.mxu0 %v2201_v6 }
  0x39   : > { %2060 = vmatprep.subr.bf16.mxu0 %v2202_v7 }
  0x3b   : > { %2101 = vmatpush3.bf16.msra.mxu1 %v2179_v45 }
  0x3c   : > { %1192 = vmatprep.subr.bf16.mxu1 %v2186_v56  ;;  %2061 = vmatpush3.bf16.msra.mxu0 %v2203_v8 }
  0x3d   : > { %936 = vmatmul.mubr.bf16.gmra.mxu0 %v2170_v46 }
  0x3e   : > { %1001 = vmatmul.mubr.bf16.gmra.mxu1 %v2171_v47  ;;  %943 = vmatprep.mubr.bf16.mxu0 %v2173_v48 }
  0x3f   : > { %1008 = vmatprep.mubr.bf16.mxu1 %v2175_v49 }
  0x45   : > { %944 = vmatmul.mubr.bf16.gmra.mxu0 %v2177_v50  ;;  %v1875_v50 = vld [vmem:[%s2620_s2] ss:$0 sm:$0xff] }
  0x46   : > { %1009 = vmatmul.mubr.bf16.gmra.mxu1 %v2178_v51 }
  0x47   : > { %2102 = vmatprep.mubr.msk.bf16.mxu1 %vm874_vm0, %v2180_v52 }
  0x4e   : > { %2103 = vmatmul.mubr.msk.bf16.vlgmr.msra.gmra.mxu1 %vm874_vm0, %v2181_v53 }
  0x4f   : > { %2106 = vmatprep.mubr.msk.bf16.mxu1 %vm874_vm0, %v2182_v54  ;;  %1193 = vmatpush1.bf16.msra.mxu1 %v2184_v57 }
  0x50   : > { %1194 = vmatprep.subr.bf16.mxu1 %v2189_v58 }
  0x53   : > { %1195 = vmatpush1.bf16.msra.mxu1 %v2187_v59 }
  0x54   : > { %1196 = vmatprep.subr.bf16.mxu1 %v2192_v60 }
  0x56   : > { %2107 = vmatmul.mubr.msk.bf16.gmra.mxu1 %vm874_vm0, %v2183_v55 }
  0x57   : > { %1197 = vmatpush1.bf16.msra.mxu1 %v2190_v61  ;;  %1216 = vmatprep.mubr.bf16.mxu1 %v2220_v0  ;;  %v1876_v61 = vld [vmem:[%s2621_s3] ss:$0 sm:$0xff] }
  0x58   : > { %1198 = vmatprep.subr.bf16.mxu1 %v2195_v62 }
  0x5b   : > { %1199 = vmatpush1.bf16.msra.mxu1 %v2193_v63 }
  0xed   : > { %v1982_v9 = vpop.f32.mrf.mxu0 }
  0xee   : > { %v2022_v10 = vpop.f32.mrf.mxu1 }
  0xef   : > { %v1983_v11 = vpop.f32.mrf.mxu0 }
  0xf0   : > { %v2023_v12 = vpop.f32.mrf.mxu1  ;;  %v1984_v34 = vadd.f32 %v1983_v11, %v1982_v9 }
  0xf1   : > { %v1985_v13 = vpop.f32.mrf.mxu0  ;;  %v2024_v35 = vadd.f32 %v2023_v12, %v2022_v10 }
  0xf2   : > { %v2025_v14 = vpop.f32.mrf.mxu1 }
  0xf3   : > { %v1986_v15 = vpop.f32.mrf.mxu0  ;;  %v987_v40 = vadd.f32 %v2024_v35, %v1984_v34 }
  0xf4   : > { %v2026_v16 = vpop.f32.mrf.mxu1  ;;  %v1987_v41 = vadd.f32 %v1986_v15, %v1985_v13 }
  0xf5   : > { %v1988_v17 = vpop.f32.mrf.mxu0  ;;  %v2027_v42 = vadd.f32 %v2026_v16, %v2025_v14 }
  0xf6   : > { %v2028_v18 = vpop.f32.mrf.mxu1 }
  0xf7   : > { %v1989_v19 = vpop.f32.mrf.mxu0  ;;  %v990_v54 = vadd.f32 %v2027_v42, %v1987_v41 }
  0xf8   : > { %v2029_v20 = vpop.f32.mrf.mxu1  ;;  %v1990_v47 = vadd.f32 %v1989_v19, %v1988_v17 }
  0xf9   : > { %v1991_v21 = vpop.f32.mrf.mxu0  ;;  %v2030_v48 = vadd.f32 %v2029_v20, %v2028_v18 }
  0xfa   : > { %v2031_v22 = vpop.f32.mrf.mxu1 }
  0xfb   : > { %v1992_v23 = vpop.f32.mrf.mxu0  ;;  %v995_v57 = vadd.f32 %v2030_v48, %v1990_v47  ;;  %v2204_v48 = vld [vmem:[%s2626_s8 + $0x58] sm:$0xff]  }
  0xfc   : > { %v2032_v24 = vpop.f32.mrf.mxu1  ;;  %v1993_v43 = vadd.f32 %v1992_v23, %v1991_v21  ;;  %2062 = vmatprep.subr.bf16.mxu0 %v2204_v48 }
  0xfd   : > { %v1994_v26 = vpop.f32.mrf.mxu0  ;;  %v2033_v44 = vadd.f32 %v2032_v24, %v2031_v22 }
  0xfe   : > { %v2034_v25 = vpop.f32.mrf.mxu1 }
  0xff   : > { %v1995_v29 = vpop.f32.mrf.mxu0  ;;  %v998_v53 = vadd.f32 %v2033_v44, %v1993_v43 }
 0x100   : > { %v2035_v27 = vpop.f32.mrf.mxu1  ;;  %v1996_v6 = vadd.f32 %v1995_v29, %v1994_v26 }
 0x101   : > { %v1997_v32 = vpop.f32.mrf.mxu0  ;;  %v2036_v7 = vadd.f32 %v2035_v27, %v2034_v25 }
 0x102   : > { %v2037_v28 = vpop.f32.mrf.mxu1 }
 0x103   : > { %v1998_v37 = vpop.f32.mrf.mxu0  ;;  %v1003_v19 = vadd.f32 %v2036_v7, %v1996_v6  ;;  %v1314_v7 = vld [vmem:[%s2531_s29 + $0x8] sm:$0xff] }
 0x104   : > { %v2038_v30 = vpop.f32.mrf.mxu1  ;;  %v1999_v60 = vadd.f32 %v1998_v37, %v1997_v32 }
 0x105   : > { %v2000_v45 = vpop.f32.mrf.mxu0  ;;  %v2039_v63 = vadd.f32 %v2038_v30, %v2037_v28 }
 0x106   : > { %v2040_v31 = vpop.f32.mrf.mxu1 }
 0x107   : > { %v2001_v55 = vpop.f32.mrf.mxu0  ;;  %v1006_v14 = vadd.f32 %v2039_v63, %v1999_v60  ;;  %v1285_v60 = vld [vmem:[%s2624_s6] sm:$0x3] }
 0x108   : > { %v2041_v33 = vpop.f32.mrf.mxu1  ;;  %v2002_v25 = vadd.f32 %v2001_v55, %v2000_v45  ;;  %v1259_v55 = vlaneseq }
 0x109   : > { %v2003_v4 = vpop.f32.mrf.mxu0  ;;  %v2042_v26 = vadd.f32 %v2041_v33, %v2040_v31 }
 0x10a   : > { %v2043_v36 = vpop.f32.mrf.mxu1 }
 0x10b   : > { %v2004_v15 = vpop.f32.mrf.mxu0  ;;  %v1011_v35 = vadd.f32 %v2042_v26, %v2002_v25 }
 0x10c   : > { %v2044_v38 = vpop.f32.mrf.mxu1  ;;  %v2005_v21 = vadd.f32 %v2004_v15, %v2003_v4  ;;  %v1323_v15 = vunpack.c.l.bf16 %v1314_v7 }
 0x10d   : > { %v2045_v22 = vadd.f32 %v2044_v38, %v2043_v36 }
 0x10e   : > { %v2104_v39 = vpop.f32.mrf.mxu1 }
 0x10f   : > { %v1060_v1 = vadd.f32 %v2104_v39, %v995_v57  ;;  %v1014_v32 = vadd.f32 %v2045_v22, %v2005_v21  ;;  %v1315_v21 = vld [vmem:[%s2531_s29 + $0x10] sm:$0xff] }
 0x110   : > { %v1051_v46 = vpop.f32.mrf.mxu1 }
 0x111   : > { %v1052_v49 = vadd.f32 %v1051_v46, %v987_v40  ;;  %v1091_v11 = vmul.f32 %v1875_v50, %v1060_v1 }
 0x112   : > { %v2105_v51 = vpop.f32.mrf.mxu1 }
 0x113   : > { %v1089_v52 = vmul.f32 %v1875_v50, %v1052_v49  ;;  %v1063_v58 = vadd.f32 %v2105_v51, %v998_v53  ;;  %v1106_v23 = vadd.f32 %v1876_v61, %v1091_v11  ;;  %v2205_v49 = vld [vmem:[%s2626_s8 + $0x18] sm:$0xff]   ;;  %v2208_v51 = vld [vmem:[%s2626_s8 + $0x48] sm:$0xff]   ;;  %v2210_v53 = vld [vmem:[%s2626_s8 + $0x40] sm:$0xff]  }
 0x114   : > { %v1054_v56 = vpop.f32.mrf.mxu1  ;;  %2063 = vmatpush3.bf16.msra.mxu0 %v2205_v49 }
 0x115   : > { %v1055_v59 = vadd.f32 %v1054_v56, %v990_v54  ;;  %v1104_v2 = vadd.f32 %v1876_v61, %v1089_v52  ;;  %v1092_v8 = vmul.f32 %v1875_v50, %v1063_v58  ;;  %v1114_v29 = vmax.f32 %v1106_v23, 0.0  ;;  %v2209_v52 = vld [vmem:[%s2626_s8 + $0x8] sm:$0xff]   ;;  %v2211_v54 = vld [vmem:[%s2626_s8] sm:$0xff]  }
 0x116   : > { %v2108_v62 = vpop.f32.mrf.mxu1  ;;  %v1260_v56 = vshrl.u32 %v1259_v55, 7  ;;  %v1257_v58 = vld [vmem:[%s2623_s5] sm:$0x3] }
 0x117   : > { %v1090_v3 = vmul.f32 %v1875_v50, %v1055_v59  ;;  %v1112_v12 = vmax.f32 %v1104_v2, 0.0  ;;  %v1107_v17 = vadd.f32 %v1876_v61, %v1092_v8  ;;  %v1076_v40 = vadd.f32 %v2108_v62, %v1011_v35  ;;  %v1313_v62 = vld [vmem:[%s2531_s29] sm:$0xff] }
 0x118   : > { %v1067_v5 = vpop.f32.mrf.mxu1  ;;  %v1261_v57 = vsub.s32 0, %v1260_v56  ;;  %v1265_v59 = vsub.s32 1, %v1260_v56  ;;  %v1321_v4 = vunpack.c.l.bf16 %v1313_v62  ;;  %v1318_v56 = vld [vmem:[%s2531_s29 + $0x28] sm:$0xff] }
 0x119   : > { %v1105_v9 = vadd.f32 %v1876_v61, %v1090_v3  ;;  %v1068_v24 = vadd.f32 %v1067_v5, %v1003_v19  ;;  %v1115_v27 = vmax.f32 %v1107_v17, 0.0  ;;  %v1095_v42 = vmul.f32 %v1875_v50, %v1076_v40 }
 0x11a   : > { %v2109_v10 = vpop.f32.mrf.mxu1  ;;  %v2539_v63 = vrot.slane %v1285_v60, %v1261_v57  ;;  %v2541_v1 = vrot.slane %v1257_v58, %v1265_v59  ;;  %v2544_v5 = vrot.slane %v1285_v60, %v1265_v59 }
 0x11b   : > { %v1113_v13 = vmax.f32 %v1105_v9, 0.0  ;;  %v1093_v30 = vmul.f32 %v1875_v50, %v1068_v24  ;;  %v1121_v34 = vpack.c.bf16 %v1115_v27, %v1114_v29  ;;  %v1079_v37 = vadd.f32 %v2109_v10, %v1014_v32 }
 0x11c   : > { %v1070_v16 = vpop.f32.mrf.mxu1  ;;  %v1110_v44 = vadd.f32 %v1876_v61, %v1095_v42  ;;  %v1322_v10 = vunpack.c.h.bf16 %v1313_v62 }
 0x11d   : > { %v1120_v18 = vpack.c.bf16 %v1113_v13, %v1112_v12  ;;  %v1071_v20 = vadd.f32 %v1070_v16, %v1006_v14  ;;  %v1108_v41 = vadd.f32 %v1876_v61, %v1093_v30  ;;  %v1096_v36 = vmul.f32 %v1875_v50, %v1079_v37  ;;  %v1316_v30 = vld [vmem:[%s2531_s29 + $0x18] sm:$0xff] }
 0x11e   : > { %v1118_v46 = vmax.f32 %v1110_v44, 0.0  ;;  %v1327_v42 = vunpack.c.l.bf16 %v1316_v30  ;;  %v1328_v48 = vunpack.c.h.bf16 %v1316_v30  ;;  %v1320_v30 = vld [vmem:[%s2531_s29 + $0x38] sm:$0xff] }
 0x11f   : > { %1885 = vmatmul.mubr.msk.bf16.vlgmr.msra.gmra.mxu1 %vm874_vm0, %v1120_v18  ;;  %v1094_v28 = vmul.f32 %v1875_v50, %v1071_v20  ;;  %v1116_v43 = vmax.f32 %v1108_v41, 0.0  ;;  %v1111_v31 = vadd.f32 %v1876_v61, %v1096_v36  ;;  %v2207_v50 = vld [vmem:[%s2626_s8 + $0x10] sm:$0xff]   ;;  %v1324_v20 = vunpack.c.h.bf16 %v1314_v7 }
 0x120   : > { %1226 = vmatprep.mubr.bf16.mxu1 %v2220_v0 }
 0x121   : > { %v1109_v39 = vadd.f32 %v1876_v61, %v1094_v28  ;;  %v1119_v45 = vmax.f32 %v1111_v31, 0.0  ;;  %v2536_v61 = vrot.slane %v1257_v58, %v1261_v57  ;;  %v1325_v28 = vunpack.c.l.bf16 %v1315_v21 }
 0x123   : > { %v1117_v38 = vmax.f32 %v1109_v39, 0.0  ;;  %v1123_v47 = vpack.c.bf16 %v1119_v45, %v1118_v46  ;;  %v1326_v39 = vunpack.c.h.bf16 %v1315_v21 }
 0x125   : > { %v1122_v33 = vpack.c.bf16 %v1117_v38, %v1116_v43  ;;  %v1317_v43 = vld [vmem:[%s2531_s29 + $0x20] sm:$0xff] }
 0x127   : > { %1886 = vmatmul.mubr.msk.bf16.gmra.mxu1 %vm874_vm0, %v1121_v34 }
 0x128   : > { %1236 = vmatprep.mubr.bf16.mxu1 %v2220_v0 }
 0x12f   : > { %1887 = vmatmul.mubr.msk.bf16.gmra.mxu1 %vm874_vm0, %v1122_v33 }
 0x130   : > { %1246 = vmatprep.mubr.bf16.mxu1 %v2220_v0  ;;  %v2206_v0 = vld [vmem:[%s2626_s8 + $0x50] sm:$0xff]  }
 0x131   : > { %2064 = vmatprep.subr.bf16.mxu0 %v2206_v0 }
 0x132   : > { %2065 = vmatpush3.bf16.msra.mxu0 %v2207_v50  ;;  %v1329_v50 = vunpack.c.l.bf16 %v1317_v43 }
 0x133   : > { %2066 = vmatprep.subr.bf16.mxu0 %v2208_v51 }
 0x136   : > { %2067 = vmatpush3.bf16.msra.mxu0 %v2209_v52 }
 0x137   : > { %1888 = vmatmul.mubr.msk.bf16.gmra.mxu1 %vm874_vm0, %v1123_v47  ;;  %2068 = vmatprep.subr.bf16.mxu0 %v2210_v53 }
 0x13a   : > { %2069 = vmatpush3.bf16.msra.mxu0 %v2211_v54 }
 0x1df   : > { %v1218_v2 = vpop.f32.mrf.mxu1 }
 0x1e0   : > { %v1269_v3 = vmul.f32 %v2536_v61, %v1218_v2 }
 0x1e1   : > { %v1220_v6 = vpop.f32.mrf.mxu1 }
 0x1e2   : > { %v1297_v8 = vadd.f32 %v2539_v63, %v1269_v3  ;;  %v1270_v9 = vmul.f32 %v2541_v1, %v1220_v6  ;;  %v1330_v3 = vunpack.c.h.bf16 %v1317_v43  ;;  %v1335_v43 = vunpack.c.l.bf16 %v1320_v30 }
 0x1e3   : > { %v1222_v11 = vpop.f32.mrf.mxu1 }
 0x1e4   : > { %v1337_v12 = vadd.f32 %v1321_v4, %v1297_v8  ;;  %v1298_v13 = vadd.f32 %v2544_v5, %v1270_v9  ;;  %v1271_v14 = vmul.f32 %v2536_v61, %v1222_v11  ;;  %v1331_v8 = vunpack.c.l.bf16 %v1318_v56 }
 0x1e5   : > { %v1224_v16 = vpop.f32.mrf.mxu1 }
 0x1e6   : > { %v1338_v17 = vadd.f32 %v1322_v10, %v1298_v13  ;;  %v1299_v18 = vadd.f32 %v2539_v63, %v1271_v14  ;;  %v1272_v19 = vmul.f32 %v2541_v1, %v1224_v16  ;;  %v1353_v22 = vmax.f32 %v1337_v12, 0.0  ;;  %v1319_v13 = vld [vmem:[%s2531_s29 + $0x30] sm:$0xff] }
 0x1e7   : > { %v1228_v23 = vpop.f32.mrf.mxu1  ;;  %v1333_v21 = vunpack.c.l.bf16 %v1319_v13 }
 0x1e8   : > { %v1354_v24 = vmax.f32 %v1338_v17, 0.0  ;;  %v1339_v25 = vadd.f32 %v1323_v15, %v1299_v18  ;;  %v1300_v26 = vadd.f32 %v2544_v5, %v1272_v19  ;;  %v1273_v27 = vmul.f32 %v2536_v61, %v1228_v23 }
 0x1e9   : > { %v1230_v29 = vpop.f32.mrf.mxu1  ;;  %v1332_v18 = vunpack.c.h.bf16 %v1318_v56 }
 0x1ea   : > { %v1927_v32 = vpack.c.bf16 %v1354_v24, %v1353_v22  ;;  %v1340_v34 = vadd.f32 %v1324_v20, %v1300_v26  ;;  %v1301_v35 = vadd.f32 %v2539_v63, %v1273_v27  ;;  %v1274_v37 = vmul.f32 %v2541_v1, %v1230_v29 }
 0x1eb   : > { %v1232_v40 = vpop.f32.mrf.mxu1  ;;  %v1355_v41 = vmax.f32 %v1339_v25, 0.0 }
 0x1ec   : > { %1417 = vst [vmem:[%s2561_s15] sm:$0xff] %v1927_v32  ;;  %v1356_v36 = vmax.f32 %v1340_v34, 0.0  ;;  %v1275_v38 = vmul.f32 %v2536_v61, %v1232_v40  ;;  %v1341_v31 = vadd.f32 %v1325_v28, %v1301_v35  ;;  %v1302_v33 = vadd.f32 %v2544_v5, %v1274_v37 }
 0x1ed   : > { %v1234_v44 = vpop.f32.mrf.mxu1  ;;  %v1369_v52 = vpack.c.bf16 %v1355_v41, %v1353_v22  ;;  %v1334_v37 = vunpack.c.h.bf16 %v1319_v13 }
 0x1ee   : > { %v1928_v45 = vpack.c.bf16 %v1356_v36, %v1355_v41  ;;  %v1303_v46 = vadd.f32 %v2539_v63, %v1275_v38  ;;  %v1276_v47 = vmul.f32 %v2541_v1, %v1234_v44  ;;  %v1342_v49 = vadd.f32 %v1326_v39, %v1302_v33 }
 0x1ef   : > { %v1238_v0 = vpop.f32.mrf.mxu1  ;;  %v1370_v51 = vpack.c.bf16 %v1356_v36, %v1354_v24  ;;  %v1357_v57 = vmax.f32 %v1341_v31, 0.0 }
 0x1f0   : > { %1418 = vst [vmem:[%s2561_s15 + $0x8] sm:$0xff] %v1928_v45  ;;  %v1343_v53 = vadd.f32 %v1327_v42, %v1303_v46  ;;  %v1304_v54 = vadd.f32 %v2544_v5, %v1276_v47  ;;  %v1277_v55 = vmul.f32 %v2536_v61, %v1238_v0  ;;  %v1358_v58 = vmax.f32 %v1342_v49, 0.0 }
 0x1f1   : > { %1585 = vmatprep.mubr.bf16.mxu0 %v1370_v51  ;;  %v1240_v59 = vpop.f32.mrf.mxu1  ;;  %v1336_v47 = vunpack.c.h.bf16 %v1320_v30 }
 0x1f2   : > { %v1344_v60 = vadd.f32 %v1328_v48, %v1304_v54  ;;  %v1305_v62 = vadd.f32 %v2539_v63, %v1277_v55  ;;  %v1278_v2 = vmul.f32 %v2541_v1, %v1240_v59  ;;  %1586 = vmatmul.mubr.bf16.vlgmr.msra.gmra.mxu0 %v1369_v52  ;;  %v1929_v4 = vpack.c.bf16 %v1358_v58, %v1357_v57 }
 0x1f3   : > { %v1359_v6 = vmax.f32 %v1343_v53, 0.0  ;;  %v1242_v7 = vpop.f32.mrf.mxu1 }
 0x1f4   : > { %v1360_v9 = vmax.f32 %v1344_v60, 0.0  ;;  %v1345_v10 = vadd.f32 %v1329_v50, %v1305_v62  ;;  %v1306_v11 = vadd.f32 %v2544_v5, %v1278_v2  ;;  %v1279_v12 = vmul.f32 %v2536_v61, %v1242_v7  ;;  %1419 = vst [vmem:[%s2561_s15 + $0x10] sm:$0xff] %v1929_v4 }
 0x1f5   : > { %v1244_v14 = vpop.f32.mrf.mxu1  ;;  %v1371_v23 = vpack.c.bf16 %v1359_v6, %v1357_v57 }
 0x1f6   : > { %v1930_v15 = vpack.c.bf16 %v1360_v9, %v1359_v6  ;;  %v1346_v16 = vadd.f32 %v1330_v3, %v1306_v11  ;;  %v1307_v17 = vadd.f32 %v2539_v63, %v1279_v12  ;;  %v1280_v19 = vmul.f32 %v2541_v1, %v1244_v14  ;;  %v1914_v3 = vld [vmem:[%s2628_s10] ss:$0 sm:$0xff] }
 0x1f7   : > { %v1248_v20 = vpop.f32.mrf.mxu1  ;;  %v1372_v22 = vpack.c.bf16 %v1360_v9, %v1358_v58  ;;  %v1361_v24 = vmax.f32 %v1345_v10, 0.0 }
 0x1f8   : > { %1420 = vst [vmem:[%s2561_s15 + $0x18] sm:$0xff] %v1930_v15  ;;  %v1362_v25 = vmax.f32 %v1346_v16, 0.0  ;;  %v1347_v26 = vadd.f32 %v1331_v8, %v1307_v17  ;;  %v1281_v27 = vmul.f32 %v2536_v61, %v1248_v20  ;;  %v1308_v28 = vadd.f32 %v2544_v5, %v1280_v19 }
 0x1f9   : > { %1593 = vmatprep.mubr.bf16.mxu0 %v1372_v22  ;;  %v1250_v29 = vpop.f32.mrf.mxu1 }
 0x1fa   : > { %v1931_v32 = vpack.c.bf16 %v1362_v25, %v1361_v24  ;;  %v1309_v34 = vadd.f32 %v2539_v63, %v1281_v27  ;;  %v1282_v35 = vmul.f32 %v2541_v1, %v1250_v29  ;;  %1594 = vmatmul.mubr.bf16.gmra.mxu0 %v1371_v23  ;;  %v1363_v39 = vmax.f32 %v1347_v26, 0.0 }
 0x1fb   : > { %v1348_v40 = vadd.f32 %v1332_v18, %v1308_v28  ;;  %v1252_v41 = vpop.f32.mrf.mxu1 }
 0x1fc   : > { %1421 = vst [vmem:[%s2561_s15 + $0x20] sm:$0xff] %v1931_v32  ;;  %v1349_v36 = vadd.f32 %v1333_v21, %v1309_v34  ;;  %v1310_v38 = vadd.f32 %v2544_v5, %v1282_v35  ;;  %v1283_v42 = vmul.f32 %v2536_v61, %v1252_v41  ;;  %v1373_v0 = vpack.c.bf16 %v1363_v39, %v1361_v24 }
 0x1fd   : > { %v1364_v31 = vmax.f32 %v1348_v40, 0.0  ;;  %v1254_v33 = vpop.f32.mrf.mxu1 }
 0x1fe   : > { %v1350_v44 = vadd.f32 %v1334_v37, %v1310_v38  ;;  %v1311_v45 = vadd.f32 %v2539_v63, %v1283_v42  ;;  %v1284_v46 = vmul.f32 %v2541_v1, %v1254_v33  ;;  %v1365_v50 = vmax.f32 %v1349_v36, 0.0 }
 0x1ff   : > { %v1932_v48 = vpack.c.bf16 %v1364_v31, %v1363_v39  ;;  %v1374_v49 = vpack.c.bf16 %v1364_v31, %v1362_v25 }
 0x200   : > { %v1366_v51 = vmax.f32 %v1350_v44, 0.0  ;;  %v1351_v52 = vadd.f32 %v1335_v43, %v1311_v45  ;;  %v1312_v53 = vadd.f32 %v2544_v5, %v1284_v46  ;;  %v1913_v5 = vld [vmem:[%s2627_s9] ss:$0 sm:$0xff] }
 0x201   : > { %1422 = vst [vmem:[%s2561_s15 + $0x28] sm:$0xff] %v1932_v48  ;;  %1601 = vmatprep.mubr.bf16.mxu0 %v1374_v49 }
 0x202   : > { %v1933_v61 = vpack.c.bf16 %v1366_v51, %v1365_v50  ;;  %v1352_v54 = vadd.f32 %v1336_v47, %v1312_v53  ;;  %1602 = vmatmul.mubr.bf16.gmra.mxu0 %v1373_v0  ;;  %v1367_v55 = vmax.f32 %v1351_v52, 0.0 }
 0x204   : > { %1423 = vst [vmem:[%s2561_s15 + $0x30] sm:$0xff] %v1933_v61  ;;  %v1368_v63 = vmax.f32 %v1352_v54, 0.0  ;;  %v1375_v57 = vpack.c.bf16 %v1367_v55, %v1365_v50 }
 0x206   : > { %v1934_v56 = vpack.c.bf16 %v1368_v63, %v1367_v55  ;;  %v1376_v1 = vpack.c.bf16 %v1368_v63, %v1366_v51 }
 0x208   : > { %1424 = vst [vmem:[%s2561_s15 + $0x38] sm:$0xff] %v1934_v56  ;;  %1609 = vmatprep.mubr.bf16.mxu0 %v1376_v1 }
 0x20a   : > { %1610 = vmatmul.mubr.bf16.gmra.mxu0 %v1375_v57 }
 0x2b2   : > { %v2070_v58 = vpop.f32.mrf.mxu0 }
 0x2b4   : > { %v2071_v59 = vpop.f32.mrf.mxu0 }
 0x2b5   : > { %v2072_v60 = vadd.f32 %v2071_v59, %v2070_v58 }
 0x2b6   : > { %v2073_v62 = vpop.f32.mrf.mxu0 }
 0x2b7   : > { %v1625_v2 = vmul.f32 %v2072_v60, %v1913_v5 }
 0x2b8   : > { %v2074_v4 = vpop.f32.mrf.mxu0 }
 0x2b9   : > { %v2075_v6 = vadd.f32 %v2074_v4, %v2073_v62  ;;  %v1640_v8 = vadd.f32 %v1914_v3, %v1625_v2 }
 0x2ba   : > { %v2076_v7 = vpop.f32.mrf.mxu0 }
 0x2bb   : > { %v1626_v9 = vmul.f32 %v2075_v6, %v1913_v5  ;;  %v1648_v14 = vmax.f32 %v1640_v8, 0.0 }
 0x2bc   : > { %v2077_v10 = vpop.f32.mrf.mxu0 }
 0x2bd   : > { %v1641_v11 = vadd.f32 %v1914_v3, %v1626_v9  ;;  %v2078_v12 = vadd.f32 %v2077_v10, %v2076_v7 }
 0x2be   : > { %v2079_v13 = vpop.f32.mrf.mxu0 }
 0x2bf   : > { %v1649_v15 = vmax.f32 %v1641_v11, 0.0  ;;  %v1627_v16 = vmul.f32 %v2078_v12, %v1913_v5 }
 0x2c0   : > { %v2080_v17 = vpop.f32.mrf.mxu0 }
 0x2c1   : > { %v1946_v18 = vpack.c.bf16 %v1649_v15, %v1648_v14  ;;  %v2081_v19 = vadd.f32 %v2080_v17, %v2079_v13  ;;  %v1642_v21 = vadd.f32 %v1914_v3, %v1627_v16 }
 0x2c2   : > { %v2082_v20 = vpop.f32.mrf.mxu0 }
 0x2c3   : > { %1947 = vst [vmem:[%s2609_s27] sm:$0xff] %v1946_v18   ;;  %v1628_v22 = vmul.f32 %v2081_v19, %v1913_v5  ;;  %v1650_v27 = vmax.f32 %v1642_v21, 0.0 }
 0x2c4   : > { %v2083_v23 = vpop.f32.mrf.mxu0 }
 0x2c5   : > { %v1643_v24 = vadd.f32 %v1914_v3, %v1628_v22  ;;  %v2084_v25 = vadd.f32 %v2083_v23, %v2082_v20 }
 0x2c6   : > { %v2085_v26 = vpop.f32.mrf.mxu0 }
 0x2c7   : > { %v1651_v28 = vmax.f32 %v1643_v24, 0.0  ;;  %v1629_v29 = vmul.f32 %v2084_v25, %v1913_v5 }
 0x2c8   : > { %v2086_v30 = vpop.f32.mrf.mxu0 }
 0x2c9   : > { %v1951_v32 = vpack.c.bf16 %v1651_v28, %v1650_v27  ;;  %v2087_v34 = vadd.f32 %v2086_v30, %v2085_v26  ;;  %v1644_v37 = vadd.f32 %v1914_v3, %v1629_v29 }
 0x2ca   : > { %v2088_v35 = vpop.f32.mrf.mxu0 }
 0x2cb   : > { %1963 = vst [vmem:[%s2609_s27 + $0x8] sm:$0xff] %v1951_v32   ;;  %v1630_v39 = vmul.f32 %v2087_v34, %v1913_v5  ;;  %v1652_v42 = vmax.f32 %v1644_v37, 0.0 }
 0x2cc   : > { %v2089_v40 = vpop.f32.mrf.mxu0 }
 0x2cd   : > { %v1645_v41 = vadd.f32 %v1914_v3, %v1630_v39  ;;  %v2090_v36 = vadd.f32 %v2089_v40, %v2088_v35 }
 0x2ce   : > { %v2091_v38 = vpop.f32.mrf.mxu0 }
 0x2cf   : > { %v1653_v43 = vmax.f32 %v1645_v41, 0.0  ;;  %v1631_v31 = vmul.f32 %v2090_v36, %v1913_v5 }
 0x2d0   : > { %v2092_v33 = vpop.f32.mrf.mxu0 }
 0x2d1   : > { %v1956_v44 = vpack.c.bf16 %v1653_v43, %v1652_v42  ;;  %v2093_v45 = vadd.f32 %v2092_v33, %v2091_v38  ;;  %v1646_v46 = vadd.f32 %v1914_v3, %v1631_v31 }
 0x2d3   : > { %1964 = vst [vmem:[%s2609_s27 + $0x10] sm:$0xff] %v1956_v44   ;;  %v1632_v47 = vmul.f32 %v2093_v45, %v1913_v5  ;;  %v1654_v49 = vmax.f32 %v1646_v46, 0.0 }
 0x2d5   : > { %v1647_v48 = vadd.f32 %v1914_v3, %v1632_v47 }
 0x2d7   : > { %v1655_v0 = vmax.f32 %v1647_v48, 0.0 }
 0x2d9   : > { %v1961_v50 = vpack.c.bf16 %v1655_v0, %v1654_v49 }
 0x2db   : > { %1965 = vst [vmem:[%s2609_s27 + $0x18] sm:$0xff] %v1961_v50  }
 0x2dc PF: > { %s23_s21 = sadd.s32 1, %s2218_s21  }
 0x2dd   : > { %p20_p4 = scmp.ge.s32.totalorder %s23_s21, 4  }
 0x2df   :  { %22 = sbr.rel (!%p20_p4) target bundleno = 1 (0x1), region = 109 }

// kernel: base_net_forward.14
= control target key start
LH: loop header
LB: loop body
LE: loop exit
PB: predicated region body
PF: predicated region fallthrough
CT: control target
= control target key end

     0   :  { %s3576_s18 = smov 0   ;;  %s4246_s0 = inlined_call_operand.vmem [shape: bf16[32,1152], index: 0, kind: input, shape index: {}]   ;;  %s4247_s1 = inlined_call_operand.vmem [shape: bf16[1152,128], index: 1, kind: input, shape index: {}]   ;;  %s4248_s2 = inlined_call_operand.vmem [shape: f32[1,128], index: 2, kind: input, shape index: {}]   ;;  %s4249_s3 = inlined_call_operand.vmem [shape: f32[1,128], index: 3, kind: input, shape index: {}]   ;;  %s4250_s4 = inlined_call_operand.vmem [shape: bf16[128,512], index: 4, kind: input, shape index: {}]   ;;  %s4251_s5 = inlined_call_operand.vmem [shape: f32[1,512], index: 5, kind: input, shape index: {}]   ;;  %s4252_s6 = inlined_call_operand.vmem [shape: f32[1,512], index: 6, kind: input, shape index: {}]   ;;  %s4253_s7 = inlined_call_operand.vmem [shape: bf16[32,256], index: 7, kind: input, shape index: {}]   ;;  %s4254_s8 = inlined_call_operand.vmem [shape: bf16[256,512], index: 8, kind: input, shape index: {}]   ;;  %s4255_s9 = inlined_call_operand.vmem [shape: f32[1,512], index: 9, kind: input, shape index: {}]   ;;  %s4256_s10 = inlined_call_operand.vmem [shape: f32[1,512], index: 10, kind: input, shape index: {}]   ;;  %s4257_s11 = inlined_call_operand.vmem [shape: bf16[512,128], index: 11, kind: input, shape index: {}]   ;;  %s4258_s12 = inlined_call_operand.vmem [shape: f32[1,128], index: 12, kind: input, shape index: {}]   ;;  %s4259_s13 = inlined_call_operand.vmem [shape: f32[1,128], index: 13, kind: input, shape index: {}]   ;;  %s4260_s14 = inlined_call_operand.vmem [shape: bf16[32,512], index: 14, kind: output, shape index: {0}]   ;;  %s4261_s15 = inlined_call_operand.vmem [shape: bf16[32,128], index: 15, kind: output, shape index: {1}]  }
   0x1 LB: > { %s2797_s19 = sadd.s32 4294967295, %s3491_s18   ;;  %p2801_p0 = scmp.ge.s32.totalorder %s3491_s18, 1  ;;  %s3491_s18 = sphi %s3576_s18, %s26_s18  }
   0x2   : > { %p454_p1 = scmp.lt.s32.totalorder %s3491_s18, 3 }
   0x4   : > { %p455_p2 = pnand %p2801_p0, %p454_p1 }
   0x5   : > { %s2802_s24 = sshll.u32 (!%p455_p2), %s2797_s19, 1 }
   0x6   : > { %458 = sbr.rel (%p455_p2) target bundleno = 802 (0x322), region = 76  ;;  %p516_p3 = scmp.lt.s32.totalorder (!%p455_p2), %s2802_s24, 3 }
   0xb   : > { %v3221_v0 = vld [vmem:[%s4247_s1 + $0x78] sm:$0xff]   ;;  %v3225_v4 = vld [vmem:[%s4247_s1 + $0x70] sm:$0xff]   ;;  %v3229_v8 = vld [vmem:[%s4247_s1 + $0x68] sm:$0xff]   ;;  %s4263_s24 = smov (!%p516_p3, %s2802_s24), 3  ;;  %vm3494_vm0 = vmmov 0  }
   0xc   : > { %v3222_v1 = vld [vmem:[%s4247_s1 + $0xf8] sm:$0xff]   ;;  %3048 = vmatprep.subr.bf16.mxu0 %v3221_v0  ;;  %v3226_v5 = vld [vmem:[%s4247_s1 + $0xf0] sm:$0xff]   ;;  %v3230_v9 = vld [vmem:[%s4247_s1 + $0xe8] sm:$0xff]   ;;  %s3209_s20 = smul.u32 36, %s4263_s24  ;;  %s3035_s23 = sshll.u32 %s4263_s24, 3 }
   0xd   : > { %v3223_v2 = vld [vmem:[%s4247_s1 + $0x38] sm:$0xff]   ;;  %3070 = vmatprep.subr.bf16.mxu1 %v3222_v1  ;;  %v3227_v6 = vld [vmem:[%s4247_s1 + $0x30] sm:$0xff]   ;;  %v3231_v10 = vld [vmem:[%s4247_s1 + $0x28] sm:$0xff]   ;;  %s3925_s26 = scalar_lea.vmem %s4253_s7, %s3035_s23  ;;  %s3036_s29 = sshll.u32 %s4263_s24, 4 }
   0xe   : > { %v3224_v3 = vld [vmem:[%s4247_s1 + $0xb8] sm:$0xff]   ;;  %3049 = vmatpush3.bf16.msra.mxu0 %v3223_v2  ;;  %v3228_v7 = vld [vmem:[%s4247_s1 + $0xb0] sm:$0xff]   ;;  %v3232_v11 = vld [vmem:[%s4247_s1 + $0xa8] sm:$0xff]   ;;  %s3682_s17 = scalar_lea.vmem %s4246_s0, %s3209_s20  ;;  %s534_s16 = scalar_lea.vmem %s4260_s14, %s3036_s29 }
   0xf   : > { %3071 = vmatpush3.bf16.msra.mxu1 %v3224_v3  ;;  %3050 = vmatprep.subr.bf16.mxu0 %v3225_v4  ;;  %v3233_v12 = vld [vmem:[%s4247_s1 + $0x60] sm:$0xff]   ;;  %v3237_v16 = vld [vmem:[%s4247_s1 + $0x58] sm:$0xff]   ;;  %v3241_v20 = vld [vmem:[%s4247_s1 + $0x50] sm:$0xff]   ;;  %s2811_s20 = sshll.u32 %s4263_s24, 2 }
  0x10   : > { %3072 = vmatprep.subr.bf16.mxu1 %v3226_v5  ;;  %v3234_v13 = vld [vmem:[%s4247_s1 + $0xe0] sm:$0xff]   ;;  %v3238_v17 = vld [vmem:[%s4247_s1 + $0xd8] sm:$0xff]   ;;  %v3242_v21 = vld [vmem:[%s4247_s1 + $0xd0] sm:$0xff]   ;;  %s540_s28 = scalar_lea.vmem %s4261_s15, %s2811_s20 }
  0x11   : > { %v3235_v14 = vld [vmem:[%s4247_s1 + $0x20] sm:$0xff]   ;;  %v3239_v18 = vld [vmem:[%s4247_s1 + $0x18] sm:$0xff]   ;;  %v3243_v22 = vld [vmem:[%s4247_s1 + $0x10] sm:$0xff]  }
  0x12   : > { %3051 = vmatpush3.bf16.msra.mxu0 %v3227_v6  ;;  %v3236_v15 = vld [vmem:[%s4247_s1 + $0xa0] sm:$0xff]   ;;  %v3240_v19 = vld [vmem:[%s4247_s1 + $0x98] sm:$0xff]   ;;  %v3244_v23 = vld [vmem:[%s4247_s1 + $0x90] sm:$0xff]   ;;  %v3493_v6 = vmov 0.0  }
  0x13   : > { %3073 = vmatpush3.bf16.msra.mxu1 %v3228_v7  ;;  %3052 = vmatprep.subr.bf16.mxu0 %v3229_v8  ;;  %v3245_v24 = vld [vmem:[%s4247_s1 + $0x48] sm:$0xff]   ;;  %v3249_v28 = vld [vmem:[%s4247_s1 + $0x40] sm:$0xff]   ;;  %v3259_v36 = vld [vmem:[%s4247_s1 + $0x178] sm:$0xff]  }
  0x14   : > { %3074 = vmatprep.subr.bf16.mxu1 %v3230_v9  ;;  %v3246_v25 = vld [vmem:[%s4247_s1 + $0xc8] sm:$0xff]   ;;  %v3250_v29 = vld [vmem:[%s4247_s1 + $0xc0] sm:$0xff]   ;;  %v3260_v37 = vld [vmem:[%s4247_s1 + $0x138] sm:$0xff]  }
  0x15   : > { %v3247_v26 = vld [vmem:[%s4247_s1 + $0x8] sm:$0xff]   ;;  %v3251_v30 = vld [vmem:[%s4247_s1] sm:$0xff]   ;;  %v3261_v38 = vld [vmem:[%s4247_s1 + $0x1f8] sm:$0xff]  }
  0x16   : > { %3053 = vmatpush3.bf16.msra.mxu0 %v3231_v10  ;;  %v3248_v27 = vld [vmem:[%s4247_s1 + $0x88] sm:$0xff]   ;;  %v3252_v31 = vld [vmem:[%s4247_s1 + $0x80] sm:$0xff]   ;;  %v3262_v39 = vld [vmem:[%s4247_s1 + $0x1b8] sm:$0xff]  }
  0x17   : > { %3075 = vmatpush3.bf16.msra.mxu1 %v3232_v11  ;;  %3054 = vmatprep.subr.bf16.mxu0 %v3233_v12  ;;  %v3253_v32 = vld [vmem:[%s3682_s17] ss:$36 sps:$4 sm:$0xff]   ;;  %v3256_v34 = vld [vmem:[%s3682_s17 + $0x8] ss:$36 sps:$4 sm:$0xff]   ;;  %v3263_v40 = vld [vmem:[%s4247_s1 + $0x170] sm:$0xff]  }
  0x18   : > { %3076 = vmatprep.subr.bf16.mxu1 %v3234_v13  ;;  %v3255_v33 = vld [vmem:[%s3682_s17 + $0x4] ss:$36 sps:$4 sm:$0xff]   ;;  %v3258_v35 = vld [vmem:[%s3682_s17 + $0xc] ss:$36 sps:$4 sm:$0xff]   ;;  %v3275_v52 = vld [vmem:[%s4247_s1 + $0x158] sm:$0xff]  }
  0x19   : > { %1207 = vmatprep.mubr.bf16.mxu0 %v3255_v33  ;;  %1248 = vmatprep.mubr.bf16.mxu1 %v3258_v35  ;;  %v3264_v41 = vld [vmem:[%s4247_s1 + $0x130] sm:$0xff]   ;;  %v3267_v44 = vld [vmem:[%s4247_s1 + $0x168] sm:$0xff]   ;;  %v3271_v48 = vld [vmem:[%s4247_s1 + $0x160] sm:$0xff]  }
  0x1a   : > { %3055 = vmatpush3.bf16.msra.mxu0 %v3235_v14  ;;  %v3265_v42 = vld [vmem:[%s4247_s1 + $0x1f0] sm:$0xff]   ;;  %v3268_v45 = vld [vmem:[%s4247_s1 + $0x128] sm:$0xff]   ;;  %v3272_v49 = vld [vmem:[%s4247_s1 + $0x120] sm:$0xff]  }
  0x1b   : > { %3077 = vmatpush3.bf16.msra.mxu1 %v3236_v15  ;;  %3056 = vmatprep.subr.bf16.mxu0 %v3237_v16  ;;  %v3266_v43 = vld [vmem:[%s4247_s1 + $0x1b0] sm:$0xff]   ;;  %v3269_v46 = vld [vmem:[%s4247_s1 + $0x1e8] sm:$0xff]   ;;  %v3273_v50 = vld [vmem:[%s4247_s1 + $0x1e0] sm:$0xff]  }
  0x1c   : > { %3078 = vmatprep.subr.bf16.mxu1 %v3238_v17  ;;  %v3270_v47 = vld [vmem:[%s4247_s1 + $0x1a8] sm:$0xff]   ;;  %v3274_v51 = vld [vmem:[%s4247_s1 + $0x1a0] sm:$0xff]   ;;  %v3276_v53 = vld [vmem:[%s4247_s1 + $0x118] sm:$0xff]  }
  0x1d   : > { %v3277_v54 = vld [vmem:[%s4247_s1 + $0x1d8] sm:$0xff]   ;;  %v3279_v56 = vld [vmem:[%s4247_s1 + $0x150] sm:$0xff]   ;;  %v3283_v60 = vld [vmem:[%s4247_s1 + $0x148] sm:$0xff]  }
  0x1e   : > { %3057 = vmatpush3.bf16.msra.mxu0 %v3239_v18  ;;  %v3278_v55 = vld [vmem:[%s4247_s1 + $0x198] sm:$0xff]   ;;  %v3280_v57 = vld [vmem:[%s4247_s1 + $0x110] sm:$0xff]   ;;  %v3284_v61 = vld [vmem:[%s4247_s1 + $0x108] sm:$0xff]  }
  0x1f   : > { %3079 = vmatpush3.bf16.msra.mxu1 %v3240_v19  ;;  %3058 = vmatprep.subr.bf16.mxu0 %v3241_v20  ;;  %v3281_v58 = vld [vmem:[%s4247_s1 + $0x1d0] sm:$0xff]   ;;  %v3285_v62 = vld [vmem:[%s4247_s1 + $0x1c8] sm:$0xff]   ;;  %v3287_v0 = vld [vmem:[%s4247_s1 + $0x140] sm:$0xff]  }
  0x20   : > { %3080 = vmatprep.subr.bf16.mxu1 %v3242_v21  ;;  %v3282_v59 = vld [vmem:[%s4247_s1 + $0x190] sm:$0xff]   ;;  %v3286_v63 = vld [vmem:[%s4247_s1 + $0x188] sm:$0xff]   ;;  %v3288_v1 = vld [vmem:[%s4247_s1 + $0x100] sm:$0xff]  }
  0x21   : > { %v3289_v2 = vld [vmem:[%s4247_s1 + $0x1c0] sm:$0xff]   ;;  %v3290_v3 = vld [vmem:[%s3682_s17 + $0x10] ss:$36 sps:$4 sm:$0xff]   ;;  %v3294_v7 = vld [vmem:[%s3682_s17 + $0x18] ss:$36 sps:$4 sm:$0xff]  }
  0x22   : > { %3059 = vmatpush3.bf16.msra.mxu0 %v3243_v22  ;;  %v3292_v4 = vld [vmem:[%s3682_s17 + $0x14] ss:$36 sps:$4 sm:$0xff]   ;;  %v3293_v5 = vld [vmem:[%s4247_s1 + $0x180] sm:$0xff]   ;;  %v3299_v11 = vld [vmem:[%s4247_s1 + $0x228] sm:$0xff]  }
  0x23   : > { %3081 = vmatpush3.bf16.msra.mxu1 %v3244_v23  ;;  %3060 = vmatprep.subr.bf16.mxu0 %v3245_v24  ;;  %v3296_v8 = vld [vmem:[%s3682_s17 + $0x1c] ss:$36 sps:$4 sm:$0xff]   ;;  %v3298_v10 = vld [vmem:[%s4247_s1 + $0x230] sm:$0xff]   ;;  %v3303_v15 = vld [vmem:[%s4247_s1 + $0x208] sm:$0xff]  }
  0x24   : > { %3082 = vmatprep.subr.bf16.mxu1 %v3246_v25  ;;  %v3297_v9 = vld [vmem:[%s4247_s1 + $0x238] sm:$0xff]   ;;  %v3300_v12 = vld [vmem:[%s4247_s1 + $0x220] sm:$0xff]   ;;  %v3302_v14 = vld [vmem:[%s4247_s1 + $0x210] sm:$0xff]  }
  0x25   : > { %v3301_v13 = vld [vmem:[%s4247_s1 + $0x218] sm:$0xff]   ;;  %v3304_v16 = vld [vmem:[%s4247_s1 + $0x200] sm:$0xff]  }
  0x26   : > { %3061 = vmatpush3.bf16.msra.mxu0 %v3247_v26  ;;  %v3305_v17 = vld [vmem:[%s3682_s17 + $0x20] ss:$36 sps:$4 sm:$0xff]   ;;  %v3309_v20 = vld [vmem:[%s4250_s4 + $0xe8] ss:$16 sps:$4 sm:$0xff]   ;;  %v3311_v21 = vld [vmem:[%s4250_s4 + $0xec] ss:$16 sps:$4 sm:$0xff]  }
  0x27   : > { %3083 = vmatpush3.bf16.msra.mxu1 %v3248_v27  ;;  %3062 = vmatprep.subr.bf16.mxu0 %v3249_v28  ;;  %v3306_v18 = vld [vmem:[%s4250_s4 + $0xe0] ss:$16 sps:$4 sm:$0xff]   ;;  %v3308_v19 = vld [vmem:[%s4250_s4 + $0xe4] ss:$16 sps:$4 sm:$0xff]   ;;  %v3317_v23 = vld [vmem:[%s4250_s4 + $0xcc] ss:$16 sps:$4 sm:$0xff]  }
  0x28   : > { %3084 = vmatprep.subr.bf16.mxu1 %v3250_v29  ;;  %v3314_v22 = vld [vmem:[%s4250_s4 + $0xc4] ss:$16 sps:$4 sm:$0xff]   ;;  %v3312_v24 = vld [vmem:[%s4250_s4 + $0xc0] ss:$16 sps:$4 sm:$0xff]   ;;  %v3315_v25 = vld [vmem:[%s4250_s4 + $0xc8] ss:$16 sps:$4 sm:$0xff]  }
  0x29   : > { %v3320_v26 = vld [vmem:[%s4250_s4 + $0xa4] ss:$16 sps:$4 sm:$0xff]   ;;  %v3323_v27 = vld [vmem:[%s4250_s4 + $0xac] ss:$16 sps:$4 sm:$0xff]   ;;  %v3318_v28 = vld [vmem:[%s4250_s4 + $0xa0] ss:$16 sps:$4 sm:$0xff]  }
  0x2a   : > { %3063 = vmatpush3.bf16.msra.mxu0 %v3251_v30  ;;  %v3321_v29 = vld [vmem:[%s4250_s4 + $0xa8] ss:$16 sps:$4 sm:$0xff]   ;;  %v3326_v30 = vld [vmem:[%s4250_s4 + $0x84] ss:$16 sps:$4 sm:$0xff]   ;;  %v3335_v35 = vld [vmem:[%s4250_s4 + $0x6c] ss:$16 sps:$4 sm:$0xff]  }
  0x2b   : > { %3085 = vmatpush3.bf16.msra.mxu1 %v3252_v31  ;;  %3092 = vmatprep.subr.bf16.mxu0 %v3259_v36  ;;  %v3329_v31 = vld [vmem:[%s4250_s4 + $0x8c] ss:$16 sps:$4 sm:$0xff]   ;;  %v3327_v33 = vld [vmem:[%s4250_s4 + $0x88] ss:$16 sps:$4 sm:$0xff]   ;;  %v3330_v36 = vld [vmem:[%s4250_s4 + $0x60] ss:$16 sps:$4 sm:$0xff]  }
  0x2c   : > { %3114 = vmatprep.subr.bf16.mxu1 %v3261_v38  ;;  %v3338_v38 = vld [vmem:[%s4250_s4 + $0x44] ss:$16 sps:$4 sm:$0xff]  }
  0x2d   : > { %1208 = vmatmul.mubr.bf16.vlgmr.msra.gmra.mxu0 %v3253_v32  ;;  %v3324_v32 = vld [vmem:[%s4250_s4 + $0x80] ss:$16 sps:$4 sm:$0xff]  }
  0x2e   : > { %1249 = vmatmul.mubr.bf16.vlgmr.msra.gmra.mxu1 %v3256_v34  ;;  %3093 = vmatpush3.bf16.msra.mxu0 %v3260_v37  ;;  %v3332_v34 = vld [vmem:[%s4250_s4 + $0x64] ss:$16 sps:$4 sm:$0xff]   ;;  %v3333_v37 = vld [vmem:[%s4250_s4 + $0x68] ss:$16 sps:$4 sm:$0xff]  }
  0x2f   : > { %3115 = vmatpush3.bf16.msra.mxu1 %v3262_v39  ;;  %3094 = vmatprep.subr.bf16.mxu0 %v3263_v40  ;;  %v3341_v39 = vld [vmem:[%s4250_s4 + $0x4c] ss:$16 sps:$4 sm:$0xff]   ;;  %v3336_v40 = vld [vmem:[%s4250_s4 + $0x40] ss:$16 sps:$4 sm:$0xff]  }
  0x30   : > { %3116 = vmatprep.subr.bf16.mxu1 %v3265_v42  ;;  %1289 = vmatprep.mubr.bf16.mxu0 %v3292_v4  ;;  %v3344_v42 = vld [vmem:[%s4250_s4 + $0x24] ss:$16 sps:$4 sm:$0xff]  }
  0x31   : > { %1330 = vmatprep.mubr.bf16.mxu1 %v3296_v8 }
  0x32   : > { %3095 = vmatpush3.bf16.msra.mxu0 %v3264_v41  ;;  %v3339_v41 = vld [vmem:[%s4250_s4 + $0x48] ss:$16 sps:$4 sm:$0xff]  }
  0x33   : > { %3117 = vmatpush3.bf16.msra.mxu1 %v3266_v43  ;;  %3096 = vmatprep.subr.bf16.mxu0 %v3267_v44  ;;  %v3347_v43 = vld [vmem:[%s4250_s4 + $0x2c] ss:$16 sps:$4 sm:$0xff]   ;;  %v3342_v44 = vld [vmem:[%s4250_s4 + $0x20] ss:$16 sps:$4 sm:$0xff]  }
  0x34   : > { %3118 = vmatprep.subr.bf16.mxu1 %v3269_v46  ;;  %v3350_v46 = vld [vmem:[%s4250_s4 + $0x4] ss:$16 sps:$4 sm:$0xff]  }
  0x36   : > { %3097 = vmatpush3.bf16.msra.mxu0 %v3268_v45  ;;  %v3345_v45 = vld [vmem:[%s4250_s4 + $0x28] ss:$16 sps:$4 sm:$0xff]  }
  0x37   : > { %3119 = vmatpush3.bf16.msra.mxu1 %v3270_v47  ;;  %3098 = vmatprep.subr.bf16.mxu0 %v3271_v48  ;;  %v3353_v47 = vld [vmem:[%s4250_s4 + $0xc] ss:$16 sps:$4 sm:$0xff]   ;;  %v3348_v48 = vld [vmem:[%s4250_s4] ss:$16 sps:$4 sm:$0xff]  }
  0x38   : > { %3120 = vmatprep.subr.bf16.mxu1 %v3273_v50  ;;  %v3356_v50 = vld [vmem:[%s4254_s8 + $0xe4] ss:$16 sps:$4 sm:$0xff]  }
  0x3a   : > { %3099 = vmatpush3.bf16.msra.mxu0 %v3272_v49  ;;  %v3351_v49 = vld [vmem:[%s4250_s4 + $0x8] ss:$16 sps:$4 sm:$0xff]  }
  0x3b   : > { %3121 = vmatpush3.bf16.msra.mxu1 %v3274_v51  ;;  %3100 = vmatprep.subr.bf16.mxu0 %v3275_v52  ;;  %v3359_v51 = vld [vmem:[%s4254_s8 + $0xec] ss:$16 sps:$4 sm:$0xff]   ;;  %v3495_v52 = vmov 0  }
  0x3c   : > { %3122 = vmatprep.subr.bf16.mxu1 %v3277_v54 }
  0x3e   : > { %3101 = vmatpush3.bf16.msra.mxu0 %v3276_v53 }
  0x3f   : > { %3123 = vmatpush3.bf16.msra.mxu1 %v3278_v55  ;;  %3102 = vmatprep.subr.bf16.mxu0 %v3279_v56 }
  0x40   : > { %3124 = vmatprep.subr.bf16.mxu1 %v3281_v58 }
  0x42   : > { %3103 = vmatpush3.bf16.msra.mxu0 %v3280_v57 }
  0x43   : > { %3125 = vmatpush3.bf16.msra.mxu1 %v3282_v59  ;;  %3104 = vmatprep.subr.bf16.mxu0 %v3283_v60 }
  0x44   : > { %3126 = vmatprep.subr.bf16.mxu1 %v3285_v62 }
  0x46   : > { %3105 = vmatpush3.bf16.msra.mxu0 %v3284_v61 }
  0x47   : > { %3127 = vmatpush3.bf16.msra.mxu1 %v3286_v63  ;;  %3106 = vmatprep.subr.bf16.mxu0 %v3287_v0 }
  0x48   : > { %3128 = vmatprep.subr.bf16.mxu1 %v3289_v2 }
  0x4a   : > { %3107 = vmatpush3.bf16.msra.mxu0 %v3288_v1 }
  0x4b   : > { %3189 = vmatprep.subr.bf16.mxu0 %v3493_v6  ;;  %3129 = vmatpush3.bf16.msra.mxu1 %v3293_v5 }
  0x4c   : > { %1593 = vmatprep.subr.bf16.mxu1 %v3308_v19  ;;  %v2893_v19 = vld [vmem:[%s4248_s2] ss:$0 sm:$0xff] }
  0x4d   : > { %1290 = vmatmul.mubr.bf16.vlgmr.msra.gmra.mxu0 %v3290_v3 }
  0x4e   : > { %3205 = vmatprep.mubr.msk.bf16.mxu0 %vm3494_vm0, %v3493_v6  ;;  %3190 = vmatpush3.bf16.msra.mxu0 %v3297_v9 }
  0x4f   : > { %1331 = vmatmul.mubr.bf16.vlgmr.msra.gmra.mxu1 %v3294_v7  ;;  %3191 = vmatprep.subr.bf16.mxu0 %v3493_v6 }
  0x50   : > { %1594 = vmatpush1.bf16.msra.mxu1 %v3306_v18  ;;  %1625 = vmatprep.mubr.bf16.mxu1 %v3495_v52 }
  0x51   : > { %1595 = vmatprep.subr.bf16.mxu1 %v3314_v22 }
  0x52   : > { %3192 = vmatpush3.bf16.msra.mxu0 %v3298_v10 }
  0x53   : > { %3193 = vmatprep.subr.bf16.mxu0 %v3493_v6 }
  0x54   : > { %1596 = vmatpush1.bf16.msra.mxu1 %v3312_v24  ;;  %v2894_v24 = vld [vmem:[%s4249_s3] ss:$0 sm:$0xff] }
  0x55   : > { %1597 = vmatprep.subr.bf16.mxu1 %v3320_v26 }
  0x56   : > { %3194 = vmatpush3.bf16.msra.mxu0 %v3299_v11 }
  0x57   : > { %3195 = vmatprep.subr.bf16.mxu0 %v3493_v6 }
  0x58   : > { %1598 = vmatpush1.bf16.msra.mxu1 %v3318_v28 }
  0x59   : > { %1599 = vmatprep.subr.bf16.mxu1 %v3326_v30 }
  0x5a   : > { %3196 = vmatpush3.bf16.msra.mxu0 %v3300_v12 }
  0x5b   : > { %3197 = vmatprep.subr.bf16.mxu0 %v3493_v6 }
  0x5c   : > { %1600 = vmatpush1.bf16.msra.mxu1 %v3324_v32 }
  0x5d   : > { %1601 = vmatprep.subr.bf16.mxu1 %v3332_v34  ;;  %v3357_v34 = vld [vmem:[%s4254_s8 + $0xe8] ss:$16 sps:$4 sm:$0xff]  }
  0x5e   : > { %3198 = vmatpush3.bf16.msra.mxu0 %v3301_v13 }
  0x5f   : > { %3199 = vmatprep.subr.bf16.mxu0 %v3493_v6 }
  0x60   : > { %1602 = vmatpush1.bf16.msra.mxu1 %v3330_v36  ;;  %v3362_v36 = vld [vmem:[%s4254_s8 + $0xc4] ss:$16 sps:$4 sm:$0xff]  }
  0x61   : > { %1603 = vmatprep.subr.bf16.mxu1 %v3338_v38  ;;  %v3452_v38 = vld [vmem:[%s3925_s26 + $0x4] ss:$8 sps:$4 sm:$0xff]  }
  0x62   : > { %3200 = vmatpush3.bf16.msra.mxu0 %v3302_v14 }
  0x63   : > { %3201 = vmatprep.subr.bf16.mxu0 %v3493_v6 }
  0x64   : > { %1604 = vmatpush1.bf16.msra.mxu1 %v3336_v40  ;;  %v3363_v40 = vld [vmem:[%s4254_s8 + $0xc8] ss:$16 sps:$4 sm:$0xff]  }
  0x65   : > { %1605 = vmatprep.subr.bf16.mxu1 %v3344_v42  ;;  %v3371_v42 = vld [vmem:[%s4254_s8 + $0xac] ss:$16 sps:$4 sm:$0xff]  }
  0x66   : > { %3202 = vmatpush3.bf16.msra.mxu0 %v3303_v15 }
  0x67   : > { %3203 = vmatprep.subr.bf16.mxu0 %v3493_v6 }
  0x68   : > { %1606 = vmatpush1.bf16.msra.mxu1 %v3342_v44  ;;  %v3369_v44 = vld [vmem:[%s4254_s8 + $0xa8] ss:$16 sps:$4 sm:$0xff]  }
  0x69   : > { %1607 = vmatprep.subr.bf16.mxu1 %v3350_v46  ;;  %v3377_v46 = vld [vmem:[%s4254_s8 + $0x8c] ss:$16 sps:$4 sm:$0xff]  }
  0x6a   : > { %3204 = vmatpush3.bf16.msra.mxu0 %v3304_v16 }
  0x6b   : > { %1636 = vmatprep.subr.bf16.mxu0 %v3311_v21 }
  0x6c   : > { %1608 = vmatpush1.bf16.msra.mxu1 %v3348_v48  ;;  %v3375_v48 = vld [vmem:[%s4254_s8 + $0x88] ss:$16 sps:$4 sm:$0xff]  }
  0x6d   : > { %3206 = vmatmul.mubr.bf16.vlgmr.msra.gmra.mxu0 %v3305_v17  ;;  %2135 = vmatprep.subr.bf16.mxu1 %v3356_v50  ;;  %v3383_v50 = vld [vmem:[%s4254_s8 + $0x6c] ss:$16 sps:$4 sm:$0xff]  }
  0x6e   : > { %1637 = vmatpush1.bf16.msra.mxu0 %v3309_v20  ;;  %1668 = vmatprep.mubr.bf16.mxu0 %v3495_v52  ;;  %v3381_v52 = vld [vmem:[%s4254_s8 + $0x68] ss:$16 sps:$4 sm:$0xff]  }
  0x6f   : > { %1638 = vmatprep.subr.bf16.mxu0 %v3317_v23 }
  0x72   : > { %1639 = vmatpush1.bf16.msra.mxu0 %v3315_v25 }
  0x73   : > { %1640 = vmatprep.subr.bf16.mxu0 %v3323_v27 }
  0x76   : > { %1641 = vmatpush1.bf16.msra.mxu0 %v3321_v29 }
  0x77   : > { %1642 = vmatprep.subr.bf16.mxu0 %v3329_v31 }
  0x7a   : > { %1643 = vmatpush1.bf16.msra.mxu0 %v3327_v33  ;;  %v3354_v33 = vld [vmem:[%s4254_s8 + $0xe0] ss:$16 sps:$4 sm:$0xff]  }
  0x7b   : > { %1644 = vmatprep.subr.bf16.mxu0 %v3335_v35 }
  0x7e   : > { %1645 = vmatpush1.bf16.msra.mxu0 %v3333_v37  ;;  %v3365_v37 = vld [vmem:[%s4254_s8 + $0xcc] ss:$16 sps:$4 sm:$0xff]  }
  0x7f   : > { %1646 = vmatprep.subr.bf16.mxu0 %v3341_v39  ;;  %v3360_v39 = vld [vmem:[%s4254_s8 + $0xc0] ss:$16 sps:$4 sm:$0xff]  }
  0x82   : > { %1647 = vmatpush1.bf16.msra.mxu0 %v3339_v41  ;;  %v3368_v41 = vld [vmem:[%s4254_s8 + $0xa4] ss:$16 sps:$4 sm:$0xff]  }
  0x83   : > { %1648 = vmatprep.subr.bf16.mxu0 %v3347_v43  ;;  %v3366_v43 = vld [vmem:[%s4254_s8 + $0xa0] ss:$16 sps:$4 sm:$0xff]  }
  0x86   : > { %1649 = vmatpush1.bf16.msra.mxu0 %v3345_v45  ;;  %v3374_v45 = vld [vmem:[%s4254_s8 + $0x84] ss:$16 sps:$4 sm:$0xff]  }
  0x87   : > { %1650 = vmatprep.subr.bf16.mxu0 %v3353_v47  ;;  %v3372_v47 = vld [vmem:[%s4254_s8 + $0x80] ss:$16 sps:$4 sm:$0xff]  }
  0x8a   : > { %1651 = vmatpush1.bf16.msra.mxu0 %v3351_v49  ;;  %v3380_v49 = vld [vmem:[%s4254_s8 + $0x64] ss:$16 sps:$4 sm:$0xff]  }
  0x8b   : > { %2178 = vmatprep.subr.bf16.mxu0 %v3359_v51  ;;  %v3378_v51 = vld [vmem:[%s4254_s8 + $0x60] ss:$16 sps:$4 sm:$0xff]  }
  0xed   : > { %v3064_v53 = vpop.f32.mrf.mxu0 }
  0xee   : > { %v3086_v54 = vpop.f32.mrf.mxu1 }
  0xef   : > { %v3065_v55 = vpop.f32.mrf.mxu0 }
  0xf0   : > { %v3087_v56 = vpop.f32.mrf.mxu1  ;;  %v3066_v2 = vadd.f32 %v3065_v55, %v3064_v53  ;;  %v3386_v53 = vld [vmem:[%s4254_s8 + $0x44] ss:$16 sps:$4 sm:$0xff]   ;;  %v3384_v55 = vld [vmem:[%s4254_s8 + $0x40] ss:$16 sps:$4 sm:$0xff]  }
  0xf1   : > { %v3067_v57 = vpop.f32.mrf.mxu0  ;;  %v3088_v3 = vadd.f32 %v3087_v56, %v3086_v54  ;;  %v3389_v54 = vld [vmem:[%s4254_s8 + $0x4c] ss:$16 sps:$4 sm:$0xff]   ;;  %v3387_v56 = vld [vmem:[%s4254_s8 + $0x48] ss:$16 sps:$4 sm:$0xff]  }
  0xf2   : > { %v3089_v58 = vpop.f32.mrf.mxu1 }
  0xf3   : > { %v3068_v59 = vpop.f32.mrf.mxu0  ;;  %v1251_v7 = vadd.f32 %v3088_v3, %v3066_v2  ;;  %v3407_v2 = vld [vmem:[%s4254_s8 + $0x1ec] ss:$16 sps:$4 sm:$0xff]   ;;  %v3402_v3 = vld [vmem:[%s4254_s8 + $0x1e0] ss:$16 sps:$4 sm:$0xff]  }
  0xf4   : > { %v3090_v61 = vpop.f32.mrf.mxu1  ;;  %v3069_v8 = vadd.f32 %v3068_v59, %v3067_v57  ;;  %v3392_v57 = vld [vmem:[%s4254_s8 + $0x24] ss:$16 sps:$4 sm:$0xff]   ;;  %v3390_v59 = vld [vmem:[%s4254_s8 + $0x20] ss:$16 sps:$4 sm:$0xff]  }
  0xf5   : > { %v3091_v9 = vadd.f32 %v3090_v61, %v3089_v58  ;;  %v3395_v58 = vld [vmem:[%s4254_s8 + $0x2c] ss:$16 sps:$4 sm:$0xff]   ;;  %v3398_v61 = vld [vmem:[%s4254_s8 + $0x4] ss:$16 sps:$4 sm:$0xff]  }
  0xf7   : > { %v1254_v14 = vadd.f32 %v3091_v9, %v3069_v8  ;;  %v3411_v8 = vld [vmem:[%s4254_s8 + $0x1c8] ss:$16 sps:$4 sm:$0xff]   ;;  %v3416_v9 = vld [vmem:[%s4254_s8 + $0x1a4] ss:$16 sps:$4 sm:$0xff]  }
 0x10d   : > { %v3108_v60 = vpop.f32.mrf.mxu0 }
 0x10f   : > { %v3109_v62 = vpop.f32.mrf.mxu0  ;;  %v3130_v63 = vpop.f32.mrf.mxu1 }
 0x110   : > { %v3110_v4 = vadd.f32 %v3109_v62, %v3108_v60  ;;  %v3393_v60 = vld [vmem:[%s4254_s8 + $0x28] ss:$16 sps:$4 sm:$0xff]   ;;  %v3401_v62 = vld [vmem:[%s4254_s8 + $0xc] ss:$16 sps:$4 sm:$0xff]  }
 0x111   : > { %v3111_v0 = vpop.f32.mrf.mxu0  ;;  %v3131_v1 = vpop.f32.mrf.mxu1 }
 0x112   : > { %v1292_v10 = vadd.f32 %v3110_v4, %v1251_v7  ;;  %v3132_v11 = vadd.f32 %v3131_v1, %v3130_v63  ;;  %v3396_v63 = vld [vmem:[%s4254_s8] ss:$16 sps:$4 sm:$0xff]   ;;  %v3404_v1 = vld [vmem:[%s4254_s8 + $0x1e4] ss:$16 sps:$4 sm:$0xff]   ;;  %v3405_v4 = vld [vmem:[%s4254_s8 + $0x1e8] ss:$16 sps:$4 sm:$0xff]  }
 0x113   : > { %v3112_v5 = vpop.f32.mrf.mxu0  ;;  %v3133_v6 = vpop.f32.mrf.mxu1  ;;  %v3408_v7 = vld [vmem:[%s4254_s8 + $0x1c0] ss:$16 sps:$4 sm:$0xff]  }
 0x114   : > { %v3113_v12 = vadd.f32 %v3112_v5, %v3111_v0  ;;  %v1333_v17 = vadd.f32 %v3132_v11, %v1292_v10  ;;  %v3399_v0 = vld [vmem:[%s4254_s8 + $0x8] ss:$16 sps:$4 sm:$0xff]   ;;  %v3410_v5 = vld [vmem:[%s4254_s8 + $0x1c4] ss:$16 sps:$4 sm:$0xff]   ;;  %v3419_v10 = vld [vmem:[%s4254_s8 + $0x1ac] ss:$16 sps:$4 sm:$0xff]  }
 0x115   : > { %v3134_v13 = vpop.f32.mrf.mxu1  ;;  %v3414_v11 = vld [vmem:[%s4254_s8 + $0x1a0] ss:$16 sps:$4 sm:$0xff]  }
 0x116   : > { %v1295_v15 = vadd.f32 %v3113_v12, %v1254_v14  ;;  %v3135_v16 = vadd.f32 %v3134_v13, %v3133_v6  ;;  %v3413_v6 = vld [vmem:[%s4254_s8 + $0x1cc] ss:$16 sps:$4 sm:$0xff]   ;;  %v3417_v12 = vld [vmem:[%s4254_s8 + $0x1a8] ss:$16 sps:$4 sm:$0xff]   ;;  %v3422_v13 = vld [vmem:[%s4254_s8 + $0x184] ss:$16 sps:$4 sm:$0xff]  }
 0x117   : > { %v3425_v14 = vld [vmem:[%s4254_s8 + $0x18c] ss:$16 sps:$4 sm:$0xff]  }
 0x118   : > { %v1336_v23 = vadd.f32 %v3135_v16, %v1295_v15  ;;  %v3420_v15 = vld [vmem:[%s4254_s8 + $0x180] ss:$16 sps:$4 sm:$0xff]   ;;  %v3423_v16 = vld [vmem:[%s4254_s8 + $0x188] ss:$16 sps:$4 sm:$0xff]  }
 0x12d   : > { %v1373_v18 = vpop.f32.mrf.mxu0 }
 0x12e   : > { %v1374_v20 = vadd.f32 %v1373_v18, %v1333_v17  ;;  %v3428_v17 = vld [vmem:[%s4254_s8 + $0x164] ss:$16 sps:$4 sm:$0xff]   ;;  %v3431_v18 = vld [vmem:[%s4254_s8 + $0x16c] ss:$16 sps:$4 sm:$0xff]  }
 0x12f   : > { %v3207_v21 = vpop.f32.mrf.mxu0 }
 0x130   : > { %v1387_v22 = vmul.f32 %v2893_v19, %v1374_v20  ;;  %v3429_v20 = vld [vmem:[%s4254_s8 + $0x168] ss:$16 sps:$4 sm:$0xff]   ;;  %v3434_v21 = vld [vmem:[%s4254_s8 + $0x144] ss:$16 sps:$4 sm:$0xff]  }
 0x131   : > { %v1376_v25 = vpop.f32.mrf.mxu0 }
 0x132   : > { %v1377_v26 = vadd.f32 %v1376_v25, %v1336_v23  ;;  %v1396_v28 = vadd.f32 %v2894_v24, %v1387_v22  ;;  %v3437_v22 = vld [vmem:[%s4254_s8 + $0x14c] ss:$16 sps:$4 sm:$0xff]   ;;  %v3432_v23 = vld [vmem:[%s4254_s8 + $0x140] ss:$16 sps:$4 sm:$0xff]   ;;  %v3440_v25 = vld [vmem:[%s4254_s8 + $0x124] ss:$16 sps:$4 sm:$0xff]  }
 0x133   : > { %v3208_v27 = vpop.f32.mrf.mxu0 }
 0x134   : > { %v1388_v29 = vmul.f32 %v2893_v19, %v1377_v26  ;;  %v1398_v31 = vmax.f32 %v1396_v28, 0.0  ;;  %v3426_v19 = vld [vmem:[%s4254_s8 + $0x160] ss:$16 sps:$4 sm:$0xff]   ;;  %v3443_v26 = vld [vmem:[%s4254_s8 + $0x12c] ss:$16 sps:$4 sm:$0xff]  }
 0x135   : > { %v3438_v27 = vld [vmem:[%s4254_s8 + $0x120] ss:$16 sps:$4 sm:$0xff]   ;;  %v3441_v28 = vld [vmem:[%s4254_s8 + $0x128] ss:$16 sps:$4 sm:$0xff]  }
 0x136   : > { %v1397_v30 = vadd.f32 %v2894_v24, %v1388_v29  ;;  %v3435_v24 = vld [vmem:[%s4254_s8 + $0x148] ss:$16 sps:$4 sm:$0xff]   ;;  %v3446_v29 = vld [vmem:[%s4254_s8 + $0x104] ss:$16 sps:$4 sm:$0xff]  }
 0x138   : > { %v1399_v32 = vmax.f32 %v1397_v30, 0.0  ;;  %v3449_v30 = vld [vmem:[%s4254_s8 + $0x10c] ss:$16 sps:$4 sm:$0xff]  }
 0x13a   : > { %v1400_v35 = vpack.c.bf16 %v1399_v32, %v1398_v31  ;;  %v3444_v31 = vld [vmem:[%s4254_s8 + $0x100] ss:$16 sps:$4 sm:$0xff]   ;;  %v3447_v32 = vld [vmem:[%s4254_s8 + $0x108] ss:$16 sps:$4 sm:$0xff]  }
 0x13c   : > { %1626 = vmatmul.mubr.bf16.vlgmr.msra.gmra.mxu1 %v1400_v35  ;;  %1669 = vmatmul.mubr.bf16.vlgmr.msra.gmra.mxu0 %v1400_v35  ;;  %v3454_v35 = vld [vmem:[%s4257_s11 + $0xf8] sm:$0xff]  }
 0x13d   : > { %2136 = vmatpush1.bf16.msra.mxu1 %v3354_v33  ;;  %2179 = vmatpush1.bf16.msra.mxu0 %v3357_v34  ;;  %v3450_v33 = vld [vmem:[%s3925_s26] ss:$8 sps:$4 sm:$0xff]   ;;  %v3453_v34 = vld [vmem:[%s4257_s11 + $0x78] sm:$0xff]  }
 0x13e   : > { %2137 = vmatprep.subr.bf16.mxu1 %v3362_v36  ;;  %2180 = vmatprep.subr.bf16.mxu0 %v3365_v37  ;;  %v3455_v36 = vld [vmem:[%s4257_s11 + $0x38] sm:$0xff]  }
 0x13f   : > { %2167 = vmatprep.mubr.bf16.mxu1 %v3452_v38  ;;  %2210 = vmatprep.mubr.bf16.mxu0 %v3452_v38  ;;  %v3456_v37 = vld [vmem:[%s4257_s11 + $0xb8] sm:$0xff]   ;;  %v3457_v38 = vld [vmem:[%s4257_s11 + $0x70] sm:$0xff]  }
 0x141   : > { %2138 = vmatpush1.bf16.msra.mxu1 %v3360_v39  ;;  %2181 = vmatpush1.bf16.msra.mxu0 %v3363_v40  ;;  %v3458_v39 = vld [vmem:[%s4257_s11 + $0xf0] sm:$0xff]  }
 0x142   : > { %2139 = vmatprep.subr.bf16.mxu1 %v3368_v41  ;;  %2182 = vmatprep.subr.bf16.mxu0 %v3371_v42  ;;  %v3459_v40 = vld [vmem:[%s4257_s11 + $0x30] sm:$0xff]   ;;  %v3461_v42 = vld [vmem:[%s4257_s11 + $0x68] sm:$0xff]  }
 0x143   : > { %v3460_v41 = vld [vmem:[%s4257_s11 + $0xb0] sm:$0xff]  }
 0x145   : > { %2140 = vmatpush1.bf16.msra.mxu1 %v3366_v43  ;;  %2183 = vmatpush1.bf16.msra.mxu0 %v3369_v44  ;;  %v3462_v43 = vld [vmem:[%s4257_s11 + $0xe8] sm:$0xff]  }
 0x146   : > { %2141 = vmatprep.subr.bf16.mxu1 %v3374_v45  ;;  %2184 = vmatprep.subr.bf16.mxu0 %v3377_v46  ;;  %v3463_v44 = vld [vmem:[%s4257_s11 + $0x28] sm:$0xff]   ;;  %v3465_v46 = vld [vmem:[%s4257_s11 + $0x60] sm:$0xff]  }
 0x147   : > { %v3464_v45 = vld [vmem:[%s4257_s11 + $0xa8] sm:$0xff]  }
 0x149   : > { %2142 = vmatpush1.bf16.msra.mxu1 %v3372_v47  ;;  %2185 = vmatpush1.bf16.msra.mxu0 %v3375_v48  ;;  %v3466_v47 = vld [vmem:[%s4257_s11 + $0xe0] sm:$0xff]  }
 0x14a   : > { %2143 = vmatprep.subr.bf16.mxu1 %v3380_v49  ;;  %2186 = vmatprep.subr.bf16.mxu0 %v3383_v50  ;;  %v3467_v48 = vld [vmem:[%s4257_s11 + $0x20] sm:$0xff]   ;;  %v3469_v50 = vld [vmem:[%s4257_s11 + $0x58] sm:$0xff]  }
 0x14b   : > { %v3468_v49 = vld [vmem:[%s4257_s11 + $0xa0] sm:$0xff]  }
 0x14d   : > { %2144 = vmatpush1.bf16.msra.mxu1 %v3378_v51  ;;  %2187 = vmatpush1.bf16.msra.mxu0 %v3381_v52  ;;  %v3470_v51 = vld [vmem:[%s4257_s11 + $0xd8] sm:$0xff]  }
 0x14e   : > { %2145 = vmatprep.subr.bf16.mxu1 %v3386_v53  ;;  %2188 = vmatprep.subr.bf16.mxu0 %v3389_v54  ;;  %v3471_v52 = vld [vmem:[%s4257_s11 + $0x18] sm:$0xff]   ;;  %v3473_v54 = vld [vmem:[%s4257_s11 + $0x50] sm:$0xff]  }
 0x14f   : > { %v3472_v53 = vld [vmem:[%s4257_s11 + $0x98] sm:$0xff]  }
 0x151   : > { %2146 = vmatpush1.bf16.msra.mxu1 %v3384_v55  ;;  %2189 = vmatpush1.bf16.msra.mxu0 %v3387_v56  ;;  %v3474_v55 = vld [vmem:[%s4257_s11 + $0xd0] sm:$0xff]  }
 0x152   : > { %2147 = vmatprep.subr.bf16.mxu1 %v3392_v57  ;;  %2190 = vmatprep.subr.bf16.mxu0 %v3395_v58  ;;  %v3475_v56 = vld [vmem:[%s4257_s11 + $0x10] sm:$0xff]   ;;  %v3477_v58 = vld [vmem:[%s4257_s11 + $0x48] sm:$0xff]  }
 0x153   : > { %v3476_v57 = vld [vmem:[%s4257_s11 + $0x90] sm:$0xff]  }
 0x155   : > { %2148 = vmatpush1.bf16.msra.mxu1 %v3390_v59  ;;  %2191 = vmatpush1.bf16.msra.mxu0 %v3393_v60  ;;  %v3478_v59 = vld [vmem:[%s4257_s11 + $0xc8] sm:$0xff]  }
 0x156   : > { %2149 = vmatprep.subr.bf16.mxu1 %v3398_v61  ;;  %2192 = vmatprep.subr.bf16.mxu0 %v3401_v62  ;;  %v3479_v60 = vld [vmem:[%s4257_s11 + $0x8] sm:$0xff]   ;;  %v3481_v62 = vld [vmem:[%s4257_s11 + $0x40] sm:$0xff]  }
 0x157   : > { %v3480_v61 = vld [vmem:[%s4257_s11 + $0x88] sm:$0xff]  }
 0x159   : > { %2150 = vmatpush1.bf16.msra.mxu1 %v3396_v63  ;;  %2193 = vmatpush1.bf16.msra.mxu0 %v3399_v0  ;;  %v3482_v63 = vld [vmem:[%s4257_s11 + $0xc0] sm:$0xff]  }
 0x15a   : > { %2151 = vmatprep.subr.bf16.mxu1 %v3404_v1  ;;  %2194 = vmatprep.subr.bf16.mxu0 %v3407_v2  ;;  %v3483_v0 = vld [vmem:[%s4257_s11] sm:$0xff]   ;;  %v1681_v2 = vlaneseq }
 0x15b   : > { %v3484_v1 = vld [vmem:[%s4257_s11 + $0x80] sm:$0xff]  }
 0x15d   : > { %2152 = vmatpush2.bf16.msra.mxu1 %v3402_v3  ;;  %2195 = vmatpush2.bf16.msra.mxu0 %v3405_v4  ;;  %v1682_v3 = vshrl.u32 %v1681_v2, 7 }
 0x15e   : > { %2153 = vmatprep.subr.bf16.mxu1 %v3410_v5  ;;  %2196 = vmatprep.subr.bf16.mxu0 %v3413_v6 }
 0x15f   : > { %v1683_v6 = vsub.s32 0, %v1682_v3 }
 0x161   : > { %2154 = vmatpush2.bf16.msra.mxu1 %v3408_v7  ;;  %2197 = vmatpush2.bf16.msra.mxu0 %v3411_v8  ;;  %v1691_v7 = vsub.s32 2, %v1682_v3  ;;  %v1679_v8 = vld [vmem:[%s4251_s5] sm:$0xf] }
 0x162   : > { %2155 = vmatprep.subr.bf16.mxu1 %v3416_v9  ;;  %2198 = vmatprep.subr.bf16.mxu0 %v3419_v10 }
 0x165   : > { %2156 = vmatpush2.bf16.msra.mxu1 %v3414_v11  ;;  %2199 = vmatpush2.bf16.msra.mxu0 %v3417_v12  ;;  %v1687_v11 = vsub.s32 1, %v1682_v3  ;;  %v1695_v12 = vsub.s32 3, %v1682_v3 }
 0x166   : > { %2157 = vmatprep.subr.bf16.mxu1 %v3422_v13  ;;  %2200 = vmatprep.subr.bf16.mxu0 %v3425_v14  ;;  %v1684_v13 = vrot.slane %v1679_v8, %v1683_v6  ;;  %v1709_v14 = vld [vmem:[%s4252_s6] sm:$0xf] }
 0x169   : > { %2158 = vmatpush2.bf16.msra.mxu1 %v3420_v15  ;;  %2201 = vmatpush2.bf16.msra.mxu0 %v3423_v16  ;;  %v1692_v15 = vrot.slane %v1679_v8, %v1691_v7 }
 0x16a   : > { %2159 = vmatprep.subr.bf16.mxu1 %v3428_v17  ;;  %2202 = vmatprep.subr.bf16.mxu0 %v3431_v18  ;;  %v2221_v18 = vld [vmem:[%s4255_s9] sm:$0xf] }
 0x16d   : > { %2160 = vmatpush2.bf16.msra.mxu1 %v3426_v19  ;;  %2203 = vmatpush2.bf16.msra.mxu0 %v3429_v20  ;;  %v1714_v19 = vrot.slane %v1709_v14, %v1683_v6  ;;  %v1722_v20 = vrot.slane %v1709_v14, %v1691_v7 }
 0x16e   : > { %2161 = vmatprep.subr.bf16.mxu1 %v3434_v21  ;;  %2204 = vmatprep.subr.bf16.mxu0 %v3437_v22  ;;  %v1688_v21 = vrot.slane %v1679_v8, %v1687_v11  ;;  %v1696_v22 = vrot.slane %v1679_v8, %v1695_v12 }
 0x171   : > { %2162 = vmatpush2.bf16.msra.mxu1 %v3432_v23  ;;  %2205 = vmatpush2.bf16.msra.mxu0 %v3435_v24  ;;  %v2251_v23 = vld [vmem:[%s4256_s10] sm:$0xf] }
 0x172   : > { %2163 = vmatprep.subr.bf16.mxu1 %v3440_v25  ;;  %2206 = vmatprep.subr.bf16.mxu0 %v3443_v26  ;;  %v2226_v26 = vrot.slane %v2221_v18, %v1683_v6 }
 0x175   : > { %2164 = vmatpush2.bf16.msra.mxu1 %v3438_v27  ;;  %2207 = vmatpush2.bf16.msra.mxu0 %v3441_v28  ;;  %v2234_v27 = vrot.slane %v2221_v18, %v1691_v7  ;;  %v1718_v28 = vrot.slane %v1709_v14, %v1687_v11 }
 0x176   : > { %2165 = vmatprep.subr.bf16.mxu1 %v3446_v29  ;;  %2208 = vmatprep.subr.bf16.mxu0 %v3449_v30  ;;  %v1726_v29 = vrot.slane %v1709_v14, %v1695_v12 }
 0x179   : > { %2166 = vmatpush2.bf16.msra.mxu1 %v3444_v31  ;;  %2209 = vmatpush2.bf16.msra.mxu0 %v3447_v32  ;;  %v2256_v32 = vrot.slane %v2251_v23, %v1683_v6 }
 0x17a   : > { %3145 = vmatprep.subr.bf16.mxu1 %v3453_v34  ;;  %3167 = vmatprep.subr.bf16.mxu0 %v3454_v35  ;;  %v2230_v34 = vrot.slane %v2221_v18, %v1687_v11  ;;  %v2238_v35 = vrot.slane %v2221_v18, %v1695_v12 }
 0x17c   : > { %2168 = vmatmul.mubr.bf16.vlgmr.msra.gmra.mxu1 %v3450_v33  ;;  %2211 = vmatmul.mubr.bf16.vlgmr.msra.gmra.mxu0 %v3450_v33  ;;  %v2264_v33 = vrot.slane %v2251_v23, %v1691_v7 }
 0x17d   : > { %3146 = vmatpush3.bf16.msra.mxu1 %v3455_v36  ;;  %3168 = vmatpush3.bf16.msra.mxu0 %v3456_v37 }
 0x17e   : > { %3147 = vmatprep.subr.bf16.mxu1 %v3457_v38  ;;  %3169 = vmatprep.subr.bf16.mxu0 %v3458_v39 }
 0x181   : > { %3148 = vmatpush3.bf16.msra.mxu1 %v3459_v40  ;;  %3170 = vmatpush3.bf16.msra.mxu0 %v3460_v41  ;;  %v2260_v40 = vrot.slane %v2251_v23, %v1687_v11  ;;  %v2268_v41 = vrot.slane %v2251_v23, %v1695_v12 }
 0x182   : > { %3149 = vmatprep.subr.bf16.mxu1 %v3461_v42  ;;  %3171 = vmatprep.subr.bf16.mxu0 %v3462_v43 }
 0x185   : > { %3150 = vmatpush3.bf16.msra.mxu1 %v3463_v44  ;;  %3172 = vmatpush3.bf16.msra.mxu0 %v3464_v45 }
 0x186   : > { %3151 = vmatprep.subr.bf16.mxu1 %v3465_v46  ;;  %3173 = vmatprep.subr.bf16.mxu0 %v3466_v47 }
 0x189   : > { %3152 = vmatpush3.bf16.msra.mxu1 %v3467_v48  ;;  %3174 = vmatpush3.bf16.msra.mxu0 %v3468_v49 }
 0x18a   : > { %3153 = vmatprep.subr.bf16.mxu1 %v3469_v50  ;;  %3175 = vmatprep.subr.bf16.mxu0 %v3470_v51 }
 0x18d   : > { %3154 = vmatpush3.bf16.msra.mxu1 %v3471_v52  ;;  %3176 = vmatpush3.bf16.msra.mxu0 %v3472_v53 }
 0x18e   : > { %3155 = vmatprep.subr.bf16.mxu1 %v3473_v54  ;;  %3177 = vmatprep.subr.bf16.mxu0 %v3474_v55 }
 0x191   : > { %3156 = vmatpush3.bf16.msra.mxu1 %v3475_v56  ;;  %3178 = vmatpush3.bf16.msra.mxu0 %v3476_v57 }
 0x192   : > { %3157 = vmatprep.subr.bf16.mxu1 %v3477_v58  ;;  %3179 = vmatprep.subr.bf16.mxu0 %v3478_v59 }
 0x195   : > { %3158 = vmatpush3.bf16.msra.mxu1 %v3479_v60  ;;  %3180 = vmatpush3.bf16.msra.mxu0 %v3480_v61 }
 0x196   : > { %3159 = vmatprep.subr.bf16.mxu1 %v3481_v62  ;;  %3181 = vmatprep.subr.bf16.mxu0 %v3482_v63 }
 0x199   : > { %3160 = vmatpush3.bf16.msra.mxu1 %v3483_v0  ;;  %3182 = vmatpush3.bf16.msra.mxu0 %v3484_v1 }
 0x1fc   : > { %v1627_v4 = vpop.f32.mrf.mxu1  ;;  %v1670_v5 = vpop.f32.mrf.mxu0 }
 0x1fd   : > { %v1701_v24 = vmul.f32 %v1684_v13, %v1627_v4  ;;  %v1703_v25 = vmul.f32 %v1692_v15, %v1670_v5 }
 0x1fe   : > { %v1629_v9 = vpop.f32.mrf.mxu1  ;;  %v1672_v10 = vpop.f32.mrf.mxu0 }
 0x1ff   : > { %v1702_v36 = vmul.f32 %v1688_v21, %v1629_v9  ;;  %v1704_v37 = vmul.f32 %v1696_v22, %v1672_v10  ;;  %v1731_v42 = vadd.f32 %v1714_v19, %v1701_v24  ;;  %v1733_v43 = vadd.f32 %v1722_v20, %v1703_v25 }
 0x200   : > { %v1631_v16 = vpop.f32.mrf.mxu1  ;;  %v1674_v17 = vpop.f32.mrf.mxu0 }
 0x201   : > { %v1705_v46 = vmul.f32 %v1684_v13, %v1631_v16  ;;  %v1707_v47 = vmul.f32 %v1692_v15, %v1674_v17  ;;  %v1732_v56 = vadd.f32 %v1718_v28, %v1702_v36  ;;  %v1734_v57 = vadd.f32 %v1726_v29, %v1704_v37 }
 0x202   : > { %v1633_v30 = vpop.f32.mrf.mxu1  ;;  %v1676_v31 = vpop.f32.mrf.mxu0 }
 0x203   : > { %v1706_v48 = vmul.f32 %v1688_v21, %v1633_v30  ;;  %v1708_v49 = vmul.f32 %v1696_v22, %v1676_v31  ;;  %v1735_v0 = vadd.f32 %v1714_v19, %v1705_v46  ;;  %v1737_v1 = vadd.f32 %v1722_v20, %v1707_v47 }
 0x205   : > { %v1736_v6 = vadd.f32 %v1718_v28, %v1706_v48  ;;  %v1738_v7 = vadd.f32 %v1726_v29, %v1708_v49 }
 0x23c   : > { %v2169_v38 = vpop.f32.mrf.mxu1  ;;  %v2212_v39 = vpop.f32.mrf.mxu0 }
 0x23d   : > { %v2243_v44 = vmul.f32 %v2226_v26, %v2169_v38  ;;  %v2245_v45 = vmul.f32 %v2234_v27, %v2212_v39 }
 0x23e   : > { %v2171_v50 = vpop.f32.mrf.mxu1  ;;  %v2214_v51 = vpop.f32.mrf.mxu0 }
 0x23f   : > { %v2273_v52 = vadd.f32 %v2256_v32, %v2243_v44  ;;  %v2275_v53 = vadd.f32 %v2264_v33, %v2245_v45  ;;  %v2244_v54 = vmul.f32 %v2230_v34, %v2171_v50  ;;  %v2246_v55 = vmul.f32 %v2238_v35, %v2214_v51  ;;  %v3030_v51 = vld [vmem:[%s4259_s13] ss:$0 sm:$0xff] }
 0x240   : > { %v2173_v58 = vpop.f32.mrf.mxu1  ;;  %v2216_v59 = vpop.f32.mrf.mxu0 }
 0x241   : > { %v2281_v60 = vadd.f32 %v2273_v52, %v1731_v42  ;;  %v2283_v61 = vadd.f32 %v2275_v53, %v1733_v43  ;;  %v2274_v62 = vadd.f32 %v2260_v40, %v2244_v54  ;;  %v2276_v63 = vadd.f32 %v2268_v41, %v2246_v55  ;;  %v3029_v42 = vld [vmem:[%s4258_s12] ss:$0 sm:$0xff] }
 0x242   : > { %v2247_v2 = vmul.f32 %v2226_v26, %v2173_v58  ;;  %v2249_v3 = vmul.f32 %v2234_v27, %v2216_v59  ;;  %v2175_v4 = vpop.f32.mrf.mxu1  ;;  %v2218_v5 = vpop.f32.mrf.mxu0 }
 0x243   : > { %v2282_v8 = vadd.f32 %v2274_v62, %v1732_v56  ;;  %v2284_v9 = vadd.f32 %v2276_v63, %v1734_v57  ;;  %v2248_v12 = vmul.f32 %v2230_v34, %v2175_v4  ;;  %v2250_v13 = vmul.f32 %v2238_v35, %v2218_v5 }
 0x244   : > { %v2277_v10 = vadd.f32 %v2256_v32, %v2247_v2  ;;  %v2279_v11 = vadd.f32 %v2264_v33, %v2249_v3  ;;  %v2289_v14 = vmax.f32 %v2281_v60, 0.0  ;;  %v2291_v15 = vmax.f32 %v2283_v61, 0.0 }
 0x245   : > { %v2290_v16 = vmax.f32 %v2282_v8, 0.0  ;;  %v2292_v17 = vmax.f32 %v2284_v9, 0.0  ;;  %v2278_v20 = vadd.f32 %v2260_v40, %v2248_v12  ;;  %v2280_v21 = vadd.f32 %v2268_v41, %v2250_v13 }
 0x246   : > { %v2285_v18 = vadd.f32 %v2277_v10, %v1735_v0  ;;  %v2287_v19 = vadd.f32 %v2279_v11, %v1737_v1 }
 0x247   : > { %v3037_v22 = vpack.c.bf16 %v2290_v16, %v2289_v14  ;;  %v3038_v23 = vpack.c.bf16 %v2292_v17, %v2291_v15  ;;  %v2286_v24 = vadd.f32 %v2278_v20, %v1736_v6  ;;  %v2288_v25 = vadd.f32 %v2280_v21, %v1738_v7 }
 0x248   : > { %v2293_v26 = vmax.f32 %v2285_v18, 0.0  ;;  %v2295_v27 = vmax.f32 %v2287_v19, 0.0 }
 0x249   : > { %2321 = vst [vmem:[%s534_s16] sm:$0xff] %v3037_v22  ;;  %2322 = vst [vmem:[%s534_s16 + $0x8] sm:$0xff] %v3038_v23  ;;  %v2294_v28 = vmax.f32 %v2286_v24, 0.0  ;;  %v2296_v29 = vmax.f32 %v2288_v25, 0.0 }
 0x24a   : > { %v2297_v34 = vpack.c.bf16 %v2293_v26, %v2289_v14  ;;  %v2299_v35 = vpack.c.bf16 %v2295_v27, %v2291_v15 }
 0x24b   : > { %v3039_v30 = vpack.c.bf16 %v2294_v28, %v2293_v26  ;;  %v3040_v31 = vpack.c.bf16 %v2296_v29, %v2295_v27  ;;  %v2298_v32 = vpack.c.bf16 %v2294_v28, %v2290_v16  ;;  %v2300_v33 = vpack.c.bf16 %v2296_v29, %v2292_v17 }
 0x24d   : > { %2323 = vst [vmem:[%s534_s16 + $0x10] sm:$0xff] %v3039_v30  ;;  %2324 = vst [vmem:[%s534_s16 + $0x18] sm:$0xff] %v3040_v31  ;;  %2613 = vmatprep.mubr.bf16.mxu1 %v2298_v32  ;;  %2654 = vmatprep.mubr.bf16.mxu0 %v2300_v33 }
 0x24e   : > { %2614 = vmatmul.mubr.bf16.vlgmr.msra.gmra.mxu1 %v2297_v34  ;;  %2655 = vmatmul.mubr.bf16.vlgmr.msra.gmra.mxu0 %v2299_v35 }
 0x30e   : > { %v3161_v36 = vpop.f32.mrf.mxu1  ;;  %v3183_v37 = vpop.f32.mrf.mxu0 }
 0x310   : > { %v3162_v38 = vpop.f32.mrf.mxu1  ;;  %v3184_v39 = vpop.f32.mrf.mxu0 }
 0x311   : > { %v3163_v40 = vadd.f32 %v3162_v38, %v3161_v36  ;;  %v3185_v41 = vadd.f32 %v3184_v39, %v3183_v37 }
 0x312   : > { %v3164_v43 = vpop.f32.mrf.mxu1  ;;  %v3186_v44 = vpop.f32.mrf.mxu0 }
 0x313   : > { %v2657_v45 = vadd.f32 %v3185_v41, %v3163_v40 }
 0x314   : > { %v3165_v46 = vpop.f32.mrf.mxu1  ;;  %v3187_v47 = vpop.f32.mrf.mxu0 }
 0x315   : > { %v2670_v48 = vmul.f32 %v3029_v42, %v2657_v45  ;;  %v3166_v49 = vadd.f32 %v3165_v46, %v3164_v43  ;;  %v3188_v50 = vadd.f32 %v3187_v47, %v3186_v44 }
 0x317   : > { %v2660_v52 = vadd.f32 %v3188_v50, %v3166_v49  ;;  %v2679_v53 = vadd.f32 %v3030_v51, %v2670_v48 }
 0x319   : > { %v2671_v54 = vmul.f32 %v3029_v42, %v2660_v52  ;;  %v2681_v56 = vmax.f32 %v2679_v53, 0.0 }
 0x31b   : > { %v2680_v55 = vadd.f32 %v3030_v51, %v2671_v54 }
 0x31d   : > { %v2682_v57 = vmax.f32 %v2680_v55, 0.0 }
 0x31f   : > { %v3046_v58 = vpack.c.bf16 %v2682_v57, %v2681_v56 }
 0x321   : > { %3047 = vst [vmem:[%s540_s28] sm:$0xff] %v3046_v58  }
 0x322 PF: > { %s26_s18 = sadd.s32 1, %s3491_s18  }
 0x323   : > { %p23_p4 = scmp.ge.s32.totalorder %s26_s18, 4  }
 0x325   :  { %25 = sbr.rel (!%p23_p4) target bundleno = 1 (0x1), region = 121 }

// kernel: base_net_forward.17
= control target key start
LH: loop header
LB: loop body
LE: loop exit
PB: predicated region body
PF: predicated region fallthrough
CT: control target
= control target key end

     0   :  { %s2120_s27 = smov 0   ;;  %s2485_s0 = inlined_call_operand.vmem [shape: bf16[32,1152], index: 0, kind: input, shape index: {}]   ;;  %s2486_s1 = inlined_call_operand.vmem [shape: bf16[1152,128], index: 1, kind: input, shape index: {}]   ;;  %s2487_s2 = inlined_call_operand.vmem [shape: f32[1,128], index: 2, kind: input, shape index: {}]   ;;  %s2488_s3 = inlined_call_operand.vmem [shape: f32[1,128], index: 3, kind: input, shape index: {}]   ;;  %s2489_s4 = inlined_call_operand.vmem [shape: bf16[128,512], index: 4, kind: input, shape index: {}]   ;;  %s2490_s5 = inlined_call_operand.vmem [shape: f32[1,512], index: 5, kind: input, shape index: {}]   ;;  %s2491_s6 = inlined_call_operand.vmem [shape: f32[1,512], index: 6, kind: input, shape index: {}]   ;;  %s2492_s7 = inlined_call_operand.vmem [shape: bf16[32,512], index: 7, kind: input, shape index: {}]   ;;  %s2493_s8 = inlined_call_operand.vmem [shape: bf16[32,512], index: 8, kind: output, shape index: {}]  }
   0x1 LB: > { %s1662_s28 = sadd.s32 4294967295, %s2070_s27   ;;  %p1666_p0 = scmp.ge.s32.totalorder %s2070_s27, 1  ;;  %s2070_s27 = sphi %s2120_s27, %s18_s27  }
   0x2   : > { %p276_p1 = scmp.lt.s32.totalorder %s2070_s27, 3 }
   0x4   : > { %p277_p2 = pnand %p1666_p0, %p276_p1 }
   0x5   : > { %s1667_s17 = sshll.u32 (!%p277_p2), %s1662_s28, 1 }
   0x6   : > { %280 = sbr.rel (%p277_p2) target bundleno = 526 (0x20e), region = 52  ;;  %p319_p3 = scmp.lt.s32.totalorder (!%p277_p2), %s1667_s17, 3 }
   0xb   : > { %v1931_v0 = vld [vmem:[%s2486_s1 + $0x78] sm:$0xff]   ;;  %v1935_v4 = vld [vmem:[%s2486_s1 + $0x70] sm:$0xff]   ;;  %v1939_v8 = vld [vmem:[%s2486_s1 + $0x68] sm:$0xff]   ;;  %s2495_s17 = smov (!%p319_p3, %s1667_s17), 3  ;;  %vm2073_vm0 = vmmov 0  }
   0xc   : > { %v1932_v1 = vld [vmem:[%s2486_s1 + $0xf8] sm:$0xff]   ;;  %1802 = vmatprep.subr.bf16.mxu0 %v1931_v0  ;;  %v1936_v5 = vld [vmem:[%s2486_s1 + $0xf0] sm:$0xff]   ;;  %v1940_v9 = vld [vmem:[%s2486_s1 + $0xe8] sm:$0xff]   ;;  %s1919_s20 = smul.u32 36, %s2495_s17  ;;  %s1796_s29 = sshll.u32 %s2495_s17, 4 }
   0xd   : > { %v1933_v2 = vld [vmem:[%s2486_s1 + $0x38] sm:$0xff]   ;;  %1824 = vmatprep.subr.bf16.mxu1 %v1932_v1  ;;  %v1937_v6 = vld [vmem:[%s2486_s1 + $0x30] sm:$0xff]   ;;  %v1941_v10 = vld [vmem:[%s2486_s1 + $0x28] sm:$0xff]   ;;  %s330_s9 = scalar_lea.vmem %s2492_s7, %s1796_s29  ;;  %s337_s18 = scalar_lea.vmem %s2493_s8, %s1796_s29 }
   0xe   : > { %v1934_v3 = vld [vmem:[%s2486_s1 + $0xb8] sm:$0xff]   ;;  %1803 = vmatpush3.bf16.msra.mxu0 %v1933_v2  ;;  %v1938_v7 = vld [vmem:[%s2486_s1 + $0xb0] sm:$0xff]   ;;  %v1942_v11 = vld [vmem:[%s2486_s1 + $0xa8] sm:$0xff]   ;;  %s2226_s10 = scalar_lea.vmem %s2485_s0, %s1919_s20 }
   0xf   : > { %1825 = vmatpush3.bf16.msra.mxu1 %v1934_v3  ;;  %1804 = vmatprep.subr.bf16.mxu0 %v1935_v4  ;;  %v1943_v12 = vld [vmem:[%s2486_s1 + $0x60] sm:$0xff]   ;;  %v1947_v16 = vld [vmem:[%s2486_s1 + $0x58] sm:$0xff]   ;;  %v1951_v20 = vld [vmem:[%s2486_s1 + $0x50] sm:$0xff]  }
  0x10   : > { %1826 = vmatprep.subr.bf16.mxu1 %v1936_v5  ;;  %v1944_v13 = vld [vmem:[%s2486_s1 + $0xe0] sm:$0xff]   ;;  %v1948_v17 = vld [vmem:[%s2486_s1 + $0xd8] sm:$0xff]   ;;  %v1952_v21 = vld [vmem:[%s2486_s1 + $0xd0] sm:$0xff]  }
  0x11   : > { %v1945_v14 = vld [vmem:[%s2486_s1 + $0x20] sm:$0xff]   ;;  %v1949_v18 = vld [vmem:[%s2486_s1 + $0x18] sm:$0xff]   ;;  %v1953_v22 = vld [vmem:[%s2486_s1 + $0x10] sm:$0xff]  }
  0x12   : > { %1805 = vmatpush3.bf16.msra.mxu0 %v1937_v6  ;;  %v1946_v15 = vld [vmem:[%s2486_s1 + $0xa0] sm:$0xff]   ;;  %v1950_v19 = vld [vmem:[%s2486_s1 + $0x98] sm:$0xff]   ;;  %v1954_v23 = vld [vmem:[%s2486_s1 + $0x90] sm:$0xff]   ;;  %v2072_v6 = vmov 0.0  }
  0x13   : > { %1827 = vmatpush3.bf16.msra.mxu1 %v1938_v7  ;;  %1806 = vmatprep.subr.bf16.mxu0 %v1939_v8  ;;  %v1955_v24 = vld [vmem:[%s2486_s1 + $0x48] sm:$0xff]   ;;  %v1959_v28 = vld [vmem:[%s2486_s1 + $0x40] sm:$0xff]   ;;  %v1969_v36 = vld [vmem:[%s2486_s1 + $0x178] sm:$0xff]  }
  0x14   : > { %1828 = vmatprep.subr.bf16.mxu1 %v1940_v9  ;;  %v1956_v25 = vld [vmem:[%s2486_s1 + $0xc8] sm:$0xff]   ;;  %v1960_v29 = vld [vmem:[%s2486_s1 + $0xc0] sm:$0xff]   ;;  %v1970_v37 = vld [vmem:[%s2486_s1 + $0x138] sm:$0xff]  }
  0x15   : > { %v1957_v26 = vld [vmem:[%s2486_s1 + $0x8] sm:$0xff]   ;;  %v1961_v30 = vld [vmem:[%s2486_s1] sm:$0xff]   ;;  %v1971_v38 = vld [vmem:[%s2486_s1 + $0x1f8] sm:$0xff]  }
  0x16   : > { %1807 = vmatpush3.bf16.msra.mxu0 %v1941_v10  ;;  %v1958_v27 = vld [vmem:[%s2486_s1 + $0x88] sm:$0xff]   ;;  %v1962_v31 = vld [vmem:[%s2486_s1 + $0x80] sm:$0xff]   ;;  %v1972_v39 = vld [vmem:[%s2486_s1 + $0x1b8] sm:$0xff]  }
  0x17   : > { %1829 = vmatpush3.bf16.msra.mxu1 %v1942_v11  ;;  %1808 = vmatprep.subr.bf16.mxu0 %v1943_v12  ;;  %v1963_v32 = vld [vmem:[%s2226_s10] ss:$36 sps:$4 sm:$0xff]   ;;  %v1966_v34 = vld [vmem:[%s2226_s10 + $0x8] ss:$36 sps:$4 sm:$0xff]   ;;  %v1973_v40 = vld [vmem:[%s2486_s1 + $0x170] sm:$0xff]  }
  0x18   : > { %1830 = vmatprep.subr.bf16.mxu1 %v1944_v13  ;;  %v1965_v33 = vld [vmem:[%s2226_s10 + $0x4] ss:$36 sps:$4 sm:$0xff]   ;;  %v1968_v35 = vld [vmem:[%s2226_s10 + $0xc] ss:$36 sps:$4 sm:$0xff]   ;;  %v1985_v52 = vld [vmem:[%s2486_s1 + $0x158] sm:$0xff]  }
  0x19   : > { %1004 = vmatprep.mubr.bf16.mxu0 %v1965_v33  ;;  %1045 = vmatprep.mubr.bf16.mxu1 %v1968_v35  ;;  %v1974_v41 = vld [vmem:[%s2486_s1 + $0x130] sm:$0xff]   ;;  %v1977_v44 = vld [vmem:[%s2486_s1 + $0x168] sm:$0xff]   ;;  %v1981_v48 = vld [vmem:[%s2486_s1 + $0x160] sm:$0xff]  }
  0x1a   : > { %1809 = vmatpush3.bf16.msra.mxu0 %v1945_v14  ;;  %v1975_v42 = vld [vmem:[%s2486_s1 + $0x1f0] sm:$0xff]   ;;  %v1978_v45 = vld [vmem:[%s2486_s1 + $0x128] sm:$0xff]   ;;  %v1982_v49 = vld [vmem:[%s2486_s1 + $0x120] sm:$0xff]  }
  0x1b   : > { %1831 = vmatpush3.bf16.msra.mxu1 %v1946_v15  ;;  %1810 = vmatprep.subr.bf16.mxu0 %v1947_v16  ;;  %v1976_v43 = vld [vmem:[%s2486_s1 + $0x1b0] sm:$0xff]   ;;  %v1979_v46 = vld [vmem:[%s2486_s1 + $0x1e8] sm:$0xff]   ;;  %v1983_v50 = vld [vmem:[%s2486_s1 + $0x1e0] sm:$0xff]  }
  0x1c   : > { %1832 = vmatprep.subr.bf16.mxu1 %v1948_v17  ;;  %v1980_v47 = vld [vmem:[%s2486_s1 + $0x1a8] sm:$0xff]   ;;  %v1984_v51 = vld [vmem:[%s2486_s1 + $0x1a0] sm:$0xff]   ;;  %v1986_v53 = vld [vmem:[%s2486_s1 + $0x118] sm:$0xff]  }
  0x1d   : > { %v1987_v54 = vld [vmem:[%s2486_s1 + $0x1d8] sm:$0xff]   ;;  %v1989_v56 = vld [vmem:[%s2486_s1 + $0x150] sm:$0xff]   ;;  %v1993_v60 = vld [vmem:[%s2486_s1 + $0x148] sm:$0xff]  }
  0x1e   : > { %1811 = vmatpush3.bf16.msra.mxu0 %v1949_v18  ;;  %v1988_v55 = vld [vmem:[%s2486_s1 + $0x198] sm:$0xff]   ;;  %v1990_v57 = vld [vmem:[%s2486_s1 + $0x110] sm:$0xff]   ;;  %v1994_v61 = vld [vmem:[%s2486_s1 + $0x108] sm:$0xff]  }
  0x1f   : > { %1833 = vmatpush3.bf16.msra.mxu1 %v1950_v19  ;;  %1812 = vmatprep.subr.bf16.mxu0 %v1951_v20  ;;  %v1991_v58 = vld [vmem:[%s2486_s1 + $0x1d0] sm:$0xff]   ;;  %v1995_v62 = vld [vmem:[%s2486_s1 + $0x1c8] sm:$0xff]   ;;  %v1997_v0 = vld [vmem:[%s2486_s1 + $0x140] sm:$0xff]  }
  0x20   : > { %1834 = vmatprep.subr.bf16.mxu1 %v1952_v21  ;;  %v1992_v59 = vld [vmem:[%s2486_s1 + $0x190] sm:$0xff]   ;;  %v1996_v63 = vld [vmem:[%s2486_s1 + $0x188] sm:$0xff]   ;;  %v1998_v1 = vld [vmem:[%s2486_s1 + $0x100] sm:$0xff]  }
  0x21   : > { %v1999_v2 = vld [vmem:[%s2486_s1 + $0x1c0] sm:$0xff]   ;;  %v2000_v3 = vld [vmem:[%s2226_s10 + $0x10] ss:$36 sps:$4 sm:$0xff]   ;;  %v2004_v7 = vld [vmem:[%s2226_s10 + $0x18] ss:$36 sps:$4 sm:$0xff]  }
  0x22   : > { %1813 = vmatpush3.bf16.msra.mxu0 %v1953_v22  ;;  %v2002_v4 = vld [vmem:[%s2226_s10 + $0x14] ss:$36 sps:$4 sm:$0xff]   ;;  %v2003_v5 = vld [vmem:[%s2486_s1 + $0x180] sm:$0xff]   ;;  %v2009_v11 = vld [vmem:[%s2486_s1 + $0x228] sm:$0xff]  }
  0x23   : > { %1835 = vmatpush3.bf16.msra.mxu1 %v1954_v23  ;;  %1814 = vmatprep.subr.bf16.mxu0 %v1955_v24  ;;  %v2006_v8 = vld [vmem:[%s2226_s10 + $0x1c] ss:$36 sps:$4 sm:$0xff]   ;;  %v2008_v10 = vld [vmem:[%s2486_s1 + $0x230] sm:$0xff]   ;;  %v2013_v15 = vld [vmem:[%s2486_s1 + $0x208] sm:$0xff]  }
  0x24   : > { %1836 = vmatprep.subr.bf16.mxu1 %v1956_v25  ;;  %v2007_v9 = vld [vmem:[%s2486_s1 + $0x238] sm:$0xff]   ;;  %v2010_v12 = vld [vmem:[%s2486_s1 + $0x220] sm:$0xff]   ;;  %v2012_v14 = vld [vmem:[%s2486_s1 + $0x210] sm:$0xff]  }
  0x25   : > { %v2011_v13 = vld [vmem:[%s2486_s1 + $0x218] sm:$0xff]   ;;  %v2014_v16 = vld [vmem:[%s2486_s1 + $0x200] sm:$0xff]  }
  0x26   : > { %1815 = vmatpush3.bf16.msra.mxu0 %v1957_v26  ;;  %v2015_v17 = vld [vmem:[%s2226_s10 + $0x20] ss:$36 sps:$4 sm:$0xff]   ;;  %v2019_v20 = vld [vmem:[%s2489_s4 + $0xe8] ss:$16 sps:$4 sm:$0xff]   ;;  %v2021_v21 = vld [vmem:[%s2489_s4 + $0xec] ss:$16 sps:$4 sm:$0xff]  }
  0x27   : > { %1837 = vmatpush3.bf16.msra.mxu1 %v1958_v27  ;;  %1816 = vmatprep.subr.bf16.mxu0 %v1959_v28  ;;  %v2016_v18 = vld [vmem:[%s2489_s4 + $0xe0] ss:$16 sps:$4 sm:$0xff]   ;;  %v2018_v19 = vld [vmem:[%s2489_s4 + $0xe4] ss:$16 sps:$4 sm:$0xff]   ;;  %v2027_v23 = vld [vmem:[%s2489_s4 + $0xcc] ss:$16 sps:$4 sm:$0xff]  }
  0x28   : > { %1838 = vmatprep.subr.bf16.mxu1 %v1960_v29  ;;  %v2024_v22 = vld [vmem:[%s2489_s4 + $0xc4] ss:$16 sps:$4 sm:$0xff]   ;;  %v2022_v24 = vld [vmem:[%s2489_s4 + $0xc0] ss:$16 sps:$4 sm:$0xff]   ;;  %v2025_v25 = vld [vmem:[%s2489_s4 + $0xc8] ss:$16 sps:$4 sm:$0xff]  }
  0x29   : > { %v2030_v26 = vld [vmem:[%s2489_s4 + $0xa4] ss:$16 sps:$4 sm:$0xff]   ;;  %v2033_v27 = vld [vmem:[%s2489_s4 + $0xac] ss:$16 sps:$4 sm:$0xff]   ;;  %v2028_v28 = vld [vmem:[%s2489_s4 + $0xa0] ss:$16 sps:$4 sm:$0xff]  }
  0x2a   : > { %1817 = vmatpush3.bf16.msra.mxu0 %v1961_v30  ;;  %v2031_v29 = vld [vmem:[%s2489_s4 + $0xa8] ss:$16 sps:$4 sm:$0xff]   ;;  %v2036_v30 = vld [vmem:[%s2489_s4 + $0x84] ss:$16 sps:$4 sm:$0xff]   ;;  %v2045_v35 = vld [vmem:[%s2489_s4 + $0x6c] ss:$16 sps:$4 sm:$0xff]  }
  0x2b   : > { %1839 = vmatpush3.bf16.msra.mxu1 %v1962_v31  ;;  %1846 = vmatprep.subr.bf16.mxu0 %v1969_v36  ;;  %v2039_v31 = vld [vmem:[%s2489_s4 + $0x8c] ss:$16 sps:$4 sm:$0xff]   ;;  %v2037_v33 = vld [vmem:[%s2489_s4 + $0x88] ss:$16 sps:$4 sm:$0xff]   ;;  %v2040_v36 = vld [vmem:[%s2489_s4 + $0x60] ss:$16 sps:$4 sm:$0xff]  }
  0x2c   : > { %1868 = vmatprep.subr.bf16.mxu1 %v1971_v38  ;;  %v2048_v38 = vld [vmem:[%s2489_s4 + $0x44] ss:$16 sps:$4 sm:$0xff]  }
  0x2d   : > { %1005 = vmatmul.mubr.bf16.vlgmr.msra.gmra.mxu0 %v1963_v32  ;;  %v2034_v32 = vld [vmem:[%s2489_s4 + $0x80] ss:$16 sps:$4 sm:$0xff]  }
  0x2e   : > { %1046 = vmatmul.mubr.bf16.vlgmr.msra.gmra.mxu1 %v1966_v34  ;;  %1847 = vmatpush3.bf16.msra.mxu0 %v1970_v37  ;;  %v2042_v34 = vld [vmem:[%s2489_s4 + $0x64] ss:$16 sps:$4 sm:$0xff]   ;;  %v2043_v37 = vld [vmem:[%s2489_s4 + $0x68] ss:$16 sps:$4 sm:$0xff]  }
  0x2f   : > { %1869 = vmatpush3.bf16.msra.mxu1 %v1972_v39  ;;  %1848 = vmatprep.subr.bf16.mxu0 %v1973_v40  ;;  %v2051_v39 = vld [vmem:[%s2489_s4 + $0x4c] ss:$16 sps:$4 sm:$0xff]   ;;  %v2046_v40 = vld [vmem:[%s2489_s4 + $0x40] ss:$16 sps:$4 sm:$0xff]  }
  0x30   : > { %1870 = vmatprep.subr.bf16.mxu1 %v1975_v42  ;;  %1086 = vmatprep.mubr.bf16.mxu0 %v2002_v4  ;;  %v2054_v42 = vld [vmem:[%s2489_s4 + $0x24] ss:$16 sps:$4 sm:$0xff]  }
  0x31   : > { %1127 = vmatprep.mubr.bf16.mxu1 %v2006_v8 }
  0x32   : > { %1849 = vmatpush3.bf16.msra.mxu0 %v1974_v41  ;;  %v2049_v41 = vld [vmem:[%s2489_s4 + $0x48] ss:$16 sps:$4 sm:$0xff]  }
  0x33   : > { %1871 = vmatpush3.bf16.msra.mxu1 %v1976_v43  ;;  %1850 = vmatprep.subr.bf16.mxu0 %v1977_v44  ;;  %v2057_v43 = vld [vmem:[%s2489_s4 + $0x2c] ss:$16 sps:$4 sm:$0xff]   ;;  %v2052_v44 = vld [vmem:[%s2489_s4 + $0x20] ss:$16 sps:$4 sm:$0xff]  }
  0x34   : > { %1872 = vmatprep.subr.bf16.mxu1 %v1979_v46  ;;  %v2060_v46 = vld [vmem:[%s2489_s4 + $0x4] ss:$16 sps:$4 sm:$0xff]  }
  0x36   : > { %1851 = vmatpush3.bf16.msra.mxu0 %v1978_v45  ;;  %v2055_v45 = vld [vmem:[%s2489_s4 + $0x28] ss:$16 sps:$4 sm:$0xff]  }
  0x37   : > { %1873 = vmatpush3.bf16.msra.mxu1 %v1980_v47  ;;  %1852 = vmatprep.subr.bf16.mxu0 %v1981_v48  ;;  %v2063_v47 = vld [vmem:[%s2489_s4 + $0xc] ss:$16 sps:$4 sm:$0xff]   ;;  %v2058_v48 = vld [vmem:[%s2489_s4] ss:$16 sps:$4 sm:$0xff]  }
  0x38   : > { %1874 = vmatprep.subr.bf16.mxu1 %v1983_v50  ;;  %v2074_v50 = vmov 0  }
  0x3a   : > { %1853 = vmatpush3.bf16.msra.mxu0 %v1982_v49  ;;  %v2061_v49 = vld [vmem:[%s2489_s4 + $0x8] ss:$16 sps:$4 sm:$0xff]  }
  0x3b   : > { %1875 = vmatpush3.bf16.msra.mxu1 %v1984_v51  ;;  %1854 = vmatprep.subr.bf16.mxu0 %v1985_v52 }
  0x3c   : > { %1876 = vmatprep.subr.bf16.mxu1 %v1987_v54 }
  0x3e   : > { %1855 = vmatpush3.bf16.msra.mxu0 %v1986_v53 }
  0x3f   : > { %1877 = vmatpush3.bf16.msra.mxu1 %v1988_v55  ;;  %1856 = vmatprep.subr.bf16.mxu0 %v1989_v56 }
  0x40   : > { %1878 = vmatprep.subr.bf16.mxu1 %v1991_v58 }
  0x42   : > { %1857 = vmatpush3.bf16.msra.mxu0 %v1990_v57 }
  0x43   : > { %1879 = vmatpush3.bf16.msra.mxu1 %v1992_v59  ;;  %1858 = vmatprep.subr.bf16.mxu0 %v1993_v60 }
  0x44   : > { %1880 = vmatprep.subr.bf16.mxu1 %v1995_v62 }
  0x46   : > { %1859 = vmatpush3.bf16.msra.mxu0 %v1994_v61 }
  0x47   : > { %1881 = vmatpush3.bf16.msra.mxu1 %v1996_v63  ;;  %1860 = vmatprep.subr.bf16.mxu0 %v1997_v0 }
  0x48   : > { %1882 = vmatprep.subr.bf16.mxu1 %v1999_v2 }
  0x4a   : > { %1861 = vmatpush3.bf16.msra.mxu0 %v1998_v1 }
  0x4b   : > { %1899 = vmatprep.subr.bf16.mxu0 %v2072_v6  ;;  %1883 = vmatpush3.bf16.msra.mxu1 %v2003_v5 }
  0x4c   : > { %1390 = vmatprep.subr.bf16.mxu1 %v2018_v19 }
  0x4d   : > { %1087 = vmatmul.mubr.bf16.vlgmr.msra.gmra.mxu0 %v2000_v3 }
  0x4e   : > { %1915 = vmatprep.mubr.msk.bf16.mxu0 %vm2073_vm0, %v2072_v6  ;;  %1900 = vmatpush3.bf16.msra.mxu0 %v2007_v9 }
  0x4f   : > { %1128 = vmatmul.mubr.bf16.vlgmr.msra.gmra.mxu1 %v2004_v7  ;;  %1901 = vmatprep.subr.bf16.mxu0 %v2072_v6 }
  0x50   : > { %1391 = vmatpush1.bf16.msra.mxu1 %v2016_v18  ;;  %1422 = vmatprep.mubr.bf16.mxu1 %v2074_v50 }
  0x51   : > { %1392 = vmatprep.subr.bf16.mxu1 %v2024_v22  ;;  %v1757_v22 = vld [vmem:[%s2488_s3] ss:$0 sm:$0xff] }
  0x52   : > { %1902 = vmatpush3.bf16.msra.mxu0 %v2008_v10 }
  0x53   : > { %1903 = vmatprep.subr.bf16.mxu0 %v2072_v6 }
  0x54   : > { %1393 = vmatpush1.bf16.msra.mxu1 %v2022_v24 }
  0x55   : > { %1394 = vmatprep.subr.bf16.mxu1 %v2030_v26 }
  0x56   : > { %1904 = vmatpush3.bf16.msra.mxu0 %v2009_v11 }
  0x57   : > { %1905 = vmatprep.subr.bf16.mxu0 %v2072_v6 }
  0x58   : > { %1395 = vmatpush1.bf16.msra.mxu1 %v2028_v28 }
  0x59   : > { %1396 = vmatprep.subr.bf16.mxu1 %v2036_v30 }
  0x5a   : > { %1906 = vmatpush3.bf16.msra.mxu0 %v2010_v12 }
  0x5b   : > { %1907 = vmatprep.subr.bf16.mxu0 %v2072_v6 }
  0x5c   : > { %1397 = vmatpush1.bf16.msra.mxu1 %v2034_v32  ;;  %v1478_v32 = vlaneseq }
  0x5d   : > { %1398 = vmatprep.subr.bf16.mxu1 %v2042_v34 }
  0x5e   : > { %1908 = vmatpush3.bf16.msra.mxu0 %v2011_v13 }
  0x5f   : > { %1909 = vmatprep.subr.bf16.mxu0 %v2072_v6 }
  0x60   : > { %1399 = vmatpush1.bf16.msra.mxu1 %v2040_v36  ;;  %v1476_v36 = vld [vmem:[%s2490_s5] sm:$0xf] }
  0x61   : > { %1400 = vmatprep.subr.bf16.mxu1 %v2048_v38 }
  0x62   : > { %1910 = vmatpush3.bf16.msra.mxu0 %v2012_v14 }
  0x63   : > { %1911 = vmatprep.subr.bf16.mxu0 %v2072_v6 }
  0x64   : > { %1401 = vmatpush1.bf16.msra.mxu1 %v2046_v40 }
  0x65   : > { %1402 = vmatprep.subr.bf16.mxu1 %v2054_v42 }
  0x66   : > { %1912 = vmatpush3.bf16.msra.mxu0 %v2013_v15 }
  0x67   : > { %1913 = vmatprep.subr.bf16.mxu0 %v2072_v6 }
  0x68   : > { %1403 = vmatpush1.bf16.msra.mxu1 %v2052_v44 }
  0x69   : > { %1404 = vmatprep.subr.bf16.mxu1 %v2060_v46 }
  0x6a   : > { %1914 = vmatpush3.bf16.msra.mxu0 %v2014_v16 }
  0x6b   : > { %1433 = vmatprep.subr.bf16.mxu0 %v2021_v21 }
  0x6c   : > { %1405 = vmatpush1.bf16.msra.mxu1 %v2058_v48 }
  0x6d   : > { %1916 = vmatmul.mubr.bf16.vlgmr.msra.gmra.mxu0 %v2015_v17  ;;  %v1756_v17 = vld [vmem:[%s2487_s2] ss:$0 sm:$0xff] }
  0x6e   : > { %1434 = vmatpush1.bf16.msra.mxu0 %v2019_v20  ;;  %1465 = vmatprep.mubr.bf16.mxu0 %v2074_v50 }
  0x6f   : > { %1435 = vmatprep.subr.bf16.mxu0 %v2027_v23 }
  0x72   : > { %1436 = vmatpush1.bf16.msra.mxu0 %v2025_v25 }
  0x73   : > { %1437 = vmatprep.subr.bf16.mxu0 %v2033_v27 }
  0x76   : > { %1438 = vmatpush1.bf16.msra.mxu0 %v2031_v29 }
  0x77   : > { %1439 = vmatprep.subr.bf16.mxu0 %v2039_v31 }
  0x7a   : > { %1440 = vmatpush1.bf16.msra.mxu0 %v2037_v33  ;;  %v1479_v33 = vshrl.u32 %v1478_v32, 7 }
  0x7b   : > { %1441 = vmatprep.subr.bf16.mxu0 %v2045_v35 }
  0x7c   : > { %v1480_v34 = vsub.s32 0, %v1479_v33  ;;  %v1488_v35 = vsub.s32 2, %v1479_v33  ;;  %v1492_v38 = vsub.s32 3, %v1479_v33 }
  0x7e   : > { %1442 = vmatpush1.bf16.msra.mxu0 %v2043_v37  ;;  %v1484_v37 = vsub.s32 1, %v1479_v33  ;;  %v1481_v40 = vrot.slane %v1476_v36, %v1480_v34  ;;  %v1489_v42 = vrot.slane %v1476_v36, %v1488_v35 }
  0x7f   : > { %1443 = vmatprep.subr.bf16.mxu0 %v2051_v39  ;;  %v1506_v39 = vld [vmem:[%s2491_s6] sm:$0xf] }
  0x80   : > { %v1511_v44 = vrot.slane %v1506_v39, %v1480_v34  ;;  %v1485_v46 = vrot.slane %v1476_v36, %v1484_v37 }
  0x82   : > { %1444 = vmatpush1.bf16.msra.mxu0 %v2049_v41  ;;  %v1536_v41 = vld [vmem:[%s330_s9] sm:$0xff] }
  0x83   : > { %1445 = vmatprep.subr.bf16.mxu0 %v2057_v43  ;;  %v1537_v43 = vld [vmem:[%s330_s9 + $0x8] sm:$0xff] }
  0x86   : > { %1446 = vmatpush1.bf16.msra.mxu0 %v2055_v45  ;;  %v1519_v45 = vrot.slane %v1506_v39, %v1488_v35 }
  0x87   : > { %1447 = vmatprep.subr.bf16.mxu0 %v2063_v47  ;;  %v1493_v47 = vrot.slane %v1476_v36, %v1492_v38 }
  0x8a   : > { %1448 = vmatpush1.bf16.msra.mxu0 %v2061_v49  ;;  %v1540_v49 = vunpack.c.l.bf16 %v1536_v41 }
  0xed   : > { %v1818_v51 = vpop.f32.mrf.mxu0 }
  0xee   : > { %v1840_v52 = vpop.f32.mrf.mxu1 }
  0xef   : > { %v1819_v53 = vpop.f32.mrf.mxu0 }
  0xf0   : > { %v1841_v54 = vpop.f32.mrf.mxu1  ;;  %v1820_v0 = vadd.f32 %v1819_v53, %v1818_v51  ;;  %v1542_v51 = vunpack.c.l.bf16 %v1537_v43 }
  0xf1   : > { %v1821_v55 = vpop.f32.mrf.mxu0  ;;  %v1842_v1 = vadd.f32 %v1841_v54, %v1840_v52  ;;  %v1515_v54 = vrot.slane %v1506_v39, %v1484_v37 }
  0xf2   : > { %v1843_v56 = vpop.f32.mrf.mxu1 }
  0xf3   : > { %v1822_v57 = vpop.f32.mrf.mxu0  ;;  %v1048_v5 = vadd.f32 %v1842_v1, %v1820_v0  ;;  %v1538_v0 = vld [vmem:[%s330_s9 + $0x10] sm:$0xff]  ;;  %v1539_v1 = vld [vmem:[%s330_s9 + $0x18] sm:$0xff] }
  0xf4   : > { %v1844_v59 = vpop.f32.mrf.mxu1  ;;  %v1823_v6 = vadd.f32 %v1822_v57, %v1821_v55  ;;  %v1523_v55 = vrot.slane %v1506_v39, %v1492_v38  ;;  %v1541_v57 = vunpack.c.h.bf16 %v1536_v41 }
  0xf5   : > { %v1845_v7 = vadd.f32 %v1844_v59, %v1843_v56  ;;  %v1543_v59 = vunpack.c.h.bf16 %v1537_v43 }
  0xf7   : > { %v1051_v12 = vadd.f32 %v1845_v7, %v1823_v6 }
 0x10d   : > { %v1862_v58 = vpop.f32.mrf.mxu0 }
 0x10f   : > { %v1863_v60 = vpop.f32.mrf.mxu0  ;;  %v1884_v61 = vpop.f32.mrf.mxu1 }
 0x110   : > { %v1864_v2 = vadd.f32 %v1863_v60, %v1862_v58 }
 0x111   : > { %v1865_v62 = vpop.f32.mrf.mxu0  ;;  %v1885_v63 = vpop.f32.mrf.mxu1 }
 0x112   : > { %v1089_v8 = vadd.f32 %v1864_v2, %v1048_v5  ;;  %v1886_v9 = vadd.f32 %v1885_v63, %v1884_v61 }
 0x113   : > { %v1866_v3 = vpop.f32.mrf.mxu0  ;;  %v1887_v4 = vpop.f32.mrf.mxu1 }
 0x114   : > { %v1867_v10 = vadd.f32 %v1866_v3, %v1865_v62  ;;  %v1130_v15 = vadd.f32 %v1886_v9, %v1089_v8  ;;  %v1544_v9 = vunpack.c.l.bf16 %v1538_v0 }
 0x115   : > { %v1888_v11 = vpop.f32.mrf.mxu1 }
 0x116   : > { %v1092_v13 = vadd.f32 %v1867_v10, %v1051_v12  ;;  %v1889_v14 = vadd.f32 %v1888_v11, %v1887_v4  ;;  %v1546_v11 = vunpack.c.l.bf16 %v1539_v1 }
 0x118   : > { %v1133_v21 = vadd.f32 %v1889_v14, %v1092_v13 }
 0x12d   : > { %v1170_v16 = vpop.f32.mrf.mxu0 }
 0x12e   : > { %v1171_v18 = vadd.f32 %v1170_v16, %v1130_v15  ;;  %v1545_v16 = vunpack.c.h.bf16 %v1538_v0 }
 0x12f   : > { %v1917_v19 = vpop.f32.mrf.mxu0 }
 0x130   : > { %v1184_v20 = vmul.f32 %v1756_v17, %v1171_v18 }
 0x131   : > { %v1173_v23 = vpop.f32.mrf.mxu0 }
 0x132   : > { %v1174_v24 = vadd.f32 %v1173_v23, %v1133_v21  ;;  %v1193_v26 = vadd.f32 %v1757_v22, %v1184_v20 }
 0x133   : > { %v1918_v25 = vpop.f32.mrf.mxu0 }
 0x134   : > { %v1185_v27 = vmul.f32 %v1756_v17, %v1174_v24  ;;  %v1195_v29 = vmax.f32 %v1193_v26, 0.0  ;;  %v1547_v17 = vunpack.c.h.bf16 %v1539_v1 }
 0x136   : > { %v1194_v28 = vadd.f32 %v1757_v22, %v1185_v27 }
 0x138   : > { %v1196_v30 = vmax.f32 %v1194_v28, 0.0 }
 0x13a   : > { %v1197_v31 = vpack.c.bf16 %v1196_v30, %v1195_v29 }
 0x13c   : > { %1423 = vmatmul.mubr.bf16.vlgmr.msra.gmra.mxu1 %v1197_v31  ;;  %1466 = vmatmul.mubr.bf16.vlgmr.msra.gmra.mxu0 %v1197_v31 }
 0x1fc   : > { %v1424_v48 = vpop.f32.mrf.mxu1  ;;  %v1467_v50 = vpop.f32.mrf.mxu0 }
 0x1fd   : > { %v1498_v52 = vmul.f32 %v1481_v40, %v1424_v48  ;;  %v1500_v53 = vmul.f32 %v1489_v42, %v1467_v50 }
 0x1fe   : > { %v1426_v56 = vpop.f32.mrf.mxu1  ;;  %v1469_v58 = vpop.f32.mrf.mxu0 }
 0x1ff   : > { %v1528_v60 = vadd.f32 %v1511_v44, %v1498_v52  ;;  %v1530_v61 = vadd.f32 %v1519_v45, %v1500_v53  ;;  %v1499_v62 = vmul.f32 %v1485_v46, %v1426_v56  ;;  %v1501_v63 = vmul.f32 %v1493_v47, %v1469_v58 }
 0x200   : > { %v1428_v2 = vpop.f32.mrf.mxu1  ;;  %v1471_v3 = vpop.f32.mrf.mxu0 }
 0x201   : > { %v1548_v4 = vadd.f32 %v1540_v49, %v1528_v60  ;;  %v1550_v5 = vadd.f32 %v1542_v51, %v1530_v61  ;;  %v1529_v6 = vadd.f32 %v1515_v54, %v1499_v62  ;;  %v1531_v7 = vadd.f32 %v1523_v55, %v1501_v63 }
 0x202   : > { %v1502_v8 = vmul.f32 %v1481_v40, %v1428_v2  ;;  %v1504_v10 = vmul.f32 %v1489_v42, %v1471_v3  ;;  %v1430_v12 = vpop.f32.mrf.mxu1  ;;  %v1473_v13 = vpop.f32.mrf.mxu0 }
 0x203   : > { %v1549_v14 = vadd.f32 %v1541_v57, %v1529_v6  ;;  %v1551_v15 = vadd.f32 %v1543_v59, %v1531_v7  ;;  %v1503_v20 = vmul.f32 %v1485_v46, %v1430_v12  ;;  %v1505_v21 = vmul.f32 %v1493_v47, %v1473_v13 }
 0x204   : > { %v1532_v18 = vadd.f32 %v1511_v44, %v1502_v8  ;;  %v1534_v19 = vadd.f32 %v1519_v45, %v1504_v10  ;;  %v1556_v22 = vmax.f32 %v1548_v4, 0.0  ;;  %v1558_v23 = vmax.f32 %v1550_v5, 0.0 }
 0x205   : > { %v1557_v24 = vmax.f32 %v1549_v14, 0.0  ;;  %v1559_v25 = vmax.f32 %v1551_v15, 0.0  ;;  %v1533_v28 = vadd.f32 %v1515_v54, %v1503_v20  ;;  %v1535_v29 = vadd.f32 %v1523_v55, %v1505_v21 }
 0x206   : > { %v1552_v26 = vadd.f32 %v1544_v9, %v1532_v18  ;;  %v1554_v27 = vadd.f32 %v1546_v11, %v1534_v19 }
 0x207   : > { %v1798_v30 = vpack.c.bf16 %v1557_v24, %v1556_v22  ;;  %v1799_v31 = vpack.c.bf16 %v1559_v25, %v1558_v23  ;;  %v1553_v32 = vadd.f32 %v1545_v16, %v1533_v28  ;;  %v1555_v33 = vadd.f32 %v1547_v17, %v1535_v29 }
 0x208   : > { %v1560_v34 = vmax.f32 %v1552_v26, 0.0  ;;  %v1562_v35 = vmax.f32 %v1554_v27, 0.0 }
 0x209   : > { %1588 = vst [vmem:[%s337_s18] sm:$0xff] %v1798_v30  ;;  %1589 = vst [vmem:[%s337_s18 + $0x8] sm:$0xff] %v1799_v31  ;;  %v1561_v36 = vmax.f32 %v1553_v32, 0.0  ;;  %v1563_v37 = vmax.f32 %v1555_v33, 0.0 }
 0x20b   : > { %v1800_v38 = vpack.c.bf16 %v1561_v36, %v1560_v34  ;;  %v1801_v39 = vpack.c.bf16 %v1563_v37, %v1562_v35 }
 0x20d   : > { %1590 = vst [vmem:[%s337_s18 + $0x10] sm:$0xff] %v1800_v38  ;;  %1591 = vst [vmem:[%s337_s18 + $0x18] sm:$0xff] %v1801_v39 }
 0x20e PF: > { %s18_s27 = sadd.s32 1, %s2070_s27  }
 0x20f   : > { %p15_p4 = scmp.ge.s32.totalorder %s18_s27, 4  }
 0x211   :  { %17 = sbr.rel (!%p15_p4) target bundleno = 1 (0x1), region = 85 }

// kernel: base_net_forward.15
= control target key start
LH: loop header
LB: loop body
LE: loop exit
PB: predicated region body
PF: predicated region fallthrough
CT: control target
= control target key end

     0   :  { %s2785_s21 = smov 0   ;;  %s3256_s0 = inlined_call_operand.vmem [shape: bf16[32,1152], index: 0, kind: input, shape index: {}]   ;;  %s3257_s1 = inlined_call_operand.vmem [shape: bf16[1152,128], index: 1, kind: input, shape index: {}]   ;;  %s3258_s2 = inlined_call_operand.vmem [shape: f32[1,128], index: 2, kind: input, shape index: {}]   ;;  %s3259_s3 = inlined_call_operand.vmem [shape: f32[1,128], index: 3, kind: input, shape index: {}]   ;;  %s3260_s4 = inlined_call_operand.vmem [shape: bf16[128,512], index: 4, kind: input, shape index: {}]   ;;  %s3261_s5 = inlined_call_operand.vmem [shape: f32[1,512], index: 5, kind: input, shape index: {}]   ;;  %s3262_s6 = inlined_call_operand.vmem [shape: f32[1,512], index: 6, kind: input, shape index: {}]   ;;  %s3263_s7 = inlined_call_operand.vmem [shape: bf16[32,512], index: 7, kind: input, shape index: {}]   ;;  %s3264_s8 = inlined_call_operand.vmem [shape: bf16[512,128], index: 8, kind: input, shape index: {}]   ;;  %s3265_s9 = inlined_call_operand.vmem [shape: f32[1,128], index: 9, kind: input, shape index: {}]   ;;  %s3266_s10 = inlined_call_operand.vmem [shape: f32[1,128], index: 10, kind: input, shape index: {}]   ;;  %s3267_s11 = inlined_call_operand.vmem [shape: bf16[32,512], index: 11, kind: output, shape index: {0}]   ;;  %s3268_s12 = inlined_call_operand.vmem [shape: bf16[32,128], index: 12, kind: output, shape index: {1}]  }
   0x1 LB: > { %s2186_s22 = sadd.s32 4294967295, %s2715_s21   ;;  %p2190_p0 = scmp.ge.s32.totalorder %s2715_s21, 1  ;;  %s2715_s21 = sphi %s2785_s21, %s23_s21  }
   0x2   : > { %p379_p1 = scmp.lt.s32.totalorder %s2715_s21, 3 }
   0x4   : > { %p380_p2 = pnand %p2190_p0, %p379_p1 }
   0x5   : > { %s2191_s19 = sshll.u32 (!%p380_p2), %s2186_s22, 1 }
   0x6   : > { %383 = sbr.rel (%p380_p2) target bundleno = 738 (0x2e2), region = 64  ;;  %p435_p3 = scmp.lt.s32.totalorder (!%p380_p2), %s2191_s19, 3 }
   0xb   : > { %v2544_v0 = vld [vmem:[%s3257_s1 + $0x78] sm:$0xff]   ;;  %v2548_v4 = vld [vmem:[%s3257_s1 + $0x70] sm:$0xff]   ;;  %v2552_v8 = vld [vmem:[%s3257_s1 + $0x68] sm:$0xff]   ;;  %s3270_s19 = smov (!%p435_p3, %s2191_s19), 3  ;;  %vm2718_vm0 = vmmov 0  }
   0xc   : > { %v2545_v1 = vld [vmem:[%s3257_s1 + $0xf8] sm:$0xff]   ;;  %2371 = vmatprep.subr.bf16.mxu0 %v2544_v0  ;;  %v2549_v5 = vld [vmem:[%s3257_s1 + $0xf0] sm:$0xff]   ;;  %v2553_v9 = vld [vmem:[%s3257_s1 + $0xe8] sm:$0xff]   ;;  %s2532_s28 = smul.u32 36, %s3270_s19  ;;  %s2358_s18 = sshll.u32 %s3270_s19, 4 }
   0xd   : > { %v2546_v2 = vld [vmem:[%s3257_s1 + $0x38] sm:$0xff]   ;;  %2393 = vmatprep.subr.bf16.mxu1 %v2545_v1  ;;  %v2550_v6 = vld [vmem:[%s3257_s1 + $0x30] sm:$0xff]   ;;  %v2554_v10 = vld [vmem:[%s3257_s1 + $0x28] sm:$0xff]   ;;  %s446_s25 = scalar_lea.vmem %s3263_s7, %s2358_s18  ;;  %s453_s30 = scalar_lea.vmem %s3267_s11, %s2358_s18 }
   0xe   : > { %v2547_v3 = vld [vmem:[%s3257_s1 + $0xb8] sm:$0xff]   ;;  %2372 = vmatpush3.bf16.msra.mxu0 %v2546_v2  ;;  %v2551_v7 = vld [vmem:[%s3257_s1 + $0xb0] sm:$0xff]   ;;  %v2555_v11 = vld [vmem:[%s3257_s1 + $0xa8] sm:$0xff]   ;;  %s2891_s23 = scalar_lea.vmem %s3256_s0, %s2532_s28  ;;  %s2200_s17 = sshll.u32 %s3270_s19, 2 }
   0xf   : > { %2394 = vmatpush3.bf16.msra.mxu1 %v2547_v3  ;;  %2373 = vmatprep.subr.bf16.mxu0 %v2548_v4  ;;  %v2556_v12 = vld [vmem:[%s3257_s1 + $0x60] sm:$0xff]   ;;  %v2560_v16 = vld [vmem:[%s3257_s1 + $0x58] sm:$0xff]   ;;  %v2564_v20 = vld [vmem:[%s3257_s1 + $0x50] sm:$0xff]   ;;  %s459_s24 = scalar_lea.vmem %s3268_s12, %s2200_s17 }
  0x10   : > { %2395 = vmatprep.subr.bf16.mxu1 %v2549_v5  ;;  %v2557_v13 = vld [vmem:[%s3257_s1 + $0xe0] sm:$0xff]   ;;  %v2561_v17 = vld [vmem:[%s3257_s1 + $0xd8] sm:$0xff]   ;;  %v2565_v21 = vld [vmem:[%s3257_s1 + $0xd0] sm:$0xff]  }
  0x11   : > { %v2558_v14 = vld [vmem:[%s3257_s1 + $0x20] sm:$0xff]   ;;  %v2562_v18 = vld [vmem:[%s3257_s1 + $0x18] sm:$0xff]   ;;  %v2566_v22 = vld [vmem:[%s3257_s1 + $0x10] sm:$0xff]  }
  0x12   : > { %2374 = vmatpush3.bf16.msra.mxu0 %v2550_v6  ;;  %v2559_v15 = vld [vmem:[%s3257_s1 + $0xa0] sm:$0xff]   ;;  %v2563_v19 = vld [vmem:[%s3257_s1 + $0x98] sm:$0xff]   ;;  %v2567_v23 = vld [vmem:[%s3257_s1 + $0x90] sm:$0xff]   ;;  %v2717_v6 = vmov 0.0  }
  0x13   : > { %2396 = vmatpush3.bf16.msra.mxu1 %v2551_v7  ;;  %2375 = vmatprep.subr.bf16.mxu0 %v2552_v8  ;;  %v2568_v24 = vld [vmem:[%s3257_s1 + $0x48] sm:$0xff]   ;;  %v2572_v28 = vld [vmem:[%s3257_s1 + $0x40] sm:$0xff]   ;;  %v2582_v36 = vld [vmem:[%s3257_s1 + $0x178] sm:$0xff]  }
  0x14   : > { %2397 = vmatprep.subr.bf16.mxu1 %v2553_v9  ;;  %v2569_v25 = vld [vmem:[%s3257_s1 + $0xc8] sm:$0xff]   ;;  %v2573_v29 = vld [vmem:[%s3257_s1 + $0xc0] sm:$0xff]   ;;  %v2583_v37 = vld [vmem:[%s3257_s1 + $0x138] sm:$0xff]  }
  0x15   : > { %v2570_v26 = vld [vmem:[%s3257_s1 + $0x8] sm:$0xff]   ;;  %v2574_v30 = vld [vmem:[%s3257_s1] sm:$0xff]   ;;  %v2584_v38 = vld [vmem:[%s3257_s1 + $0x1f8] sm:$0xff]  }
  0x16   : > { %2376 = vmatpush3.bf16.msra.mxu0 %v2554_v10  ;;  %v2571_v27 = vld [vmem:[%s3257_s1 + $0x88] sm:$0xff]   ;;  %v2575_v31 = vld [vmem:[%s3257_s1 + $0x80] sm:$0xff]   ;;  %v2585_v39 = vld [vmem:[%s3257_s1 + $0x1b8] sm:$0xff]  }
  0x17   : > { %2398 = vmatpush3.bf16.msra.mxu1 %v2555_v11  ;;  %2377 = vmatprep.subr.bf16.mxu0 %v2556_v12  ;;  %v2576_v32 = vld [vmem:[%s2891_s23] ss:$36 sps:$4 sm:$0xff]   ;;  %v2579_v34 = vld [vmem:[%s2891_s23 + $0x8] ss:$36 sps:$4 sm:$0xff]   ;;  %v2586_v40 = vld [vmem:[%s3257_s1 + $0x170] sm:$0xff]  }
  0x18   : > { %2399 = vmatprep.subr.bf16.mxu1 %v2557_v13  ;;  %v2578_v33 = vld [vmem:[%s2891_s23 + $0x4] ss:$36 sps:$4 sm:$0xff]   ;;  %v2581_v35 = vld [vmem:[%s2891_s23 + $0xc] ss:$36 sps:$4 sm:$0xff]   ;;  %v2598_v52 = vld [vmem:[%s3257_s1 + $0x158] sm:$0xff]  }
  0x19   : > { %1126 = vmatprep.mubr.bf16.mxu0 %v2578_v33  ;;  %1167 = vmatprep.mubr.bf16.mxu1 %v2581_v35  ;;  %v2587_v41 = vld [vmem:[%s3257_s1 + $0x130] sm:$0xff]   ;;  %v2590_v44 = vld [vmem:[%s3257_s1 + $0x168] sm:$0xff]   ;;  %v2594_v48 = vld [vmem:[%s3257_s1 + $0x160] sm:$0xff]  }
  0x1a   : > { %2378 = vmatpush3.bf16.msra.mxu0 %v2558_v14  ;;  %v2588_v42 = vld [vmem:[%s3257_s1 + $0x1f0] sm:$0xff]   ;;  %v2591_v45 = vld [vmem:[%s3257_s1 + $0x128] sm:$0xff]   ;;  %v2595_v49 = vld [vmem:[%s3257_s1 + $0x120] sm:$0xff]  }
  0x1b   : > { %2400 = vmatpush3.bf16.msra.mxu1 %v2559_v15  ;;  %2379 = vmatprep.subr.bf16.mxu0 %v2560_v16  ;;  %v2589_v43 = vld [vmem:[%s3257_s1 + $0x1b0] sm:$0xff]   ;;  %v2592_v46 = vld [vmem:[%s3257_s1 + $0x1e8] sm:$0xff]   ;;  %v2596_v50 = vld [vmem:[%s3257_s1 + $0x1e0] sm:$0xff]  }
  0x1c   : > { %2401 = vmatprep.subr.bf16.mxu1 %v2561_v17  ;;  %v2593_v47 = vld [vmem:[%s3257_s1 + $0x1a8] sm:$0xff]   ;;  %v2597_v51 = vld [vmem:[%s3257_s1 + $0x1a0] sm:$0xff]   ;;  %v2599_v53 = vld [vmem:[%s3257_s1 + $0x118] sm:$0xff]  }
  0x1d   : > { %v2600_v54 = vld [vmem:[%s3257_s1 + $0x1d8] sm:$0xff]   ;;  %v2602_v56 = vld [vmem:[%s3257_s1 + $0x150] sm:$0xff]   ;;  %v2606_v60 = vld [vmem:[%s3257_s1 + $0x148] sm:$0xff]  }
  0x1e   : > { %2380 = vmatpush3.bf16.msra.mxu0 %v2562_v18  ;;  %v2601_v55 = vld [vmem:[%s3257_s1 + $0x198] sm:$0xff]   ;;  %v2603_v57 = vld [vmem:[%s3257_s1 + $0x110] sm:$0xff]   ;;  %v2607_v61 = vld [vmem:[%s3257_s1 + $0x108] sm:$0xff]  }
  0x1f   : > { %2402 = vmatpush3.bf16.msra.mxu1 %v2563_v19  ;;  %2381 = vmatprep.subr.bf16.mxu0 %v2564_v20  ;;  %v2604_v58 = vld [vmem:[%s3257_s1 + $0x1d0] sm:$0xff]   ;;  %v2608_v62 = vld [vmem:[%s3257_s1 + $0x1c8] sm:$0xff]   ;;  %v2610_v0 = vld [vmem:[%s3257_s1 + $0x140] sm:$0xff]  }
  0x20   : > { %2403 = vmatprep.subr.bf16.mxu1 %v2565_v21  ;;  %v2605_v59 = vld [vmem:[%s3257_s1 + $0x190] sm:$0xff]   ;;  %v2609_v63 = vld [vmem:[%s3257_s1 + $0x188] sm:$0xff]   ;;  %v2611_v1 = vld [vmem:[%s3257_s1 + $0x100] sm:$0xff]  }
  0x21   : > { %v2612_v2 = vld [vmem:[%s3257_s1 + $0x1c0] sm:$0xff]   ;;  %v2613_v3 = vld [vmem:[%s2891_s23 + $0x10] ss:$36 sps:$4 sm:$0xff]   ;;  %v2617_v7 = vld [vmem:[%s2891_s23 + $0x18] ss:$36 sps:$4 sm:$0xff]  }
  0x22   : > { %2382 = vmatpush3.bf16.msra.mxu0 %v2566_v22  ;;  %v2615_v4 = vld [vmem:[%s2891_s23 + $0x14] ss:$36 sps:$4 sm:$0xff]   ;;  %v2616_v5 = vld [vmem:[%s3257_s1 + $0x180] sm:$0xff]   ;;  %v2622_v11 = vld [vmem:[%s3257_s1 + $0x228] sm:$0xff]  }
  0x23   : > { %2404 = vmatpush3.bf16.msra.mxu1 %v2567_v23  ;;  %2383 = vmatprep.subr.bf16.mxu0 %v2568_v24  ;;  %v2619_v8 = vld [vmem:[%s2891_s23 + $0x1c] ss:$36 sps:$4 sm:$0xff]   ;;  %v2621_v10 = vld [vmem:[%s3257_s1 + $0x230] sm:$0xff]   ;;  %v2626_v15 = vld [vmem:[%s3257_s1 + $0x208] sm:$0xff]  }
  0x24   : > { %2405 = vmatprep.subr.bf16.mxu1 %v2569_v25  ;;  %v2620_v9 = vld [vmem:[%s3257_s1 + $0x238] sm:$0xff]   ;;  %v2623_v12 = vld [vmem:[%s3257_s1 + $0x220] sm:$0xff]   ;;  %v2625_v14 = vld [vmem:[%s3257_s1 + $0x210] sm:$0xff]  }
  0x25   : > { %v2624_v13 = vld [vmem:[%s3257_s1 + $0x218] sm:$0xff]   ;;  %v2627_v16 = vld [vmem:[%s3257_s1 + $0x200] sm:$0xff]  }
  0x26   : > { %2384 = vmatpush3.bf16.msra.mxu0 %v2570_v26  ;;  %v2628_v17 = vld [vmem:[%s2891_s23 + $0x20] ss:$36 sps:$4 sm:$0xff]   ;;  %v2632_v20 = vld [vmem:[%s3260_s4 + $0xe8] ss:$16 sps:$4 sm:$0xff]   ;;  %v2634_v21 = vld [vmem:[%s3260_s4 + $0xec] ss:$16 sps:$4 sm:$0xff]  }
  0x27   : > { %2406 = vmatpush3.bf16.msra.mxu1 %v2571_v27  ;;  %2385 = vmatprep.subr.bf16.mxu0 %v2572_v28  ;;  %v2629_v18 = vld [vmem:[%s3260_s4 + $0xe0] ss:$16 sps:$4 sm:$0xff]   ;;  %v2631_v19 = vld [vmem:[%s3260_s4 + $0xe4] ss:$16 sps:$4 sm:$0xff]   ;;  %v2640_v23 = vld [vmem:[%s3260_s4 + $0xcc] ss:$16 sps:$4 sm:$0xff]  }
  0x28   : > { %2407 = vmatprep.subr.bf16.mxu1 %v2573_v29  ;;  %v2637_v22 = vld [vmem:[%s3260_s4 + $0xc4] ss:$16 sps:$4 sm:$0xff]   ;;  %v2635_v24 = vld [vmem:[%s3260_s4 + $0xc0] ss:$16 sps:$4 sm:$0xff]   ;;  %v2638_v25 = vld [vmem:[%s3260_s4 + $0xc8] ss:$16 sps:$4 sm:$0xff]  }
  0x29   : > { %v2643_v26 = vld [vmem:[%s3260_s4 + $0xa4] ss:$16 sps:$4 sm:$0xff]   ;;  %v2646_v27 = vld [vmem:[%s3260_s4 + $0xac] ss:$16 sps:$4 sm:$0xff]   ;;  %v2641_v28 = vld [vmem:[%s3260_s4 + $0xa0] ss:$16 sps:$4 sm:$0xff]  }
  0x2a   : > { %2386 = vmatpush3.bf16.msra.mxu0 %v2574_v30  ;;  %v2644_v29 = vld [vmem:[%s3260_s4 + $0xa8] ss:$16 sps:$4 sm:$0xff]   ;;  %v2649_v30 = vld [vmem:[%s3260_s4 + $0x84] ss:$16 sps:$4 sm:$0xff]   ;;  %v2658_v35 = vld [vmem:[%s3260_s4 + $0x6c] ss:$16 sps:$4 sm:$0xff]  }
  0x2b   : > { %2408 = vmatpush3.bf16.msra.mxu1 %v2575_v31  ;;  %2415 = vmatprep.subr.bf16.mxu0 %v2582_v36  ;;  %v2652_v31 = vld [vmem:[%s3260_s4 + $0x8c] ss:$16 sps:$4 sm:$0xff]   ;;  %v2650_v33 = vld [vmem:[%s3260_s4 + $0x88] ss:$16 sps:$4 sm:$0xff]   ;;  %v2653_v36 = vld [vmem:[%s3260_s4 + $0x60] ss:$16 sps:$4 sm:$0xff]  }
  0x2c   : > { %2437 = vmatprep.subr.bf16.mxu1 %v2584_v38  ;;  %v2661_v38 = vld [vmem:[%s3260_s4 + $0x44] ss:$16 sps:$4 sm:$0xff]  }
  0x2d   : > { %1127 = vmatmul.mubr.bf16.vlgmr.msra.gmra.mxu0 %v2576_v32  ;;  %v2647_v32 = vld [vmem:[%s3260_s4 + $0x80] ss:$16 sps:$4 sm:$0xff]  }
  0x2e   : > { %1168 = vmatmul.mubr.bf16.vlgmr.msra.gmra.mxu1 %v2579_v34  ;;  %2416 = vmatpush3.bf16.msra.mxu0 %v2583_v37  ;;  %v2655_v34 = vld [vmem:[%s3260_s4 + $0x64] ss:$16 sps:$4 sm:$0xff]   ;;  %v2656_v37 = vld [vmem:[%s3260_s4 + $0x68] ss:$16 sps:$4 sm:$0xff]  }
  0x2f   : > { %2438 = vmatpush3.bf16.msra.mxu1 %v2585_v39  ;;  %2417 = vmatprep.subr.bf16.mxu0 %v2586_v40  ;;  %v2664_v39 = vld [vmem:[%s3260_s4 + $0x4c] ss:$16 sps:$4 sm:$0xff]   ;;  %v2659_v40 = vld [vmem:[%s3260_s4 + $0x40] ss:$16 sps:$4 sm:$0xff]  }
  0x30   : > { %2439 = vmatprep.subr.bf16.mxu1 %v2588_v42  ;;  %1208 = vmatprep.mubr.bf16.mxu0 %v2615_v4  ;;  %v2667_v42 = vld [vmem:[%s3260_s4 + $0x24] ss:$16 sps:$4 sm:$0xff]  }
  0x31   : > { %1249 = vmatprep.mubr.bf16.mxu1 %v2619_v8 }
  0x32   : > { %2418 = vmatpush3.bf16.msra.mxu0 %v2587_v41  ;;  %v2662_v41 = vld [vmem:[%s3260_s4 + $0x48] ss:$16 sps:$4 sm:$0xff]  }
  0x33   : > { %2440 = vmatpush3.bf16.msra.mxu1 %v2589_v43  ;;  %2419 = vmatprep.subr.bf16.mxu0 %v2590_v44  ;;  %v2670_v43 = vld [vmem:[%s3260_s4 + $0x2c] ss:$16 sps:$4 sm:$0xff]   ;;  %v2665_v44 = vld [vmem:[%s3260_s4 + $0x20] ss:$16 sps:$4 sm:$0xff]  }
  0x34   : > { %2441 = vmatprep.subr.bf16.mxu1 %v2592_v46  ;;  %v2673_v46 = vld [vmem:[%s3260_s4 + $0x4] ss:$16 sps:$4 sm:$0xff]  }
  0x36   : > { %2420 = vmatpush3.bf16.msra.mxu0 %v2591_v45  ;;  %v2668_v45 = vld [vmem:[%s3260_s4 + $0x28] ss:$16 sps:$4 sm:$0xff]  }
  0x37   : > { %2442 = vmatpush3.bf16.msra.mxu1 %v2593_v47  ;;  %2421 = vmatprep.subr.bf16.mxu0 %v2594_v48  ;;  %v2676_v47 = vld [vmem:[%s3260_s4 + $0xc] ss:$16 sps:$4 sm:$0xff]   ;;  %v2671_v48 = vld [vmem:[%s3260_s4] ss:$16 sps:$4 sm:$0xff]  }
  0x38   : > { %2443 = vmatprep.subr.bf16.mxu1 %v2596_v50  ;;  %v2719_v50 = vmov 0  }
  0x3a   : > { %2422 = vmatpush3.bf16.msra.mxu0 %v2595_v49  ;;  %v2674_v49 = vld [vmem:[%s3260_s4 + $0x8] ss:$16 sps:$4 sm:$0xff]  }
  0x3b   : > { %2444 = vmatpush3.bf16.msra.mxu1 %v2597_v51  ;;  %2423 = vmatprep.subr.bf16.mxu0 %v2598_v52  ;;  %v2677_v51 = vld [vmem:[%s3264_s8 + $0x78] sm:$0xff]  }
  0x3c   : > { %2445 = vmatprep.subr.bf16.mxu1 %v2600_v54  ;;  %v2678_v52 = vld [vmem:[%s3264_s8 + $0xf8] sm:$0xff]  }
  0x3e   : > { %2424 = vmatpush3.bf16.msra.mxu0 %v2599_v53 }
  0x3f   : > { %2446 = vmatpush3.bf16.msra.mxu1 %v2601_v55  ;;  %2425 = vmatprep.subr.bf16.mxu0 %v2602_v56 }
  0x40   : > { %2447 = vmatprep.subr.bf16.mxu1 %v2604_v58 }
  0x42   : > { %2426 = vmatpush3.bf16.msra.mxu0 %v2603_v57 }
  0x43   : > { %2448 = vmatpush3.bf16.msra.mxu1 %v2605_v59  ;;  %2427 = vmatprep.subr.bf16.mxu0 %v2606_v60 }
  0x44   : > { %2449 = vmatprep.subr.bf16.mxu1 %v2608_v62 }
  0x46   : > { %2428 = vmatpush3.bf16.msra.mxu0 %v2607_v61 }
  0x47   : > { %2450 = vmatpush3.bf16.msra.mxu1 %v2609_v63  ;;  %2429 = vmatprep.subr.bf16.mxu0 %v2610_v0 }
  0x48   : > { %2451 = vmatprep.subr.bf16.mxu1 %v2612_v2 }
  0x4a   : > { %2430 = vmatpush3.bf16.msra.mxu0 %v2611_v1 }
  0x4b   : > { %2512 = vmatprep.subr.bf16.mxu0 %v2717_v6  ;;  %2452 = vmatpush3.bf16.msra.mxu1 %v2616_v5 }
  0x4c   : > { %1512 = vmatprep.subr.bf16.mxu1 %v2631_v19  ;;  %v2282_v19 = vld [vmem:[%s3258_s2] ss:$0 sm:$0xff] }
  0x4d   : > { %1209 = vmatmul.mubr.bf16.vlgmr.msra.gmra.mxu0 %v2613_v3 }
  0x4e   : > { %2528 = vmatprep.mubr.msk.bf16.mxu0 %vm2718_vm0, %v2717_v6  ;;  %2513 = vmatpush3.bf16.msra.mxu0 %v2620_v9 }
  0x4f   : > { %1250 = vmatmul.mubr.bf16.vlgmr.msra.gmra.mxu1 %v2617_v7  ;;  %2514 = vmatprep.subr.bf16.mxu0 %v2717_v6 }
  0x50   : > { %1513 = vmatpush1.bf16.msra.mxu1 %v2629_v18  ;;  %1544 = vmatprep.mubr.bf16.mxu1 %v2719_v50 }
  0x51   : > { %1514 = vmatprep.subr.bf16.mxu1 %v2637_v22 }
  0x52   : > { %2515 = vmatpush3.bf16.msra.mxu0 %v2621_v10 }
  0x53   : > { %2516 = vmatprep.subr.bf16.mxu0 %v2717_v6 }
  0x54   : > { %1515 = vmatpush1.bf16.msra.mxu1 %v2635_v24  ;;  %v2283_v24 = vld [vmem:[%s3259_s3] ss:$0 sm:$0xff] }
  0x55   : > { %1516 = vmatprep.subr.bf16.mxu1 %v2643_v26 }
  0x56   : > { %2517 = vmatpush3.bf16.msra.mxu0 %v2622_v11 }
  0x57   : > { %2518 = vmatprep.subr.bf16.mxu0 %v2717_v6 }
  0x58   : > { %1517 = vmatpush1.bf16.msra.mxu1 %v2641_v28 }
  0x59   : > { %1518 = vmatprep.subr.bf16.mxu1 %v2649_v30 }
  0x5a   : > { %2519 = vmatpush3.bf16.msra.mxu0 %v2623_v12 }
  0x5b   : > { %2520 = vmatprep.subr.bf16.mxu0 %v2717_v6 }
  0x5c   : > { %1519 = vmatpush1.bf16.msra.mxu1 %v2647_v32 }
  0x5d   : > { %1520 = vmatprep.subr.bf16.mxu1 %v2655_v34  ;;  %v2680_v34 = vld [vmem:[%s3264_s8 + $0xb8] sm:$0xff]  }
  0x5e   : > { %2521 = vmatpush3.bf16.msra.mxu0 %v2624_v13 }
  0x5f   : > { %2522 = vmatprep.subr.bf16.mxu0 %v2717_v6 }
  0x60   : > { %1521 = vmatpush1.bf16.msra.mxu1 %v2653_v36  ;;  %v2681_v36 = vld [vmem:[%s3264_s8 + $0x70] sm:$0xff]  }
  0x61   : > { %1522 = vmatprep.subr.bf16.mxu1 %v2661_v38  ;;  %v2683_v38 = vld [vmem:[%s3264_s8 + $0x30] sm:$0xff]  }
  0x62   : > { %2523 = vmatpush3.bf16.msra.mxu0 %v2625_v14 }
  0x63   : > { %2524 = vmatprep.subr.bf16.mxu0 %v2717_v6 }
  0x64   : > { %1523 = vmatpush1.bf16.msra.mxu1 %v2659_v40  ;;  %v2685_v40 = vld [vmem:[%s3264_s8 + $0x68] sm:$0xff]  }
  0x65   : > { %1524 = vmatprep.subr.bf16.mxu1 %v2667_v42  ;;  %v2687_v42 = vld [vmem:[%s3264_s8 + $0x28] sm:$0xff]  }
  0x66   : > { %2525 = vmatpush3.bf16.msra.mxu0 %v2626_v15 }
  0x67   : > { %2526 = vmatprep.subr.bf16.mxu0 %v2717_v6 }
  0x68   : > { %1525 = vmatpush1.bf16.msra.mxu1 %v2665_v44  ;;  %v2689_v44 = vld [vmem:[%s3264_s8 + $0x60] sm:$0xff]  }
  0x69   : > { %1526 = vmatprep.subr.bf16.mxu1 %v2673_v46  ;;  %v2691_v46 = vld [vmem:[%s3264_s8 + $0x20] sm:$0xff]  }
  0x6a   : > { %2527 = vmatpush3.bf16.msra.mxu0 %v2627_v16 }
  0x6b   : > { %1555 = vmatprep.subr.bf16.mxu0 %v2634_v21 }
  0x6c   : > { %1527 = vmatpush1.bf16.msra.mxu1 %v2671_v48  ;;  %v2693_v48 = vld [vmem:[%s3264_s8 + $0x58] sm:$0xff]  }
  0x6d   : > { %2529 = vmatmul.mubr.bf16.vlgmr.msra.gmra.mxu0 %v2628_v17  ;;  %2468 = vmatprep.subr.bf16.mxu1 %v2677_v51  ;;  %v2696_v51 = vld [vmem:[%s3264_s8 + $0x98] sm:$0xff]  }
  0x6e   : > { %1556 = vmatpush1.bf16.msra.mxu0 %v2632_v20  ;;  %1587 = vmatprep.mubr.bf16.mxu0 %v2719_v50  ;;  %v2695_v50 = vld [vmem:[%s3264_s8 + $0x18] sm:$0xff]  }
  0x6f   : > { %1557 = vmatprep.subr.bf16.mxu0 %v2640_v23 }
  0x72   : > { %1558 = vmatpush1.bf16.msra.mxu0 %v2638_v25 }
  0x73   : > { %1559 = vmatprep.subr.bf16.mxu0 %v2646_v27 }
  0x76   : > { %1560 = vmatpush1.bf16.msra.mxu0 %v2644_v29 }
  0x77   : > { %1561 = vmatprep.subr.bf16.mxu0 %v2652_v31 }
  0x7a   : > { %1562 = vmatpush1.bf16.msra.mxu0 %v2650_v33  ;;  %v2679_v33 = vld [vmem:[%s3264_s8 + $0x38] sm:$0xff]  }
  0x7b   : > { %1563 = vmatprep.subr.bf16.mxu0 %v2658_v35 }
  0x7e   : > { %1564 = vmatpush1.bf16.msra.mxu0 %v2656_v37  ;;  %v2682_v37 = vld [vmem:[%s3264_s8 + $0xf0] sm:$0xff]  }
  0x7f   : > { %1565 = vmatprep.subr.bf16.mxu0 %v2664_v39  ;;  %v2684_v39 = vld [vmem:[%s3264_s8 + $0xb0] sm:$0xff]  }
  0x82   : > { %1566 = vmatpush1.bf16.msra.mxu0 %v2662_v41  ;;  %v2686_v41 = vld [vmem:[%s3264_s8 + $0xe8] sm:$0xff]  }
  0x83   : > { %1567 = vmatprep.subr.bf16.mxu0 %v2670_v43  ;;  %v2688_v43 = vld [vmem:[%s3264_s8 + $0xa8] sm:$0xff]  }
  0x86   : > { %1568 = vmatpush1.bf16.msra.mxu0 %v2668_v45  ;;  %v2690_v45 = vld [vmem:[%s3264_s8 + $0xe0] sm:$0xff]  }
  0x87   : > { %1569 = vmatprep.subr.bf16.mxu0 %v2676_v47  ;;  %v2692_v47 = vld [vmem:[%s3264_s8 + $0xa0] sm:$0xff]  }
  0x8a   : > { %1570 = vmatpush1.bf16.msra.mxu0 %v2674_v49  ;;  %v2694_v49 = vld [vmem:[%s3264_s8 + $0xd8] sm:$0xff]  }
  0x8b   : > { %2490 = vmatprep.subr.bf16.mxu0 %v2678_v52  ;;  %v2697_v52 = vld [vmem:[%s3264_s8 + $0x50] sm:$0xff]  }
  0xed   : > { %v2387_v53 = vpop.f32.mrf.mxu0 }
  0xee   : > { %v2409_v54 = vpop.f32.mrf.mxu1 }
  0xef   : > { %v2388_v55 = vpop.f32.mrf.mxu0 }
  0xf0   : > { %v2410_v56 = vpop.f32.mrf.mxu1  ;;  %v2389_v2 = vadd.f32 %v2388_v55, %v2387_v53  ;;  %v2698_v53 = vld [vmem:[%s3264_s8 + $0xd0] sm:$0xff]  }
  0xf1   : > { %v2390_v57 = vpop.f32.mrf.mxu0  ;;  %v2411_v3 = vadd.f32 %v2410_v56, %v2409_v54  ;;  %v2699_v54 = vld [vmem:[%s3264_s8 + $0x10] sm:$0xff]   ;;  %v2701_v56 = vld [vmem:[%s3264_s8 + $0x48] sm:$0xff]  }
  0xf2   : > { %v2412_v58 = vpop.f32.mrf.mxu1  ;;  %v2700_v55 = vld [vmem:[%s3264_s8 + $0x90] sm:$0xff]  }
  0xf3   : > { %v2391_v59 = vpop.f32.mrf.mxu0  ;;  %v1170_v7 = vadd.f32 %v2411_v3, %v2389_v2 }
  0xf4   : > { %v2413_v61 = vpop.f32.mrf.mxu1  ;;  %v2392_v8 = vadd.f32 %v2391_v59, %v2390_v57  ;;  %v2702_v57 = vld [vmem:[%s3264_s8 + $0xc8] sm:$0xff]  }
  0xf5   : > { %v2414_v9 = vadd.f32 %v2413_v61, %v2412_v58  ;;  %v2703_v58 = vld [vmem:[%s3264_s8 + $0x8] sm:$0xff]   ;;  %v2706_v61 = vld [vmem:[%s3264_s8 + $0xc0] sm:$0xff]  }
  0xf6   : > { %v2704_v59 = vld [vmem:[%s3264_s8 + $0x88] sm:$0xff]  }
  0xf7   : > { %v1173_v14 = vadd.f32 %v2414_v9, %v2392_v8  ;;  %v1658_v9 = vld [vmem:[%s446_s25] sm:$0xff] }
 0x10d   : > { %v2431_v60 = vpop.f32.mrf.mxu0 }
 0x10f   : > { %v2432_v62 = vpop.f32.mrf.mxu0  ;;  %v2453_v63 = vpop.f32.mrf.mxu1 }
 0x110   : > { %v2433_v4 = vadd.f32 %v2432_v62, %v2431_v60  ;;  %v2705_v60 = vld [vmem:[%s3264_s8 + $0x40] sm:$0xff]  }
 0x111   : > { %v2434_v0 = vpop.f32.mrf.mxu0  ;;  %v2454_v1 = vpop.f32.mrf.mxu1  ;;  %v2707_v62 = vld [vmem:[%s3264_s8] sm:$0xff]  }
 0x112   : > { %v1211_v10 = vadd.f32 %v2433_v4, %v1170_v7  ;;  %v2455_v11 = vadd.f32 %v2454_v1, %v2453_v63  ;;  %v2708_v63 = vld [vmem:[%s3264_s8 + $0x80] sm:$0xff]  }
 0x113   : > { %v2435_v5 = vpop.f32.mrf.mxu0  ;;  %v2456_v6 = vpop.f32.mrf.mxu1  ;;  %v1598_v4 = vld [vmem:[%s3261_s5] sm:$0xf] }
 0x114   : > { %v2436_v12 = vadd.f32 %v2435_v5, %v2434_v0  ;;  %v1252_v17 = vadd.f32 %v2455_v11, %v1211_v10  ;;  %v1600_v0 = vlaneseq  ;;  %v1628_v7 = vld [vmem:[%s3262_s6] sm:$0xf]  ;;  %v1659_v11 = vld [vmem:[%s446_s25 + $0x8] sm:$0xff] }
 0x115   : > { %v2457_v13 = vpop.f32.mrf.mxu1 }
 0x116   : > { %v1214_v15 = vadd.f32 %v2436_v12, %v1173_v14  ;;  %v2458_v16 = vadd.f32 %v2457_v13, %v2456_v6  ;;  %v1601_v1 = vshrl.u32 %v1600_v0, 7 }
 0x118   : > { %v1255_v23 = vadd.f32 %v2458_v16, %v1214_v15  ;;  %v1602_v2 = vsub.s32 0, %v1601_v1  ;;  %v1610_v3 = vsub.s32 2, %v1601_v1  ;;  %v1606_v5 = vsub.s32 1, %v1601_v1 }
 0x119   : > { %v1614_v6 = vsub.s32 3, %v1601_v1 }
 0x11a   : > { %v1603_v8 = vrot.slane %v1598_v4, %v1602_v2  ;;  %v1611_v10 = vrot.slane %v1598_v4, %v1610_v3  ;;  %v1633_v12 = vrot.slane %v1628_v7, %v1602_v2  ;;  %v1641_v13 = vrot.slane %v1628_v7, %v1610_v3 }
 0x11b   : > { %v1607_v14 = vrot.slane %v1598_v4, %v1606_v5  ;;  %v1615_v15 = vrot.slane %v1598_v4, %v1614_v6 }
 0x12d   : > { %v1292_v18 = vpop.f32.mrf.mxu0 }
 0x12e   : > { %v1293_v20 = vadd.f32 %v1292_v18, %v1252_v17  ;;  %v1662_v17 = vunpack.c.l.bf16 %v1658_v9 }
 0x12f   : > { %v2530_v21 = vpop.f32.mrf.mxu0 }
 0x130   : > { %v1306_v22 = vmul.f32 %v2282_v19, %v1293_v20 }
 0x131   : > { %v1295_v25 = vpop.f32.mrf.mxu0 }
 0x132   : > { %v1296_v26 = vadd.f32 %v1295_v25, %v1255_v23  ;;  %v1315_v28 = vadd.f32 %v2283_v24, %v1306_v22  ;;  %v1637_v22 = vrot.slane %v1628_v7, %v1606_v5  ;;  %v1645_v23 = vrot.slane %v1628_v7, %v1614_v6 }
 0x133   : > { %v2531_v27 = vpop.f32.mrf.mxu0  ;;  %v1663_v25 = vunpack.c.h.bf16 %v1658_v9 }
 0x134   : > { %v1307_v29 = vmul.f32 %v2282_v19, %v1296_v26  ;;  %v1317_v31 = vmax.f32 %v1315_v28, 0.0  ;;  %v1664_v19 = vunpack.c.l.bf16 %v1659_v11  ;;  %v1665_v27 = vunpack.c.h.bf16 %v1659_v11 }
 0x136   : > { %v1316_v30 = vadd.f32 %v2283_v24, %v1307_v29 }
 0x138   : > { %v1318_v32 = vmax.f32 %v1316_v30, 0.0 }
 0x13a   : > { %v1319_v35 = vpack.c.bf16 %v1318_v32, %v1317_v31  ;;  %v1660_v32 = vld [vmem:[%s446_s25 + $0x10] sm:$0xff] }
 0x13c   : > { %1545 = vmatmul.mubr.bf16.vlgmr.msra.gmra.mxu1 %v1319_v35  ;;  %1588 = vmatmul.mubr.bf16.vlgmr.msra.gmra.mxu0 %v1319_v35 }
 0x13d   : > { %2469 = vmatpush3.bf16.msra.mxu1 %v2679_v33  ;;  %2491 = vmatpush3.bf16.msra.mxu0 %v2680_v34  ;;  %v1661_v33 = vld [vmem:[%s446_s25 + $0x18] sm:$0xff] }
 0x13e   : > { %2470 = vmatprep.subr.bf16.mxu1 %v2681_v36  ;;  %2492 = vmatprep.subr.bf16.mxu0 %v2682_v37 }
 0x141   : > { %2471 = vmatpush3.bf16.msra.mxu1 %v2683_v38  ;;  %2493 = vmatpush3.bf16.msra.mxu0 %v2684_v39 }
 0x142   : > { %2472 = vmatprep.subr.bf16.mxu1 %v2685_v40  ;;  %2494 = vmatprep.subr.bf16.mxu0 %v2686_v41  ;;  %v1666_v41 = vunpack.c.l.bf16 %v1660_v32 }
 0x145   : > { %2473 = vmatpush3.bf16.msra.mxu1 %v2687_v42  ;;  %2495 = vmatpush3.bf16.msra.mxu0 %v2688_v43  ;;  %v1668_v43 = vunpack.c.l.bf16 %v1661_v33 }
 0x146   : > { %2474 = vmatprep.subr.bf16.mxu1 %v2689_v44  ;;  %2496 = vmatprep.subr.bf16.mxu0 %v2690_v45 }
 0x149   : > { %2475 = vmatpush3.bf16.msra.mxu1 %v2691_v46  ;;  %2497 = vmatpush3.bf16.msra.mxu0 %v2692_v47 }
 0x14a   : > { %2476 = vmatprep.subr.bf16.mxu1 %v2693_v48  ;;  %2498 = vmatprep.subr.bf16.mxu0 %v2694_v49  ;;  %v1667_v48 = vunpack.c.h.bf16 %v1660_v32  ;;  %v1669_v49 = vunpack.c.h.bf16 %v1661_v33 }
 0x14d   : > { %2477 = vmatpush3.bf16.msra.mxu1 %v2695_v50  ;;  %2499 = vmatpush3.bf16.msra.mxu0 %v2696_v51 }
 0x14e   : > { %2478 = vmatprep.subr.bf16.mxu1 %v2697_v52  ;;  %2500 = vmatprep.subr.bf16.mxu0 %v2698_v53 }
 0x151   : > { %2479 = vmatpush3.bf16.msra.mxu1 %v2699_v54  ;;  %2501 = vmatpush3.bf16.msra.mxu0 %v2700_v55 }
 0x152   : > { %2480 = vmatprep.subr.bf16.mxu1 %v2701_v56  ;;  %2502 = vmatprep.subr.bf16.mxu0 %v2702_v57 }
 0x155   : > { %2481 = vmatpush3.bf16.msra.mxu1 %v2703_v58  ;;  %2503 = vmatpush3.bf16.msra.mxu0 %v2704_v59 }
 0x156   : > { %2482 = vmatprep.subr.bf16.mxu1 %v2705_v60  ;;  %2504 = vmatprep.subr.bf16.mxu0 %v2706_v61 }
 0x159   : > { %2483 = vmatpush3.bf16.msra.mxu1 %v2707_v62  ;;  %2505 = vmatpush3.bf16.msra.mxu0 %v2708_v63 }
 0x1fc   : > { %v1546_v16 = vpop.f32.mrf.mxu1  ;;  %v1589_v18 = vpop.f32.mrf.mxu0 }
 0x1fd   : > { %v1620_v20 = vmul.f32 %v1603_v8, %v1546_v16  ;;  %v1622_v21 = vmul.f32 %v1611_v10, %v1589_v18  ;;  %v2352_v18 = vld [vmem:[%s3265_s9] ss:$0 sm:$0xff] }
 0x1fe   : > { %v1548_v24 = vpop.f32.mrf.mxu1  ;;  %v1591_v26 = vpop.f32.mrf.mxu0 }
 0x1ff   : > { %v1650_v28 = vadd.f32 %v1633_v12, %v1620_v20  ;;  %v1652_v29 = vadd.f32 %v1641_v13, %v1622_v21  ;;  %v1621_v30 = vmul.f32 %v1607_v14, %v1548_v24  ;;  %v1623_v31 = vmul.f32 %v1615_v15, %v1591_v26 }
 0x200   : > { %v1550_v34 = vpop.f32.mrf.mxu1  ;;  %v1593_v35 = vpop.f32.mrf.mxu0 }
 0x201   : > { %v1670_v36 = vadd.f32 %v1662_v17, %v1650_v28  ;;  %v1672_v37 = vadd.f32 %v1664_v19, %v1652_v29  ;;  %v1651_v38 = vadd.f32 %v1637_v22, %v1621_v30  ;;  %v1653_v39 = vadd.f32 %v1645_v23, %v1623_v31 }
 0x202   : > { %v1624_v40 = vmul.f32 %v1603_v8, %v1550_v34  ;;  %v1626_v42 = vmul.f32 %v1611_v10, %v1593_v35  ;;  %v1552_v44 = vpop.f32.mrf.mxu1  ;;  %v1595_v45 = vpop.f32.mrf.mxu0 }
 0x203   : > { %v1671_v46 = vadd.f32 %v1663_v25, %v1651_v38  ;;  %v1673_v47 = vadd.f32 %v1665_v27, %v1653_v39  ;;  %v1625_v52 = vmul.f32 %v1607_v14, %v1552_v44  ;;  %v1627_v53 = vmul.f32 %v1615_v15, %v1595_v45  ;;  %v2353_v27 = vld [vmem:[%s3266_s10] ss:$0 sm:$0xff] }
 0x204   : > { %v1654_v50 = vadd.f32 %v1633_v12, %v1624_v40  ;;  %v1656_v51 = vadd.f32 %v1641_v13, %v1626_v42  ;;  %v1678_v54 = vmax.f32 %v1670_v36, 0.0  ;;  %v1680_v55 = vmax.f32 %v1672_v37, 0.0 }
 0x205   : > { %v1679_v56 = vmax.f32 %v1671_v46, 0.0  ;;  %v1681_v57 = vmax.f32 %v1673_v47, 0.0  ;;  %v1655_v60 = vadd.f32 %v1637_v22, %v1625_v52  ;;  %v1657_v61 = vadd.f32 %v1645_v23, %v1627_v53 }
 0x206   : > { %v1674_v58 = vadd.f32 %v1666_v41, %v1654_v50  ;;  %v1676_v59 = vadd.f32 %v1668_v43, %v1656_v51 }
 0x207   : > { %v2360_v62 = vpack.c.bf16 %v1679_v56, %v1678_v54  ;;  %v2361_v63 = vpack.c.bf16 %v1681_v57, %v1680_v55  ;;  %v1675_v0 = vadd.f32 %v1667_v48, %v1655_v60  ;;  %v1677_v1 = vadd.f32 %v1669_v49, %v1657_v61 }
 0x208   : > { %v1682_v2 = vmax.f32 %v1674_v58, 0.0  ;;  %v1684_v3 = vmax.f32 %v1676_v59, 0.0 }
 0x209   : > { %1710 = vst [vmem:[%s453_s30] sm:$0xff] %v2360_v62  ;;  %1711 = vst [vmem:[%s453_s30 + $0x8] sm:$0xff] %v2361_v63  ;;  %v1683_v4 = vmax.f32 %v1675_v0, 0.0  ;;  %v1685_v5 = vmax.f32 %v1677_v1, 0.0 }
 0x20a   : > { %v1686_v10 = vpack.c.bf16 %v1682_v2, %v1678_v54  ;;  %v1688_v11 = vpack.c.bf16 %v1684_v3, %v1680_v55 }
 0x20b   : > { %v2362_v6 = vpack.c.bf16 %v1683_v4, %v1682_v2  ;;  %v2363_v7 = vpack.c.bf16 %v1685_v5, %v1684_v3  ;;  %v1687_v8 = vpack.c.bf16 %v1683_v4, %v1679_v56  ;;  %v1689_v9 = vpack.c.bf16 %v1685_v5, %v1681_v57 }
 0x20d   : > { %1712 = vst [vmem:[%s453_s30 + $0x10] sm:$0xff] %v2362_v6  ;;  %1713 = vst [vmem:[%s453_s30 + $0x18] sm:$0xff] %v2363_v7  ;;  %2002 = vmatprep.mubr.bf16.mxu1 %v1687_v8  ;;  %2043 = vmatprep.mubr.bf16.mxu0 %v1689_v9 }
 0x20e   : > { %2003 = vmatmul.mubr.bf16.vlgmr.msra.gmra.mxu1 %v1686_v10  ;;  %2044 = vmatmul.mubr.bf16.vlgmr.msra.gmra.mxu0 %v1688_v11 }
 0x2ce   : > { %v2484_v12 = vpop.f32.mrf.mxu1  ;;  %v2506_v13 = vpop.f32.mrf.mxu0 }
 0x2d0   : > { %v2485_v14 = vpop.f32.mrf.mxu1  ;;  %v2507_v15 = vpop.f32.mrf.mxu0 }
 0x2d1   : > { %v2486_v16 = vadd.f32 %v2485_v14, %v2484_v12  ;;  %v2508_v17 = vadd.f32 %v2507_v15, %v2506_v13 }
 0x2d2   : > { %v2487_v19 = vpop.f32.mrf.mxu1  ;;  %v2509_v20 = vpop.f32.mrf.mxu0 }
 0x2d3   : > { %v2046_v21 = vadd.f32 %v2508_v17, %v2486_v16 }
 0x2d4   : > { %v2488_v22 = vpop.f32.mrf.mxu1  ;;  %v2510_v23 = vpop.f32.mrf.mxu0 }
 0x2d5   : > { %v2059_v24 = vmul.f32 %v2352_v18, %v2046_v21  ;;  %v2489_v25 = vadd.f32 %v2488_v22, %v2487_v19  ;;  %v2511_v26 = vadd.f32 %v2510_v23, %v2509_v20 }
 0x2d7   : > { %v2049_v28 = vadd.f32 %v2511_v26, %v2489_v25  ;;  %v2068_v29 = vadd.f32 %v2353_v27, %v2059_v24 }
 0x2d9   : > { %v2060_v30 = vmul.f32 %v2352_v18, %v2049_v28  ;;  %v2070_v32 = vmax.f32 %v2068_v29, 0.0 }
 0x2db   : > { %v2069_v31 = vadd.f32 %v2353_v27, %v2060_v30 }
 0x2dd   : > { %v2071_v33 = vmax.f32 %v2069_v31, 0.0 }
 0x2df   : > { %v2369_v34 = vpack.c.bf16 %v2071_v33, %v2070_v32 }
 0x2e1   : > { %2370 = vst [vmem:[%s459_s24] sm:$0xff] %v2369_v34  }
 0x2e2 PF: > { %s23_s21 = sadd.s32 1, %s2715_s21  }
 0x2e3   : > { %p20_p4 = scmp.ge.s32.totalorder %s23_s21, 4  }
 0x2e5   :  { %22 = sbr.rel (!%p20_p4) target bundleno = 1 (0x1), region = 109 }

</bundles_post_ra>
